<compile_context>
chip_gen: v5e
topology: v5e:2x2
jax: 0.10.0
libtpu: 0.0.40
codegen_flags: <defaults>
</compile_context>

<pallas_src>
import jax
import jax.numpy as jnp
import numpy as np
from jax.experimental import pallas as pl
from jax.experimental.pallas import tpu as pltpu

EPS = 1e-5


def _double_conv_kernel(x_ref, w1_ref, g1_ref, b1_ref,
                        w2_ref, weff_ref, beff_ref, g2_ref, b2_ref,
                        o_ref, xp_ref, p1_ref, hp_ref, p2_ref):
    """Fused: conv3x3 -> BN -> ReLU -> conv3x3 -> folded ResBlock -> BN -> ReLU.

    x_ref   : (N, H, W, Cin)      unpadded NHWC input
    w1_ref  : (9*Cin, Cout)       conv1 taps, row k*Cin + c, tap k = dy*3 + dx
    w2_ref  : (9*Cout, Cout)      conv2 taps
    weff_ref: (Cout, Cout)        folded ResBlock weight (W1^T @ W2^T + I)
    beff_ref: (1, Cout)           folded ResBlock bias   (b1 @ W2^T + b2)
    g*/b*   : (1, Cout)           BN gamma / beta
    o_ref   : (N, H, W, Cout)
    scratch : xp (N,H+2,W+2,Cin), p1 (N*H*W, 9*Cin),
              hp (N,H+2,W+2,Cout), p2 (N*H*W, 9*Cout)
    """
    N, H, W, Cin = x_ref.shape
    Cout = g1_ref.shape[-1]
    M = N * H * W
    inv_m = 1.0 / M

    def im2col(src_ref, patch_ref, C):
        # Build the (M, 9*C) patch matrix once; a single matmul with K = 9*C
        # replaces 9 small matmuls + 8 full-size accumulate passes.
        for k in range(9):
            dy, dx = k // 3, k % 3
            patch_ref[:, k * C:(k + 1) * C] = (
                src_ref[:, dy:dy + H, dx:dx + W, :].reshape(M, C))
        return patch_ref[...]

    def bn_relu(v, g, b):
        # One-pass batch statistics: var = E[v^2] - mean^2 (f32 accumulation).
        mean = jnp.sum(v, axis=0, keepdims=True) * inv_m
        ex2 = jnp.sum(v * v, axis=0, keepdims=True) * inv_m
        var = ex2 - mean * mean
        scale = g * jax.lax.rsqrt(var + EPS)
        shift = b - mean * scale
        return jnp.maximum(v * scale + shift, 0.0)

    # Zero halo written in-kernel (no wrapper-side pad -> no extra HBM copy).
    xp_ref[...] = jnp.zeros_like(xp_ref)
    xp_ref[:, 1:H + 1, 1:W + 1, :] = x_ref[...]

    # Stage 1: conv3x3 (single im2col matmul) -> BN -> ReLU.
    h = jnp.dot(im2col(xp_ref, p1_ref, Cin), w1_ref[...],
                preferred_element_type=jnp.float32)
    h = bn_relu(h, g1_ref[...], b1_ref[...])

    # Intermediate stays in VMEM (no HBM round trip between the two stages).
    hp_ref[...] = jnp.zeros_like(hp_ref)
    hp_ref[:, 1:H + 1, 1:W + 1, :] = h.reshape(N, H, W, Cout)

    # Stage 2: conv3x3 -> folded ResBlock (one matmul + bias) -> BN -> ReLU.
    acc = jnp.dot(im2col(hp_ref, p2_ref, Cout), w2_ref[...],
                  preferred_element_type=jnp.float32)
    y = jnp.dot(acc, weff_ref[...],
                preferred_element_type=jnp.float32) + beff_ref[...]
    y = bn_relu(y, g2_ref[...], b2_ref[...])
    o_ref[...] = y.reshape(N, H, W, Cout)


def _vmem_specs(n):
    return [pl.BlockSpec(memory_space=pltpu.MemorySpace.VMEM) for _ in range(n)]


def _taps(w_oihw):
    """(O, I, 3, 3) PyTorch conv weight -> (9*I, O); row k*I + i, tap k = dy*3 + dx."""
    o, i, kh, kw = w_oihw.shape
    return jnp.transpose(w_oihw, (2, 3, 1, 0)).reshape(kh * kw * i, o)


def prepare_params(params):
    """Weight preprocessing hoisted out of the jitted forward (runs once)."""
    cout = params["w1"].shape[0]
    w1t = params["res_w1"][:, :, 0, 0].T                       # (Cout, Cout)
    w2t = params["res_w2"][:, :, 0, 0].T                       # (Cout, Cout)
    w_eff = w1t @ w2t + jnp.eye(cout, dtype=jnp.float32)       # fold ResBlock
    b_eff = (params["res_b1"].reshape(1, cout) @ w2t
             + params["res_b2"].reshape(1, cout))
    return {
        "w1": _taps(params["w1"]),
        "w2": _taps(params["w2"]),
        "w_eff": w_eff,
        "b_eff": b_eff,
        "bn1_g": params["bn1_g"].reshape(1, cout),
        "bn1_b": params["bn1_b"].reshape(1, cout),
        "bn2_g": params["bn2_g"].reshape(1, cout),
        "bn2_b": params["bn2_b"].reshape(1, cout),
    }


@jax.jit
def double_conv_forward(x_nchw, prep):
    """Forward pass matching DoubleConv(in_ch, out_ch).forward(x), training mode."""
    N, Cin, H, W = x_nchw.shape
    Cout = prep["bn1_g"].shape[-1]
    M = N * H * W

    x = jnp.transpose(x_nchw, (0, 2, 3, 1)).astype(jnp.float32)   # NCHW -> NHWC

    out_nhwc = pl.pallas_call(
        _double_conv_kernel,
        out_shape=jax.ShapeDtypeStruct((N, H, W, Cout), jnp.float32),
        in_specs=_vmem_specs(9),
        out_specs=pl.BlockSpec(memory_space=pltpu.MemorySpace.VMEM),
        scratch_shapes=[
            pltpu.VMEM((N, H + 2, W + 2, Cin), jnp.float32),   # padded input
            pltpu.VMEM((M, 9 * Cin), jnp.float32),             # im2col patches 1
            pltpu.VMEM((N, H + 2, W + 2, Cout), jnp.float32),  # padded intermediate
            pltpu.VMEM((M, 9 * Cout), jnp.float32),            # im2col patches 2
        ],
        compiler_params=pltpu.CompilerParams(
            vmem_limit_bytes=32 * 1024 * 1024),
    )(x, prep["w1"], prep["bn1_g"], prep["bn1_b"],
      prep["w2"], prep["w_eff"], prep["b_eff"], prep["bn2_g"], prep["bn2_b"])

    return jnp.transpose(out_nhwc, (0, 3, 1, 2))                  # NHWC -> NCHW


def _reference_forward(x_nchw, params):
    """Pure-JAX reference (unfused, unfolded math) for a correctness check."""
    def conv3x3(x, w_oihw):
        w_hwio = jnp.transpose(w_oihw, (2, 3, 1, 0))
        return jax.lax.conv_general_dilated(
            x, w_hwio, window_strides=(1, 1), padding="SAME",
            dimension_numbers=("NHWC", "HWIO", "NHWC"))

    def bn(x, g, b):
        m = jnp.mean(x, axis=(0, 1, 2), keepdims=True)
        v = jnp.mean((x - m) ** 2, axis=(0, 1, 2), keepdims=True)
        return (x - m) * jax.lax.rsqrt(v + EPS) * g + b

    x = jnp.transpose(x_nchw, (0, 2, 3, 1)).astype(jnp.float32)
    h = jnp.maximum(bn(conv3x3(x, params["w1"]), params["bn1_g"], params["bn1_b"]), 0.0)
    h = conv3x3(h, params["w2"])
    y = jnp.einsum("nhwc,cd->nhwd", h, params["res_w1"][:, :, 0, 0].T) + params["res_b1"]
    y = jnp.einsum("nhwc,cd->nhwd", y, params["res_w2"][:, :, 0, 0].T) + params["res_b2"]
    y = y + h
    y = jnp.maximum(bn(y, params["bn2_g"], params["bn2_b"]), 0.0)
    return jnp.transpose(y, (0, 3, 1, 2))


def init_params(key, in_channels, out_channels):
    ks = jax.random.split(key, 10)
    return {
        "w1": 0.2 * jax.random.normal(ks[0], (out_channels, in_channels, 3, 3), jnp.float32),
        "bn1_g": 1.0 + 0.1 * jax.random.normal(ks[1], (out_channels,), jnp.float32),
        "bn1_b": 0.1 * jax.random.normal(ks[2], (out_channels,), jnp.float32),
        "w2": 0.2 * jax.random.normal(ks[3], (out_channels, out_channels, 3, 3), jnp.float32),
        "res_w1": 0.2 * jax.random.normal(ks[4], (out_channels, out_channels, 1, 1), jnp.float32),
        "res_b1": 0.1 * jax.random.normal(ks[5], (out_channels,), jnp.float32),
        "res_w2": 0.2 * jax.random.normal(ks[6], (out_channels, out_channels, 1, 1), jnp.float32),
        "res_b2": 0.1 * jax.random.normal(ks[7], (out_channels,), jnp.float32),
        "bn2_g": 1.0 + 0.1 * jax.random.normal(ks[8], (out_channels,), jnp.float32),
        "bn2_b": 0.1 * jax.random.normal(ks[9], (out_channels,), jnp.float32),
    }


if __name__ == "__main__":
    key = jax.random.PRNGKey(0)
    k_x, k_p = jax.random.split(key)

    N, Cin, Cout, H, W = 2, 4, 8, 16, 16
    x = jax.random.normal(k_x, (N, Cin, H, W), jnp.float32)   # PyTorch NCHW input
    params = init_params(k_p, Cin, Cout)

    prep = prepare_params(params)                             # hoisted weight prep
    out = double_conv_forward(x, prep)
    out = jax.block_until_ready(out)

    ref = jax.block_until_ready(_reference_forward(x, params))
    assert out.shape == (N, Cout, H, W)
    assert np.allclose(np.asarray(out), np.asarray(ref), rtol=1e-3, atol=1e-3), (
        "Pallas output mismatch vs reference")

    print("KERNEL_OK")
</pallas_src>

<mosaic_0001>
module attributes {stable_mosaic.version = 11 : i64} {
  func.func @_double_conv_kernel(%arg0: memref<2x16x16x4xf32, #tpu.memory_space<vmem>>, %arg1: memref<36x8xf32, #tpu.memory_space<vmem>>, %arg2: memref<1x8xf32, #tpu.memory_space<vmem>>, %arg3: memref<1x8xf32, #tpu.memory_space<vmem>>, %arg4: memref<72x8xf32, #tpu.memory_space<vmem>>, %arg5: memref<8x8xf32, #tpu.memory_space<vmem>>, %arg6: memref<1x8xf32, #tpu.memory_space<vmem>>, %arg7: memref<1x8xf32, #tpu.memory_space<vmem>>, %arg8: memref<1x8xf32, #tpu.memory_space<vmem>>, %arg9: memref<2x16x16x8xf32, #tpu.memory_space<vmem>>, %arg10: memref<2x18x18x4xf32, #tpu.memory_space<vmem>>, %arg11: memref<512x36xf32, #tpu.memory_space<vmem>>, %arg12: memref<2x18x18x8xf32, #tpu.memory_space<vmem>>, %arg13: memref<512x72xf32, #tpu.memory_space<vmem>>) attributes {dimension_semantics = [], scalar_prefetch = 0 : i64, scratch_operands = 4 : i64, tpu.core_type = #tpu.core_type<tc>} {
    %cst = arith.constant 0.000000e+00 : f32
    %0 = vector.broadcast %cst : f32 to vector<2x18x18x4xf32>
    %c0 = arith.constant 0 : index
    %c0_0 = arith.constant 0 : index
    %c0_1 = arith.constant 0 : index
    %c0_2 = arith.constant 0 : index
    %1 = vector.load %arg10[%c0, %c0_0, %c0_1, %c0_2] : memref<2x18x18x4xf32, #tpu.memory_space<vmem>>, vector<2x18x18x4xf32>
    tpu.vector_store %arg10[%c0, %c0_0, %c0_1, %c0_2], %0 {strides = array<i32>} : memref<2x18x18x4xf32, #tpu.memory_space<vmem>>, vector<2x18x18x4xf32>,
    %c0_3 = arith.constant 0 : index
    %c0_4 = arith.constant 0 : index
    %c0_5 = arith.constant 0 : index
    %c0_6 = arith.constant 0 : index
    %2 = vector.load %arg0[%c0_3, %c0_4, %c0_5, %c0_6] : memref<2x16x16x4xf32, #tpu.memory_space<vmem>>, vector<2x16x16x4xf32>
    %c0_7 = arith.constant 0 : index
    %c1 = arith.constant 1 : index
    %c1_8 = arith.constant 1 : index
    %c0_9 = arith.constant 0 : index
    %3 = vector.load %arg10[%c0_7, %c1, %c1_8, %c0_9] : memref<2x18x18x4xf32, #tpu.memory_space<vmem>>, vector<2x16x16x4xf32>
    tpu.vector_store %arg10[%c0_7, %c1, %c1_8, %c0_9], %2 {strides = array<i32>} : memref<2x18x18x4xf32, #tpu.memory_space<vmem>>, vector<2x16x16x4xf32>,
    %c0_10 = arith.constant 0 : index
    %c0_11 = arith.constant 0 : index
    %c0_12 = arith.constant 0 : index
    %c0_13 = arith.constant 0 : index
    %4 = vector.load %arg10[%c0_10, %c0_11, %c0_12, %c0_13] : memref<2x18x18x4xf32, #tpu.memory_space<vmem>>, vector<2x16x16x4xf32>
    %5 = vector.shape_cast %4 : vector<2x16x16x4xf32> to vector<512x4xf32>
    %c0_14 = arith.constant 0 : index
    %c0_15 = arith.constant 0 : index
    %6 = vector.load %arg11[%c0_14, %c0_15] : memref<512x36xf32, #tpu.memory_space<vmem>>, vector<512x4xf32>
    tpu.vector_store %arg11[%c0_14, %c0_15], %5 {strides = array<i32>} : memref<512x36xf32, #tpu.memory_space<vmem>>, vector<512x4xf32>,
    %c0_16 = arith.constant 0 : index
    %c0_17 = arith.constant 0 : index
    %c1_18 = arith.constant 1 : index
    %c0_19 = arith.constant 0 : index
    %7 = vector.load %arg10[%c0_16, %c0_17, %c1_18, %c0_19] : memref<2x18x18x4xf32, #tpu.memory_space<vmem>>, vector<2x16x16x4xf32>
    %8 = vector.shape_cast %7 : vector<2x16x16x4xf32> to vector<512x4xf32>
    %c0_20 = arith.constant 0 : index
    %c4 = arith.constant 4 : index
    %9 = vector.load %arg11[%c0_20, %c4] : memref<512x36xf32, #tpu.memory_space<vmem>>, vector<512x4xf32>
    tpu.vector_store %arg11[%c0_20, %c4], %8 {strides = array<i32>} : memref<512x36xf32, #tpu.memory_space<vmem>>, vector<512x4xf32>,
    %c0_21 = arith.constant 0 : index
    %c0_22 = arith.constant 0 : index
    %c2 = arith.constant 2 : index
    %c0_23 = arith.constant 0 : index
    %10 = vector.load %arg10[%c0_21, %c0_22, %c2, %c0_23] : memref<2x18x18x4xf32, #tpu.memory_space<vmem>>, vector<2x16x16x4xf32>
    %11 = vector.shape_cast %10 : vector<2x16x16x4xf32> to vector<512x4xf32>
    %c0_24 = arith.constant 0 : index
    %c8 = arith.constant 8 : index
    %12 = vector.load %arg11[%c0_24, %c8] : memref<512x36xf32, #tpu.memory_space<vmem>>, vector<512x4xf32>
    tpu.vector_store %arg11[%c0_24, %c8], %11 {strides = array<i32>} : memref<512x36xf32, #tpu.memory_space<vmem>>, vector<512x4xf32>,
    %c0_25 = arith.constant 0 : index
    %c1_26 = arith.constant 1 : index
    %c0_27 = arith.constant 0 : index
    %c0_28 = arith.constant 0 : index
    %13 = vector.load %arg10[%c0_25, %c1_26, %c0_27, %c0_28] : memref<2x18x18x4xf32, #tpu.memory_space<vmem>>, vector<2x16x16x4xf32>
    %14 = vector.shape_cast %13 : vector<2x16x16x4xf32> to vector<512x4xf32>
    %c0_29 = arith.constant 0 : index
    %c12 = arith.constant 12 : index
    %15 = vector.load %arg11[%c0_29, %c12] : memref<512x36xf32, #tpu.memory_space<vmem>>, vector<512x4xf32>
    tpu.vector_store %arg11[%c0_29, %c12], %14 {strides = array<i32>} : memref<512x36xf32, #tpu.memory_space<vmem>>, vector<512x4xf32>,
    %c0_30 = arith.constant 0 : index
    %c1_31 = arith.constant 1 : index
    %c1_32 = arith.constant 1 : index
    %c0_33 = arith.constant 0 : index
    %16 = vector.load %arg10[%c0_30, %c1_31, %c1_32, %c0_33] : memref<2x18x18x4xf32, #tpu.memory_space<vmem>>, vector<2x16x16x4xf32>
    %17 = vector.shape_cast %16 : vector<2x16x16x4xf32> to vector<512x4xf32>
    %c0_34 = arith.constant 0 : index
    %c16 = arith.constant 16 : index
    %18 = vector.load %arg11[%c0_34, %c16] : memref<512x36xf32, #tpu.memory_space<vmem>>, vector<512x4xf32>
    tpu.vector_store %arg11[%c0_34, %c16], %17 {strides = array<i32>} : memref<512x36xf32, #tpu.memory_space<vmem>>, vector<512x4xf32>,
    %c0_35 = arith.constant 0 : index
    %c1_36 = arith.constant 1 : index
    %c2_37 = arith.constant 2 : index
    %c0_38 = arith.constant 0 : index
    %19 = vector.load %arg10[%c0_35, %c1_36, %c2_37, %c0_38] : memref<2x18x18x4xf32, #tpu.memory_space<vmem>>, vector<2x16x16x4xf32>
    %20 = vector.shape_cast %19 : vector<2x16x16x4xf32> to vector<512x4xf32>
    %c0_39 = arith.constant 0 : index
    %c20 = arith.constant 20 : index
    %21 = vector.load %arg11[%c0_39, %c20] : memref<512x36xf32, #tpu.memory_space<vmem>>, vector<512x4xf32>
    tpu.vector_store %arg11[%c0_39, %c20], %20 {strides = array<i32>} : memref<512x36xf32, #tpu.memory_space<vmem>>, vector<512x4xf32>,
    %c0_40 = arith.constant 0 : index
    %c2_41 = arith.constant 2 : index
    %c0_42 = arith.constant 0 : index
    %c0_43 = arith.constant 0 : index
    %22 = vector.load %arg10[%c0_40, %c2_41, %c0_42, %c0_43] : memref<2x18x18x4xf32, #tpu.memory_space<vmem>>, vector<2x16x16x4xf32>
    %23 = vector.shape_cast %22 : vector<2x16x16x4xf32> to vector<512x4xf32>
    %c0_44 = arith.constant 0 : index
    %c24 = arith.constant 24 : index
    %24 = vector.load %arg11[%c0_44, %c24] : memref<512x36xf32, #tpu.memory_space<vmem>>, vector<512x4xf32>
    tpu.vector_store %arg11[%c0_44, %c24], %23 {strides = array<i32>} : memref<512x36xf32, #tpu.memory_space<vmem>>, vector<512x4xf32>,
    %c0_45 = arith.constant 0 : index
    %c2_46 = arith.constant 2 : index
    %c1_47 = arith.constant 1 : index
    %c0_48 = arith.constant 0 : index
    %25 = vector.load %arg10[%c0_45, %c2_46, %c1_47, %c0_48] : memref<2x18x18x4xf32, #tpu.memory_space<vmem>>, vector<2x16x16x4xf32>
    %26 = vector.shape_cast %25 : vector<2x16x16x4xf32> to vector<512x4xf32>
    %c0_49 = arith.constant 0 : index
    %c28 = arith.constant 28 : index
    %27 = vector.load %arg11[%c0_49, %c28] : memref<512x36xf32, #tpu.memory_space<vmem>>, vector<512x4xf32>
    tpu.vector_store %arg11[%c0_49, %c28], %26 {strides = array<i32>} : memref<512x36xf32, #tpu.memory_space<vmem>>, vector<512x4xf32>,
    %c0_50 = arith.constant 0 : index
    %c2_51 = arith.constant 2 : index
    %c2_52 = arith.constant 2 : index
    %c0_53 = arith.constant 0 : index
    %28 = vector.load %arg10[%c0_50, %c2_51, %c2_52, %c0_53] : memref<2x18x18x4xf32, #tpu.memory_space<vmem>>, vector<2x16x16x4xf32>
    %29 = vector.shape_cast %28 : vector<2x16x16x4xf32> to vector<512x4xf32>
    %c0_54 = arith.constant 0 : index
    %c32 = arith.constant 32 : index
    %30 = vector.load %arg11[%c0_54, %c32] : memref<512x36xf32, #tpu.memory_space<vmem>>, vector<512x4xf32>
    tpu.vector_store %arg11[%c0_54, %c32], %29 {strides = array<i32>} : memref<512x36xf32, #tpu.memory_space<vmem>>, vector<512x4xf32>,
    %c0_55 = arith.constant 0 : index
    %c0_56 = arith.constant 0 : index
    %31 = vector.load %arg11[%c0_55, %c0_56] : memref<512x36xf32, #tpu.memory_space<vmem>>, vector<512x36xf32>
    %c0_57 = arith.constant 0 : index
    %c0_58 = arith.constant 0 : index
    %32 = vector.load %arg1[%c0_57, %c0_58] : memref<36x8xf32, #tpu.memory_space<vmem>>, vector<36x8xf32>
    %cst_59 = arith.constant dense<0.000000e+00> : vector<512x8xf32>
    %33 = tpu.matmul %31, %32, %cst_59 {dimension_numbers = #tpu.dot_dimension_numbers<[1], [0], [0], [1], [0, 0, 1, 1], [], []>} : vector<512x36xf32>, vector<36x8xf32>, vector<512x8xf32> -> vector<512x8xf32>
    %c0_60 = arith.constant 0 : index
    %c0_61 = arith.constant 0 : index
    %34 = vector.load %arg2[%c0_60, %c0_61] : memref<1x8xf32, #tpu.memory_space<vmem>>, vector<1x8xf32>
    %c0_62 = arith.constant 0 : index
    %c0_63 = arith.constant 0 : index
    %35 = vector.load %arg3[%c0_62, %c0_63] : memref<1x8xf32, #tpu.memory_space<vmem>>, vector<1x8xf32>
    %cst_64 = arith.constant dense<0.000000e+00> : vector<8xf32>
    %36 = vector.multi_reduction <add>, %33, %cst_64 [0] : vector<512x8xf32> to vector<8xf32>
    %37 = vector.shape_cast %36 : vector<8xf32> to vector<1x8xf32>
    %cst_65 = arith.constant 0.001953125 : f32
    %38 = vector.broadcast %cst_65 : f32 to vector<1x8xf32>
    %39 = arith.mulf %37, %38 : vector<1x8xf32>
    %40 = arith.mulf %33, %33 : vector<512x8xf32>
    %cst_66 = arith.constant dense<0.000000e+00> : vector<8xf32>
    %41 = vector.multi_reduction <add>, %40, %cst_66 [0] : vector<512x8xf32> to vector<8xf32>
    %42 = vector.shape_cast %41 : vector<8xf32> to vector<1x8xf32>
    %cst_67 = arith.constant 0.001953125 : f32
    %43 = vector.broadcast %cst_67 : f32 to vector<1x8xf32>
    %44 = arith.mulf %42, %43 : vector<1x8xf32>
    %45 = arith.mulf %39, %39 : vector<1x8xf32>
    %46 = arith.subf %44, %45 : vector<1x8xf32>
    %cst_68 = arith.constant 9.99999974E-6 : f32
    %47 = vector.broadcast %cst_68 : f32 to vector<1x8xf32>
    %48 = arith.addf %46, %47 : vector<1x8xf32>
    %49 = math.rsqrt %48 : vector<1x8xf32>
    %50 = arith.mulf %34, %49 : vector<1x8xf32>
    %51 = arith.mulf %39, %50 : vector<1x8xf32>
    %52 = arith.subf %35, %51 : vector<1x8xf32>
    %53 = vector.broadcast %50 : vector<1x8xf32> to vector<512x8xf32>
    %54 = arith.mulf %33, %53 : vector<512x8xf32>
    %55 = vector.broadcast %52 : vector<1x8xf32> to vector<512x8xf32>
    %56 = arith.addf %54, %55 : vector<512x8xf32>
    %cst_69 = arith.constant 0.000000e+00 : f32
    %57 = vector.broadcast %cst_69 : f32 to vector<512x8xf32>
    %58 = arith.maximumf %56, %57 : vector<512x8xf32>
    %cst_70 = arith.constant 0.000000e+00 : f32
    %59 = vector.broadcast %cst_70 : f32 to vector<2x18x18x8xf32>
    %c0_71 = arith.constant 0 : index
    %c0_72 = arith.constant 0 : index
    %c0_73 = arith.constant 0 : index
    %c0_74 = arith.constant 0 : index
    %60 = vector.load %arg12[%c0_71, %c0_72, %c0_73, %c0_74] : memref<2x18x18x8xf32, #tpu.memory_space<vmem>>, vector<2x18x18x8xf32>
    tpu.vector_store %arg12[%c0_71, %c0_72, %c0_73, %c0_74], %59 {strides = array<i32>} : memref<2x18x18x8xf32, #tpu.memory_space<vmem>>, vector<2x18x18x8xf32>,
    %61 = vector.shape_cast %58 : vector<512x8xf32> to vector<2x16x16x8xf32>
    %c0_75 = arith.constant 0 : index
    %c1_76 = arith.constant 1 : index
    %c1_77 = arith.constant 1 : index
    %c0_78 = arith.constant 0 : index
    %62 = vector.load %arg12[%c0_75, %c1_76, %c1_77, %c0_78] : memref<2x18x18x8xf32, #tpu.memory_space<vmem>>, vector<2x16x16x8xf32>
    tpu.vector_store %arg12[%c0_75, %c1_76, %c1_77, %c0_78], %61 {strides = array<i32>} : memref<2x18x18x8xf32, #tpu.memory_space<vmem>>, vector<2x16x16x8xf32>,
    %c0_79 = arith.constant 0 : index
    %c0_80 = arith.constant 0 : index
    %c0_81 = arith.constant 0 : index
    %c0_82 = arith.constant 0 : index
    %63 = vector.load %arg12[%c0_79, %c0_80, %c0_81, %c0_82] : memref<2x18x18x8xf32, #tpu.memory_space<vmem>>, vector<2x16x16x8xf32>
    %64 = vector.shape_cast %63 : vector<2x16x16x8xf32> to vector<512x8xf32>
    %c0_83 = arith.constant 0 : index
    %c0_84 = arith.constant 0 : index
    %65 = vector.load %arg13[%c0_83, %c0_84] : memref<512x72xf32, #tpu.memory_space<vmem>>, vector<512x8xf32>
    tpu.vector_store %arg13[%c0_83, %c0_84], %64 {strides = array<i32>} : memref<512x72xf32, #tpu.memory_space<vmem>>, vector<512x8xf32>,
    %c0_85 = arith.constant 0 : index
    %c0_86 = arith.constant 0 : index
    %c1_87 = arith.constant 1 : index
    %c0_88 = arith.constant 0 : index
    %66 = vector.load %arg12[%c0_85, %c0_86, %c1_87, %c0_88] : memref<2x18x18x8xf32, #tpu.memory_space<vmem>>, vector<2x16x16x8xf32>
    %67 = vector.shape_cast %66 : vector<2x16x16x8xf32> to vector<512x8xf32>
    %c0_89 = arith.constant 0 : index
    %c8_90 = arith.constant 8 : index
    %68 = vector.load %arg13[%c0_89, %c8_90] : memref<512x72xf32, #tpu.memory_space<vmem>>, vector<512x8xf32>
    tpu.vector_store %arg13[%c0_89, %c8_90], %67 {strides = array<i32>} : memref<512x72xf32, #tpu.memory_space<vmem>>, vector<512x8xf32>,
    %c0_91 = arith.constant 0 : index
    %c0_92 = arith.constant 0 : index
    %c2_93 = arith.constant 2 : index
    %c0_94 = arith.constant 0 : index
    %69 = vector.load %arg12[%c0_91, %c0_92, %c2_93, %c0_94] : memref<2x18x18x8xf32, #tpu.memory_space<vmem>>, vector<2x16x16x8xf32>
    %70 = vector.shape_cast %69 : vector<2x16x16x8xf32> to vector<512x8xf32>
    %c0_95 = arith.constant 0 : index
    %c16_96 = arith.constant 16 : index
    %71 = vector.load %arg13[%c0_95, %c16_96] : memref<512x72xf32, #tpu.memory_space<vmem>>, vector<512x8xf32>
    tpu.vector_store %arg13[%c0_95, %c16_96], %70 {strides = array<i32>} : memref<512x72xf32, #tpu.memory_space<vmem>>, vector<512x8xf32>,
    %c0_97 = arith.constant 0 : index
    %c1_98 = arith.constant 1 : index
    %c0_99 = arith.constant 0 : index
    %c0_100 = arith.constant 0 : index
    %72 = vector.load %arg12[%c0_97, %c1_98, %c0_99, %c0_100] : memref<2x18x18x8xf32, #tpu.memory_space<vmem>>, vector<2x16x16x8xf32>
    %73 = vector.shape_cast %72 : vector<2x16x16x8xf32> to vector<512x8xf32>
    %c0_101 = arith.constant 0 : index
    %c24_102 = arith.constant 24 : index
    %74 = vector.load %arg13[%c0_101, %c24_102] : memref<512x72xf32, #tpu.memory_space<vmem>>, vector<512x8xf32>
    tpu.vector_store %arg13[%c0_101, %c24_102], %73 {strides = array<i32>} : memref<512x72xf32, #tpu.memory_space<vmem>>, vector<512x8xf32>,
    %c0_103 = arith.constant 0 : index
    %c1_104 = arith.constant 1 : index
    %c1_105 = arith.constant 1 : index
    %c0_106 = arith.constant 0 : index
    %75 = vector.load %arg12[%c0_103, %c1_104, %c1_105, %c0_106] : memref<2x18x18x8xf32, #tpu.memory_space<vmem>>, vector<2x16x16x8xf32>
    %76 = vector.shape_cast %75 : vector<2x16x16x8xf32> to vector<512x8xf32>
    %c0_107 = arith.constant 0 : index
    %c32_108 = arith.constant 32 : index
    %77 = vector.load %arg13[%c0_107, %c32_108] : memref<512x72xf32, #tpu.memory_space<vmem>>, vector<512x8xf32>
    tpu.vector_store %arg13[%c0_107, %c32_108], %76 {strides = array<i32>} : memref<512x72xf32, #tpu.memory_space<vmem>>, vector<512x8xf32>,
    %c0_109 = arith.constant 0 : index
    %c1_110 = arith.constant 1 : index
    %c2_111 = arith.constant 2 : index
    %c0_112 = arith.constant 0 : index
    %78 = vector.load %arg12[%c0_109, %c1_110, %c2_111, %c0_112] : memref<2x18x18x8xf32, #tpu.memory_space<vmem>>, vector<2x16x16x8xf32>
    %79 = vector.shape_cast %78 : vector<2x16x16x8xf32> to vector<512x8xf32>
    %c0_113 = arith.constant 0 : index
    %c40 = arith.constant 40 : index
    %80 = vector.load %arg13[%c0_113, %c40] : memref<512x72xf32, #tpu.memory_space<vmem>>, vector<512x8xf32>
    tpu.vector_store %arg13[%c0_113, %c40], %79 {strides = array<i32>} : memref<512x72xf32, #tpu.memory_space<vmem>>, vector<512x8xf32>,
    %c0_114 = arith.constant 0 : index
    %c2_115 = arith.constant 2 : index
    %c0_116 = arith.constant 0 : index
    %c0_117 = arith.constant 0 : index
    %81 = vector.load %arg12[%c0_114, %c2_115, %c0_116, %c0_117] : memref<2x18x18x8xf32, #tpu.memory_space<vmem>>, vector<2x16x16x8xf32>
    %82 = vector.shape_cast %81 : vector<2x16x16x8xf32> to vector<512x8xf32>
    %c0_118 = arith.constant 0 : index
    %c48 = arith.constant 48 : index
    %83 = vector.load %arg13[%c0_118, %c48] : memref<512x72xf32, #tpu.memory_space<vmem>>, vector<512x8xf32>
    tpu.vector_store %arg13[%c0_118, %c48], %82 {strides = array<i32>} : memref<512x72xf32, #tpu.memory_space<vmem>>, vector<512x8xf32>,
    %c0_119 = arith.constant 0 : index
    %c2_120 = arith.constant 2 : index
    %c1_121 = arith.constant 1 : index
    %c0_122 = arith.constant 0 : index
    %84 = vector.load %arg12[%c0_119, %c2_120, %c1_121, %c0_122] : memref<2x18x18x8xf32, #tpu.memory_space<vmem>>, vector<2x16x16x8xf32>
    %85 = vector.shape_cast %84 : vector<2x16x16x8xf32> to vector<512x8xf32>
    %c0_123 = arith.constant 0 : index
    %c56 = arith.constant 56 : index
    %86 = vector.load %arg13[%c0_123, %c56] : memref<512x72xf32, #tpu.memory_space<vmem>>, vector<512x8xf32>
    tpu.vector_store %arg13[%c0_123, %c56], %85 {strides = array<i32>} : memref<512x72xf32, #tpu.memory_space<vmem>>, vector<512x8xf32>,
    %c0_124 = arith.constant 0 : index
    %c2_125 = arith.constant 2 : index
    %c2_126 = arith.constant 2 : index
    %c0_127 = arith.constant 0 : index
    %87 = vector.load %arg12[%c0_124, %c2_125, %c2_126, %c0_127] : memref<2x18x18x8xf32, #tpu.memory_space<vmem>>, vector<2x16x16x8xf32>
    %88 = vector.shape_cast %87 : vector<2x16x16x8xf32> to vector<512x8xf32>
    %c0_128 = arith.constant 0 : index
    %c64 = arith.constant 64 : index
    %89 = vector.load %arg13[%c0_128, %c64] : memref<512x72xf32, #tpu.memory_space<vmem>>, vector<512x8xf32>
    tpu.vector_store %arg13[%c0_128, %c64], %88 {strides = array<i32>} : memref<512x72xf32, #tpu.memory_space<vmem>>, vector<512x8xf32>,
    %c0_129 = arith.constant 0 : index
    %c0_130 = arith.constant 0 : index
    %90 = vector.load %arg13[%c0_129, %c0_130] : memref<512x72xf32, #tpu.memory_space<vmem>>, vector<512x72xf32>
    %c0_131 = arith.constant 0 : index
    %c0_132 = arith.constant 0 : index
    %91 = vector.load %arg4[%c0_131, %c0_132] : memref<72x8xf32, #tpu.memory_space<vmem>>, vector<72x8xf32>
    %cst_133 = arith.constant dense<0.000000e+00> : vector<512x8xf32>
    %92 = tpu.matmul %90, %91, %cst_133 {dimension_numbers = #tpu.dot_dimension_numbers<[1], [0], [0], [1], [0, 0, 1, 1], [], []>} : vector<512x72xf32>, vector<72x8xf32>, vector<512x8xf32> -> vector<512x8xf32>
    %c0_134 = arith.constant 0 : index
    %c0_135 = arith.constant 0 : index
    %93 = vector.load %arg5[%c0_134, %c0_135] : memref<8x8xf32, #tpu.memory_space<vmem>>, vector<8x8xf32>
    %cst_136 = arith.constant dense<0.000000e+00> : vector<512x8xf32>
    %94 = tpu.matmul %92, %93, %cst_136 {dimension_numbers = #tpu.dot_dimension_numbers<[1], [0], [0], [1], [0, 0, 1, 1], [], []>} : vector<512x8xf32>, vector<8x8xf32>, vector<512x8xf32> -> vector<512x8xf32>
    %c0_137 = arith.constant 0 : index
    %c0_138 = arith.constant 0 : index
    %95 = vector.load %arg6[%c0_137, %c0_138] : memref<1x8xf32, #tpu.memory_space<vmem>>, vector<1x8xf32>
    %96 = vector.broadcast %95 : vector<1x8xf32> to vector<512x8xf32>
    %97 = arith.addf %94, %96 : vector<512x8xf32>
    %c0_139 = arith.constant 0 : index
    %c0_140 = arith.constant 0 : index
    %98 = vector.load %arg7[%c0_139, %c0_140] : memref<1x8xf32, #tpu.memory_space<vmem>>, vector<1x8xf32>
    %c0_141 = arith.constant 0 : index
    %c0_142 = arith.constant 0 : index
    %99 = vector.load %arg8[%c0_141, %c0_142] : memref<1x8xf32, #tpu.memory_space<vmem>>, vector<1x8xf32>
    %cst_143 = arith.constant dense<0.000000e+00> : vector<8xf32>
    %100 = vector.multi_reduction <add>, %97, %cst_143 [0] : vector<512x8xf32> to vector<8xf32>
    %101 = vector.shape_cast %100 : vector<8xf32> to vector<1x8xf32>
    %cst_144 = arith.constant 0.001953125 : f32
    %102 = vector.broadcast %cst_144 : f32 to vector<1x8xf32>
    %103 = arith.mulf %101, %102 : vector<1x8xf32>
    %104 = arith.mulf %97, %97 : vector<512x8xf32>
    %cst_145 = arith.constant dense<0.000000e+00> : vector<8xf32>
    %105 = vector.multi_reduction <add>, %104, %cst_145 [0] : vector<512x8xf32> to vector<8xf32>
    %106 = vector.shape_cast %105 : vector<8xf32> to vector<1x8xf32>
    %cst_146 = arith.constant 0.001953125 : f32
    %107 = vector.broadcast %cst_146 : f32 to vector<1x8xf32>
    %108 = arith.mulf %106, %107 : vector<1x8xf32>
    %109 = arith.mulf %103, %103 : vector<1x8xf32>
    %110 = arith.subf %108, %109 : vector<1x8xf32>
    %cst_147 = arith.constant 9.99999974E-6 : f32
    %111 = vector.broadcast %cst_147 : f32 to vector<1x8xf32>
    %112 = arith.addf %110, %111 : vector<1x8xf32>
    %113 = math.rsqrt %112 : vector<1x8xf32>
    %114 = arith.mulf %98, %113 : vector<1x8xf32>
    %115 = arith.mulf %103, %114 : vector<1x8xf32>
    %116 = arith.subf %99, %115 : vector<1x8xf32>
    %117 = vector.broadcast %114 : vector<1x8xf32> to vector<512x8xf32>
    %118 = arith.mulf %97, %117 : vector<512x8xf32>
    %119 = vector.broadcast %116 : vector<1x8xf32> to vector<512x8xf32>
    %120 = arith.addf %118, %119 : vector<512x8xf32>
    %cst_148 = arith.constant 0.000000e+00 : f32
    %121 = vector.broadcast %cst_148 : f32 to vector<512x8xf32>
    %122 = arith.maximumf %120, %121 : vector<512x8xf32>
    %123 = vector.shape_cast %122 : vector<512x8xf32> to vector<2x16x16x8xf32>
    %c0_149 = arith.constant 0 : index
    %c0_150 = arith.constant 0 : index
    %c0_151 = arith.constant 0 : index
    %c0_152 = arith.constant 0 : index
    %124 = vector.load %arg9[%c0_149, %c0_150, %c0_151, %c0_152] : memref<2x16x16x8xf32, #tpu.memory_space<vmem>>, vector<2x16x16x8xf32>
    tpu.vector_store %arg9[%c0_149, %c0_150, %c0_151, %c0_152], %123 {strides = array<i32>} : memref<2x16x16x8xf32, #tpu.memory_space<vmem>>, vector<2x16x16x8xf32>,
    return
  }
}

</mosaic_0001>

<bundles_post_ra>
// kernel: double_conv_forward.1
= control target key start
LH: loop header
LB: loop body
LE: loop exit
PB: predicated region body
PF: predicated region fallthrough
CT: control target
= control target key end

     0   :  { %vm32_vm0 = vcmask 31744   ;;  %v15290_v0 = vmov 0.0   ;;  %s9611_s11 = smov 4   ;;  %vm35_vm1 = vcmask 25600   ;;  %vm719_vm2 = vcmask 64544   ;;  %s9612_s30 = smov 8   ;;  %s15280_s0 = inlined_call_operand.vmem [shape: f32[2,16,16,4], index: 0, kind: input, shape index: {}]   ;;  %s15281_s1 = inlined_call_operand.vmem [shape: f32[36,8], index: 1, kind: input, shape index: {}]   ;;  %s15282_s2 = inlined_call_operand.vmem [shape: f32[1,8], index: 2, kind: input, shape index: {}]   ;;  %s15283_s3 = inlined_call_operand.vmem [shape: f32[1,8], index: 3, kind: input, shape index: {}]   ;;  %s15284_s4 = inlined_call_operand.vmem [shape: f32[72,8], index: 4, kind: input, shape index: {}]   ;;  %s15285_s5 = inlined_call_operand.vmem [shape: f32[8,8], index: 5, kind: input, shape index: {}]   ;;  %s15286_s6 = inlined_call_operand.vmem [shape: f32[1,8], index: 6, kind: input, shape index: {}]   ;;  %s15287_s7 = inlined_call_operand.vmem [shape: f32[1,8], index: 7, kind: input, shape index: {}]   ;;  %s15288_s8 = inlined_call_operand.vmem [shape: f32[1,8], index: 8, kind: input, shape index: {}]   ;;  %s15289_s9 = inlined_call_operand.vmem [shape: f32[2,16,16,8], index: 9, kind: output, shape index: {}]  }
   0x1   :  { %37 = vst.msk [vmem:[#allocation2 + $0x18] sm:$0xff] %vm32_vm0, %v15290_v0  ;;  %v142_v1 = vld [vmem:[%s15280_s0] sm:$0xff]  ;;  %v143_v4 = vld [vmem:[%s15280_s0 + $0x8] sm:$0xff]  ;;  %v149_v10 = vld [vmem:[%s15280_s0 + $0x38] sm:$0xff]  ;;  %vm1104_vm3 = vcmask 97344   ;;  %vm1489_vm4 = vcmask 130144  }
   0x2   :  { %38 = vst.msk [vmem:[#allocation2 + $0x20] sm:$0xff] %vm32_vm0, %v15290_v0  ;;  %v147_v7 = vld [vmem:[%s15280_s0 + $0x28] sm:$0xff]  ;;  %v146_v8 = vld [vmem:[%s15280_s0 + $0x20] sm:$0xff]  ;;  %v144_v11 = vld [vmem:[%s15280_s0 + $0x10] sm:$0xff]  ;;  %vm1874_vm5 = vcmask 162944   ;;  %s9615_s19 = smov 20  }
   0x3   :  { %207 = vst.msk [vmem:[#allocation2 + $0x19] sm:$0xff] %vm32_vm0, %v142_v1  ;;  %v150_v9 = vld [vmem:[%s15280_s0 + $0x40] sm:$0xff]  ;;  %v153_v12 = vld [vmem:[%s15280_s0 + $0x58] sm:$0xff]  ;;  %v152_v13 = vld [vmem:[%s15280_s0 + $0x50] sm:$0xff]  ;;  %vm2259_vm6 = vcmask 195744   ;;  %s9616_s20 = smov 24  }
   0x4   :  { %33 = vst.msk [vmem:[#allocation2] sm:$0xff] %vm32_vm0, %v15290_v0  ;;  %v145_v14 = vld [vmem:[%s15280_s0 + $0x18] sm:$0xff]  ;;  %v156_v15 = vld [vmem:[%s15280_s0 + $0x70] sm:$0xff]  ;;  %v155_v16 = vld [vmem:[%s15280_s0 + $0x68] sm:$0xff]  ;;  %vm2645_vm7 = vcmask 228544   ;;  %s9617_s21 = smov 28  }
   0x5   :  { %34 = vst.msk [vmem:[#allocation2 + $0x8] sm:$0xff] %vm32_vm0, %v15290_v0  ;;  %v148_v18 = vld [vmem:[%s15280_s0 + $0x30] sm:$0xff]  ;;  %v159_v20 = vld [vmem:[%s15280_s0 + $0x88] sm:$0xff]  ;;  %v158_v21 = vld [vmem:[%s15280_s0 + $0x80] sm:$0xff]  ;;  %vm3030_vm8 = vcmask 261344   ;;  %s9618_s22 = smov 32  }
   0x6   :  { %40 = vst.msk [vmem:[#allocation2 + $0x30] sm:$0xff] %vm32_vm0, %v15290_v0  ;;  %v151_v22 = vld [vmem:[%s15280_s0 + $0x48] sm:$0xff]  ;;  %v162_v24 = vld [vmem:[%s15280_s0 + $0xa0] sm:$0xff]  ;;  %v161_v27 = vld [vmem:[%s15280_s0 + $0x98] sm:$0xff]  ;;  %vm3742_vm9 = vcmask 1043456   ;;  %vm3415_vm10 = vcmask 294144  }
   0x7   :  { %41 = vst.msk [vmem:[#allocation2 + $0x38] sm:$0xff] %vm32_vm0, %v15290_v0  ;;  %v154_v28 = vld [vmem:[%s15280_s0 + $0x60] sm:$0xff]  ;;  %v165_v29 = vld [vmem:[%s15280_s0 + $0xb8] sm:$0xff]  ;;  %v164_v33 = vld [vmem:[%s15280_s0 + $0xb0] sm:$0xff]  ;;  %vm3549_vm11 = vcmask 293888   ;;  %vm3957_vm12 = vcmask 64512  }
   0x8   :  { %43 = vst.msk [vmem:[#allocation2 + $0x48] sm:$0xff] %vm32_vm0, %v15290_v0  ;;  %v157_v34 = vld [vmem:[%s15280_s0 + $0x78] sm:$0xff]  ;;  %v168_v35 = vld [vmem:[%s15280_s0 + $0xd0] sm:$0xff]  ;;  %v167_v39 = vld [vmem:[%s15280_s0 + $0xc8] sm:$0xff]  ;;  %vm4506_vm13 = vcmask 58368   ;;  %s9622_s16 = smov 48  }
   0x9   :  { %44 = vst.msk [vmem:[#allocation2 + $0x50] sm:$0xff] %vm32_vm0, %v15290_v0  ;;  %v160_v40 = vld [vmem:[%s15280_s0 + $0x90] sm:$0xff]  ;;  %v171_v41 = vld [vmem:[%s15280_s0 + $0xe8] sm:$0xff]  ;;  %v170_v45 = vld [vmem:[%s15280_s0 + $0xe0] sm:$0xff] }
   0xa   :  { %v401_v2 = vld [vmem:[#allocation2 + $0x19] sm:$0xff]  ;;  %46 = vst.msk [vmem:[#allocation2 + $0x60] sm:$0xff] %vm32_vm0, %v15290_v0  ;;  %v163_v46 = vld [vmem:[%s15280_s0 + $0xa8] sm:$0xff]  ;;  %v176_v56 = vld [vmem:[%s15280_s0 + $0x110] sm:$0xff] }
   0xb   :  { %531 = vrot.lane.b32.xlu1 %v401_v2, %s9611_s11  ;;  %47 = vst.msk [vmem:[#allocation2 + $0x68] sm:$0xff] %vm32_vm0, %v15290_v0  ;;  %v174_v47 = vld [vmem:[%s15280_s0 + $0x100] sm:$0xff]  ;;  %v177_v52 = vld [vmem:[%s15280_s0 + $0x118] sm:$0xff]  ;;  %v180_v58 = vld [vmem:[%s15280_s0 + $0x130] sm:$0xff] }
   0xc   :  { %49 = vst.msk [vmem:[#allocation2 + $0x78] sm:$0xff] %vm32_vm0, %v15290_v0  ;;  %v399_v3 = vld [vmem:[#allocation2 + $0x1] sm:$0xff]  ;;  %v169_v57 = vld [vmem:[%s15280_s0 + $0xd8] sm:$0xff] }
   0xd   :  { %50 = vst.msk [vmem:[#allocation2 + $0x80] sm:$0xff] %vm32_vm0, %v15290_v0  ;;  %527 = vrot.lane.b32.xlu0 %v399_v3, %s9611_s11  ;;  %v166_v51 = vld [vmem:[%s15280_s0 + $0xc0] sm:$0xff]  ;;  %v179_v62 = vld [vmem:[%s15280_s0 + $0x128] sm:$0xff] }
   0xe   :  { %52 = vst.msk [vmem:[#allocation2 + $0x90] sm:$0xff] %vm32_vm0, %v15290_v0  ;;  %v183_v63 = vld [vmem:[%s15280_s0 + $0x148] sm:$0xff] }
   0xf   :  { %53 = vst.msk [vmem:[#allocation2 + $0x98] sm:$0xff] %vm32_vm0, %v15290_v0 }
  0x10   :  { %55 = vst.msk [vmem:[#allocation2 + $0xa8] sm:$0xff] %vm32_vm0, %v15290_v0 }
  0x11   :  { %56 = vst.msk [vmem:[#allocation2 + $0xb0] sm:$0xff] %vm32_vm0, %v15290_v0 }
  0x12   :  { %58 = vst.msk [vmem:[#allocation2 + $0xc0] sm:$0xff] %vm32_vm0, %v15290_v0 }
  0x13   :  { %59 = vst.msk [vmem:[#allocation2 + $0xc8] sm:$0xff] %vm32_vm0, %v15290_v0 }
  0x14   :  { %61 = vst.msk [vmem:[#allocation2 + $0xd8] sm:$0xff] %vm32_vm0, %v15290_v0 }
  0x15   :  { %62 = vst.msk [vmem:[#allocation2 + $0xe0] sm:$0xff] %vm32_vm0, %v15290_v0 }
  0x16   :  { %64 = vst.msk [vmem:[#allocation2 + $0xf0] sm:$0xff] %vm32_vm0, %v15290_v0 }
  0x17   :  { %65 = vst.msk [vmem:[#allocation2 + $0xf8] sm:$0xff] %vm32_vm0, %v15290_v0 }
  0x18   :  { %67 = vst.msk [vmem:[#allocation2 + $0x108] sm:$0xff] %vm32_vm0, %v15290_v0 }
  0x19   :  { %68 = vst.msk [vmem:[#allocation2 + $0x110] sm:$0xff] %vm32_vm0, %v15290_v0 }
  0x1a   :  { %70 = vst.msk [vmem:[#allocation2 + $0x120] sm:$0xff] %vm32_vm0, %v15290_v0 }
  0x1b   :  { %71 = vst.msk [vmem:[#allocation2 + $0x128] sm:$0xff] %vm32_vm0, %v15290_v0 }
  0x1c   :  { %73 = vst.msk [vmem:[#allocation2 + $0x138] sm:$0xff] %vm32_vm0, %v15290_v0 }
  0x1d   :  { %74 = vst.msk [vmem:[#allocation2 + $0x140] sm:$0xff] %vm32_vm0, %v15290_v0 }
  0x1e   :  { %76 = vst.msk [vmem:[#allocation2 + $0x150] sm:$0xff] %vm32_vm0, %v15290_v0 }
  0x1f   :  { %77 = vst.msk [vmem:[#allocation2 + $0x158] sm:$0xff] %vm32_vm0, %v15290_v0 }
  0x20   :  { %79 = vst.msk [vmem:[#allocation2 + $0x168] sm:$0xff] %vm32_vm0, %v15290_v0 }
  0x21   :  { %80 = vst.msk [vmem:[#allocation2 + $0x170] sm:$0xff] %vm32_vm0, %v15290_v0 }
  0x22   :  { %82 = vst.msk [vmem:[#allocation2 + $0x180] sm:$0xff] %vm32_vm0, %v15290_v0 }
  0x23   :  { %83 = vst.msk [vmem:[#allocation2 + $0x188] sm:$0xff] %vm32_vm0, %v15290_v0 }
  0x24   :  { %85 = vst.msk [vmem:[#allocation2 + $0x198] sm:$0xff] %vm32_vm0, %v15290_v0 }
  0x25   :  { %86 = vst.msk [vmem:[#allocation2 + $0x1a0] sm:$0xff] %vm32_vm0, %v15290_v0 }
  0x26   :  { %88 = vst.msk [vmem:[#allocation2 + $0x1b0] sm:$0xff] %vm32_vm0, %v15290_v0 }
  0x27   :  { %89 = vst.msk [vmem:[#allocation2 + $0x1b8] sm:$0xff] %vm32_vm0, %v15290_v0 }
  0x28   :  { %91 = vst.msk [vmem:[#allocation2 + $0x1c8] sm:$0xff] %vm32_vm0, %v15290_v0 }
  0x29   :  { %92 = vst.msk [vmem:[#allocation2 + $0x1d0] sm:$0xff] %vm32_vm0, %v15290_v0 }
  0x2a   :  { %94 = vst.msk [vmem:[#allocation2 + $0x1e0] sm:$0xff] %vm32_vm0, %v15290_v0 }
  0x2b   :  { %95 = vst.msk [vmem:[#allocation2 + $0x1e8] sm:$0xff] %vm32_vm0, %v15290_v0 }
  0x2c   :  { %97 = vst.msk [vmem:[#allocation2 + $0x1f8] sm:$0xff] %vm32_vm0, %v15290_v0 }
  0x2d   :  { %98 = vst.msk [vmem:[#allocation2 + $0x200] sm:$0xff] %vm32_vm0, %v15290_v0 }
  0x2e   :  { %100 = vst.msk [vmem:[#allocation2 + $0x210] sm:$0xff] %vm32_vm0, %v15290_v0 }
  0x2f   :  { %101 = vst.msk [vmem:[#allocation2 + $0x218] sm:$0xff] %vm32_vm0, %v15290_v0 }
  0x30   :  { %103 = vst.msk [vmem:[#allocation2 + $0x228] sm:$0xff] %vm32_vm0, %v15290_v0 }
  0x31   :  { %104 = vst.msk [vmem:[#allocation2 + $0x230] sm:$0xff] %vm32_vm0, %v15290_v0 }
  0x32   :  { %106 = vst.msk [vmem:[#allocation2 + $0x240] sm:$0xff] %vm32_vm0, %v15290_v0 }
  0x33   :  { %107 = vst.msk [vmem:[#allocation2 + $0x248] sm:$0xff] %vm32_vm0, %v15290_v0 }
  0x34   :  { %109 = vst.msk [vmem:[#allocation2 + $0x258] sm:$0xff] %vm32_vm0, %v15290_v0 }
  0x35   :  { %110 = vst.msk [vmem:[#allocation2 + $0x260] sm:$0xff] %vm32_vm0, %v15290_v0 }
  0x36   :  { %112 = vst.msk [vmem:[#allocation2 + $0x270] sm:$0xff] %vm32_vm0, %v15290_v0 }
  0x37   :  { %113 = vst.msk [vmem:[#allocation2 + $0x278] sm:$0xff] %vm32_vm0, %v15290_v0 }
  0x38   :  { %115 = vst.msk [vmem:[#allocation2 + $0x288] sm:$0xff] %vm32_vm0, %v15290_v0 }
  0x39   :  { %116 = vst.msk [vmem:[#allocation2 + $0x290] sm:$0xff] %vm32_vm0, %v15290_v0 }
  0x3a   :  { %118 = vst.msk [vmem:[#allocation2 + $0x2a0] sm:$0xff] %vm32_vm0, %v15290_v0 }
  0x3b   :  { %119 = vst.msk [vmem:[#allocation2 + $0x2a8] sm:$0xff] %vm32_vm0, %v15290_v0 }
  0x3c   :  { %121 = vst.msk [vmem:[#allocation2 + $0x2b8] sm:$0xff] %vm32_vm0, %v15290_v0 }
  0x3d   :  { %122 = vst.msk [vmem:[#allocation2 + $0x2c0] sm:$0xff] %vm32_vm0, %v15290_v0 }
  0x3e   :  { %124 = vst.msk [vmem:[#allocation2 + $0x2d0] sm:$0xff] %vm32_vm0, %v15290_v0 }
  0x3f   :  { %125 = vst.msk [vmem:[#allocation2 + $0x2d8] sm:$0xff] %vm32_vm0, %v15290_v0 }
  0x40   :  { %127 = vst.msk [vmem:[#allocation2 + $0x2e8] sm:$0xff] %vm32_vm0, %v15290_v0 }
  0x41   :  { %128 = vst.msk [vmem:[#allocation2 + $0x2f0] sm:$0xff] %vm32_vm0, %v15290_v0 }
  0x42   :  { %130 = vst.msk [vmem:[#allocation2 + $0x300] sm:$0xff] %vm32_vm0, %v15290_v0 }
  0x43   :  { %131 = vst.msk [vmem:[#allocation2 + $0x308] sm:$0xff] %vm32_vm0, %v15290_v0 }
  0x44   :  { %133 = vst.msk [vmem:[#allocation2 + $0x318] sm:$0xff] %vm32_vm0, %v15290_v0 }
  0x45   :  { %134 = vst.msk [vmem:[#allocation2 + $0x320] sm:$0xff] %vm32_vm0, %v15290_v0 }
  0x46   :  { %136 = vst.msk [vmem:[#allocation2 + $0x330] sm:$0xff] %vm32_vm0, %v15290_v0 }
  0x47   :  { %137 = vst.msk [vmem:[#allocation2 + $0x338] sm:$0xff] %vm32_vm0, %v15290_v0 }
  0x48   :  { %139 = vst.msk [vmem:[#allocation2 + $0x348] sm:$0xff] %vm32_vm0, %v15290_v0 }
  0x49   :  { %140 = vst.msk [vmem:[#allocation2 + $0x350] sm:$0xff] %vm32_vm0, %v15290_v0 }
  0x4a   :  { %39 = vst.msk [vmem:[#allocation2 + $0x28] sm:$0x3] %vm35_vm1, %v15290_v0 }
  0x4b   :  { %208 = vst.msk [vmem:[#allocation2 + $0x21] sm:$0xff] %vm32_vm0, %v143_v4  ;;  %v182_v4 = vld [vmem:[%s15280_s0 + $0x140] sm:$0xff] }
  0x4c   :  { %36 = vst.msk [vmem:[#allocation2 + $0x10] sm:$0x3] %vm35_vm1, %v15290_v0 }
  0x4d   :  { %42 = vst.msk [vmem:[#allocation2 + $0x40] sm:$0x3] %vm35_vm1, %v15290_v0 }
  0x4e   :  { %45 = vst.msk [vmem:[#allocation2 + $0x58] sm:$0x3] %vm35_vm1, %v15290_v0 }
  0x4f   :  { %48 = vst.msk [vmem:[#allocation2 + $0x70] sm:$0x3] %vm35_vm1, %v15290_v0 }
  0x50   :  { %51 = vst.msk [vmem:[#allocation2 + $0x88] sm:$0x3] %vm35_vm1, %v15290_v0 }
  0x51   :  { %54 = vst.msk [vmem:[#allocation2 + $0xa0] sm:$0x3] %vm35_vm1, %v15290_v0 }
  0x52   :  { %v402_v5 = vld [vmem:[#allocation2 + $0x21] sm:$0xff]  ;;  %57 = vst.msk [vmem:[#allocation2 + $0xb8] sm:$0x3] %vm35_vm1, %v15290_v0 }
  0x53   :  { %533 = vrot.lane.b32.xlu1 %v402_v5, %s9611_s11  ;;  %60 = vst.msk [vmem:[#allocation2 + $0xd0] sm:$0x3] %vm35_vm1, %v15290_v0  ;;  %v400_v6 = vld [vmem:[#allocation2 + $0x9] sm:$0xff] }
  0x54   :  { %63 = vst.msk [vmem:[#allocation2 + $0xe8] sm:$0x3] %vm35_vm1, %v15290_v0  ;;  %529 = vrot.lane.b32.xlu0 %v400_v6, %s9611_s11  ;;  %v273_v6 = vld [vmem:[#allocation2 + $0x18] sm:$0xff] }
  0x55   :  { %66 = vst.msk [vmem:[#allocation2 + $0x100] sm:$0x3] %vm35_vm1, %v15290_v0 }
  0x56   :  { %69 = vst.msk [vmem:[#allocation2 + $0x118] sm:$0x3] %vm35_vm1, %v15290_v0 }
  0x57   :  { %72 = vst.msk [vmem:[#allocation2 + $0x130] sm:$0x3] %vm35_vm1, %v15290_v0 }
  0x58   :  { %75 = vst.msk [vmem:[#allocation2 + $0x148] sm:$0x3] %vm35_vm1, %v15290_v0 }
  0x59   :  { %78 = vst.msk [vmem:[#allocation2 + $0x160] sm:$0x3] %vm35_vm1, %v15290_v0 }
  0x5a   :  { %81 = vst.msk [vmem:[#allocation2 + $0x178] sm:$0x3] %vm35_vm1, %v15290_v0 }
  0x5b   :  { %84 = vst.msk [vmem:[#allocation2 + $0x190] sm:$0x3] %vm35_vm1, %v15290_v0 }
  0x5c   :  { %87 = vst.msk [vmem:[#allocation2 + $0x1a8] sm:$0x3] %vm35_vm1, %v15290_v0 }
  0x5d   :  { %90 = vst.msk [vmem:[#allocation2 + $0x1c0] sm:$0x3] %vm35_vm1, %v15290_v0 }
  0x5e   :  { %93 = vst.msk [vmem:[#allocation2 + $0x1d8] sm:$0x3] %vm35_vm1, %v15290_v0 }
  0x5f   :  { %96 = vst.msk [vmem:[#allocation2 + $0x1f0] sm:$0x3] %vm35_vm1, %v15290_v0 }
  0x60   :  { %99 = vst.msk [vmem:[#allocation2 + $0x208] sm:$0x3] %vm35_vm1, %v15290_v0 }
  0x61   :  { %102 = vst.msk [vmem:[#allocation2 + $0x220] sm:$0x3] %vm35_vm1, %v15290_v0 }
  0x62   :  { %105 = vst.msk [vmem:[#allocation2 + $0x238] sm:$0x3] %vm35_vm1, %v15290_v0 }
  0x63   :  { %108 = vst.msk [vmem:[#allocation2 + $0x250] sm:$0x3] %vm35_vm1, %v15290_v0 }
  0x64   :  { %111 = vst.msk [vmem:[#allocation2 + $0x268] sm:$0x3] %vm35_vm1, %v15290_v0 }
  0x65   :  { %114 = vst.msk [vmem:[#allocation2 + $0x280] sm:$0x3] %vm35_vm1, %v15290_v0 }
  0x66   :  { %117 = vst.msk [vmem:[#allocation2 + $0x298] sm:$0x3] %vm35_vm1, %v15290_v0 }
  0x67   :  { %120 = vst.msk [vmem:[#allocation2 + $0x2b0] sm:$0x3] %vm35_vm1, %v15290_v0 }
  0x68   :  { %123 = vst.msk [vmem:[#allocation2 + $0x2c8] sm:$0x3] %vm35_vm1, %v15290_v0 }
  0x69   :  { %126 = vst.msk [vmem:[#allocation2 + $0x2e0] sm:$0x3] %vm35_vm1, %v15290_v0 }
  0x6a   :  { %129 = vst.msk [vmem:[#allocation2 + $0x2f8] sm:$0x3] %vm35_vm1, %v15290_v0 }
  0x6b   :  { %132 = vst.msk [vmem:[#allocation2 + $0x310] sm:$0x3] %vm35_vm1, %v15290_v0 }
  0x6c   :  { %135 = vst.msk [vmem:[#allocation2 + $0x328] sm:$0x3] %vm35_vm1, %v15290_v0 }
  0x6d   :  { %138 = vst.msk [vmem:[#allocation2 + $0x340] sm:$0x3] %vm35_vm1, %v15290_v0 }
  0x6e   :  { %141 = vst.msk [vmem:[#allocation2 + $0x358] sm:$0x3] %vm35_vm1, %v15290_v0  ;;  %vm5126_vm1 = vcmask 130112  }
  0x6f   :  { %212 = vst.msk [vmem:[#allocation2 + $0x51] sm:$0xff] %vm32_vm0, %v147_v7  ;;  %v175_v7 = vld [vmem:[%s15280_s0 + $0x108] sm:$0xff] }
  0x70   :  { %211 = vst.msk [vmem:[#allocation2 + $0x49] sm:$0xff] %vm32_vm0, %v146_v8 }
  0x71   :  { %215 = vst.msk [vmem:[#allocation2 + $0x79] sm:$0xff] %vm32_vm0, %v150_v9  ;;  %v186_v9 = vld [vmem:[%s15280_s0 + $0x160] sm:$0xff] }
  0x72   :  { %214 = vst.msk [vmem:[#allocation2 + $0x69] sm:$0xff] %vm32_vm0, %v149_v10 }
  0x73   :  { %209 = vst.msk [vmem:[#allocation2 + $0x31] sm:$0xff] %vm32_vm0, %v144_v11  ;;  %v432_v11 = vld [vmem:[#allocation2 + $0x1b9] sm:$0xff] }
  0x74   :  { %218 = vst.msk [vmem:[#allocation2 + $0x99] sm:$0xff] %vm32_vm0, %v153_v12  ;;  %v185_v12 = vld [vmem:[%s15280_s0 + $0x158] sm:$0xff] }
  0x75   :  { %217 = vst.msk [vmem:[#allocation2 + $0x91] sm:$0xff] %vm32_vm0, %v152_v13 }
  0x76   :  { %v406_v17 = vld [vmem:[#allocation2 + $0x51] sm:$0xff]  ;;  %210 = vst.msk [vmem:[#allocation2 + $0x39] sm:$0xff] %vm32_vm0, %v145_v14  ;;  %v271_v14 = vld [vmem:[#allocation2] sm:$0xff] }
  0x77   :  { %541 = vrot.lane.b32.xlu1 %v406_v17, %s9611_s11  ;;  %v405_v19 = vld [vmem:[#allocation2 + $0x49] sm:$0xff]  ;;  %221 = vst.msk [vmem:[#allocation2 + $0xc1] sm:$0xff] %vm32_vm0, %v156_v15  ;;  %v10087_v17 = vld [vmem:[#allocation2 + $0x20] sm:$0xff] }
  0x78   :  { %539 = vrot.lane.b32.xlu0 %v405_v19, %s9611_s11  ;;  %220 = vst.msk [vmem:[#allocation2 + $0xb1] sm:$0xff] %vm32_vm0, %v155_v16  ;;  %v409_v25 = vld [vmem:[#allocation2 + $0x79] sm:$0xff] }
  0x79   :  { %213 = vst.msk [vmem:[#allocation2 + $0x61] sm:$0xff] %vm32_vm0, %v148_v18  ;;  %v408_v26 = vld [vmem:[#allocation2 + $0x69] sm:$0xff]  ;;  %v178_v18 = vld [vmem:[%s15280_s0 + $0x120] sm:$0xff]  ;;  %v189_v19 = vld [vmem:[%s15280_s0 + $0x178] sm:$0xff] }
  0x7a   :  { %v403_v23 = vld [vmem:[#allocation2 + $0x31] sm:$0xff]  ;;  %224 = vst.msk [vmem:[#allocation2 + $0xe1] sm:$0xff] %vm32_vm0, %v159_v20 }
  0x7b   :  { %535 = vrot.lane.b32.xlu2 %v403_v23, %s9611_s11  ;;  %223 = vst.msk [vmem:[#allocation2 + $0xd9] sm:$0xff] %vm32_vm0, %v158_v21  ;;  %v412_v31 = vld [vmem:[#allocation2 + $0x99] sm:$0xff]  ;;  %v10082_v15 = vld [vmem:[#allocation2 + $0x30] sm:$0xff] }
  0x7c   :  { %216 = vst.msk [vmem:[#allocation2 + $0x81] sm:$0xff] %vm32_vm0, %v151_v22  ;;  %v411_v32 = vld [vmem:[#allocation2 + $0x91] sm:$0xff] }
  0x7d   :  { %227 = vst.msk [vmem:[#allocation2 + $0x109] sm:$0xff] %vm32_vm0, %v162_v24  ;;  %v404_v30 = vld [vmem:[#allocation2 + $0x39] sm:$0xff]  ;;  %v532_v5 = vpop.permute.xlu1 %531  ;;  %v188_v23 = vld [vmem:[%s15280_s0 + $0x170] sm:$0xff]  ;;  %v272_v24 = vld [vmem:[#allocation2 + $0x8] sm:$0xff] }
  0x7e   :  { %226 = vst.msk [vmem:[#allocation2 + $0xf9] sm:$0xff] %vm32_vm0, %v161_v27  ;;  %v415_v37 = vld [vmem:[#allocation2 + $0xc1] sm:$0xff]  ;;  %v431_v27 = vld [vmem:[#allocation2 + $0x1b1] sm:$0xff] }
  0x7f   :  { %547 = vrot.lane.b32.xlu1 %v409_v25, %s9611_s11  ;;  %219 = vst.msk [vmem:[#allocation2 + $0xa9] sm:$0xff] %vm32_vm0, %v154_v28  ;;  %v414_v38 = vld [vmem:[#allocation2 + $0xb1] sm:$0xff]  ;;  %v528_v13 = vpop.permute.xlu0 %527 }
  0x80   :  { %545 = vrot.lane.b32.xlu0 %v408_v26, %s9611_s11  ;;  %230 = vst.msk [vmem:[#allocation2 + $0x129] sm:$0xff] %vm32_vm0, %v165_v29  ;;  %v407_v36 = vld [vmem:[#allocation2 + $0x61] sm:$0xff]  ;;  %v276_v26 = vld [vmem:[#allocation2 + $0x38] sm:$0xff]  ;;  %v10111_v28 = vld [vmem:[#allocation2 + $0x50] sm:$0xff] }
  0x81   :  { %229 = vst.msk [vmem:[#allocation2 + $0x121] sm:$0xff] %vm32_vm0, %v164_v33  ;;  %v418_v43 = vld [vmem:[#allocation2 + $0xe1] sm:$0xff]  ;;  %v181_v29 = vld [vmem:[%s15280_s0 + $0x138] sm:$0xff] }
  0x82   :  { %222 = vst.msk [vmem:[#allocation2 + $0xc9] sm:$0xff] %vm32_vm0, %v157_v34  ;;  %v417_v44 = vld [vmem:[#allocation2 + $0xd9] sm:$0xff]  ;;  %v191_v33 = vld [vmem:[%s15280_s0 + $0x188] sm:$0xff] }
  0x83   :  { %537 = vrot.lane.b32.xlu2 %v404_v30, %s9611_s11  ;;  %233 = vst.msk [vmem:[#allocation2 + $0x151] sm:$0xff] %vm32_vm0, %v168_v35  ;;  %v410_v42 = vld [vmem:[#allocation2 + $0x81] sm:$0xff]  ;;  %v192_v30 = vld [vmem:[%s15280_s0 + $0x190] sm:$0xff] }
  0x84   :  { %232 = vst.msk [vmem:[#allocation2 + $0x141] sm:$0xff] %vm32_vm0, %v167_v39  ;;  %v421_v49 = vld [vmem:[#allocation2 + $0x109] sm:$0xff]  ;;  %v10132_v35 = vld [vmem:[#allocation2 + $0x60] sm:$0xff] }
  0x85   :  { %225 = vst.msk [vmem:[#allocation2 + $0xf1] sm:$0xff] %vm32_vm0, %v160_v40  ;;  %v420_v50 = vld [vmem:[#allocation2 + $0xf9] sm:$0xff]  ;;  %v10130_v34 = vld [vmem:[#allocation2 + $0x48] sm:$0xff] }
  0x86   :  { %236 = vst.msk [vmem:[#allocation2 + $0x171] sm:$0xff] %vm32_vm0, %v171_v41  ;;  %v413_v48 = vld [vmem:[#allocation2 + $0xa9] sm:$0xff] }
  0x87   :  { %553 = vrot.lane.b32.xlu1 %v412_v31, %s9611_s11  ;;  %235 = vst.msk [vmem:[#allocation2 + $0x169] sm:$0xff] %vm32_vm0, %v170_v45  ;;  %v424_v54 = vld [vmem:[#allocation2 + $0x129] sm:$0xff]  ;;  %v10160_v45 = vld [vmem:[#allocation2 + $0x80] sm:$0xff] }
  0x88   :  { %551 = vrot.lane.b32.xlu0 %v411_v32, %s9611_s11  ;;  %228 = vst.msk [vmem:[#allocation2 + $0x111] sm:$0xff] %vm32_vm0, %v163_v46  ;;  %v423_v55 = vld [vmem:[#allocation2 + $0x121] sm:$0xff]  ;;  %v10162_v46 = vld [vmem:[#allocation2 + $0x98] sm:$0xff] }
  0x89   :  { %239 = vst.msk [vmem:[#allocation2 + $0x1c9] sm:$0xff] %vm32_vm0, %v174_v47  ;;  %v416_v53 = vld [vmem:[#allocation2 + $0xc9] sm:$0xff] }
  0x8a   :  { %231 = vst.msk [vmem:[#allocation2 + $0x139] sm:$0xff] %vm32_vm0, %v166_v51  ;;  %v427_v60 = vld [vmem:[#allocation2 + $0x151] sm:$0xff]  ;;  %v195_v39 = vld [vmem:[%s15280_s0 + $0x1a8] sm:$0xff] }
  0x8b   :  { %543 = vrot.lane.b32.xlu2 %v407_v36, %s9611_s11  ;;  %242 = vst.msk [vmem:[#allocation2 + $0x1e9] sm:$0xff] %vm32_vm0, %v177_v52  ;;  %v426_v61 = vld [vmem:[#allocation2 + $0x141] sm:$0xff]  ;;  %v10134_v36 = vld [vmem:[#allocation2 + $0x78] sm:$0xff] }
  0x8c   :  { %241 = vst.msk [vmem:[#allocation2 + $0x1e1] sm:$0xff] %vm32_vm0, %v176_v56  ;;  %v419_v59 = vld [vmem:[#allocation2 + $0xf1] sm:$0xff]  ;;  %v10190_v56 = vld [vmem:[#allocation2 + $0xc0] sm:$0xff] }
  0x8d   :  { %234 = vst.msk [vmem:[#allocation2 + $0x159] sm:$0xff] %vm32_vm0, %v169_v57  ;;  %v430_v2 = vld [vmem:[#allocation2 + $0x171] sm:$0xff] }
  0x8e   :  { %245 = vst.msk [vmem:[#allocation2 + $0x211] sm:$0xff] %vm32_vm0, %v180_v58  ;;  %v429_v3 = vld [vmem:[#allocation2 + $0x169] sm:$0xff]  ;;  %v190_v58 = vld [vmem:[%s15280_s0 + $0x180] sm:$0xff] }
  0x8f   :  { %559 = vrot.lane.b32.xlu1 %v415_v37, %s9611_s11  ;;  %244 = vst.msk [vmem:[#allocation2 + $0x201] sm:$0xff] %vm32_vm0, %v179_v62  ;;  %v422_v1 = vld [vmem:[#allocation2 + $0x111] sm:$0xff] }
  0x90   :  { %557 = vrot.lane.b32.xlu0 %v414_v38, %s9611_s11  ;;  %248 = vst.msk [vmem:[#allocation2 + $0x231] sm:$0xff] %vm32_vm0, %v183_v63  ;;  %v433_v10 = vld [vmem:[#allocation2 + $0x1c9] sm:$0xff] }
  0x91   :  { %247 = vst.msk [vmem:[#allocation2 + $0x229] sm:$0xff] %vm32_vm0, %v182_v4  ;;  %v425_v8 = vld [vmem:[#allocation2 + $0x139] sm:$0xff]  ;;  %v184_v38 = vld [vmem:[%s15280_s0 + $0x150] sm:$0xff] }
  0x92   :  { %337 = vst.msk [vmem:[#allocation3 + $0x10] sm:$0xff] %vm32_vm0, %v273_v6  ;;  %v436_v20 = vld [vmem:[#allocation2 + $0x1e9] sm:$0xff] }
  0x93   :  { %549 = vrot.lane.b32.xlu2 %v410_v42, %s9611_s11  ;;  %722 = vst.msk [vmem:[#allocation3 + $0x10] sm:$0xff] %vm719_vm2, %v532_v5  ;;  %v435_v21 = vld [vmem:[#allocation2 + $0x1e1] sm:$0xff]  ;;  %v200_v63 = vld [vmem:[%s15280_s0 + $0x1d0] sm:$0xff] }
  0x94   :  { %240 = vst.msk [vmem:[#allocation2 + $0x1d1] sm:$0xff] %vm32_vm0, %v175_v7  ;;  %v428_v16 = vld [vmem:[#allocation2 + $0x159] sm:$0xff] }
  0x95   :  { %251 = vst.msk [vmem:[#allocation2 + $0x259] sm:$0xff] %vm32_vm0, %v186_v9  ;;  %v439_v31 = vld [vmem:[#allocation2 + $0x211] sm:$0xff]  ;;  %v10224_v5 = vld [vmem:[#allocation2 + $0xe0] sm:$0xff] }
  0x96   :  { %250 = vst.msk [vmem:[#allocation2 + $0x249] sm:$0xff] %vm32_vm0, %v185_v12  ;;  %v438_v32 = vld [vmem:[#allocation2 + $0x201] sm:$0xff]  ;;  %v193_v7 = vld [vmem:[%s15280_s0 + $0x198] sm:$0xff] }
  0x97   :  { %565 = vrot.lane.b32.xlu1 %v418_v43, %s9611_s11  ;;  %335 = vst.msk [vmem:[#allocation3] sm:$0xff] %vm32_vm0, %v271_v14  ;;  %v442_v40 = vld [vmem:[#allocation2 + $0x231] sm:$0xff]  ;;  %v194_v43 = vld [vmem:[%s15280_s0 + $0x1a0] sm:$0xff] }
  0x98   :  { %563 = vrot.lane.b32.xlu0 %v417_v44, %s9611_s11  ;;  %720 = vst.msk [vmem:[#allocation3] sm:$0xff] %vm719_vm2, %v528_v13  ;;  %v441_v41 = vld [vmem:[#allocation2 + $0x229] sm:$0xff]  ;;  %v10240_v12 = vld [vmem:[#allocation2 + $0xd8] sm:$0xff] }
  0x99   :  { %339 = vst.msk [vmem:[#allocation3 + $0x20] sm:$0xff] %vm32_vm0, %v10082_v15  ;;  %v10158_v44 = vld [vmem:[#allocation2 + $0x68] sm:$0xff]  ;;  %v10242_v13 = vld [vmem:[#allocation2 + $0xf0] sm:$0xff] }
  0x9a   :  { %338 = vst.msk [vmem:[#allocation3 + $0x18] sm:$0xff] %vm32_vm0, %v10087_v17 }
  0x9b   :  { %555 = vrot.lane.b32.xlu2 %v413_v48, %s9611_s11  ;;  %243 = vst.msk [vmem:[#allocation2 + $0x1f9] sm:$0xff] %vm32_vm0, %v178_v18  ;;  %v434_v37 = vld [vmem:[#allocation2 + $0x1d1] sm:$0xff]  ;;  %v187_v48 = vld [vmem:[%s15280_s0 + $0x168] sm:$0xff] }
  0x9c   :  { %254 = vst.msk [vmem:[#allocation2 + $0x279] sm:$0xff] %vm32_vm0, %v189_v19  ;;  %v10250_v18 = vld [vmem:[#allocation2 + $0x108] sm:$0xff] }
  0x9d   :  { %253 = vst.msk [vmem:[#allocation2 + $0x271] sm:$0xff] %vm32_vm0, %v188_v23  ;;  %v444_v51 = vld [vmem:[#allocation2 + $0x249] sm:$0xff] }
  0x9e   :  { %336 = vst.msk [vmem:[#allocation3 + $0x8] sm:$0xff] %vm32_vm0, %v272_v24  ;;  %v199_v24 = vld [vmem:[%s15280_s0 + $0x1c8] sm:$0xff] }
  0x9f   :  { %571 = vrot.lane.b32.xlu1 %v421_v49, %s9611_s11  ;;  %340 = vst.msk [vmem:[#allocation3 + $0x28] sm:$0xff] %vm32_vm0, %v276_v26  ;;  %v198_v49 = vld [vmem:[%s15280_s0 + $0x1c0] sm:$0xff]  ;;  %v10268_v26 = vld [vmem:[#allocation2 + $0x110] sm:$0xff] }
  0xa0   :  { %569 = vrot.lane.b32.xlu0 %v420_v50, %s9611_s11  ;;  %342 = vst.msk [vmem:[#allocation3 + $0x38] sm:$0xff] %vm32_vm0, %v10111_v28  ;;  %v445_v50 = vld [vmem:[#allocation2 + $0x259] sm:$0xff] }
  0xa1   :  { %246 = vst.msk [vmem:[#allocation2 + $0x219] sm:$0xff] %vm32_vm0, %v181_v29 }
  0xa2   :  { %257 = vst.msk [vmem:[#allocation2 + $0x2a1] sm:$0xff] %vm32_vm0, %v192_v30  ;;  %v437_v47 = vld [vmem:[#allocation2 + $0x1f9] sm:$0xff]  ;;  %v10276_v30 = vld [vmem:[#allocation2 + $0x128] sm:$0xff] }
  0xa3   :  { %561 = vrot.lane.b32.xlu2 %v416_v53, %s9611_s11  ;;  %256 = vst.msk [vmem:[#allocation2 + $0x291] sm:$0xff] %vm32_vm0, %v191_v33  ;;  %v197_v53 = vld [vmem:[%s15280_s0 + $0x1b8] sm:$0xff] }
  0xa4   :  { %341 = vst.msk [vmem:[#allocation3 + $0x30] sm:$0xff] %vm32_vm0, %v10130_v34 }
  0xa5   :  { %343 = vst.msk [vmem:[#allocation3 + $0x40] sm:$0xff] %vm32_vm0, %v10132_v35 }
  0xa6   :  { %345 = vst.msk [vmem:[#allocation3 + $0x50] sm:$0xff] %vm32_vm0, %v10134_v36 }
  0xa7   :  { %577 = vrot.lane.b32.xlu1 %v424_v54, %s9611_s11  ;;  %249 = vst.msk [vmem:[#allocation2 + $0x241] sm:$0xff] %vm32_vm0, %v184_v38  ;;  %v10186_v54 = vld [vmem:[#allocation2 + $0x90] sm:$0xff]  ;;  %v202_v38 = vld [vmem:[%s15280_s0 + $0x1e0] sm:$0xff] }
  0xa8   :  { %575 = vrot.lane.b32.xlu0 %v423_v55, %s9611_s11  ;;  %260 = vst.msk [vmem:[#allocation2 + $0x2c1] sm:$0xff] %vm32_vm0, %v195_v39  ;;  %v10188_v55 = vld [vmem:[#allocation2 + $0xa8] sm:$0xff]  ;;  %v440_v57 = vld [vmem:[#allocation2 + $0x219] sm:$0xff] }
  0xa9   :  { %259 = vst.msk [vmem:[#allocation2 + $0x2b9] sm:$0xff] %vm32_vm0, %v194_v43  ;;  %v10288_v39 = vld [vmem:[#allocation2 + $0x120] sm:$0xff]  ;;  %v10298_v43 = vld [vmem:[#allocation2 + $0x150] sm:$0xff] }
  0xaa   :  { %344 = vst.msk [vmem:[#allocation3 + $0x48] sm:$0xff] %vm32_vm0, %v10158_v44  ;;  %v450_v9 = vld [vmem:[#allocation2 + $0x291] sm:$0xff] }
  0xab   :  { %567 = vrot.lane.b32.xlu2 %v419_v59, %s9611_s11  ;;  %346 = vst.msk [vmem:[#allocation3 + $0x58] sm:$0xff] %vm32_vm0, %v10160_v45  ;;  %v201_v59 = vld [vmem:[%s15280_s0 + $0x1d8] sm:$0xff] }
  0xac   :  { %348 = vst.msk [vmem:[#allocation3 + $0x68] sm:$0xff] %vm32_vm0, %v10162_v46 }
  0xad   :  { %252 = vst.msk [vmem:[#allocation2 + $0x261] sm:$0xff] %vm32_vm0, %v187_v48 }
  0xae   :  { %263 = vst.msk [vmem:[#allocation2 + $0x2e9] sm:$0xff] %vm32_vm0, %v198_v49 }
  0xaf   :  { %583 = vrot.lane.b32.xlu1 %v427_v60, %s9611_s11  ;;  %262 = vst.msk [vmem:[#allocation2 + $0x2d9] sm:$0xff] %vm32_vm0, %v197_v53  ;;  %v448_v60 = vld [vmem:[#allocation2 + $0x279] sm:$0xff] }
  0xb0   :  { %581 = vrot.lane.b32.xlu0 %v426_v61, %s9611_s11  ;;  %347 = vst.msk [vmem:[#allocation3 + $0x60] sm:$0xff] %vm32_vm0, %v10186_v54  ;;  %v447_v61 = vld [vmem:[#allocation2 + $0x271] sm:$0xff] }
  0xb1   :  { %349 = vst.msk [vmem:[#allocation3 + $0x70] sm:$0xff] %vm32_vm0, %v10188_v55 }
  0xb2   :  { %351 = vst.msk [vmem:[#allocation3 + $0x80] sm:$0xff] %vm32_vm0, %v10190_v56 }
  0xb3   :  { %573 = vrot.lane.b32.xlu2 %v422_v1, %s9611_s11  ;;  %255 = vst.msk [vmem:[#allocation2 + $0x289] sm:$0xff] %vm32_vm0, %v190_v58  ;;  %v10214_v1 = vld [vmem:[#allocation2 + $0xb0] sm:$0xff] }
  0xb4   :  { %266 = vst.msk [vmem:[#allocation2 + $0x309] sm:$0xff] %vm32_vm0, %v201_v59  ;;  %v446_v14 = vld [vmem:[#allocation2 + $0x261] sm:$0xff]  ;;  %v10316_v58 = vld [vmem:[#allocation2 + $0x170] sm:$0xff] }
  0xb5   :  { %265 = vst.msk [vmem:[#allocation2 + $0x301] sm:$0xff] %vm32_vm0, %v200_v63  ;;  %v10325_v63 = vld [vmem:[#allocation2 + $0x168] sm:$0xff] }
  0xb6   :  { %350 = vst.msk [vmem:[#allocation3 + $0x78] sm:$0xff] %vm32_vm0, %v10214_v1  ;;  %v456_v33 = vld [vmem:[#allocation2 + $0x2d9] sm:$0xff] }
  0xb7   :  { %589 = vrot.lane.b32.xlu1 %v430_v2, %s9611_s11  ;;  %v10216_v2 = vld [vmem:[#allocation2 + $0xc8] sm:$0xff]  ;;  %354 = vst.msk [vmem:[#allocation3 + $0x98] sm:$0xff] %vm32_vm0, %v10224_v5 }
  0xb8   :  { %587 = vrot.lane.b32.xlu0 %v429_v3, %s9611_s11  ;;  %v443_v3 = vld [vmem:[#allocation2 + $0x241] sm:$0xff]  ;;  %352 = vst.msk [vmem:[#allocation3 + $0x88] sm:$0xff] %vm32_vm0, %v10216_v2 }
  0xb9   :  { %258 = vst.msk [vmem:[#allocation2 + $0x2a9] sm:$0xff] %vm32_vm0, %v193_v7  ;;  %v10331_v7 = vld [vmem:[#allocation2 + $0x1c8] sm:$0xff] }
  0xba   :  { %353 = vst.msk [vmem:[#allocation3 + $0x90] sm:$0xff] %vm32_vm0, %v10240_v12 }
  0xbb   :  { %579 = vrot.lane.b32.xlu2 %v425_v8, %s9611_s11  ;;  %v451_v8 = vld [vmem:[#allocation2 + $0x2a1] sm:$0xff]  ;;  %355 = vst.msk [vmem:[#allocation3 + $0xa0] sm:$0xff] %vm32_vm0, %v10242_v13  ;;  %v460_v48 = vld [vmem:[#allocation2 + $0x309] sm:$0xff] }
  0xbc   :  { %357 = vst.msk [vmem:[#allocation3 + $0xb0] sm:$0xff] %vm32_vm0, %v10250_v18  ;;  %v459_v49 = vld [vmem:[#allocation2 + $0x301] sm:$0xff] }
  0xbd   :  { %264 = vst.msk [vmem:[#allocation2 + $0x2f1] sm:$0xff] %vm32_vm0, %v199_v24  ;;  %v789_v24 = vld [vmem:[#allocation2 + $0x3a] sm:$0xff] }
  0xbe   :  { %358 = vst.msk [vmem:[#allocation3 + $0xb8] sm:$0xff] %vm32_vm0, %v10268_v26 }
  0xbf   :  { %595 = vrot.lane.b32.xlu1 %v433_v10, %s9611_s11  ;;  %360 = vst.msk [vmem:[#allocation3 + $0xc8] sm:$0xff] %vm32_vm0, %v10276_v30 }
  0xc0   :  { %593 = vrot.lane.b32.xlu0 %v432_v11, %s9611_s11  ;;  %v203_v11 = vld [vmem:[%s15280_s0 + $0x1e8] sm:$0xff]  ;;  %267 = vst.msk [vmem:[#allocation2 + $0x319] sm:$0xff] %vm32_vm0, %v202_v38 }
  0xc1   :  { %268 = vst.msk [vmem:[#allocation2 + $0x321] sm:$0xff] %vm32_vm0, %v203_v11 }
  0xc2   :  { %359 = vst.msk [vmem:[#allocation3 + $0xc0] sm:$0xff] %vm32_vm0, %v10288_v39 }
  0xc3   :  { %585 = vrot.lane.b32.xlu2 %v428_v16, %s9611_s11  ;;  %363 = vst.msk [vmem:[#allocation3 + $0xe0] sm:$0xff] %vm32_vm0, %v10298_v43 }
  0xc4   :  { %366 = vst.msk [vmem:[#allocation3 + $0xf8] sm:$0xff] %vm32_vm0, %v10316_v58 }
  0xc5   :  { %v534_v22 = vpop.permute.xlu1 %533  ;;  %365 = vst.msk [vmem:[#allocation3 + $0xf0] sm:$0xff] %vm32_vm0, %v10325_v63 }
  0xc6   :  { %723 = vst.msk [vmem:[#allocation3 + $0x18] sm:$0xff] %vm719_vm2, %v534_v22  ;;  %v530_v25 = vpop.permute.xlu0 %529  ;;  %v453_v22 = vld [vmem:[#allocation2 + $0x2b9] sm:$0xff] }
  0xc7   :  { %601 = vrot.lane.b32.xlu1 %v436_v20, %s9611_s11  ;;  %721 = vst.msk [vmem:[#allocation3 + $0x8] sm:$0xff] %vm719_vm2, %v530_v25  ;;  %v196_v20 = vld [vmem:[%s15280_s0 + $0x1b0] sm:$0xff]  ;;  %v10266_v25 = vld [vmem:[#allocation2 + $0xf8] sm:$0xff] }
  0xc8   :  { %599 = vrot.lane.b32.xlu0 %v435_v21, %s9611_s11  ;;  %v454_v21 = vld [vmem:[#allocation2 + $0x2c1] sm:$0xff]  ;;  %261 = vst.msk [vmem:[#allocation2 + $0x2d1] sm:$0xff] %vm32_vm0, %v196_v20 }
  0xc9   :  { %356 = vst.msk [vmem:[#allocation3 + $0xa8] sm:$0xff] %vm32_vm0, %v10266_v25 }
  0xca   :  { %369 = vst.msk [vmem:[#allocation3 + $0x110] sm:$0xff] %vm32_vm0, %v10331_v7 }
  0xcb   :  { %591 = vrot.lane.b32.xlu2 %v431_v27, %s9611_s11  ;;  %v449_v27 = vld [vmem:[#allocation2 + $0x289] sm:$0xff] }
  0xcf   :  { %607 = vrot.lane.b32.xlu1 %v439_v31, %s9611_s11  ;;  %v455_v53 = vld [vmem:[#allocation2 + $0x2d1] sm:$0xff] }
  0xd0   :  { %605 = vrot.lane.b32.xlu0 %v438_v32, %s9611_s11  ;;  %v457_v32 = vld [vmem:[#allocation2 + $0x2e9] sm:$0xff] }
  0xd3   :  { %597 = vrot.lane.b32.xlu2 %v434_v37, %s9611_s11 }
  0xd5   :  { %v536_v42 = vpop.permute.xlu2 %535 }
  0xd6   :  { %724 = vst.msk [vmem:[#allocation3 + $0x20] sm:$0xff] %vm719_vm2, %v536_v42 }
  0xd7   :  { %613 = vrot.lane.b32.xlu1 %v442_v40, %s9611_s11  ;;  %v10290_v40 = vld [vmem:[#allocation2 + $0x138] sm:$0xff] }
  0xd8   :  { %611 = vrot.lane.b32.xlu0 %v441_v41, %s9611_s11  ;;  %v452_v41 = vld [vmem:[#allocation2 + $0x2a9] sm:$0xff]  ;;  %361 = vst.msk [vmem:[#allocation3 + $0xd0] sm:$0xff] %vm32_vm0, %v10290_v40 }
  0xdb   :  { %603 = vrot.lane.b32.xlu2 %v437_v47, %s9611_s11 }
  0xdd   :  { %v538_v52 = vpop.permute.xlu2 %537 }
  0xde   :  { %725 = vst.msk [vmem:[#allocation3 + $0x28] sm:$0xff] %vm719_vm2, %v538_v52  ;;  %v10309_v52 = vld [vmem:[#allocation2 + $0x158] sm:$0xff] }
  0xdf   :  { %619 = vrot.lane.b32.xlu1 %v445_v50, %s9611_s11  ;;  %364 = vst.msk [vmem:[#allocation3 + $0xe8] sm:$0xff] %vm32_vm0, %v10309_v52 }
  0xe0   :  { %617 = vrot.lane.b32.xlu0 %v444_v51, %s9611_s11  ;;  %v10307_v51 = vld [vmem:[#allocation2 + $0x140] sm:$0xff] }
  0xe1   :  { %362 = vst.msk [vmem:[#allocation3 + $0xd8] sm:$0xff] %vm32_vm0, %v10307_v51 }
  0xe3   :  { %609 = vrot.lane.b32.xlu2 %v440_v57, %s9611_s11 }
  0xe5   :  { %v544_v62 = vpop.permute.xlu2 %543 }
  0xe6   :  { %728 = vst.msk [vmem:[#allocation3 + $0x40] sm:$0xff] %vm719_vm2, %v544_v62 }
  0xe7   :  { %625 = vrot.lane.b32.xlu1 %v448_v60, %s9611_s11  ;;  %v784_v60 = vld [vmem:[#allocation2 + $0x2] sm:$0xff] }
  0xe8   :  { %623 = vrot.lane.b32.xlu0 %v447_v61, %s9611_s11  ;;  %v462_v61 = vld [vmem:[#allocation2 + $0x321] sm:$0xff] }
  0xe9   :  { %v542_v4 = vpop.permute.xlu1 %541 }
  0xea   :  { %727 = vst.msk [vmem:[#allocation3 + $0x38] sm:$0xff] %vm719_vm2, %v542_v4  ;;  %v540_v6 = vpop.permute.xlu0 %539  ;;  %v458_v4 = vld [vmem:[#allocation2 + $0x2f1] sm:$0xff] }
  0xeb   :  { %726 = vst.msk [vmem:[#allocation3 + $0x30] sm:$0xff] %vm719_vm2, %v540_v6  ;;  %615 = vrot.lane.b32.xlu2 %v443_v3, %s9611_s11  ;;  %v303_v3 = vld [vmem:[#allocation2 + $0x1b0] sm:$0xff] }
  0xec   :  { %367 = vst.msk [vmem:[#allocation3 + $0x100] sm:$0xff] %vm32_vm0, %v303_v3  ;;  %v10391_v3 = vld [vmem:[#allocation2 + $0x228] sm:$0xff] }
  0xed   :  { %v550_v10 = vpop.permute.xlu2 %549  ;;  %377 = vst.msk [vmem:[#allocation3 + $0x150] sm:$0xff] %vm32_vm0, %v10391_v3 }
  0xee   :  { %731 = vst.msk [vmem:[#allocation3 + $0x58] sm:$0xff] %vm719_vm2, %v550_v10  ;;  %v786_v10 = vld [vmem:[#allocation2 + $0x1a] sm:$0xff] }
  0xef   :  { %631 = vrot.lane.b32.xlu1 %v451_v8, %s9611_s11 }
  0xf0   :  { %629 = vrot.lane.b32.xlu0 %v450_v9, %s9611_s11  ;;  %v787_v9 = vld [vmem:[#allocation2 + $0x22] sm:$0xff] }
  0xf1   :  { %v548_v16 = vpop.permute.xlu1 %547 }
  0xf2   :  { %730 = vst.msk [vmem:[#allocation3 + $0x50] sm:$0xff] %vm719_vm2, %v548_v16  ;;  %v546_v19 = vpop.permute.xlu0 %545  ;;  %v10340_v16 = vld [vmem:[#allocation2 + $0x1d0] sm:$0xff] }
  0xf3   :  { %729 = vst.msk [vmem:[#allocation3 + $0x48] sm:$0xff] %vm719_vm2, %v546_v19  ;;  %621 = vrot.lane.b32.xlu2 %v446_v14, %s9611_s11  ;;  %v304_v14 = vld [vmem:[#allocation2 + $0x1b8] sm:$0xff] }
  0xf4   :  { %v461_v19 = vld [vmem:[#allocation2 + $0x319] sm:$0xff]  ;;  %368 = vst.msk [vmem:[#allocation3 + $0x108] sm:$0xff] %vm32_vm0, %v304_v14  ;;  %v798_v14 = vld [vmem:[#allocation2 + $0xaa] sm:$0xff] }
  0xf5   :  { %v556_v23 = vpop.permute.xlu2 %555  ;;  %370 = vst.msk [vmem:[#allocation3 + $0x118] sm:$0xff] %vm32_vm0, %v10340_v16 }
  0xf6   :  { %734 = vst.msk [vmem:[#allocation3 + $0x70] sm:$0xff] %vm719_vm2, %v556_v23  ;;  %v790_v23 = vld [vmem:[#allocation2 + $0x4a] sm:$0xff] }
  0xf7   :  { %637 = vrot.lane.b32.xlu1 %v454_v21, %s9611_s11  ;;  %v10346_v21 = vld [vmem:[#allocation2 + $0x1e8] sm:$0xff] }
  0xf8   :  { %635 = vrot.lane.b32.xlu0 %v453_v22, %s9611_s11  ;;  %372 = vst.msk [vmem:[#allocation3 + $0x128] sm:$0xff] %vm32_vm0, %v10346_v21 }
  0xf9   :  { %v554_v29 = vpop.permute.xlu1 %553 }
  0xfa   :  { %733 = vst.msk [vmem:[#allocation3 + $0x68] sm:$0xff] %vm719_vm2, %v554_v29  ;;  %v552_v31 = vpop.permute.xlu0 %551  ;;  %v10355_v29 = vld [vmem:[#allocation2 + $0x1e0] sm:$0xff] }
  0xfb   :  { %732 = vst.msk [vmem:[#allocation3 + $0x60] sm:$0xff] %vm719_vm2, %v552_v31  ;;  %627 = vrot.lane.b32.xlu2 %v449_v27, %s9611_s11  ;;  %v10357_v31 = vld [vmem:[#allocation2 + $0x1f8] sm:$0xff] }
  0xfc   :  { %371 = vst.msk [vmem:[#allocation3 + $0x120] sm:$0xff] %vm32_vm0, %v10355_v29 }
  0xfd   :  { %v562_v37 = vpop.permute.xlu2 %561  ;;  %373 = vst.msk [vmem:[#allocation3 + $0x130] sm:$0xff] %vm32_vm0, %v10357_v31 }
  0xfe   :  { %737 = vst.msk [vmem:[#allocation3 + $0x88] sm:$0xff] %vm719_vm2, %v562_v37  ;;  %v10364_v37 = vld [vmem:[#allocation2 + $0x210] sm:$0xff] }
  0xff   :  { %643 = vrot.lane.b32.xlu1 %v457_v32, %s9611_s11  ;;  %v785_v32 = vld [vmem:[#allocation2 + $0xa] sm:$0xff]  ;;  %375 = vst.msk [vmem:[#allocation3 + $0x140] sm:$0xff] %vm32_vm0, %v10364_v37 }
 0x100   :  { %641 = vrot.lane.b32.xlu0 %v456_v33, %s9611_s11 }
 0x101   :  { %v560_v42 = vpop.permute.xlu1 %559 }
 0x102   :  { %736 = vst.msk [vmem:[#allocation3 + $0x80] sm:$0xff] %vm719_vm2, %v560_v42  ;;  %v558_v47 = vpop.permute.xlu0 %557  ;;  %v792_v42 = vld [vmem:[#allocation2 + $0x62] sm:$0xff] }
 0x103   :  { %735 = vst.msk [vmem:[#allocation3 + $0x78] sm:$0xff] %vm719_vm2, %v558_v47  ;;  %633 = vrot.lane.b32.xlu2 %v452_v41, %s9611_s11  ;;  %v793_v41 = vld [vmem:[#allocation2 + $0x6a] sm:$0xff] }
 0x105   :  { %v568_v50 = vpop.permute.xlu2 %567 }
 0x106   :  { %740 = vst.msk [vmem:[#allocation3 + $0xa0] sm:$0xff] %vm719_vm2, %v568_v50  ;;  %v788_v50 = vld [vmem:[#allocation2 + $0x32] sm:$0xff] }
 0x107   :  { %649 = vrot.lane.b32.xlu1 %v460_v48, %s9611_s11  ;;  %v10373_v48 = vld [vmem:[#allocation2 + $0x200] sm:$0xff] }
 0x108   :  { %647 = vrot.lane.b32.xlu0 %v459_v49, %s9611_s11  ;;  %v10375_v49 = vld [vmem:[#allocation2 + $0x218] sm:$0xff]  ;;  %374 = vst.msk [vmem:[#allocation3 + $0x138] sm:$0xff] %vm32_vm0, %v10373_v48 }
 0x109   :  { %v566_v57 = vpop.permute.xlu1 %565  ;;  %376 = vst.msk [vmem:[#allocation3 + $0x148] sm:$0xff] %vm32_vm0, %v10375_v49 }
 0x10a   :  { %739 = vst.msk [vmem:[#allocation3 + $0x98] sm:$0xff] %vm719_vm2, %v566_v57  ;;  %v564_v59 = vpop.permute.xlu0 %563  ;;  %v10382_v57 = vld [vmem:[#allocation2 + $0x230] sm:$0xff] }
 0x10b   :  { %738 = vst.msk [vmem:[#allocation3 + $0x90] sm:$0xff] %vm719_vm2, %v564_v59  ;;  %639 = vrot.lane.b32.xlu2 %v455_v53, %s9611_s11 }
 0x10c   :  { %378 = vst.msk [vmem:[#allocation3 + $0x158] sm:$0xff] %vm32_vm0, %v10382_v57 }
 0x10d   :  { %v574_v62 = vpop.permute.xlu2 %573 }
 0x10e   :  { %743 = vst.msk [vmem:[#allocation3 + $0xb8] sm:$0xff] %vm719_vm2, %v574_v62 }
 0x10f   :  { %912 = vrot.lane.b32.xlu1 %v784_v60, %s9612_s30  ;;  %v796_v60 = vld [vmem:[#allocation2 + $0x92] sm:$0xff] }
 0x110   :  { %653 = vrot.lane.b32.xlu0 %v462_v61, %s9611_s11  ;;  %v795_v61 = vld [vmem:[#allocation2 + $0x82] sm:$0xff] }
 0x111   :  { %v572_v6 = vpop.permute.xlu1 %571 }
 0x112   :  { %742 = vst.msk [vmem:[#allocation3 + $0xb0] sm:$0xff] %vm719_vm2, %v572_v6  ;;  %v570_v8 = vpop.permute.xlu0 %569  ;;  %v791_v6 = vld [vmem:[#allocation2 + $0x52] sm:$0xff] }
 0x113   :  { %741 = vst.msk [vmem:[#allocation3 + $0xa8] sm:$0xff] %vm719_vm2, %v570_v8  ;;  %645 = vrot.lane.b32.xlu2 %v458_v4, %s9611_s11  ;;  %v10393_v4 = vld [vmem:[#allocation2 + $0x240] sm:$0xff] }
 0x114   :  { %379 = vst.msk [vmem:[#allocation3 + $0x160] sm:$0xff] %vm32_vm0, %v10393_v4 }
 0x115   :  { %v580_v11 = vpop.permute.xlu2 %579 }
 0x116   :  { %746 = vst.msk [vmem:[#allocation3 + $0xd0] sm:$0xff] %vm719_vm2, %v580_v11  ;;  %v799_v11 = vld [vmem:[#allocation2 + $0xb2] sm:$0xff] }
 0x117   :  { %918 = vrot.lane.b32.xlu1 %v787_v9, %s9612_s30  ;;  %v10400_v9 = vld [vmem:[#allocation2 + $0x258] sm:$0xff] }
 0x118   :  { %916 = vrot.lane.b32.xlu0 %v786_v10, %s9612_s30  ;;  %381 = vst.msk [vmem:[#allocation3 + $0x170] sm:$0xff] %vm32_vm0, %v10400_v9 }
 0x119   :  { %v578_v20 = vpop.permute.xlu1 %577 }
 0x11a   :  { %745 = vst.msk [vmem:[#allocation3 + $0xc8] sm:$0xff] %vm719_vm2, %v578_v20  ;;  %v576_v22 = vpop.permute.xlu0 %575  ;;  %v10409_v20 = vld [vmem:[#allocation2 + $0x248] sm:$0xff] }
 0x11b   :  { %744 = vst.msk [vmem:[#allocation3 + $0xc0] sm:$0xff] %vm719_vm2, %v576_v22  ;;  %651 = vrot.lane.b32.xlu2 %v461_v19, %s9611_s11  ;;  %v10411_v22 = vld [vmem:[#allocation2 + $0x260] sm:$0xff]  ;;  %s9613_s11 = smov 12  }
 0x11c   :  { %380 = vst.msk [vmem:[#allocation3 + $0x168] sm:$0xff] %vm32_vm0, %v10409_v20 }
 0x11d   :  { %v586_v27 = vpop.permute.xlu2 %585  ;;  %382 = vst.msk [vmem:[#allocation3 + $0x178] sm:$0xff] %vm32_vm0, %v10411_v22 }
 0x11e   :  { %749 = vst.msk [vmem:[#allocation3 + $0xe8] sm:$0xff] %vm719_vm2, %v586_v27  ;;  %v10418_v27 = vld [vmem:[#allocation2 + $0x278] sm:$0xff] }
 0x11f   :  { %924 = vrot.lane.b32.xlu1 %v790_v23, %s9612_s30  ;;  %v794_v23 = vld [vmem:[#allocation2 + $0x7a] sm:$0xff]  ;;  %384 = vst.msk [vmem:[#allocation3 + $0x188] sm:$0xff] %vm32_vm0, %v10418_v27 }
 0x120   :  { %922 = vrot.lane.b32.xlu0 %v789_v24, %s9612_s30 }
 0x121   :  { %v584_v33 = vpop.permute.xlu1 %583 }
 0x122   :  { %748 = vst.msk [vmem:[#allocation3 + $0xe0] sm:$0xff] %vm719_vm2, %v584_v33  ;;  %v582_v38 = vpop.permute.xlu0 %581  ;;  %v802_v33 = vld [vmem:[#allocation2 + $0xda] sm:$0xff] }
 0x123   :  { %747 = vst.msk [vmem:[#allocation3 + $0xd8] sm:$0xff] %vm719_vm2, %v582_v38  ;;  %914 = vrot.lane.b32.xlu2 %v785_v32, %s9612_s30  ;;  %v801_v38 = vld [vmem:[#allocation2 + $0xca] sm:$0xff] }
 0x125   :  { %v592_v47 = vpop.permute.xlu2 %591 }
 0x126   :  { %752 = vst.msk [vmem:[#allocation3 + $0x100] sm:$0xff] %vm719_vm2, %v592_v47  ;;  %v10429_v47 = vld [vmem:[#allocation2 + $0x288] sm:$0xff] }
 0x127   :  { %930 = vrot.lane.b32.xlu1 %v793_v41, %s9612_s30  ;;  %385 = vst.msk [vmem:[#allocation3 + $0x190] sm:$0xff] %vm32_vm0, %v10429_v47 }
 0x128   :  { %928 = vrot.lane.b32.xlu0 %v792_v42, %s9612_s30  ;;  %v10427_v42 = vld [vmem:[#allocation2 + $0x270] sm:$0xff] }
 0x129   :  { %v590_v53 = vpop.permute.xlu1 %589  ;;  %383 = vst.msk [vmem:[#allocation3 + $0x180] sm:$0xff] %vm32_vm0, %v10427_v42 }
 0x12a   :  { %751 = vst.msk [vmem:[#allocation3 + $0xf8] sm:$0xff] %vm719_vm2, %v590_v53  ;;  %v588_v59 = vpop.permute.xlu0 %587 }
 0x12b   :  { %750 = vst.msk [vmem:[#allocation3 + $0xf0] sm:$0xff] %vm719_vm2, %v588_v59  ;;  %920 = vrot.lane.b32.xlu2 %v788_v50, %s9612_s30  ;;  %v797_v50 = vld [vmem:[#allocation2 + $0x9a] sm:$0xff] }
 0x12c   :  { %v10436_v59 = vld [vmem:[#allocation2 + $0x2a0] sm:$0xff] }
 0x12d   :  { %v598_v62 = vpop.permute.xlu2 %597  ;;  %387 = vst.msk [vmem:[#allocation3 + $0x1a0] sm:$0xff] %vm32_vm0, %v10436_v59 }
 0x12e   :  { %755 = vst.msk [vmem:[#allocation3 + $0x118] sm:$0xff] %vm719_vm2, %v598_v62  ;;  %v804_v62 = vld [vmem:[#allocation2 + $0xf2] sm:$0xff] }
 0x12f   :  { %936 = vrot.lane.b32.xlu1 %v796_v60, %s9612_s30 }
 0x130   :  { %934 = vrot.lane.b32.xlu0 %v795_v61, %s9612_s30  ;;  %v805_v61 = vld [vmem:[#allocation2 + $0xfa] sm:$0xff] }
 0x131   :  { %v596_v8 = vpop.permute.xlu1 %595 }
 0x132   :  { %754 = vst.msk [vmem:[#allocation3 + $0x110] sm:$0xff] %vm719_vm2, %v596_v8  ;;  %v594_v10 = vpop.permute.xlu0 %593  ;;  %v10445_v8 = vld [vmem:[#allocation2 + $0x290] sm:$0xff] }
 0x133   :  { %753 = vst.msk [vmem:[#allocation3 + $0x108] sm:$0xff] %vm719_vm2, %v594_v10  ;;  %926 = vrot.lane.b32.xlu2 %v791_v6, %s9612_s30  ;;  %v10447_v10 = vld [vmem:[#allocation2 + $0x2a8] sm:$0xff] }
 0x134   :  { %386 = vst.msk [vmem:[#allocation3 + $0x198] sm:$0xff] %vm32_vm0, %v10445_v8 }
 0x135   :  { %v604_v19 = vpop.permute.xlu2 %603  ;;  %388 = vst.msk [vmem:[#allocation3 + $0x1a8] sm:$0xff] %vm32_vm0, %v10447_v10 }
 0x136   :  { %758 = vst.msk [vmem:[#allocation3 + $0x130] sm:$0xff] %vm719_vm2, %v604_v19  ;;  %v10454_v19 = vld [vmem:[#allocation2 + $0x2c0] sm:$0xff] }
 0x137   :  { %942 = vrot.lane.b32.xlu1 %v799_v11, %s9612_s30  ;;  %v800_v11 = vld [vmem:[#allocation2 + $0xc2] sm:$0xff]  ;;  %390 = vst.msk [vmem:[#allocation3 + $0x1b8] sm:$0xff] %vm32_vm0, %v10454_v19 }
 0x138   :  { %940 = vrot.lane.b32.xlu0 %v798_v14, %s9612_s30 }
 0x139   :  { %v602_v24 = vpop.permute.xlu1 %601 }
 0x13a   :  { %757 = vst.msk [vmem:[#allocation3 + $0x128] sm:$0xff] %vm719_vm2, %v602_v24  ;;  %v600_v32 = vpop.permute.xlu0 %599  ;;  %v808_v24 = vld [vmem:[#allocation2 + $0x122] sm:$0xff] }
 0x13b   :  { %756 = vst.msk [vmem:[#allocation3 + $0x120] sm:$0xff] %vm719_vm2, %v600_v32  ;;  %932 = vrot.lane.b32.xlu2 %v794_v23, %s9612_s30  ;;  %v807_v32 = vld [vmem:[#allocation2 + $0x112] sm:$0xff] }
 0x13d   :  { %v610_v41 = vpop.permute.xlu2 %609 }
 0x13e   :  { %761 = vst.msk [vmem:[#allocation3 + $0x148] sm:$0xff] %vm719_vm2, %v610_v41  ;;  %v10465_v41 = vld [vmem:[#allocation2 + $0x2d0] sm:$0xff] }
 0x13f   :  { %948 = vrot.lane.b32.xlu1 %v802_v33, %s9612_s30  ;;  %391 = vst.msk [vmem:[#allocation3 + $0x1c0] sm:$0xff] %vm32_vm0, %v10465_v41 }
 0x140   :  { %946 = vrot.lane.b32.xlu0 %v801_v38, %s9612_s30  ;;  %v10463_v38 = vld [vmem:[#allocation2 + $0x2b8] sm:$0xff] }
 0x141   :  { %v608_v53 = vpop.permute.xlu1 %607  ;;  %389 = vst.msk [vmem:[#allocation3 + $0x1b0] sm:$0xff] %vm32_vm0, %v10463_v38 }
 0x142   :  { %760 = vst.msk [vmem:[#allocation3 + $0x140] sm:$0xff] %vm719_vm2, %v608_v53  ;;  %v606_v60 = vpop.permute.xlu0 %605 }
 0x143   :  { %759 = vst.msk [vmem:[#allocation3 + $0x138] sm:$0xff] %vm719_vm2, %v606_v60  ;;  %938 = vrot.lane.b32.xlu2 %v797_v50, %s9612_s30  ;;  %v803_v50 = vld [vmem:[#allocation2 + $0xe2] sm:$0xff] }
 0x144   :  { %v10472_v60 = vld [vmem:[#allocation2 + $0x2e8] sm:$0xff] }
 0x145   :  { %v616_v6 = vpop.permute.xlu2 %615  ;;  %393 = vst.msk [vmem:[#allocation3 + $0x1d0] sm:$0xff] %vm32_vm0, %v10472_v60 }
 0x146   :  { %764 = vst.msk [vmem:[#allocation3 + $0x160] sm:$0xff] %vm719_vm2, %v616_v6  ;;  %v810_v6 = vld [vmem:[#allocation2 + $0x13a] sm:$0xff] }
 0x147   :  { %954 = vrot.lane.b32.xlu1 %v805_v61, %s9612_s30 }
 0x148   :  { %952 = vrot.lane.b32.xlu0 %v804_v62, %s9612_s30  ;;  %v811_v62 = vld [vmem:[#allocation2 + $0x142] sm:$0xff] }
 0x149   :  { %v614_v14 = vpop.permute.xlu1 %613 }
 0x14a   :  { %763 = vst.msk [vmem:[#allocation3 + $0x158] sm:$0xff] %vm719_vm2, %v614_v14  ;;  %v612_v23 = vpop.permute.xlu0 %611  ;;  %v10481_v14 = vld [vmem:[#allocation2 + $0x2d8] sm:$0xff] }
 0x14b   :  { %762 = vst.msk [vmem:[#allocation3 + $0x150] sm:$0xff] %vm719_vm2, %v612_v23  ;;  %944 = vrot.lane.b32.xlu2 %v800_v11, %s9612_s30  ;;  %v10483_v23 = vld [vmem:[#allocation2 + $0x2f0] sm:$0xff] }
 0x14c   :  { %15349 = vst [vmem:[#allocation6_spill] sm:$0xff] %v10483_v23 }
 0x14d   :  { %v622_v33 = vpop.permute.xlu2 %621  ;;  %392 = vst.msk [vmem:[#allocation3 + $0x1c8] sm:$0xff] %vm32_vm0, %v10481_v14 }
 0x14e   :  { %767 = vst.msk [vmem:[#allocation3 + $0x178] sm:$0xff] %vm719_vm2, %v622_v33  ;;  %v10490_v33 = vld [vmem:[#allocation2 + $0x308] sm:$0xff] }
 0x14f   :  { %960 = vrot.lane.b32.xlu1 %v808_v24, %s9612_s30  ;;  %v806_v24 = vld [vmem:[#allocation2 + $0x10a] sm:$0xff]  ;;  %394 = vst.msk [vmem:[#allocation3 + $0x1d8] sm:$0xff] %vm32_vm0, %v10483_v23  ;;  %v812_v23 = vld [vmem:[#allocation2 + $0x152] sm:$0xff] }
 0x150   :  { %958 = vrot.lane.b32.xlu0 %v807_v32, %s9612_s30  ;;  %396 = vst.msk [vmem:[#allocation3 + $0x1e8] sm:$0xff] %vm32_vm0, %v10490_v33 }
 0x151   :  { %v620_v53 = vpop.permute.xlu1 %619 }
 0x152   :  { %766 = vst.msk [vmem:[#allocation3 + $0x170] sm:$0xff] %vm719_vm2, %v620_v53  ;;  %v618_v61 = vpop.permute.xlu0 %617  ;;  %v814_v53 = vld [vmem:[#allocation2 + $0x16a] sm:$0xff] }
 0x153   :  { %765 = vst.msk [vmem:[#allocation3 + $0x168] sm:$0xff] %vm719_vm2, %v618_v61  ;;  %950 = vrot.lane.b32.xlu2 %v803_v50, %s9612_s30  ;;  %v813_v61 = vld [vmem:[#allocation2 + $0x15a] sm:$0xff] }
 0x155   :  { %v628_v11 = vpop.permute.xlu2 %627 }
 0x156   :  { %770 = vst.msk [vmem:[#allocation3 + $0x190] sm:$0xff] %vm719_vm2, %v628_v11  ;;  %v10501_v11 = vld [vmem:[#allocation2 + $0x318] sm:$0xff] }
 0x157   :  { %966 = vrot.lane.b32.xlu1 %v811_v62, %s9612_s30  ;;  %15350 = vst [vmem:[#allocation7_spill] sm:$0xff] %v10501_v11 }
 0x158   :  { %964 = vrot.lane.b32.xlu0 %v810_v6, %s9612_s30  ;;  %v10499_v6 = vld [vmem:[#allocation2 + $0x300] sm:$0xff]  ;;  %397 = vst.msk [vmem:[#allocation3 + $0x1f0] sm:$0xff] %vm32_vm0, %v10501_v11 }
 0x159   :  { %v626_v32 = vpop.permute.xlu1 %625  ;;  %395 = vst.msk [vmem:[#allocation3 + $0x1e0] sm:$0xff] %vm32_vm0, %v10499_v6 }
 0x15a   :  { %769 = vst.msk [vmem:[#allocation3 + $0x188] sm:$0xff] %vm719_vm2, %v626_v32  ;;  %v624_v50 = vpop.permute.xlu0 %623  ;;  %v809_v32 = vld [vmem:[#allocation2 + $0x12a] sm:$0xff] }
 0x15b   :  { %768 = vst.msk [vmem:[#allocation3 + $0x180] sm:$0xff] %vm719_vm2, %v624_v50  ;;  %956 = vrot.lane.b32.xlu2 %v806_v24, %s9612_s30 }
 0x15d   :  { %v634_v62 = vpop.permute.xlu2 %633 }
 0x15e   :  { %773 = vst.msk [vmem:[#allocation3 + $0x1a8] sm:$0xff] %vm719_vm2, %v634_v62  ;;  %v816_v62 = vld [vmem:[#allocation2 + $0x1b2] sm:$0xff] }
 0x15f   :  { %972 = vrot.lane.b32.xlu1 %v814_v53, %s9612_s30  ;;  %v817_v53 = vld [vmem:[#allocation2 + $0x1ba] sm:$0xff] }
 0x160   :  { %970 = vrot.lane.b32.xlu0 %v813_v61, %s9612_s30  ;;  %v10513_v61 = vld [vmem:[#allocation2 + $0x320] sm:$0xff] }
 0x161   :  { %v632_v24 = vpop.permute.xlu1 %631  ;;  %15351 = vst [vmem:[#allocation8_spill] sm:$0xff] %v10513_v61 }
 0x162   :  { %772 = vst.msk [vmem:[#allocation3 + $0x1a0] sm:$0xff] %vm719_vm2, %v632_v24  ;;  %v630_v50 = vpop.permute.xlu0 %629 }
 0x163   :  { %771 = vst.msk [vmem:[#allocation3 + $0x198] sm:$0xff] %vm719_vm2, %v630_v50  ;;  %962 = vrot.lane.b32.xlu2 %v809_v32, %s9612_s30  ;;  %v820_v32 = vld [vmem:[#allocation2 + $0x1e2] sm:$0xff] }
 0x164   :  { %398 = vst.msk [vmem:[#allocation3 + $0x1f8] sm:$0xff] %vm32_vm0, %v10513_v61 }
 0x165   :  { %v640_v0 = vpop.permute.xlu2 %639 }
 0x166   :  { %776 = vst.msk [vmem:[#allocation3 + $0x1c0] sm:$0xff] %vm719_vm2, %v640_v0  ;;  %v819_v0 = vld [vmem:[#allocation2 + $0x1d2] sm:$0xff] }
 0x167   :  { %978 = vrot.lane.b32.xlu1 %v817_v53, %s9612_s30  ;;  %v815_v53 = vld [vmem:[#allocation2 + $0x172] sm:$0xff] }
 0x168   :  { %976 = vrot.lane.b32.xlu0 %v816_v62, %s9612_s30 }
 0x169   :  { %v638_v24 = vpop.permute.xlu1 %637 }
 0x16a   :  { %775 = vst.msk [vmem:[#allocation3 + $0x1b8] sm:$0xff] %vm719_vm2, %v638_v24  ;;  %v636_v50 = vpop.permute.xlu0 %635  ;;  %v823_v24 = vld [vmem:[#allocation2 + $0x202] sm:$0xff] }
 0x16b   :  { %774 = vst.msk [vmem:[#allocation3 + $0x1b0] sm:$0xff] %vm719_vm2, %v636_v50  ;;  %968 = vrot.lane.b32.xlu2 %v812_v23, %s9612_s30  ;;  %v822_v23 = vld [vmem:[#allocation2 + $0x1fa] sm:$0xff] }
 0x16d   :  { %v646_v11 = vpop.permute.xlu2 %645 }
 0x16e   :  { %779 = vst.msk [vmem:[#allocation3 + $0x1d8] sm:$0xff] %vm719_vm2, %v646_v11  ;;  %v818_v11 = vld [vmem:[#allocation2 + $0x1ca] sm:$0xff] }
 0x16f   :  { %984 = vrot.lane.b32.xlu1 %v820_v32, %s9612_s30 }
 0x170   :  { %982 = vrot.lane.b32.xlu0 %v819_v0, %s9612_s30 }
 0x171   :  { %v644_v62 = vpop.permute.xlu1 %643 }
 0x172   :  { %778 = vst.msk [vmem:[#allocation3 + $0x1d0] sm:$0xff] %vm719_vm2, %v644_v62  ;;  %v642_v61 = vpop.permute.xlu0 %641 }
 0x173   :  { %777 = vst.msk [vmem:[#allocation3 + $0x1c8] sm:$0xff] %vm719_vm2, %v642_v61  ;;  %974 = vrot.lane.b32.xlu2 %v815_v53, %s9612_s30  ;;  %v826_v61 = vld [vmem:[#allocation2 + $0x22a] sm:$0xff]  ;;  %v825_v53 = vld [vmem:[#allocation2 + $0x21a] sm:$0xff] }
 0x175   :  { %v652_v50 = vpop.permute.xlu2 %651 }
 0x176   :  { %782 = vst.msk [vmem:[#allocation3 + $0x1f0] sm:$0xff] %vm719_vm2, %v652_v50 }
 0x177   :  { %990 = vrot.lane.b32.xlu1 %v823_v24, %s9612_s30  ;;  %v821_v24 = vld [vmem:[#allocation2 + $0x1ea] sm:$0xff] }
 0x178   :  { %988 = vrot.lane.b32.xlu0 %v822_v23, %s9612_s30 }
 0x179   :  { %v650_v32 = vpop.permute.xlu1 %649 }
 0x17a   :  { %781 = vst.msk [vmem:[#allocation3 + $0x1e8] sm:$0xff] %vm719_vm2, %v650_v32  ;;  %v648_v0 = vpop.permute.xlu0 %647  ;;  %v828_v32 = vld [vmem:[#allocation2 + $0x242] sm:$0xff] }
 0x17b   :  { %780 = vst.msk [vmem:[#allocation3 + $0x1e0] sm:$0xff] %vm719_vm2, %v648_v0  ;;  %980 = vrot.lane.b32.xlu2 %v818_v11, %s9612_s30  ;;  %v829_v11 = vld [vmem:[#allocation2 + $0x24a] sm:$0xff] }
 0x17d   :  { %v915_v62 = vpop.permute.xlu2 %914 }
 0x17e   :  { %1106 = vst.msk [vmem:[#allocation3 + $0x8] sm:$0xff] %vm1104_vm3, %v915_v62 }
 0x17f   :  { %996 = vrot.lane.b32.xlu1 %v826_v61, %s9612_s30  ;;  %v824_v61 = vld [vmem:[#allocation2 + $0x212] sm:$0xff] }
 0x180   :  { %994 = vrot.lane.b32.xlu0 %v825_v53, %s9612_s30 }
 0x181   :  { %v913_v23 = vpop.permute.xlu1 %912 }
 0x182   :  { %1105 = vst.msk [vmem:[#allocation3] sm:$0xff] %vm1104_vm3, %v913_v23  ;;  %v654_v50 = vpop.permute.xlu0 %653  ;;  %v832_v23 = vld [vmem:[#allocation2 + $0x272] sm:$0xff] }
 0x183   :  { %783 = vst.msk [vmem:[#allocation3 + $0x1f8] sm:$0xff] %vm719_vm2, %v654_v50  ;;  %986 = vrot.lane.b32.xlu2 %v821_v24, %s9612_s30  ;;  %v831_v24 = vld [vmem:[#allocation2 + $0x262] sm:$0xff]  ;;  %vm5511_vm2 = vcmask 195712  }
 0x185   :  { %v921_v0 = vpop.permute.xlu2 %920 }
 0x186   :  { %1109 = vst.msk [vmem:[#allocation3 + $0x20] sm:$0xff] %vm1104_vm3, %v921_v0 }
 0x187   :  { %1002 = vrot.lane.b32.xlu1 %v829_v11, %s9612_s30  ;;  %v827_v11 = vld [vmem:[#allocation2 + $0x232] sm:$0xff] }
 0x188   :  { %1000 = vrot.lane.b32.xlu0 %v828_v32, %s9612_s30 }
 0x189   :  { %v919_v53 = vpop.permute.xlu1 %918 }
 0x18a   :  { %1108 = vst.msk [vmem:[#allocation3 + $0x18] sm:$0xff] %vm1104_vm3, %v919_v53  ;;  %v917_v62 = vpop.permute.xlu0 %916  ;;  %v835_v53 = vld [vmem:[#allocation2 + $0x292] sm:$0xff] }
 0x18b   :  { %1107 = vst.msk [vmem:[#allocation3 + $0x10] sm:$0xff] %vm1104_vm3, %v917_v62  ;;  %992 = vrot.lane.b32.xlu2 %v824_v61, %s9612_s30  ;;  %v834_v61 = vld [vmem:[#allocation2 + $0x28a] sm:$0xff] }
 0x18d   :  { %v927_v50 = vpop.permute.xlu2 %926 }
 0x18e   :  { %1112 = vst.msk [vmem:[#allocation3 + $0x38] sm:$0xff] %vm1104_vm3, %v927_v50 }
 0x18f   :  { %1008 = vrot.lane.b32.xlu1 %v832_v23, %s9612_s30  ;;  %v830_v23 = vld [vmem:[#allocation2 + $0x25a] sm:$0xff] }
 0x190   :  { %1006 = vrot.lane.b32.xlu0 %v831_v24, %s9612_s30 }
 0x191   :  { %v925_v32 = vpop.permute.xlu1 %924 }
 0x192   :  { %1111 = vst.msk [vmem:[#allocation3 + $0x30] sm:$0xff] %vm1104_vm3, %v925_v32  ;;  %v923_v0 = vpop.permute.xlu0 %922  ;;  %v838_v32 = vld [vmem:[#allocation2 + $0x2ba] sm:$0xff] }
 0x193   :  { %1110 = vst.msk [vmem:[#allocation3 + $0x28] sm:$0xff] %vm1104_vm3, %v923_v0  ;;  %998 = vrot.lane.b32.xlu2 %v827_v11, %s9612_s30  ;;  %v837_v11 = vld [vmem:[#allocation2 + $0x2aa] sm:$0xff] }
 0x195   :  { %v933_v62 = vpop.permute.xlu2 %932 }
 0x196   :  { %1115 = vst.msk [vmem:[#allocation3 + $0x50] sm:$0xff] %vm1104_vm3, %v933_v62 }
 0x197   :  { %1014 = vrot.lane.b32.xlu1 %v835_v53, %s9612_s30  ;;  %v833_v53 = vld [vmem:[#allocation2 + $0x27a] sm:$0xff] }
 0x198   :  { %1012 = vrot.lane.b32.xlu0 %v834_v61, %s9612_s30 }
 0x199   :  { %v931_v24 = vpop.permute.xlu1 %930 }
 0x19a   :  { %1114 = vst.msk [vmem:[#allocation3 + $0x48] sm:$0xff] %vm1104_vm3, %v931_v24  ;;  %v929_v50 = vpop.permute.xlu0 %928  ;;  %v841_v24 = vld [vmem:[#allocation2 + $0x2da] sm:$0xff] }
 0x19b   :  { %1113 = vst.msk [vmem:[#allocation3 + $0x40] sm:$0xff] %vm1104_vm3, %v929_v50  ;;  %1004 = vrot.lane.b32.xlu2 %v830_v23, %s9612_s30  ;;  %v840_v23 = vld [vmem:[#allocation2 + $0x2d2] sm:$0xff] }
 0x19d   :  { %v939_v0 = vpop.permute.xlu2 %938 }
 0x19e   :  { %1118 = vst.msk [vmem:[#allocation3 + $0x68] sm:$0xff] %vm1104_vm3, %v939_v0 }
 0x19f   :  { %1020 = vrot.lane.b32.xlu1 %v838_v32, %s9612_s30  ;;  %v836_v32 = vld [vmem:[#allocation2 + $0x2a2] sm:$0xff] }
 0x1a0   :  { %1018 = vrot.lane.b32.xlu0 %v837_v11, %s9612_s30 }
 0x1a1   :  { %v937_v61 = vpop.permute.xlu1 %936 }
 0x1a2   :  { %1117 = vst.msk [vmem:[#allocation3 + $0x60] sm:$0xff] %vm1104_vm3, %v937_v61  ;;  %v935_v62 = vpop.permute.xlu0 %934  ;;  %v844_v61 = vld [vmem:[#allocation2 + $0x302] sm:$0xff] }
 0x1a3   :  { %1116 = vst.msk [vmem:[#allocation3 + $0x58] sm:$0xff] %vm1104_vm3, %v935_v62  ;;  %1010 = vrot.lane.b32.xlu2 %v833_v53, %s9612_s30  ;;  %v843_v53 = vld [vmem:[#allocation2 + $0x2f2] sm:$0xff] }
 0x1a5   :  { %v945_v50 = vpop.permute.xlu2 %944 }
 0x1a6   :  { %1121 = vst.msk [vmem:[#allocation3 + $0x80] sm:$0xff] %vm1104_vm3, %v945_v50 }
 0x1a7   :  { %1026 = vrot.lane.b32.xlu1 %v841_v24, %s9612_s30  ;;  %v839_v24 = vld [vmem:[#allocation2 + $0x2c2] sm:$0xff] }
 0x1a8   :  { %1024 = vrot.lane.b32.xlu0 %v840_v23, %s9612_s30 }
 0x1a9   :  { %v943_v11 = vpop.permute.xlu1 %942 }
 0x1aa   :  { %1120 = vst.msk [vmem:[#allocation3 + $0x78] sm:$0xff] %vm1104_vm3, %v943_v11  ;;  %v941_v0 = vpop.permute.xlu0 %940  ;;  %v847_v11 = vld [vmem:[#allocation2 + $0x322] sm:$0xff] }
 0x1ab   :  { %1119 = vst.msk [vmem:[#allocation3 + $0x70] sm:$0xff] %vm1104_vm3, %v941_v0  ;;  %1016 = vrot.lane.b32.xlu2 %v836_v32, %s9612_s30  ;;  %v846_v32 = vld [vmem:[#allocation2 + $0x31a] sm:$0xff] }
 0x1ad   :  { %v951_v62 = vpop.permute.xlu2 %950 }
 0x1ae   :  { %1124 = vst.msk [vmem:[#allocation3 + $0x98] sm:$0xff] %vm1104_vm3, %v951_v62 }
 0x1af   :  { %1032 = vrot.lane.b32.xlu1 %v844_v61, %s9612_s30  ;;  %v842_v61 = vld [vmem:[#allocation2 + $0x2ea] sm:$0xff] }
 0x1b0   :  { %1030 = vrot.lane.b32.xlu0 %v843_v53, %s9612_s30 }
 0x1b1   :  { %v949_v23 = vpop.permute.xlu1 %948 }
 0x1b2   :  { %1123 = vst.msk [vmem:[#allocation3 + $0x90] sm:$0xff] %vm1104_vm3, %v949_v23  ;;  %v947_v50 = vpop.permute.xlu0 %946 }
 0x1b3   :  { %1122 = vst.msk [vmem:[#allocation3 + $0x88] sm:$0xff] %vm1104_vm3, %v947_v50  ;;  %1022 = vrot.lane.b32.xlu2 %v839_v24, %s9612_s30  ;;  %v845_v24 = vld [vmem:[#allocation2 + $0x30a] sm:$0xff] }
 0x1b5   :  { %v957_v0 = vpop.permute.xlu2 %956 }
 0x1b6   :  { %1127 = vst.msk [vmem:[#allocation3 + $0xb0] sm:$0xff] %vm1104_vm3, %v957_v0 }
 0x1b7   :  { %1038 = vrot.lane.b32.xlu1 %v847_v11, %s9612_s30 }
 0x1b8   :  { %1036 = vrot.lane.b32.xlu0 %v846_v32, %s9612_s30 }
 0x1b9   :  { %v955_v53 = vpop.permute.xlu1 %954 }
 0x1ba   :  { %1126 = vst.msk [vmem:[#allocation3 + $0xa8] sm:$0xff] %vm1104_vm3, %v955_v53  ;;  %v953_v62 = vpop.permute.xlu0 %952 }
 0x1bb   :  { %1125 = vst.msk [vmem:[#allocation3 + $0xa0] sm:$0xff] %vm1104_vm3, %v953_v62  ;;  %1028 = vrot.lane.b32.xlu2 %v842_v61, %s9612_s30 }
 0x1bd   :  { %v963_v23 = vpop.permute.xlu2 %962 }
 0x1be   :  { %1130 = vst.msk [vmem:[#allocation3 + $0xc8] sm:$0xff] %vm1104_vm3, %v963_v23 }
 0x1bf   :  { %1301 = vrot.lane.b32.xlu1 %v10082_v15, %s9613_s11  ;;  %v1169_v15 = vld [vmem:[#allocation2 + $0x18] sm:$0xff] }
 0x1c0   :  { %1299 = vrot.lane.b32.xlu0 %v10087_v17, %s9613_s11 }
 0x1c1   :  { %v961_v50 = vpop.permute.xlu1 %960 }
 0x1c2   :  { %1129 = vst.msk [vmem:[#allocation3 + $0xc0] sm:$0xff] %vm1104_vm3, %v961_v50  ;;  %v959_v11 = vpop.permute.xlu0 %958 }
 0x1c3   :  { %1128 = vst.msk [vmem:[#allocation3 + $0xb8] sm:$0xff] %vm1104_vm3, %v959_v11  ;;  %1034 = vrot.lane.b32.xlu2 %v845_v24, %s9612_s30 }
 0x1c5   :  { %v969_v32 = vpop.permute.xlu2 %968 }
 0x1c6   :  { %1133 = vst.msk [vmem:[#allocation3 + $0xe0] sm:$0xff] %vm1104_vm3, %v969_v32 }
 0x1c7   :  { %1307 = vrot.lane.b32.xlu1 %v10111_v28, %s9613_s11  ;;  %v1172_v28 = vld [vmem:[#allocation2 + $0x38] sm:$0xff] }
 0x1c8   :  { %1305 = vrot.lane.b32.xlu0 %v10130_v34, %s9613_s11 }
 0x1c9   :  { %v967_v17 = vpop.permute.xlu1 %966 }
 0x1ca   :  { %1132 = vst.msk [vmem:[#allocation3 + $0xd8] sm:$0xff] %vm1104_vm3, %v967_v17  ;;  %v965_v0 = vpop.permute.xlu0 %964 }
 0x1cb   :  { %1131 = vst.msk [vmem:[#allocation3 + $0xd0] sm:$0xff] %vm1104_vm3, %v965_v0  ;;  %1297 = vrot.lane.b32.xlu2 %v1169_v15, %s9613_s11 }
 0x1cd   :  { %v975_v61 = vpop.permute.xlu2 %974 }
 0x1ce   :  { %1136 = vst.msk [vmem:[#allocation3 + $0xf8] sm:$0xff] %vm1104_vm3, %v975_v61 }
 0x1cf   :  { %1313 = vrot.lane.b32.xlu1 %v10134_v36, %s9613_s11 }
 0x1d0   :  { %1311 = vrot.lane.b32.xlu0 %v10158_v44, %s9613_s11 }
 0x1d1   :  { %v973_v34 = vpop.permute.xlu1 %972 }
 0x1d2   :  { %1135 = vst.msk [vmem:[#allocation3 + $0xf0] sm:$0xff] %vm1104_vm3, %v973_v34  ;;  %v971_v53 = vpop.permute.xlu0 %970 }
 0x1d3   :  { %1134 = vst.msk [vmem:[#allocation3 + $0xe8] sm:$0xff] %vm1104_vm3, %v971_v53  ;;  %1303 = vrot.lane.b32.xlu2 %v1172_v28, %s9613_s11  ;;  %v15353_v53 = vld [vmem:[#allocation6_spill] sm:$0xff] }
 0x1d5   :  { %v981_v62 = vpop.permute.xlu2 %980 }
 0x1d6   :  { %1139 = vst.msk [vmem:[#allocation3 + $0x110] sm:$0xff] %vm1104_vm3, %v981_v62  ;;  %v1555_v62 = vld [vmem:[#allocation2 + $0x21] sm:$0xff] }
 0x1d7   :  { %1319 = vrot.lane.b32.xlu1 %v10162_v46, %s9613_s11 }
 0x1d8   :  { %1317 = vrot.lane.b32.xlu0 %v10186_v54, %s9613_s11 }
 0x1d9   :  { %v979_v36 = vpop.permute.xlu1 %978 }
 0x1da   :  { %1138 = vst.msk [vmem:[#allocation3 + $0x108] sm:$0xff] %vm1104_vm3, %v979_v36  ;;  %v977_v44 = vpop.permute.xlu0 %976 }
 0x1db   :  { %1137 = vst.msk [vmem:[#allocation3 + $0x100] sm:$0xff] %vm1104_vm3, %v977_v44  ;;  %1309 = vrot.lane.b32.xlu2 %v10132_v35, %s9613_s11 }
 0x1dd   :  { %v987_v23 = vpop.permute.xlu2 %986 }
 0x1de   :  { %1142 = vst.msk [vmem:[#allocation3 + $0x128] sm:$0xff] %vm1104_vm3, %v987_v23 }
 0x1df   :  { %1325 = vrot.lane.b32.xlu1 %v10190_v56, %s9613_s11 }
 0x1e0   :  { %1323 = vrot.lane.b32.xlu0 %v10214_v1, %s9613_s11 }
 0x1e1   :  { %v985_v46 = vpop.permute.xlu1 %984 }
 0x1e2   :  { %1141 = vst.msk [vmem:[#allocation3 + $0x120] sm:$0xff] %vm1104_vm3, %v985_v46  ;;  %v983_v54 = vpop.permute.xlu0 %982  ;;  %v15354_v46 = vld [vmem:[#allocation7_spill] sm:$0xff] }
 0x1e3   :  { %1140 = vst.msk [vmem:[#allocation3 + $0x118] sm:$0xff] %vm1104_vm3, %v983_v54  ;;  %1315 = vrot.lane.b32.xlu2 %v10160_v45, %s9613_s11  ;;  %v172_v45 = vld [vmem:[%s15280_s0 + $0xf0] sm:$0xff] }
 0x1e4   :  { %237 = vst.msk [vmem:[#allocation2 + $0x181] sm:$0xff] %vm32_vm0, %v172_v45  ;;  %v1558_v54 = vld [vmem:[#allocation2 + $0x49] sm:$0xff] }
 0x1e5   :  { %v993_v24 = vpop.permute.xlu2 %992 }
 0x1e6   :  { %1145 = vst.msk [vmem:[#allocation3 + $0x140] sm:$0xff] %vm1104_vm3, %v993_v24  ;;  %v1557_v24 = vld [vmem:[#allocation2 + $0x39] sm:$0xff] }
 0x1e7   :  { %1331 = vrot.lane.b32.xlu1 %v10224_v5, %s9613_s11  ;;  %v173_v5 = vld [vmem:[%s15280_s0 + $0xf8] sm:$0xff] }
 0x1e8   :  { %1329 = vrot.lane.b32.xlu0 %v10240_v12, %s9613_s11  ;;  %238 = vst.msk [vmem:[#allocation2 + $0x189] sm:$0xff] %vm32_vm0, %v173_v5  ;;  %v1561_v5 = vld [vmem:[#allocation2 + $0x69] sm:$0xff] }
 0x1e9   :  { %v991_v35 = vpop.permute.xlu1 %990 }
 0x1ea   :  { %1144 = vst.msk [vmem:[#allocation3 + $0x138] sm:$0xff] %vm1104_vm3, %v991_v35  ;;  %v989_v56 = vpop.permute.xlu0 %988 }
 0x1eb   :  { %1143 = vst.msk [vmem:[#allocation3 + $0x130] sm:$0xff] %vm1104_vm3, %v989_v56  ;;  %1321 = vrot.lane.b32.xlu2 %v10188_v55, %s9613_s11 }
 0x1ed   :  { %v999_v1 = vpop.permute.xlu2 %998 }
 0x1ee   :  { %1148 = vst.msk [vmem:[#allocation3 + $0x158] sm:$0xff] %vm1104_vm3, %v999_v1 }
 0x1ef   :  { %1337 = vrot.lane.b32.xlu1 %v10250_v18, %s9613_s11 }
 0x1f0   :  { %1335 = vrot.lane.b32.xlu0 %v10266_v25, %s9613_s11 }
 0x1f1   :  { %v997_v55 = vpop.permute.xlu1 %996 }
 0x1f2   :  { %1147 = vst.msk [vmem:[#allocation3 + $0x150] sm:$0xff] %vm1104_vm3, %v997_v55  ;;  %v995_v12 = vpop.permute.xlu0 %994  ;;  %v1560_v55 = vld [vmem:[#allocation2 + $0x61] sm:$0xff] }
 0x1f3   :  { %1146 = vst.msk [vmem:[#allocation3 + $0x148] sm:$0xff] %vm1104_vm3, %v995_v12  ;;  %1327 = vrot.lane.b32.xlu2 %v10216_v2, %s9613_s11 }
 0x1f5   :  { %v1005_v50 = vpop.permute.xlu2 %1004 }
 0x1f6   :  { %1151 = vst.msk [vmem:[#allocation3 + $0x170] sm:$0xff] %vm1104_vm3, %v1005_v50  ;;  %v1556_v50 = vld [vmem:[#allocation2 + $0x31] sm:$0xff] }
 0x1f7   :  { %1343 = vrot.lane.b32.xlu1 %v10276_v30, %s9613_s11 }
 0x1f8   :  { %1341 = vrot.lane.b32.xlu0 %v10288_v39, %s9613_s11 }
 0x1f9   :  { %v1003_v18 = vpop.permute.xlu1 %1002 }
 0x1fa   :  { %1150 = vst.msk [vmem:[#allocation3 + $0x168] sm:$0xff] %vm1104_vm3, %v1003_v18  ;;  %v1001_v25 = vpop.permute.xlu0 %1000 }
 0x1fb   :  { %1149 = vst.msk [vmem:[#allocation3 + $0x160] sm:$0xff] %vm1104_vm3, %v1001_v25  ;;  %1333 = vrot.lane.b32.xlu2 %v10242_v13, %s9613_s11 }
 0x1fd   :  { %v1011_v11 = vpop.permute.xlu2 %1010 }
 0x1fe   :  { %1154 = vst.msk [vmem:[#allocation3 + $0x188] sm:$0xff] %vm1104_vm3, %v1011_v11  ;;  %v1564_v11 = vld [vmem:[#allocation2 + $0x91] sm:$0xff] }
 0x1ff   :  { %1349 = vrot.lane.b32.xlu1 %v10298_v43, %s9613_s11 }
 0x200   :  { %1347 = vrot.lane.b32.xlu0 %v10307_v51, %s9613_s11  ;;  %v1200_v51 = vld [vmem:[#allocation2 + $0x188] sm:$0xff] }
 0x201   :  { %v1009_v2 = vpop.permute.xlu1 %1008 }
 0x202   :  { %1153 = vst.msk [vmem:[#allocation3 + $0x180] sm:$0xff] %vm1104_vm3, %v1009_v2  ;;  %v1007_v30 = vpop.permute.xlu0 %1006  ;;  %v1563_v2 = vld [vmem:[#allocation2 + $0x81] sm:$0xff] }
 0x203   :  { %1152 = vst.msk [vmem:[#allocation3 + $0x178] sm:$0xff] %vm1104_vm3, %v1007_v30  ;;  %1339 = vrot.lane.b32.xlu2 %v10268_v26, %s9613_s11 }
 0x205   :  { %v1017_v39 = vpop.permute.xlu2 %1016 }
 0x206   :  { %1157 = vst.msk [vmem:[#allocation3 + $0x1a0] sm:$0xff] %vm1104_vm3, %v1017_v39  ;;  %v1559_v39 = vld [vmem:[#allocation2 + $0x51] sm:$0xff] }
 0x207   :  { %1355 = vrot.lane.b32.xlu1 %v10316_v58, %s9613_s11 }
 0x208   :  { %1353 = vrot.lane.b32.xlu0 %v10325_v63, %s9613_s11 }
 0x209   :  { %v1015_v13 = vpop.permute.xlu1 %1014 }
 0x20a   :  { %1156 = vst.msk [vmem:[#allocation3 + $0x198] sm:$0xff] %vm1104_vm3, %v1015_v13  ;;  %v1013_v43 = vpop.permute.xlu0 %1012 }
 0x20b   :  { %1155 = vst.msk [vmem:[#allocation3 + $0x190] sm:$0xff] %vm1104_vm3, %v1013_v43  ;;  %1345 = vrot.lane.b32.xlu2 %v10290_v40, %s9613_s11  ;;  %v1199_v40 = vld [vmem:[#allocation2 + $0x180] sm:$0xff] }
 0x20d   :  { %v1023_v26 = vpop.permute.xlu2 %1022 }
 0x20e   :  { %1160 = vst.msk [vmem:[#allocation3 + $0x1b8] sm:$0xff] %vm1104_vm3, %v1023_v26  ;;  %v1566_v26 = vld [vmem:[#allocation2 + $0xa9] sm:$0xff] }
 0x20f   :  { %1361 = vrot.lane.b32.xlu1 %v10331_v7, %s9613_s11 }
 0x210   :  { %1359 = vrot.lane.b32.xlu0 %v1200_v51, %s9613_s11  ;;  %v1567_v51 = vld [vmem:[#allocation2 + $0xb1] sm:$0xff] }
 0x211   :  { %v1021_v58 = vpop.permute.xlu1 %1020 }
 0x212   :  { %1159 = vst.msk [vmem:[#allocation3 + $0x1b0] sm:$0xff] %vm1104_vm3, %v1021_v58  ;;  %v1019_v63 = vpop.permute.xlu0 %1018 }
 0x213   :  { %1158 = vst.msk [vmem:[#allocation3 + $0x1a8] sm:$0xff] %vm1104_vm3, %v1019_v63  ;;  %1351 = vrot.lane.b32.xlu2 %v10309_v52, %s9613_s11  ;;  %v1562_v63 = vld [vmem:[#allocation2 + $0x79] sm:$0xff] }
 0x215   :  { %v1029_v32 = vpop.permute.xlu2 %1028 }
 0x216   :  { %1163 = vst.msk [vmem:[#allocation3 + $0x1d0] sm:$0xff] %vm1104_vm3, %v1029_v32 }
 0x217   :  { %1367 = vrot.lane.b32.xlu1 %v10346_v21, %s9613_s11 }
 0x218   :  { %1365 = vrot.lane.b32.xlu0 %v10355_v29, %s9613_s11 }
 0x219   :  { %v1027_v7 = vpop.permute.xlu1 %1026 }
 0x21a   :  { %1162 = vst.msk [vmem:[#allocation3 + $0x1c8] sm:$0xff] %vm1104_vm3, %v1027_v7  ;;  %v1025_v15 = vpop.permute.xlu0 %1024  ;;  %v1570_v7 = vld [vmem:[#allocation2 + $0xd9] sm:$0xff] }
 0x21b   :  { %1161 = vst.msk [vmem:[#allocation3 + $0x1c0] sm:$0xff] %vm1104_vm3, %v1025_v15  ;;  %1357 = vrot.lane.b32.xlu2 %v1199_v40, %s9613_s11  ;;  %v1569_v15 = vld [vmem:[#allocation2 + $0xc9] sm:$0xff] }
 0x21d   :  { %v1035_v17 = vpop.permute.xlu2 %1034 }
 0x21e   :  { %1166 = vst.msk [vmem:[#allocation3 + $0x1e8] sm:$0xff] %vm1104_vm3, %v1035_v17 }
 0x21f   :  { %1373 = vrot.lane.b32.xlu1 %v10364_v37, %s9613_s11 }
 0x220   :  { %1371 = vrot.lane.b32.xlu0 %v10373_v48, %s9613_s11 }
 0x221   :  { %v1033_v52 = vpop.permute.xlu1 %1032 }
 0x222   :  { %1165 = vst.msk [vmem:[#allocation3 + $0x1e0] sm:$0xff] %vm1104_vm3, %v1033_v52  ;;  %v1031_v21 = vpop.permute.xlu0 %1030  ;;  %v1565_v52 = vld [vmem:[#allocation2 + $0x99] sm:$0xff] }
 0x223   :  { %1164 = vst.msk [vmem:[#allocation3 + $0x1d8] sm:$0xff] %vm1104_vm3, %v1031_v21  ;;  %1363 = vrot.lane.b32.xlu2 %v10340_v16, %s9613_s11 }
 0x225   :  { %v1298_v29 = vpop.permute.xlu2 %1297 }
 0x226   :  { %1490 = vst.msk [vmem:[#allocation3] sm:$0xff] %vm1489_vm4, %v1298_v29 }
 0x227   :  { %1379 = vrot.lane.b32.xlu1 %v10382_v57, %s9613_s11 }
 0x228   :  { %1377 = vrot.lane.b32.xlu0 %v10391_v3, %s9613_s11 }
 0x229   :  { %v1039_v37 = vpop.permute.xlu1 %1038 }
 0x22a   :  { %1168 = vst.msk [vmem:[#allocation3 + $0x1f8] sm:$0xff] %vm1104_vm3, %v1039_v37  ;;  %v1037_v48 = vpop.permute.xlu0 %1036  ;;  %v1573_v37 = vld [vmem:[#allocation2 + $0xf9] sm:$0xff] }
 0x22b   :  { %1167 = vst.msk [vmem:[#allocation3 + $0x1f0] sm:$0xff] %vm1104_vm3, %v1037_v48  ;;  %1369 = vrot.lane.b32.xlu2 %v10357_v31, %s9613_s11  ;;  %v204_v31 = vld [vmem:[%s15280_s0 + $0x1f0] sm:$0xff]  ;;  %vm5896_vm3 = vcmask 261312  }
 0x22c   :  { %269 = vst.msk [vmem:[#allocation2 + $0x331] sm:$0xff] %vm32_vm0, %v204_v31  ;;  %v1572_v48 = vld [vmem:[#allocation2 + $0xf1] sm:$0xff]  ;;  %v1576_v31 = vld [vmem:[#allocation2 + $0x121] sm:$0xff] }
 0x22d   :  { %v1304_v16 = vpop.permute.xlu2 %1303 }
 0x22e   :  { %1493 = vst.msk [vmem:[#allocation3 + $0x18] sm:$0xff] %vm1489_vm4, %v1304_v16 }
 0x22f   :  { %1385 = vrot.lane.b32.xlu1 %v10400_v9, %s9613_s11 }
 0x230   :  { %1383 = vrot.lane.b32.xlu0 %v10409_v20, %s9613_s11 }
 0x231   :  { %v1302_v57 = vpop.permute.xlu1 %1301 }
 0x232   :  { %1492 = vst.msk [vmem:[#allocation3 + $0x10] sm:$0xff] %vm1489_vm4, %v1302_v57  ;;  %v1300_v3 = vpop.permute.xlu0 %1299  ;;  %v1568_v57 = vld [vmem:[#allocation2 + $0xc1] sm:$0xff] }
 0x233   :  { %1491 = vst.msk [vmem:[#allocation3 + $0x8] sm:$0xff] %vm1489_vm4, %v1300_v3  ;;  %1375 = vrot.lane.b32.xlu2 %v10375_v49, %s9613_s11 }
 0x235   :  { %v1310_v0 = vpop.permute.xlu2 %1309 }
 0x236   :  { %1496 = vst.msk [vmem:[#allocation3 + $0x30] sm:$0xff] %vm1489_vm4, %v1310_v0 }
 0x237   :  { %1391 = vrot.lane.b32.xlu1 %v10418_v27, %s9613_s11 }
 0x238   :  { %1389 = vrot.lane.b32.xlu0 %v10427_v42, %s9613_s11 }
 0x239   :  { %v1308_v9 = vpop.permute.xlu1 %1307 }
 0x23a   :  { %1495 = vst.msk [vmem:[#allocation3 + $0x28] sm:$0xff] %vm1489_vm4, %v1308_v9  ;;  %v1306_v20 = vpop.permute.xlu0 %1305  ;;  %v1575_v9 = vld [vmem:[#allocation2 + $0x111] sm:$0xff] }
 0x23b   :  { %1494 = vst.msk [vmem:[#allocation3 + $0x20] sm:$0xff] %vm1489_vm4, %v1306_v20  ;;  %1381 = vrot.lane.b32.xlu2 %v10393_v4, %s9613_s11 }
 0x23d   :  { %v1316_v49 = vpop.permute.xlu2 %1315 }
 0x23e   :  { %1499 = vst.msk [vmem:[#allocation3 + $0x48] sm:$0xff] %vm1489_vm4, %v1316_v49  ;;  %v1571_v49 = vld [vmem:[#allocation2 + $0xe1] sm:$0xff] }
 0x23f   :  { %1397 = vrot.lane.b32.xlu1 %v10436_v59, %s9613_s11 }
 0x240   :  { %1395 = vrot.lane.b32.xlu0 %v10445_v8, %s9613_s11 }
 0x241   :  { %v1314_v27 = vpop.permute.xlu1 %1313 }
 0x242   :  { %1498 = vst.msk [vmem:[#allocation3 + $0x40] sm:$0xff] %vm1489_vm4, %v1314_v27  ;;  %v1312_v42 = vpop.permute.xlu0 %1311 }
 0x243   :  { %1497 = vst.msk [vmem:[#allocation3 + $0x38] sm:$0xff] %vm1489_vm4, %v1312_v42  ;;  %1387 = vrot.lane.b32.xlu2 %v10411_v22, %s9613_s11 }
 0x245   :  { %v1322_v61 = vpop.permute.xlu2 %1321 }
 0x246   :  { %1502 = vst.msk [vmem:[#allocation3 + $0x60] sm:$0xff] %vm1489_vm4, %v1322_v61  ;;  %v1579_v61 = vld [vmem:[#allocation2 + $0x141] sm:$0xff] }
 0x247   :  { %1403 = vrot.lane.b32.xlu1 %v10454_v19, %s9613_s11 }
 0x248   :  { %1401 = vrot.lane.b32.xlu0 %v10463_v38, %s9613_s11 }
 0x249   :  { %v1320_v4 = vpop.permute.xlu1 %1319 }
 0x24a   :  { %1501 = vst.msk [vmem:[#allocation3 + $0x58] sm:$0xff] %vm1489_vm4, %v1320_v4  ;;  %v1318_v59 = vpop.permute.xlu0 %1317  ;;  %v1578_v4 = vld [vmem:[#allocation2 + $0x139] sm:$0xff] }
 0x24b   :  { %1500 = vst.msk [vmem:[#allocation3 + $0x50] sm:$0xff] %vm1489_vm4, %v1318_v59  ;;  %1393 = vrot.lane.b32.xlu2 %v10429_v47, %s9613_s11  ;;  %v205_v47 = vld [vmem:[%s15280_s0 + $0x1f8] sm:$0xff]  ;;  %s9614_s0 = smov 16  }
 0x24c   :  { %270 = vst.msk [vmem:[#allocation2 + $0x339] sm:$0xff] %vm32_vm0, %v205_v47  ;;  %v1581_v47 = vld [vmem:[#allocation2 + $0x159] sm:$0xff] }
 0x24d   :  { %v1328_v8 = vpop.permute.xlu2 %1327 }
 0x24e   :  { %1505 = vst.msk [vmem:[#allocation3 + $0x78] sm:$0xff] %vm1489_vm4, %v1328_v8  ;;  %v1574_v8 = vld [vmem:[#allocation2 + $0x109] sm:$0xff] }
 0x24f   :  { %1409 = vrot.lane.b32.xlu1 %v10472_v60, %s9613_s11 }
 0x250   :  { %1407 = vrot.lane.b32.xlu0 %v10481_v14, %s9613_s11 }
 0x251   :  { %v1326_v22 = vpop.permute.xlu1 %1325 }
 0x252   :  { %1504 = vst.msk [vmem:[#allocation3 + $0x70] sm:$0xff] %vm1489_vm4, %v1326_v22  ;;  %v1324_v19 = vpop.permute.xlu0 %1323 }
 0x253   :  { %1503 = vst.msk [vmem:[#allocation3 + $0x68] sm:$0xff] %vm1489_vm4, %v1324_v19  ;;  %1399 = vrot.lane.b32.xlu2 %v10447_v10, %s9613_s11  ;;  %v1231_v10 = vld [vmem:[#allocation2 + $0x330] sm:$0xff]  ;;  %v1232_v56 = vld [vmem:[#allocation2 + $0x338] sm:$0xff] }
 0x255   :  { %v1334_v38 = vpop.permute.xlu2 %1333 }
 0x256   :  { %1508 = vst.msk [vmem:[#allocation3 + $0x90] sm:$0xff] %vm1489_vm4, %v1334_v38  ;;  %v1582_v38 = vld [vmem:[#allocation2 + $0x169] sm:$0xff] }
 0x257   :  { %1415 = vrot.lane.b32.xlu1 %v10490_v33, %s9613_s11  ;;  %v15352_v33 = vld [vmem:[#allocation8_spill] sm:$0xff] }
 0x258   :  { %1413 = vrot.lane.b32.xlu0 %v10499_v6, %s9613_s11 }
 0x259   :  { %v1332_v60 = vpop.permute.xlu1 %1331 }
 0x25a   :  { %1507 = vst.msk [vmem:[#allocation3 + $0x88] sm:$0xff] %vm1489_vm4, %v1332_v60  ;;  %v1330_v14 = vpop.permute.xlu0 %1329 }
 0x25b   :  { %1506 = vst.msk [vmem:[#allocation3 + $0x80] sm:$0xff] %vm1489_vm4, %v1330_v14  ;;  %1405 = vrot.lane.b32.xlu2 %v10465_v41, %s9613_s11  ;;  %v1554_v41 = vld [vmem:[#allocation2 + $0x19] sm:$0xff]  ;;  %v1577_v14 = vld [vmem:[#allocation2 + $0x129] sm:$0xff] }
 0x25d   :  { %v1340_v28 = vpop.permute.xlu2 %1339 }
 0x25e   :  { %1511 = vst.msk [vmem:[#allocation3 + $0xa8] sm:$0xff] %vm1489_vm4, %v1340_v28 }
 0x25f   :  { %1421 = vrot.lane.b32.xlu1 %v1231_v10, %s9613_s11 }
 0x260   :  { %1419 = vrot.lane.b32.xlu0 %v15352_v33, %s9613_s11  ;;  %v1585_v33 = vld [vmem:[#allocation2 + $0x189] sm:$0xff] }
 0x261   :  { %v1338_v34 = vpop.permute.xlu1 %1337 }
 0x262   :  { %1510 = vst.msk [vmem:[#allocation3 + $0xa0] sm:$0xff] %vm1489_vm4, %v1338_v34  ;;  %v1336_v6 = vpop.permute.xlu0 %1335  ;;  %v1584_v34 = vld [vmem:[#allocation2 + $0x181] sm:$0xff] }
 0x263   :  { %1509 = vst.msk [vmem:[#allocation3 + $0x98] sm:$0xff] %vm1489_vm4, %v1336_v6  ;;  %1411 = vrot.lane.b32.xlu2 %v15353_v53, %s9613_s11  ;;  %v1580_v53 = vld [vmem:[#allocation2 + $0x151] sm:$0xff] }
 0x265   :  { %v1346_v36 = vpop.permute.xlu2 %1345 }
 0x266   :  { %1514 = vst.msk [vmem:[#allocation3 + $0xc0] sm:$0xff] %vm1489_vm4, %v1346_v36  ;;  %v1588_v36 = vld [vmem:[#allocation2 + $0x1e1] sm:$0xff] }
 0x267   :  { %1684 = vrot.lane.b32.xlu1 %v1555_v62, %s9614_s0 }
 0x268   :  { %1682 = vrot.lane.b32.xlu0 %v1554_v41, %s9614_s0 }
 0x269   :  { %v1344_v44 = vpop.permute.xlu1 %1343 }
 0x26a   :  { %1513 = vst.msk [vmem:[#allocation3 + $0xb8] sm:$0xff] %vm1489_vm4, %v1344_v44  ;;  %v1342_v23 = vpop.permute.xlu0 %1341  ;;  %v1587_v44 = vld [vmem:[#allocation2 + $0x1d1] sm:$0xff] }
 0x26b   :  { %1512 = vst.msk [vmem:[#allocation3 + $0xb0] sm:$0xff] %vm1489_vm4, %v1342_v23  ;;  %1417 = vrot.lane.b32.xlu2 %v15354_v46, %s9613_s11  ;;  %v1583_v46 = vld [vmem:[#allocation2 + $0x171] sm:$0xff] }
 0x26d   :  { %v1352_v35 = vpop.permute.xlu2 %1351 }
 0x26e   :  { %1517 = vst.msk [vmem:[#allocation3 + $0xd8] sm:$0xff] %vm1489_vm4, %v1352_v35  ;;  %v1591_v35 = vld [vmem:[#allocation2 + $0x201] sm:$0xff] }
 0x26f   :  { %1690 = vrot.lane.b32.xlu1 %v1558_v54, %s9614_s0 }
 0x270   :  { %1688 = vrot.lane.b32.xlu0 %v1557_v24, %s9614_s0 }
 0x271   :  { %v1350_v1 = vpop.permute.xlu1 %1349 }
 0x272   :  { %1516 = vst.msk [vmem:[#allocation3 + $0xd0] sm:$0xff] %vm1489_vm4, %v1350_v1  ;;  %v1348_v45 = vpop.permute.xlu0 %1347 }
 0x273   :  { %1515 = vst.msk [vmem:[#allocation3 + $0xc8] sm:$0xff] %vm1489_vm4, %v1348_v45  ;;  %1423 = vrot.lane.b32.xlu2 %v1232_v56, %s9613_s11  ;;  %v1590_v56 = vld [vmem:[#allocation2 + $0x1f9] sm:$0xff]  ;;  %v1586_v45 = vld [vmem:[#allocation2 + $0x1c9] sm:$0xff] }
 0x275   :  { %v1358_v12 = vpop.permute.xlu2 %1357 }
 0x276   :  { %1520 = vst.msk [vmem:[#allocation3 + $0xf0] sm:$0xff] %vm1489_vm4, %v1358_v12  ;;  %v1594_v12 = vld [vmem:[#allocation2 + $0x229] sm:$0xff] }
 0x277   :  { %1696 = vrot.lane.b32.xlu1 %v1561_v5, %s9614_s0 }
 0x278   :  { %1694 = vrot.lane.b32.xlu0 %v1560_v55, %s9614_s0 }
 0x279   :  { %v1356_v18 = vpop.permute.xlu1 %1355 }
 0x27a   :  { %1519 = vst.msk [vmem:[#allocation3 + $0xe8] sm:$0xff] %vm1489_vm4, %v1356_v18  ;;  %v1354_v25 = vpop.permute.xlu0 %1353 }
 0x27b   :  { %1518 = vst.msk [vmem:[#allocation3 + $0xe0] sm:$0xff] %vm1489_vm4, %v1354_v25  ;;  %1686 = vrot.lane.b32.xlu2 %v1556_v50, %s9614_s0  ;;  %v1593_v50 = vld [vmem:[#allocation2 + $0x219] sm:$0xff]  ;;  %v1589_v25 = vld [vmem:[#allocation2 + $0x1e9] sm:$0xff] }
 0x27d   :  { %v1364_v30 = vpop.permute.xlu2 %1363 }
 0x27e   :  { %1523 = vst.msk [vmem:[#allocation3 + $0x108] sm:$0xff] %vm1489_vm4, %v1364_v30  ;;  %v1597_v30 = vld [vmem:[#allocation2 + $0x249] sm:$0xff] }
 0x27f   :  { %1702 = vrot.lane.b32.xlu1 %v1564_v11, %s9614_s0 }
 0x280   :  { %1700 = vrot.lane.b32.xlu0 %v1563_v2, %s9614_s0 }
 0x281   :  { %v1362_v13 = vpop.permute.xlu1 %1361 }
 0x282   :  { %1522 = vst.msk [vmem:[#allocation3 + $0x100] sm:$0xff] %vm1489_vm4, %v1362_v13  ;;  %v1360_v43 = vpop.permute.xlu0 %1359 }
 0x283   :  { %1521 = vst.msk [vmem:[#allocation3 + $0xf8] sm:$0xff] %vm1489_vm4, %v1360_v43  ;;  %1692 = vrot.lane.b32.xlu2 %v1559_v39, %s9614_s0  ;;  %v1596_v39 = vld [vmem:[#allocation2 + $0x241] sm:$0xff]  ;;  %v1592_v43 = vld [vmem:[#allocation2 + $0x211] sm:$0xff] }
 0x285   :  { %v1370_v58 = vpop.permute.xlu2 %1369 }
 0x286   :  { %1526 = vst.msk [vmem:[#allocation3 + $0x120] sm:$0xff] %vm1489_vm4, %v1370_v58  ;;  %v1600_v58 = vld [vmem:[#allocation2 + $0x271] sm:$0xff] }
 0x287   :  { %1708 = vrot.lane.b32.xlu1 %v1567_v51, %s9614_s0 }
 0x288   :  { %1706 = vrot.lane.b32.xlu0 %v1566_v26, %s9614_s0 }
 0x289   :  { %v1368_v32 = vpop.permute.xlu1 %1367 }
 0x28a   :  { %1525 = vst.msk [vmem:[#allocation3 + $0x118] sm:$0xff] %vm1489_vm4, %v1368_v32  ;;  %v1366_v40 = vpop.permute.xlu0 %1365 }
 0x28b   :  { %1524 = vst.msk [vmem:[#allocation3 + $0x110] sm:$0xff] %vm1489_vm4, %v1366_v40  ;;  %1698 = vrot.lane.b32.xlu2 %v1562_v63, %s9614_s0  ;;  %v1599_v63 = vld [vmem:[#allocation2 + $0x261] sm:$0xff]  ;;  %v1595_v40 = vld [vmem:[#allocation2 + $0x231] sm:$0xff] }
 0x28d   :  { %v1376_v17 = vpop.permute.xlu2 %1375 }
 0x28e   :  { %1529 = vst.msk [vmem:[#allocation3 + $0x138] sm:$0xff] %vm1489_vm4, %v1376_v17  ;;  %v1603_v17 = vld [vmem:[#allocation2 + $0x291] sm:$0xff] }
 0x28f   :  { %1714 = vrot.lane.b32.xlu1 %v1570_v7, %s9614_s0 }
 0x290   :  { %1712 = vrot.lane.b32.xlu0 %v1569_v15, %s9614_s0 }
 0x291   :  { %v1374_v21 = vpop.permute.xlu1 %1373 }
 0x292   :  { %1528 = vst.msk [vmem:[#allocation3 + $0x130] sm:$0xff] %vm1489_vm4, %v1374_v21  ;;  %v1372_v29 = vpop.permute.xlu0 %1371 }
 0x293   :  { %1527 = vst.msk [vmem:[#allocation3 + $0x128] sm:$0xff] %vm1489_vm4, %v1372_v29  ;;  %1704 = vrot.lane.b32.xlu2 %v1565_v52, %s9614_s0  ;;  %v1602_v52 = vld [vmem:[#allocation2 + $0x289] sm:$0xff]  ;;  %v1598_v29 = vld [vmem:[#allocation2 + $0x259] sm:$0xff] }
 0x295   :  { %v1382_v16 = vpop.permute.xlu2 %1381 }
 0x296   :  { %1532 = vst.msk [vmem:[#allocation3 + $0x150] sm:$0xff] %vm1489_vm4, %v1382_v16  ;;  %v1606_v16 = vld [vmem:[#allocation2 + $0x2b9] sm:$0xff] }
 0x297   :  { %1720 = vrot.lane.b32.xlu1 %v1573_v37, %s9614_s0 }
 0x298   :  { %1718 = vrot.lane.b32.xlu0 %v1572_v48, %s9614_s0 }
 0x299   :  { %v1380_v3 = vpop.permute.xlu1 %1379 }
 0x29a   :  { %1531 = vst.msk [vmem:[#allocation3 + $0x148] sm:$0xff] %vm1489_vm4, %v1380_v3  ;;  %v1378_v0 = vpop.permute.xlu0 %1377 }
 0x29b   :  { %1530 = vst.msk [vmem:[#allocation3 + $0x140] sm:$0xff] %vm1489_vm4, %v1378_v0  ;;  %1710 = vrot.lane.b32.xlu2 %v1568_v57, %s9614_s0  ;;  %v1605_v57 = vld [vmem:[#allocation2 + $0x2a9] sm:$0xff]  ;;  %v1601_v0 = vld [vmem:[#allocation2 + $0x279] sm:$0xff] }
 0x29d   :  { %v1388_v20 = vpop.permute.xlu2 %1387 }
 0x29e   :  { %1535 = vst.msk [vmem:[#allocation3 + $0x168] sm:$0xff] %vm1489_vm4, %v1388_v20  ;;  %v1609_v20 = vld [vmem:[#allocation2 + $0x2d9] sm:$0xff] }
 0x29f   :  { %1726 = vrot.lane.b32.xlu1 %v1576_v31, %s9614_s0 }
 0x2a0   :  { %1724 = vrot.lane.b32.xlu0 %v1575_v9, %s9614_s0 }
 0x2a1   :  { %v1386_v27 = vpop.permute.xlu1 %1385 }
 0x2a2   :  { %1534 = vst.msk [vmem:[#allocation3 + $0x160] sm:$0xff] %vm1489_vm4, %v1386_v27  ;;  %v1384_v42 = vpop.permute.xlu0 %1383 }
 0x2a3   :  { %1533 = vst.msk [vmem:[#allocation3 + $0x158] sm:$0xff] %vm1489_vm4, %v1384_v42  ;;  %1716 = vrot.lane.b32.xlu2 %v1571_v49, %s9614_s0  ;;  %v1608_v49 = vld [vmem:[#allocation2 + $0x2d1] sm:$0xff]  ;;  %v1604_v42 = vld [vmem:[#allocation2 + $0x2a1] sm:$0xff] }
 0x2a5   :  { %v1394_v59 = vpop.permute.xlu2 %1393 }
 0x2a6   :  { %1538 = vst.msk [vmem:[#allocation3 + $0x180] sm:$0xff] %vm1489_vm4, %v1394_v59  ;;  %v1612_v59 = vld [vmem:[#allocation2 + $0x301] sm:$0xff] }
 0x2a7   :  { %1732 = vrot.lane.b32.xlu1 %v1579_v61, %s9614_s0 }
 0x2a8   :  { %1730 = vrot.lane.b32.xlu0 %v1578_v4, %s9614_s0 }
 0x2a9   :  { %v1392_v22 = vpop.permute.xlu1 %1391 }
 0x2aa   :  { %1537 = vst.msk [vmem:[#allocation3 + $0x178] sm:$0xff] %vm1489_vm4, %v1392_v22  ;;  %v1390_v19 = vpop.permute.xlu0 %1389 }
 0x2ab   :  { %1536 = vst.msk [vmem:[#allocation3 + $0x170] sm:$0xff] %vm1489_vm4, %v1390_v19  ;;  %1722 = vrot.lane.b32.xlu2 %v1574_v8, %s9614_s0  ;;  %v1611_v8 = vld [vmem:[#allocation2 + $0x2f1] sm:$0xff]  ;;  %v1607_v19 = vld [vmem:[#allocation2 + $0x2c1] sm:$0xff] }
 0x2ad   :  { %v1400_v60 = vpop.permute.xlu2 %1399 }
 0x2ae   :  { %1541 = vst.msk [vmem:[#allocation3 + $0x198] sm:$0xff] %vm1489_vm4, %v1400_v60  ;;  %v1615_v60 = vld [vmem:[#allocation2 + $0x321] sm:$0xff] }
 0x2af   :  { %1738 = vrot.lane.b32.xlu1 %v1582_v38, %s9614_s0 }
 0x2b0   :  { %1736 = vrot.lane.b32.xlu0 %v1581_v47, %s9614_s0 }
 0x2b1   :  { %v1398_v10 = vpop.permute.xlu1 %1397 }
 0x2b2   :  { %1540 = vst.msk [vmem:[#allocation3 + $0x190] sm:$0xff] %vm1489_vm4, %v1398_v10  ;;  %v1396_v28 = vpop.permute.xlu0 %1395 }
 0x2b3   :  { %1539 = vst.msk [vmem:[#allocation3 + $0x188] sm:$0xff] %vm1489_vm4, %v1396_v28  ;;  %1728 = vrot.lane.b32.xlu2 %v1577_v14, %s9614_s0  ;;  %v1614_v14 = vld [vmem:[#allocation2 + $0x319] sm:$0xff]  ;;  %v1610_v28 = vld [vmem:[#allocation2 + $0x2e9] sm:$0xff] }
 0x2b5   :  { %v1406_v6 = vpop.permute.xlu2 %1405 }
 0x2b6   :  { %1544 = vst.msk [vmem:[#allocation3 + $0x1b0] sm:$0xff] %vm1489_vm4, %v1406_v6  ;;  %v1939_v6 = vld [vmem:[#allocation2 + $0x1a] sm:$0xff] }
 0x2b7   :  { %1744 = vrot.lane.b32.xlu1 %v1585_v33, %s9614_s0 }
 0x2b8   :  { %1742 = vrot.lane.b32.xlu0 %v1584_v34, %s9614_s0 }
 0x2b9   :  { %v1404_v62 = vpop.permute.xlu1 %1403 }
 0x2ba   :  { %1543 = vst.msk [vmem:[#allocation3 + $0x1a8] sm:$0xff] %vm1489_vm4, %v1404_v62  ;;  %v1402_v41 = vpop.permute.xlu0 %1401 }
 0x2bb   :  { %1542 = vst.msk [vmem:[#allocation3 + $0x1a0] sm:$0xff] %vm1489_vm4, %v1402_v41  ;;  %1734 = vrot.lane.b32.xlu2 %v1580_v53, %s9614_s0  ;;  %v1617_v53 = vld [vmem:[#allocation2 + $0x339] sm:$0xff]  ;;  %v1613_v41 = vld [vmem:[#allocation2 + $0x309] sm:$0xff] }
 0x2bd   :  { %v1412_v23 = vpop.permute.xlu2 %1411 }
 0x2be   :  { %1547 = vst.msk [vmem:[#allocation3 + $0x1c8] sm:$0xff] %vm1489_vm4, %v1412_v23  ;;  %v1942_v23 = vld [vmem:[#allocation2 + $0x3a] sm:$0xff] }
 0x2bf   :  { %1750 = vrot.lane.b32.xlu1 %v1588_v36, %s9614_s0 }
 0x2c0   :  { %1748 = vrot.lane.b32.xlu0 %v1587_v44, %s9614_s0 }
 0x2c1   :  { %v1410_v54 = vpop.permute.xlu1 %1409 }
 0x2c2   :  { %1546 = vst.msk [vmem:[#allocation3 + $0x1c0] sm:$0xff] %vm1489_vm4, %v1410_v54  ;;  %v1408_v24 = vpop.permute.xlu0 %1407 }
 0x2c3   :  { %1545 = vst.msk [vmem:[#allocation3 + $0x1b8] sm:$0xff] %vm1489_vm4, %v1408_v24  ;;  %1740 = vrot.lane.b32.xlu2 %v1583_v46, %s9614_s0  ;;  %v1941_v46 = vld [vmem:[#allocation2 + $0x32] sm:$0xff] }
 0x2c4   :  { %v1616_v24 = vld [vmem:[#allocation2 + $0x331] sm:$0xff] }
 0x2c5   :  { %v1418_v1 = vpop.permute.xlu2 %1417 }
 0x2c6   :  { %1550 = vst.msk [vmem:[#allocation3 + $0x1e0] sm:$0xff] %vm1489_vm4, %v1418_v1  ;;  %v1945_v1 = vld [vmem:[#allocation2 + $0x62] sm:$0xff] }
 0x2c7   :  { %1756 = vrot.lane.b32.xlu1 %v1591_v35, %s9614_s0 }
 0x2c8   :  { %1754 = vrot.lane.b32.xlu0 %v1590_v56, %s9614_s0 }
 0x2c9   :  { %v1416_v5 = vpop.permute.xlu1 %1415 }
 0x2ca   :  { %1549 = vst.msk [vmem:[#allocation3 + $0x1d8] sm:$0xff] %vm1489_vm4, %v1416_v5  ;;  %v1414_v55 = vpop.permute.xlu0 %1413 }
 0x2cb   :  { %1548 = vst.msk [vmem:[#allocation3 + $0x1d0] sm:$0xff] %vm1489_vm4, %v1414_v55  ;;  %1746 = vrot.lane.b32.xlu2 %v1586_v45, %s9614_s0  ;;  %v1944_v45 = vld [vmem:[#allocation2 + $0x52] sm:$0xff]  ;;  %v1940_v55 = vld [vmem:[#allocation2 + $0x22] sm:$0xff] }
 0x2cd   :  { %v1424_v18 = vpop.permute.xlu2 %1423 }
 0x2ce   :  { %1553 = vst.msk [vmem:[#allocation3 + $0x1f8] sm:$0xff] %vm1489_vm4, %v1424_v18  ;;  %v1948_v18 = vld [vmem:[#allocation2 + $0x82] sm:$0xff] }
 0x2cf   :  { %1762 = vrot.lane.b32.xlu1 %v1594_v12, %s9614_s0 }
 0x2d0   :  { %1760 = vrot.lane.b32.xlu0 %v1593_v50, %s9614_s0 }
 0x2d1   :  { %v1422_v11 = vpop.permute.xlu1 %1421 }
 0x2d2   :  { %1552 = vst.msk [vmem:[#allocation3 + $0x1f0] sm:$0xff] %vm1489_vm4, %v1422_v11  ;;  %v1420_v2 = vpop.permute.xlu0 %1419 }
 0x2d3   :  { %1551 = vst.msk [vmem:[#allocation3 + $0x1e8] sm:$0xff] %vm1489_vm4, %v1420_v2  ;;  %1752 = vrot.lane.b32.xlu2 %v1589_v25, %s9614_s0  ;;  %v1947_v25 = vld [vmem:[#allocation2 + $0x7a] sm:$0xff]  ;;  %v1943_v2 = vld [vmem:[#allocation2 + $0x4a] sm:$0xff]  ;;  %vm6281_vm4 = vcmask 326912  }
 0x2d5   :  { %v1687_v13 = vpop.permute.xlu2 %1686 }
 0x2d6   :  { %1877 = vst.msk [vmem:[#allocation3 + $0x10] sm:$0xff] %vm1874_vm5, %v1687_v13  ;;  %v1951_v13 = vld [vmem:[#allocation2 + $0xaa] sm:$0xff] }
 0x2d7   :  { %1768 = vrot.lane.b32.xlu1 %v1597_v30, %s9614_s0 }
 0x2d8   :  { %1766 = vrot.lane.b32.xlu0 %v1596_v39, %s9614_s0 }
 0x2d9   :  { %v1685_v51 = vpop.permute.xlu1 %1684 }
 0x2da   :  { %1876 = vst.msk [vmem:[#allocation3 + $0x8] sm:$0xff] %vm1874_vm5, %v1685_v51  ;;  %v1683_v26 = vpop.permute.xlu0 %1682 }
 0x2db   :  { %1875 = vst.msk [vmem:[#allocation3] sm:$0xff] %vm1874_vm5, %v1683_v26  ;;  %1758 = vrot.lane.b32.xlu2 %v1592_v43, %s9614_s0  ;;  %v1950_v43 = vld [vmem:[#allocation2 + $0x9a] sm:$0xff]  ;;  %v1946_v26 = vld [vmem:[#allocation2 + $0x6a] sm:$0xff] }
 0x2dd   :  { %v1693_v32 = vpop.permute.xlu2 %1692 }
 0x2de   :  { %1880 = vst.msk [vmem:[#allocation3 + $0x28] sm:$0xff] %vm1874_vm5, %v1693_v32  ;;  %v1954_v32 = vld [vmem:[#allocation2 + $0xca] sm:$0xff] }
 0x2df   :  { %1774 = vrot.lane.b32.xlu1 %v1600_v58, %s9614_s0 }
 0x2e0   :  { %1772 = vrot.lane.b32.xlu0 %v1599_v63, %s9614_s0 }
 0x2e1   :  { %v1691_v7 = vpop.permute.xlu1 %1690 }
 0x2e2   :  { %1879 = vst.msk [vmem:[#allocation3 + $0x20] sm:$0xff] %vm1874_vm5, %v1691_v7  ;;  %v1689_v15 = vpop.permute.xlu0 %1688 }
 0x2e3   :  { %1878 = vst.msk [vmem:[#allocation3 + $0x18] sm:$0xff] %vm1874_vm5, %v1689_v15  ;;  %1764 = vrot.lane.b32.xlu2 %v1595_v40, %s9614_s0  ;;  %v1953_v40 = vld [vmem:[#allocation2 + $0xc2] sm:$0xff]  ;;  %v1949_v15 = vld [vmem:[#allocation2 + $0x92] sm:$0xff] }
 0x2e5   :  { %v1699_v21 = vpop.permute.xlu2 %1698 }
 0x2e6   :  { %1883 = vst.msk [vmem:[#allocation3 + $0x40] sm:$0xff] %vm1874_vm5, %v1699_v21  ;;  %v1957_v21 = vld [vmem:[#allocation2 + $0xf2] sm:$0xff] }
 0x2e7   :  { %1780 = vrot.lane.b32.xlu1 %v1603_v17, %s9614_s0 }
 0x2e8   :  { %1778 = vrot.lane.b32.xlu0 %v1602_v52, %s9614_s0 }
 0x2e9   :  { %v1697_v37 = vpop.permute.xlu1 %1696 }
 0x2ea   :  { %1882 = vst.msk [vmem:[#allocation3 + $0x38] sm:$0xff] %vm1874_vm5, %v1697_v37  ;;  %v1695_v48 = vpop.permute.xlu0 %1694 }
 0x2eb   :  { %1881 = vst.msk [vmem:[#allocation3 + $0x30] sm:$0xff] %vm1874_vm5, %v1695_v48  ;;  %1770 = vrot.lane.b32.xlu2 %v1598_v29, %s9614_s0  ;;  %v1956_v29 = vld [vmem:[#allocation2 + $0xe2] sm:$0xff]  ;;  %v1952_v48 = vld [vmem:[#allocation2 + $0xb2] sm:$0xff] }
 0x2ed   :  { %v1705_v3 = vpop.permute.xlu2 %1704 }
 0x2ee   :  { %1886 = vst.msk [vmem:[#allocation3 + $0x58] sm:$0xff] %vm1874_vm5, %v1705_v3  ;;  %v1960_v3 = vld [vmem:[#allocation2 + $0x112] sm:$0xff] }
 0x2ef   :  { %1786 = vrot.lane.b32.xlu1 %v1606_v16, %s9614_s0 }
 0x2f0   :  { %1784 = vrot.lane.b32.xlu0 %v1605_v57, %s9614_s0 }
 0x2f1   :  { %v1703_v31 = vpop.permute.xlu1 %1702 }
 0x2f2   :  { %1885 = vst.msk [vmem:[#allocation3 + $0x50] sm:$0xff] %vm1874_vm5, %v1703_v31  ;;  %v1701_v9 = vpop.permute.xlu0 %1700 }
 0x2f3   :  { %1884 = vst.msk [vmem:[#allocation3 + $0x48] sm:$0xff] %vm1874_vm5, %v1701_v9  ;;  %1776 = vrot.lane.b32.xlu2 %v1601_v0, %s9614_s0  ;;  %v1959_v0 = vld [vmem:[#allocation2 + $0x10a] sm:$0xff]  ;;  %v1955_v9 = vld [vmem:[#allocation2 + $0xda] sm:$0xff] }
 0x2f5   :  { %v1711_v27 = vpop.permute.xlu2 %1710 }
 0x2f6   :  { %1889 = vst.msk [vmem:[#allocation3 + $0x70] sm:$0xff] %vm1874_vm5, %v1711_v27  ;;  %v1963_v27 = vld [vmem:[#allocation2 + $0x13a] sm:$0xff] }
 0x2f7   :  { %1792 = vrot.lane.b32.xlu1 %v1609_v20, %s9614_s0 }
 0x2f8   :  { %1790 = vrot.lane.b32.xlu0 %v1608_v49, %s9614_s0 }
 0x2f9   :  { %v1709_v61 = vpop.permute.xlu1 %1708 }
 0x2fa   :  { %1888 = vst.msk [vmem:[#allocation3 + $0x68] sm:$0xff] %vm1874_vm5, %v1709_v61  ;;  %v1707_v4 = vpop.permute.xlu0 %1706 }
 0x2fb   :  { %1887 = vst.msk [vmem:[#allocation3 + $0x60] sm:$0xff] %vm1874_vm5, %v1707_v4  ;;  %1782 = vrot.lane.b32.xlu2 %v1604_v42, %s9614_s0  ;;  %v1962_v42 = vld [vmem:[#allocation2 + $0x12a] sm:$0xff]  ;;  %v1958_v4 = vld [vmem:[#allocation2 + $0xfa] sm:$0xff] }
 0x2fd   :  { %v1717_v22 = vpop.permute.xlu2 %1716 }
 0x2fe   :  { %1892 = vst.msk [vmem:[#allocation3 + $0x88] sm:$0xff] %vm1874_vm5, %v1717_v22  ;;  %v1966_v22 = vld [vmem:[#allocation2 + $0x15a] sm:$0xff] }
 0x2ff   :  { %1798 = vrot.lane.b32.xlu1 %v1612_v59, %s9614_s0 }
 0x300   :  { %1796 = vrot.lane.b32.xlu0 %v1611_v8, %s9614_s0 }
 0x301   :  { %v1715_v38 = vpop.permute.xlu1 %1714 }
 0x302   :  { %1891 = vst.msk [vmem:[#allocation3 + $0x80] sm:$0xff] %vm1874_vm5, %v1715_v38  ;;  %v1713_v47 = vpop.permute.xlu0 %1712 }
 0x303   :  { %1890 = vst.msk [vmem:[#allocation3 + $0x78] sm:$0xff] %vm1874_vm5, %v1713_v47  ;;  %1788 = vrot.lane.b32.xlu2 %v1607_v19, %s9614_s0  ;;  %v1965_v19 = vld [vmem:[#allocation2 + $0x152] sm:$0xff]  ;;  %v1961_v47 = vld [vmem:[#allocation2 + $0x122] sm:$0xff] }
 0x305   :  { %v1723_v10 = vpop.permute.xlu2 %1722 }
 0x306   :  { %1895 = vst.msk [vmem:[#allocation3 + $0xa0] sm:$0xff] %vm1874_vm5, %v1723_v10  ;;  %v1969_v10 = vld [vmem:[#allocation2 + $0x182] sm:$0xff] }
 0x307   :  { %1804 = vrot.lane.b32.xlu1 %v1615_v60, %s9614_s0 }
 0x308   :  { %1802 = vrot.lane.b32.xlu0 %v1614_v14, %s9614_s0 }
 0x309   :  { %v1721_v33 = vpop.permute.xlu1 %1720 }
 0x30a   :  { %1894 = vst.msk [vmem:[#allocation3 + $0x98] sm:$0xff] %vm1874_vm5, %v1721_v33  ;;  %v1719_v34 = vpop.permute.xlu0 %1718 }
 0x30b   :  { %1893 = vst.msk [vmem:[#allocation3 + $0x90] sm:$0xff] %vm1874_vm5, %v1719_v34  ;;  %1794 = vrot.lane.b32.xlu2 %v1610_v28, %s9614_s0  ;;  %v1968_v28 = vld [vmem:[#allocation2 + $0x172] sm:$0xff]  ;;  %v1964_v34 = vld [vmem:[#allocation2 + $0x142] sm:$0xff] }
 0x30d   :  { %v1729_v62 = vpop.permute.xlu2 %1728 }
 0x30e   :  { %1898 = vst.msk [vmem:[#allocation3 + $0xb8] sm:$0xff] %vm1874_vm5, %v1729_v62  ;;  %v1972_v62 = vld [vmem:[#allocation2 + $0x1d2] sm:$0xff] }
 0x30f   :  { %2067 = vrot.lane.b32.xlu1 %v1939_v6, %s9615_s19 }
 0x310   :  { %1808 = vrot.lane.b32.xlu0 %v1617_v53, %s9614_s0 }
 0x311   :  { %v1727_v36 = vpop.permute.xlu1 %1726 }
 0x312   :  { %1897 = vst.msk [vmem:[#allocation3 + $0xb0] sm:$0xff] %vm1874_vm5, %v1727_v36  ;;  %v1725_v44 = vpop.permute.xlu0 %1724 }
 0x313   :  { %1896 = vst.msk [vmem:[#allocation3 + $0xa8] sm:$0xff] %vm1874_vm5, %v1725_v44  ;;  %1800 = vrot.lane.b32.xlu2 %v1613_v41, %s9614_s0  ;;  %v1971_v41 = vld [vmem:[#allocation2 + $0x1ca] sm:$0xff] }
 0x314   :  { %v1967_v44 = vld [vmem:[#allocation2 + $0x16a] sm:$0xff] }
 0x315   :  { %v1735_v54 = vpop.permute.xlu2 %1734 }
 0x316   :  { %1901 = vst.msk [vmem:[#allocation3 + $0xd0] sm:$0xff] %vm1874_vm5, %v1735_v54  ;;  %v1975_v54 = vld [vmem:[#allocation2 + $0x1fa] sm:$0xff] }
 0x317   :  { %2073 = vrot.lane.b32.xlu1 %v1942_v23, %s9615_s19 }
 0x318   :  { %2071 = vrot.lane.b32.xlu0 %v1941_v46, %s9615_s19 }
 0x319   :  { %v1733_v35 = vpop.permute.xlu1 %1732 }
 0x31a   :  { %1900 = vst.msk [vmem:[#allocation3 + $0xc8] sm:$0xff] %vm1874_vm5, %v1733_v35  ;;  %v1731_v56 = vpop.permute.xlu0 %1730 }
 0x31b   :  { %1899 = vst.msk [vmem:[#allocation3 + $0xc0] sm:$0xff] %vm1874_vm5, %v1731_v56  ;;  %1806 = vrot.lane.b32.xlu2 %v1616_v24, %s9614_s0  ;;  %v1974_v24 = vld [vmem:[#allocation2 + $0x1ea] sm:$0xff] }
 0x31c   :  { %v1970_v56 = vld [vmem:[#allocation2 + $0x18a] sm:$0xff] }
 0x31d   :  { %v1741_v5 = vpop.permute.xlu2 %1740 }
 0x31e   :  { %1904 = vst.msk [vmem:[#allocation3 + $0xe8] sm:$0xff] %vm1874_vm5, %v1741_v5  ;;  %v1978_v5 = vld [vmem:[#allocation2 + $0x21a] sm:$0xff] }
 0x31f   :  { %2079 = vrot.lane.b32.xlu1 %v1945_v1, %s9615_s19 }
 0x320   :  { %2077 = vrot.lane.b32.xlu0 %v1944_v45, %s9615_s19 }
 0x321   :  { %v1739_v12 = vpop.permute.xlu1 %1738 }
 0x322   :  { %1903 = vst.msk [vmem:[#allocation3 + $0xe0] sm:$0xff] %vm1874_vm5, %v1739_v12  ;;  %v1737_v50 = vpop.permute.xlu0 %1736 }
 0x323   :  { %1902 = vst.msk [vmem:[#allocation3 + $0xd8] sm:$0xff] %vm1874_vm5, %v1737_v50  ;;  %2069 = vrot.lane.b32.xlu2 %v1940_v55, %s9615_s19  ;;  %v1977_v55 = vld [vmem:[#allocation2 + $0x212] sm:$0xff]  ;;  %v1973_v50 = vld [vmem:[#allocation2 + $0x1e2] sm:$0xff] }
 0x325   :  { %v1747_v11 = vpop.permute.xlu2 %1746 }
 0x326   :  { %1907 = vst.msk [vmem:[#allocation3 + $0x100] sm:$0xff] %vm1874_vm5, %v1747_v11  ;;  %v1981_v11 = vld [vmem:[#allocation2 + $0x242] sm:$0xff] }
 0x327   :  { %2085 = vrot.lane.b32.xlu1 %v1948_v18, %s9615_s19 }
 0x328   :  { %2083 = vrot.lane.b32.xlu0 %v1947_v25, %s9615_s19 }
 0x329   :  { %v1745_v30 = vpop.permute.xlu1 %1744 }
 0x32a   :  { %1906 = vst.msk [vmem:[#allocation3 + $0xf8] sm:$0xff] %vm1874_vm5, %v1745_v30  ;;  %v1743_v39 = vpop.permute.xlu0 %1742 }
 0x32b   :  { %1905 = vst.msk [vmem:[#allocation3 + $0xf0] sm:$0xff] %vm1874_vm5, %v1743_v39  ;;  %2075 = vrot.lane.b32.xlu2 %v1943_v2, %s9615_s19  ;;  %v1980_v2 = vld [vmem:[#allocation2 + $0x232] sm:$0xff]  ;;  %v1976_v39 = vld [vmem:[#allocation2 + $0x202] sm:$0xff] }
 0x32d   :  { %v1753_v51 = vpop.permute.xlu2 %1752 }
 0x32e   :  { %1910 = vst.msk [vmem:[#allocation3 + $0x118] sm:$0xff] %vm1874_vm5, %v1753_v51  ;;  %v1984_v51 = vld [vmem:[#allocation2 + $0x262] sm:$0xff] }
 0x32f   :  { %2091 = vrot.lane.b32.xlu1 %v1951_v13, %s9615_s19 }
 0x330   :  { %2089 = vrot.lane.b32.xlu0 %v1950_v43, %s9615_s19 }
 0x331   :  { %v1751_v58 = vpop.permute.xlu1 %1750 }
 0x332   :  { %1909 = vst.msk [vmem:[#allocation3 + $0x110] sm:$0xff] %vm1874_vm5, %v1751_v58  ;;  %v1749_v63 = vpop.permute.xlu0 %1748 }
 0x333   :  { %1908 = vst.msk [vmem:[#allocation3 + $0x108] sm:$0xff] %vm1874_vm5, %v1749_v63  ;;  %2081 = vrot.lane.b32.xlu2 %v1946_v26, %s9615_s19  ;;  %v1983_v26 = vld [vmem:[#allocation2 + $0x25a] sm:$0xff]  ;;  %v1979_v63 = vld [vmem:[#allocation2 + $0x22a] sm:$0xff] }
 0x335   :  { %v1759_v7 = vpop.permute.xlu2 %1758 }
 0x336   :  { %1913 = vst.msk [vmem:[#allocation3 + $0x130] sm:$0xff] %vm1874_vm5, %v1759_v7  ;;  %v1987_v7 = vld [vmem:[#allocation2 + $0x28a] sm:$0xff] }
 0x337   :  { %2097 = vrot.lane.b32.xlu1 %v1954_v32, %s9615_s19 }
 0x338   :  { %2095 = vrot.lane.b32.xlu0 %v1953_v40, %s9615_s19 }
 0x339   :  { %v1757_v17 = vpop.permute.xlu1 %1756 }
 0x33a   :  { %1912 = vst.msk [vmem:[#allocation3 + $0x128] sm:$0xff] %vm1874_vm5, %v1757_v17  ;;  %v1755_v52 = vpop.permute.xlu0 %1754 }
 0x33b   :  { %1911 = vst.msk [vmem:[#allocation3 + $0x120] sm:$0xff] %vm1874_vm5, %v1755_v52  ;;  %2087 = vrot.lane.b32.xlu2 %v1949_v15, %s9615_s19  ;;  %v1986_v15 = vld [vmem:[#allocation2 + $0x27a] sm:$0xff]  ;;  %v1982_v52 = vld [vmem:[#allocation2 + $0x24a] sm:$0xff] }
 0x33d   :  { %v1765_v37 = vpop.permute.xlu2 %1764 }
 0x33e   :  { %1916 = vst.msk [vmem:[#allocation3 + $0x148] sm:$0xff] %vm1874_vm5, %v1765_v37  ;;  %v1990_v37 = vld [vmem:[#allocation2 + $0x2aa] sm:$0xff] }
 0x33f   :  { %2103 = vrot.lane.b32.xlu1 %v1957_v21, %s9615_s19 }
 0x340   :  { %2101 = vrot.lane.b32.xlu0 %v1956_v29, %s9615_s19 }
 0x341   :  { %v1763_v16 = vpop.permute.xlu1 %1762 }
 0x342   :  { %1915 = vst.msk [vmem:[#allocation3 + $0x140] sm:$0xff] %vm1874_vm5, %v1763_v16  ;;  %v1761_v57 = vpop.permute.xlu0 %1760 }
 0x343   :  { %1914 = vst.msk [vmem:[#allocation3 + $0x138] sm:$0xff] %vm1874_vm5, %v1761_v57  ;;  %2093 = vrot.lane.b32.xlu2 %v1952_v48, %s9615_s19  ;;  %v1989_v48 = vld [vmem:[#allocation2 + $0x2a2] sm:$0xff]  ;;  %v1985_v57 = vld [vmem:[#allocation2 + $0x272] sm:$0xff] }
 0x345   :  { %v1771_v31 = vpop.permute.xlu2 %1770 }
 0x346   :  { %1919 = vst.msk [vmem:[#allocation3 + $0x160] sm:$0xff] %vm1874_vm5, %v1771_v31  ;;  %v1993_v31 = vld [vmem:[#allocation2 + $0x2d2] sm:$0xff] }
 0x347   :  { %2109 = vrot.lane.b32.xlu1 %v1960_v3, %s9615_s19 }
 0x348   :  { %2107 = vrot.lane.b32.xlu0 %v1959_v0, %s9615_s19 }
 0x349   :  { %v1769_v20 = vpop.permute.xlu1 %1768 }
 0x34a   :  { %1918 = vst.msk [vmem:[#allocation3 + $0x158] sm:$0xff] %vm1874_vm5, %v1769_v20  ;;  %v1767_v49 = vpop.permute.xlu0 %1766 }
 0x34b   :  { %1917 = vst.msk [vmem:[#allocation3 + $0x150] sm:$0xff] %vm1874_vm5, %v1767_v49  ;;  %2099 = vrot.lane.b32.xlu2 %v1955_v9, %s9615_s19  ;;  %v1992_v9 = vld [vmem:[#allocation2 + $0x2c2] sm:$0xff]  ;;  %v1988_v49 = vld [vmem:[#allocation2 + $0x292] sm:$0xff] }
 0x34d   :  { %v1777_v61 = vpop.permute.xlu2 %1776 }
 0x34e   :  { %1922 = vst.msk [vmem:[#allocation3 + $0x178] sm:$0xff] %vm1874_vm5, %v1777_v61  ;;  %v1996_v61 = vld [vmem:[#allocation2 + $0x2f2] sm:$0xff] }
 0x34f   :  { %2115 = vrot.lane.b32.xlu1 %v1963_v27, %s9615_s19 }
 0x350   :  { %2113 = vrot.lane.b32.xlu0 %v1962_v42, %s9615_s19 }
 0x351   :  { %v1775_v59 = vpop.permute.xlu1 %1774 }
 0x352   :  { %1921 = vst.msk [vmem:[#allocation3 + $0x170] sm:$0xff] %vm1874_vm5, %v1775_v59  ;;  %v1773_v8 = vpop.permute.xlu0 %1772 }
 0x353   :  { %1920 = vst.msk [vmem:[#allocation3 + $0x168] sm:$0xff] %vm1874_vm5, %v1773_v8  ;;  %2105 = vrot.lane.b32.xlu2 %v1958_v4, %s9615_s19  ;;  %v1995_v4 = vld [vmem:[#allocation2 + $0x2ea] sm:$0xff]  ;;  %v1991_v8 = vld [vmem:[#allocation2 + $0x2ba] sm:$0xff] }
 0x355   :  { %v1783_v38 = vpop.permute.xlu2 %1782 }
 0x356   :  { %1925 = vst.msk [vmem:[#allocation3 + $0x190] sm:$0xff] %vm1874_vm5, %v1783_v38  ;;  %v1999_v38 = vld [vmem:[#allocation2 + $0x31a] sm:$0xff] }
 0x357   :  { %2121 = vrot.lane.b32.xlu1 %v1966_v22, %s9615_s19 }
 0x358   :  { %2119 = vrot.lane.b32.xlu0 %v1965_v19, %s9615_s19 }
 0x359   :  { %v1781_v60 = vpop.permute.xlu1 %1780 }
 0x35a   :  { %1924 = vst.msk [vmem:[#allocation3 + $0x188] sm:$0xff] %vm1874_vm5, %v1781_v60  ;;  %v1779_v14 = vpop.permute.xlu0 %1778 }
 0x35b   :  { %1923 = vst.msk [vmem:[#allocation3 + $0x180] sm:$0xff] %vm1874_vm5, %v1779_v14  ;;  %2111 = vrot.lane.b32.xlu2 %v1961_v47, %s9615_s19  ;;  %v1998_v47 = vld [vmem:[#allocation2 + $0x30a] sm:$0xff]  ;;  %v1994_v14 = vld [vmem:[#allocation2 + $0x2da] sm:$0xff] }
 0x35d   :  { %v1789_v33 = vpop.permute.xlu2 %1788 }
 0x35e   :  { %1928 = vst.msk [vmem:[#allocation3 + $0x1a8] sm:$0xff] %vm1874_vm5, %v1789_v33  ;;  %v2002_v33 = vld [vmem:[#allocation2 + $0x33a] sm:$0xff] }
 0x35f   :  { %2127 = vrot.lane.b32.xlu1 %v1969_v10, %s9615_s19 }
 0x360   :  { %2125 = vrot.lane.b32.xlu0 %v1968_v28, %s9615_s19 }
 0x361   :  { %v1787_v6 = vpop.permute.xlu1 %1786 }
 0x362   :  { %1927 = vst.msk [vmem:[#allocation3 + $0x1a0] sm:$0xff] %vm1874_vm5, %v1787_v6  ;;  %v1785_v53 = vpop.permute.xlu0 %1784 }
 0x363   :  { %1926 = vst.msk [vmem:[#allocation3 + $0x198] sm:$0xff] %vm1874_vm5, %v1785_v53  ;;  %2117 = vrot.lane.b32.xlu2 %v1964_v34, %s9615_s19  ;;  %v2001_v34 = vld [vmem:[#allocation2 + $0x332] sm:$0xff]  ;;  %v1997_v53 = vld [vmem:[#allocation2 + $0x302] sm:$0xff] }
 0x365   :  { %v1795_v36 = vpop.permute.xlu2 %1794 }
 0x366   :  { %1931 = vst.msk [vmem:[#allocation3 + $0x1c0] sm:$0xff] %vm1874_vm5, %v1795_v36  ;;  %v2327_v36 = vld [vmem:[#allocation2 + $0x48] sm:$0xff] }
 0x367   :  { %2133 = vrot.lane.b32.xlu1 %v1972_v62, %s9615_s19 }
 0x368   :  { %2131 = vrot.lane.b32.xlu0 %v1971_v41, %s9615_s19 }
 0x369   :  { %v1793_v23 = vpop.permute.xlu1 %1792 }
 0x36a   :  { %1930 = vst.msk [vmem:[#allocation3 + $0x1b8] sm:$0xff] %vm1874_vm5, %v1793_v23  ;;  %v1791_v46 = vpop.permute.xlu0 %1790 }
 0x36b   :  { %1929 = vst.msk [vmem:[#allocation3 + $0x1b0] sm:$0xff] %vm1874_vm5, %v1791_v46  ;;  %2123 = vrot.lane.b32.xlu2 %v1967_v44, %s9615_s19  ;;  %v2326_v44 = vld [vmem:[#allocation2 + $0x38] sm:$0xff]  ;;  %v2000_v46 = vld [vmem:[#allocation2 + $0x322] sm:$0xff] }
 0x36d   :  { %v1801_v35 = vpop.permute.xlu2 %1800 }
 0x36e   :  { %1934 = vst.msk [vmem:[#allocation3 + $0x1d8] sm:$0xff] %vm1874_vm5, %v1801_v35  ;;  %v2330_v35 = vld [vmem:[#allocation2 + $0x68] sm:$0xff] }
 0x36f   :  { %2139 = vrot.lane.b32.xlu1 %v1975_v54, %s9615_s19 }
 0x370   :  { %2137 = vrot.lane.b32.xlu0 %v1974_v24, %s9615_s19 }
 0x371   :  { %v1799_v1 = vpop.permute.xlu1 %1798 }
 0x372   :  { %1933 = vst.msk [vmem:[#allocation3 + $0x1d0] sm:$0xff] %vm1874_vm5, %v1799_v1  ;;  %v1797_v45 = vpop.permute.xlu0 %1796 }
 0x373   :  { %1932 = vst.msk [vmem:[#allocation3 + $0x1c8] sm:$0xff] %vm1874_vm5, %v1797_v45  ;;  %2129 = vrot.lane.b32.xlu2 %v1970_v56, %s9615_s19  ;;  %v2329_v56 = vld [vmem:[#allocation2 + $0x60] sm:$0xff]  ;;  %v2325_v45 = vld [vmem:[#allocation2 + $0x30] sm:$0xff] }
 0x375   :  { %v1807_v12 = vpop.permute.xlu2 %1806 }
 0x376   :  { %1937 = vst.msk [vmem:[#allocation3 + $0x1f0] sm:$0xff] %vm1874_vm5, %v1807_v12  ;;  %v2333_v12 = vld [vmem:[#allocation2 + $0x90] sm:$0xff] }
 0x377   :  { %2145 = vrot.lane.b32.xlu1 %v1978_v5, %s9615_s19 }
 0x378   :  { %2143 = vrot.lane.b32.xlu0 %v1977_v55, %s9615_s19 }
 0x379   :  { %v1805_v18 = vpop.permute.xlu1 %1804 }
 0x37a   :  { %1936 = vst.msk [vmem:[#allocation3 + $0x1e8] sm:$0xff] %vm1874_vm5, %v1805_v18  ;;  %v1803_v25 = vpop.permute.xlu0 %1802 }
 0x37b   :  { %1935 = vst.msk [vmem:[#allocation3 + $0x1e0] sm:$0xff] %vm1874_vm5, %v1803_v25  ;;  %2135 = vrot.lane.b32.xlu2 %v1973_v50, %s9615_s19  ;;  %v2332_v50 = vld [vmem:[#allocation2 + $0x80] sm:$0xff]  ;;  %v2328_v25 = vld [vmem:[#allocation2 + $0x50] sm:$0xff] }
 0x37d   :  { %v2070_v30 = vpop.permute.xlu2 %2069 }
 0x37e   :  { %2261 = vst.msk [vmem:[#allocation3 + $0x8] sm:$0xff] %vm2259_vm6, %v2070_v30  ;;  %v2336_v30 = vld [vmem:[#allocation2 + $0xb0] sm:$0xff] }
 0x37f   :  { %2151 = vrot.lane.b32.xlu1 %v1981_v11, %s9615_s19 }
 0x380   :  { %2149 = vrot.lane.b32.xlu0 %v1980_v2, %s9615_s19 }
 0x381   :  { %v2068_v13 = vpop.permute.xlu1 %2067 }
 0x382   :  { %2260 = vst.msk [vmem:[#allocation3] sm:$0xff] %vm2259_vm6, %v2068_v13  ;;  %v1809_v43 = vpop.permute.xlu0 %1808 }
 0x383   :  { %1938 = vst.msk [vmem:[#allocation3 + $0x1f8] sm:$0xff] %vm1874_vm5, %v1809_v43  ;;  %2141 = vrot.lane.b32.xlu2 %v1976_v39, %s9615_s19  ;;  %v2335_v39 = vld [vmem:[#allocation2 + $0xa8] sm:$0xff]  ;;  %v2331_v43 = vld [vmem:[#allocation2 + $0x78] sm:$0xff]  ;;  %vm6666_vm5 = vcmask 392512  }
 0x385   :  { %v2076_v58 = vpop.permute.xlu2 %2075 }
 0x386   :  { %2264 = vst.msk [vmem:[#allocation3 + $0x20] sm:$0xff] %vm2259_vm6, %v2076_v58  ;;  %v2339_v58 = vld [vmem:[#allocation2 + $0xd8] sm:$0xff] }
 0x387   :  { %2157 = vrot.lane.b32.xlu1 %v1984_v51, %s9615_s19 }
 0x388   :  { %2155 = vrot.lane.b32.xlu0 %v1983_v26, %s9615_s19 }
 0x389   :  { %v2074_v32 = vpop.permute.xlu1 %2073 }
 0x38a   :  { %2263 = vst.msk [vmem:[#allocation3 + $0x18] sm:$0xff] %vm2259_vm6, %v2074_v32  ;;  %v2072_v40 = vpop.permute.xlu0 %2071 }
 0x38b   :  { %2262 = vst.msk [vmem:[#allocation3 + $0x10] sm:$0xff] %vm2259_vm6, %v2072_v40  ;;  %2147 = vrot.lane.b32.xlu2 %v1979_v63, %s9615_s19  ;;  %v2338_v63 = vld [vmem:[#allocation2 + $0xc8] sm:$0xff]  ;;  %v2334_v40 = vld [vmem:[#allocation2 + $0x98] sm:$0xff] }
 0x38d   :  { %v2082_v17 = vpop.permute.xlu2 %2081 }
 0x38e   :  { %2267 = vst.msk [vmem:[#allocation3 + $0x38] sm:$0xff] %vm2259_vm6, %v2082_v17  ;;  %v2342_v17 = vld [vmem:[#allocation2 + $0xf8] sm:$0xff] }
 0x38f   :  { %2163 = vrot.lane.b32.xlu1 %v1987_v7, %s9615_s19 }
 0x390   :  { %2161 = vrot.lane.b32.xlu0 %v1986_v15, %s9615_s19 }
 0x391   :  { %v2080_v21 = vpop.permute.xlu1 %2079 }
 0x392   :  { %2266 = vst.msk [vmem:[#allocation3 + $0x30] sm:$0xff] %vm2259_vm6, %v2080_v21  ;;  %v2078_v29 = vpop.permute.xlu0 %2077 }
 0x393   :  { %2265 = vst.msk [vmem:[#allocation3 + $0x28] sm:$0xff] %vm2259_vm6, %v2078_v29  ;;  %2153 = vrot.lane.b32.xlu2 %v1982_v52, %s9615_s19  ;;  %v2341_v52 = vld [vmem:[#allocation2 + $0xf0] sm:$0xff]  ;;  %v2337_v29 = vld [vmem:[#allocation2 + $0xc0] sm:$0xff] }
 0x395   :  { %v2088_v16 = vpop.permute.xlu2 %2087 }
 0x396   :  { %2270 = vst.msk [vmem:[#allocation3 + $0x50] sm:$0xff] %vm2259_vm6, %v2088_v16  ;;  %v2345_v16 = vld [vmem:[#allocation2 + $0x120] sm:$0xff] }
 0x397   :  { %2169 = vrot.lane.b32.xlu1 %v1990_v37, %s9615_s19 }
 0x398   :  { %2167 = vrot.lane.b32.xlu0 %v1989_v48, %s9615_s19 }
 0x399   :  { %v2086_v3 = vpop.permute.xlu1 %2085 }
 0x39a   :  { %2269 = vst.msk [vmem:[#allocation3 + $0x48] sm:$0xff] %vm2259_vm6, %v2086_v3  ;;  %v2084_v0 = vpop.permute.xlu0 %2083 }
 0x39b   :  { %2268 = vst.msk [vmem:[#allocation3 + $0x40] sm:$0xff] %vm2259_vm6, %v2084_v0  ;;  %2159 = vrot.lane.b32.xlu2 %v1985_v57, %s9615_s19  ;;  %v2344_v57 = vld [vmem:[#allocation2 + $0x110] sm:$0xff]  ;;  %v2340_v0 = vld [vmem:[#allocation2 + $0xe0] sm:$0xff] }
 0x39d   :  { %v2094_v20 = vpop.permute.xlu2 %2093 }
 0x39e   :  { %2273 = vst.msk [vmem:[#allocation3 + $0x68] sm:$0xff] %vm2259_vm6, %v2094_v20  ;;  %v2348_v20 = vld [vmem:[#allocation2 + $0x140] sm:$0xff] }
 0x39f   :  { %2175 = vrot.lane.b32.xlu1 %v1993_v31, %s9615_s19 }
 0x3a0   :  { %2173 = vrot.lane.b32.xlu0 %v1992_v9, %s9615_s19 }
 0x3a1   :  { %v2092_v27 = vpop.permute.xlu1 %2091 }
 0x3a2   :  { %2272 = vst.msk [vmem:[#allocation3 + $0x60] sm:$0xff] %vm2259_vm6, %v2092_v27  ;;  %v2090_v42 = vpop.permute.xlu0 %2089 }
 0x3a3   :  { %2271 = vst.msk [vmem:[#allocation3 + $0x58] sm:$0xff] %vm2259_vm6, %v2090_v42  ;;  %2165 = vrot.lane.b32.xlu2 %v1988_v49, %s9615_s19  ;;  %v2347_v49 = vld [vmem:[#allocation2 + $0x138] sm:$0xff]  ;;  %v2343_v42 = vld [vmem:[#allocation2 + $0x108] sm:$0xff] }
 0x3a5   :  { %v2100_v59 = vpop.permute.xlu2 %2099 }
 0x3a6   :  { %2276 = vst.msk [vmem:[#allocation3 + $0x80] sm:$0xff] %vm2259_vm6, %v2100_v59  ;;  %v2351_v59 = vld [vmem:[#allocation2 + $0x168] sm:$0xff] }
 0x3a7   :  { %2181 = vrot.lane.b32.xlu1 %v1996_v61, %s9615_s19 }
 0x3a8   :  { %2179 = vrot.lane.b32.xlu0 %v1995_v4, %s9615_s19 }
 0x3a9   :  { %v2098_v22 = vpop.permute.xlu1 %2097 }
 0x3aa   :  { %2275 = vst.msk [vmem:[#allocation3 + $0x78] sm:$0xff] %vm2259_vm6, %v2098_v22  ;;  %v2096_v19 = vpop.permute.xlu0 %2095 }
 0x3ab   :  { %2274 = vst.msk [vmem:[#allocation3 + $0x70] sm:$0xff] %vm2259_vm6, %v2096_v19  ;;  %2171 = vrot.lane.b32.xlu2 %v1991_v8, %s9615_s19  ;;  %v2350_v8 = vld [vmem:[#allocation2 + $0x158] sm:$0xff]  ;;  %v2346_v19 = vld [vmem:[#allocation2 + $0x128] sm:$0xff] }
 0x3ad   :  { %v2106_v60 = vpop.permute.xlu2 %2105 }
 0x3ae   :  { %2279 = vst.msk [vmem:[#allocation3 + $0x98] sm:$0xff] %vm2259_vm6, %v2106_v60  ;;  %v2354_v60 = vld [vmem:[#allocation2 + $0x188] sm:$0xff] }
 0x3af   :  { %2187 = vrot.lane.b32.xlu1 %v1999_v38, %s9615_s19 }
 0x3b0   :  { %2185 = vrot.lane.b32.xlu0 %v1998_v47, %s9615_s19 }
 0x3b1   :  { %v2104_v10 = vpop.permute.xlu1 %2103 }
 0x3b2   :  { %2278 = vst.msk [vmem:[#allocation3 + $0x90] sm:$0xff] %vm2259_vm6, %v2104_v10  ;;  %v2102_v28 = vpop.permute.xlu0 %2101 }
 0x3b3   :  { %2277 = vst.msk [vmem:[#allocation3 + $0x88] sm:$0xff] %vm2259_vm6, %v2102_v28  ;;  %2177 = vrot.lane.b32.xlu2 %v1994_v14, %s9615_s19  ;;  %v2353_v14 = vld [vmem:[#allocation2 + $0x180] sm:$0xff]  ;;  %v2349_v28 = vld [vmem:[#allocation2 + $0x150] sm:$0xff] }
 0x3b5   :  { %v2112_v6 = vpop.permute.xlu2 %2111 }
 0x3b6   :  { %2282 = vst.msk [vmem:[#allocation3 + $0xb0] sm:$0xff] %vm2259_vm6, %v2112_v6  ;;  %v2357_v6 = vld [vmem:[#allocation2 + $0x1e0] sm:$0xff] }
 0x3b7   :  { %2193 = vrot.lane.b32.xlu1 %v2002_v33, %s9615_s19 }
 0x3b8   :  { %2191 = vrot.lane.b32.xlu0 %v2001_v34, %s9615_s19 }
 0x3b9   :  { %v2110_v62 = vpop.permute.xlu1 %2109 }
 0x3ba   :  { %2281 = vst.msk [vmem:[#allocation3 + $0xa8] sm:$0xff] %vm2259_vm6, %v2110_v62  ;;  %v2108_v41 = vpop.permute.xlu0 %2107 }
 0x3bb   :  { %2280 = vst.msk [vmem:[#allocation3 + $0xa0] sm:$0xff] %vm2259_vm6, %v2108_v41  ;;  %2183 = vrot.lane.b32.xlu2 %v1997_v53, %s9615_s19  ;;  %v2356_v53 = vld [vmem:[#allocation2 + $0x1a0] sm:$0xff]  ;;  %v2352_v41 = vld [vmem:[#allocation2 + $0x170] sm:$0xff] }
 0x3bd   :  { %v2118_v23 = vpop.permute.xlu2 %2117 }
 0x3be   :  { %2285 = vst.msk [vmem:[#allocation3 + $0xc8] sm:$0xff] %vm2259_vm6, %v2118_v23  ;;  %v2360_v23 = vld [vmem:[#allocation2 + $0x200] sm:$0xff] }
 0x3bf   :  { %2457 = vrot.lane.b32.xlu1 %v2327_v36, %s9616_s20 }
 0x3c0   :  { %2455 = vrot.lane.b32.xlu0 %v2326_v44, %s9616_s20 }
 0x3c1   :  { %v2116_v54 = vpop.permute.xlu1 %2115 }
 0x3c2   :  { %2284 = vst.msk [vmem:[#allocation3 + $0xc0] sm:$0xff] %vm2259_vm6, %v2116_v54  ;;  %v2114_v24 = vpop.permute.xlu0 %2113 }
 0x3c3   :  { %2283 = vst.msk [vmem:[#allocation3 + $0xb8] sm:$0xff] %vm2259_vm6, %v2114_v24  ;;  %2189 = vrot.lane.b32.xlu2 %v2000_v46, %s9615_s19  ;;  %v2359_v46 = vld [vmem:[#allocation2 + $0x1f8] sm:$0xff] }
 0x3c4   :  { %v2355_v24 = vld [vmem:[#allocation2 + $0x198] sm:$0xff] }
 0x3c5   :  { %v2124_v1 = vpop.permute.xlu2 %2123 }
 0x3c6   :  { %2288 = vst.msk [vmem:[#allocation3 + $0xe0] sm:$0xff] %vm2259_vm6, %v2124_v1  ;;  %v2363_v1 = vld [vmem:[#allocation2 + $0x228] sm:$0xff] }
 0x3c7   :  { %2463 = vrot.lane.b32.xlu1 %v2330_v35, %s9616_s20 }
 0x3c8   :  { %2461 = vrot.lane.b32.xlu0 %v2329_v56, %s9616_s20 }
 0x3c9   :  { %v2122_v5 = vpop.permute.xlu1 %2121 }
 0x3ca   :  { %2287 = vst.msk [vmem:[#allocation3 + $0xd8] sm:$0xff] %vm2259_vm6, %v2122_v5  ;;  %v2120_v55 = vpop.permute.xlu0 %2119 }
 0x3cb   :  { %2286 = vst.msk [vmem:[#allocation3 + $0xd0] sm:$0xff] %vm2259_vm6, %v2120_v55  ;;  %2453 = vrot.lane.b32.xlu2 %v2325_v45, %s9616_s20  ;;  %v2362_v45 = vld [vmem:[#allocation2 + $0x218] sm:$0xff]  ;;  %v2358_v55 = vld [vmem:[#allocation2 + $0x1e8] sm:$0xff] }
 0x3cd   :  { %v2130_v18 = vpop.permute.xlu2 %2129 }
 0x3ce   :  { %2291 = vst.msk [vmem:[#allocation3 + $0xf8] sm:$0xff] %vm2259_vm6, %v2130_v18  ;;  %v2366_v18 = vld [vmem:[#allocation2 + $0x248] sm:$0xff] }
 0x3cf   :  { %2469 = vrot.lane.b32.xlu1 %v2333_v12, %s9616_s20 }
 0x3d0   :  { %2467 = vrot.lane.b32.xlu0 %v2332_v50, %s9616_s20 }
 0x3d1   :  { %v2128_v11 = vpop.permute.xlu1 %2127 }
 0x3d2   :  { %2290 = vst.msk [vmem:[#allocation3 + $0xf0] sm:$0xff] %vm2259_vm6, %v2128_v11  ;;  %v2126_v2 = vpop.permute.xlu0 %2125 }
 0x3d3   :  { %2289 = vst.msk [vmem:[#allocation3 + $0xe8] sm:$0xff] %vm2259_vm6, %v2126_v2  ;;  %2459 = vrot.lane.b32.xlu2 %v2328_v25, %s9616_s20  ;;  %v2365_v25 = vld [vmem:[#allocation2 + $0x240] sm:$0xff]  ;;  %v2361_v2 = vld [vmem:[#allocation2 + $0x210] sm:$0xff] }
 0x3d5   :  { %v2136_v13 = vpop.permute.xlu2 %2135 }
 0x3d6   :  { %2294 = vst.msk [vmem:[#allocation3 + $0x110] sm:$0xff] %vm2259_vm6, %v2136_v13  ;;  %v2369_v13 = vld [vmem:[#allocation2 + $0x270] sm:$0xff] }
 0x3d7   :  { %2475 = vrot.lane.b32.xlu1 %v2336_v30, %s9616_s20 }
 0x3d8   :  { %2473 = vrot.lane.b32.xlu0 %v2335_v39, %s9616_s20 }
 0x3d9   :  { %v2134_v51 = vpop.permute.xlu1 %2133 }
 0x3da   :  { %2293 = vst.msk [vmem:[#allocation3 + $0x108] sm:$0xff] %vm2259_vm6, %v2134_v51  ;;  %v2132_v26 = vpop.permute.xlu0 %2131 }
 0x3db   :  { %2292 = vst.msk [vmem:[#allocation3 + $0x100] sm:$0xff] %vm2259_vm6, %v2132_v26  ;;  %2465 = vrot.lane.b32.xlu2 %v2331_v43, %s9616_s20  ;;  %v2368_v43 = vld [vmem:[#allocation2 + $0x260] sm:$0xff]  ;;  %v2364_v26 = vld [vmem:[#allocation2 + $0x230] sm:$0xff] }
 0x3dd   :  { %v2142_v32 = vpop.permute.xlu2 %2141 }
 0x3de   :  { %2297 = vst.msk [vmem:[#allocation3 + $0x128] sm:$0xff] %vm2259_vm6, %v2142_v32  ;;  %v2372_v32 = vld [vmem:[#allocation2 + $0x290] sm:$0xff] }
 0x3df   :  { %2481 = vrot.lane.b32.xlu1 %v2339_v58, %s9616_s20 }
 0x3e0   :  { %2479 = vrot.lane.b32.xlu0 %v2338_v63, %s9616_s20 }
 0x3e1   :  { %v2140_v7 = vpop.permute.xlu1 %2139 }
 0x3e2   :  { %2296 = vst.msk [vmem:[#allocation3 + $0x120] sm:$0xff] %vm2259_vm6, %v2140_v7  ;;  %v2138_v15 = vpop.permute.xlu0 %2137 }
 0x3e3   :  { %2295 = vst.msk [vmem:[#allocation3 + $0x118] sm:$0xff] %vm2259_vm6, %v2138_v15  ;;  %2471 = vrot.lane.b32.xlu2 %v2334_v40, %s9616_s20  ;;  %v2371_v40 = vld [vmem:[#allocation2 + $0x288] sm:$0xff]  ;;  %v2367_v15 = vld [vmem:[#allocation2 + $0x258] sm:$0xff] }
 0x3e5   :  { %v2148_v21 = vpop.permute.xlu2 %2147 }
 0x3e6   :  { %2300 = vst.msk [vmem:[#allocation3 + $0x140] sm:$0xff] %vm2259_vm6, %v2148_v21  ;;  %v2375_v21 = vld [vmem:[#allocation2 + $0x2b8] sm:$0xff] }
 0x3e7   :  { %2487 = vrot.lane.b32.xlu1 %v2342_v17, %s9616_s20 }
 0x3e8   :  { %2485 = vrot.lane.b32.xlu0 %v2341_v52, %s9616_s20 }
 0x3e9   :  { %v2146_v37 = vpop.permute.xlu1 %2145 }
 0x3ea   :  { %2299 = vst.msk [vmem:[#allocation3 + $0x138] sm:$0xff] %vm2259_vm6, %v2146_v37  ;;  %v2144_v48 = vpop.permute.xlu0 %2143 }
 0x3eb   :  { %2298 = vst.msk [vmem:[#allocation3 + $0x130] sm:$0xff] %vm2259_vm6, %v2144_v48  ;;  %2477 = vrot.lane.b32.xlu2 %v2337_v29, %s9616_s20  ;;  %v2374_v29 = vld [vmem:[#allocation2 + $0x2a8] sm:$0xff]  ;;  %v2370_v48 = vld [vmem:[#allocation2 + $0x278] sm:$0xff] }
 0x3ed   :  { %v2154_v3 = vpop.permute.xlu2 %2153 }
 0x3ee   :  { %2303 = vst.msk [vmem:[#allocation3 + $0x158] sm:$0xff] %vm2259_vm6, %v2154_v3  ;;  %v2378_v3 = vld [vmem:[#allocation2 + $0x2d8] sm:$0xff] }
 0x3ef   :  { %2493 = vrot.lane.b32.xlu1 %v2345_v16, %s9616_s20 }
 0x3f0   :  { %2491 = vrot.lane.b32.xlu0 %v2344_v57, %s9616_s20 }
 0x3f1   :  { %v2152_v31 = vpop.permute.xlu1 %2151 }
 0x3f2   :  { %2302 = vst.msk [vmem:[#allocation3 + $0x150] sm:$0xff] %vm2259_vm6, %v2152_v31  ;;  %v2150_v9 = vpop.permute.xlu0 %2149 }
 0x3f3   :  { %2301 = vst.msk [vmem:[#allocation3 + $0x148] sm:$0xff] %vm2259_vm6, %v2150_v9  ;;  %2483 = vrot.lane.b32.xlu2 %v2340_v0, %s9616_s20  ;;  %v2377_v0 = vld [vmem:[#allocation2 + $0x2d0] sm:$0xff]  ;;  %v2373_v9 = vld [vmem:[#allocation2 + $0x2a0] sm:$0xff] }
 0x3f5   :  { %v2160_v27 = vpop.permute.xlu2 %2159 }
 0x3f6   :  { %2306 = vst.msk [vmem:[#allocation3 + $0x170] sm:$0xff] %vm2259_vm6, %v2160_v27  ;;  %v2381_v27 = vld [vmem:[#allocation2 + $0x300] sm:$0xff] }
 0x3f7   :  { %2499 = vrot.lane.b32.xlu1 %v2348_v20, %s9616_s20 }
 0x3f8   :  { %2497 = vrot.lane.b32.xlu0 %v2347_v49, %s9616_s20 }
 0x3f9   :  { %v2158_v61 = vpop.permute.xlu1 %2157 }
 0x3fa   :  { %2305 = vst.msk [vmem:[#allocation3 + $0x168] sm:$0xff] %vm2259_vm6, %v2158_v61  ;;  %v2156_v4 = vpop.permute.xlu0 %2155 }
 0x3fb   :  { %2304 = vst.msk [vmem:[#allocation3 + $0x160] sm:$0xff] %vm2259_vm6, %v2156_v4  ;;  %2489 = vrot.lane.b32.xlu2 %v2343_v42, %s9616_s20  ;;  %v2380_v42 = vld [vmem:[#allocation2 + $0x2f0] sm:$0xff]  ;;  %v2376_v4 = vld [vmem:[#allocation2 + $0x2c0] sm:$0xff] }
 0x3fd   :  { %v2166_v22 = vpop.permute.xlu2 %2165 }
 0x3fe   :  { %2309 = vst.msk [vmem:[#allocation3 + $0x188] sm:$0xff] %vm2259_vm6, %v2166_v22  ;;  %v2384_v22 = vld [vmem:[#allocation2 + $0x320] sm:$0xff] }
 0x3ff   :  { %2505 = vrot.lane.b32.xlu1 %v2351_v59, %s9616_s20 }
 0x400   :  { %2503 = vrot.lane.b32.xlu0 %v2350_v8, %s9616_s20 }
 0x401   :  { %v2164_v38 = vpop.permute.xlu1 %2163 }
 0x402   :  { %2308 = vst.msk [vmem:[#allocation3 + $0x180] sm:$0xff] %vm2259_vm6, %v2164_v38  ;;  %v2162_v47 = vpop.permute.xlu0 %2161 }
 0x403   :  { %2307 = vst.msk [vmem:[#allocation3 + $0x178] sm:$0xff] %vm2259_vm6, %v2162_v47  ;;  %2495 = vrot.lane.b32.xlu2 %v2346_v19, %s9616_s20  ;;  %v2383_v19 = vld [vmem:[#allocation2 + $0x318] sm:$0xff]  ;;  %v2379_v47 = vld [vmem:[#allocation2 + $0x2e8] sm:$0xff] }
 0x405   :  { %v2172_v10 = vpop.permute.xlu2 %2171 }
 0x406   :  { %2312 = vst.msk [vmem:[#allocation3 + $0x1a0] sm:$0xff] %vm2259_vm6, %v2172_v10  ;;  %v2387_v10 = vld [vmem:[#allocation2 + $0x348] sm:$0xff] }
 0x407   :  { %2511 = vrot.lane.b32.xlu1 %v2354_v60, %s9616_s20 }
 0x408   :  { %2509 = vrot.lane.b32.xlu0 %v2353_v14, %s9616_s20 }
 0x409   :  { %v2170_v33 = vpop.permute.xlu1 %2169 }
 0x40a   :  { %2311 = vst.msk [vmem:[#allocation3 + $0x198] sm:$0xff] %vm2259_vm6, %v2170_v33  ;;  %v2168_v34 = vpop.permute.xlu0 %2167 }
 0x40b   :  { %2310 = vst.msk [vmem:[#allocation3 + $0x190] sm:$0xff] %vm2259_vm6, %v2168_v34  ;;  %2501 = vrot.lane.b32.xlu2 %v2349_v28, %s9616_s20  ;;  %v2386_v28 = vld [vmem:[#allocation2 + $0x338] sm:$0xff]  ;;  %v2382_v34 = vld [vmem:[#allocation2 + $0x308] sm:$0xff] }
 0x40d   :  { %v2178_v62 = vpop.permute.xlu2 %2177 }
 0x40e   :  { %2315 = vst.msk [vmem:[#allocation3 + $0x1b8] sm:$0xff] %vm2259_vm6, %v2178_v62  ;;  %v2711_v62 = vld [vmem:[#allocation2 + $0x39] sm:$0xff] }
 0x40f   :  { %2517 = vrot.lane.b32.xlu1 %v2357_v6, %s9616_s20 }
 0x410   :  { %2515 = vrot.lane.b32.xlu0 %v2356_v53, %s9616_s20 }
 0x411   :  { %v2176_v36 = vpop.permute.xlu1 %2175 }
 0x412   :  { %2314 = vst.msk [vmem:[#allocation3 + $0x1b0] sm:$0xff] %vm2259_vm6, %v2176_v36  ;;  %v2174_v44 = vpop.permute.xlu0 %2173 }
 0x413   :  { %2313 = vst.msk [vmem:[#allocation3 + $0x1a8] sm:$0xff] %vm2259_vm6, %v2174_v44  ;;  %2507 = vrot.lane.b32.xlu2 %v2352_v41, %s9616_s20  ;;  %v2710_v41 = vld [vmem:[#allocation2 + $0x31] sm:$0xff] }
 0x414   :  { %v2385_v44 = vld [vmem:[#allocation2 + $0x330] sm:$0xff] }
 0x415   :  { %v2184_v54 = vpop.permute.xlu2 %2183 }
 0x416   :  { %2318 = vst.msk [vmem:[#allocation3 + $0x1d0] sm:$0xff] %vm2259_vm6, %v2184_v54  ;;  %v2714_v54 = vld [vmem:[#allocation2 + $0x61] sm:$0xff] }
 0x417   :  { %2523 = vrot.lane.b32.xlu1 %v2360_v23, %s9616_s20 }
 0x418   :  { %2521 = vrot.lane.b32.xlu0 %v2359_v46, %s9616_s20 }
 0x419   :  { %v2182_v35 = vpop.permute.xlu1 %2181 }
 0x41a   :  { %2317 = vst.msk [vmem:[#allocation3 + $0x1c8] sm:$0xff] %vm2259_vm6, %v2182_v35  ;;  %v2180_v56 = vpop.permute.xlu0 %2179 }
 0x41b   :  { %2316 = vst.msk [vmem:[#allocation3 + $0x1c0] sm:$0xff] %vm2259_vm6, %v2180_v56  ;;  %2513 = vrot.lane.b32.xlu2 %v2355_v24, %s9616_s20  ;;  %v2713_v24 = vld [vmem:[#allocation2 + $0x51] sm:$0xff] }
 0x41c   :  { %v2388_v56 = vld [vmem:[#allocation2 + $0x350] sm:$0xff] }
 0x41d   :  { %v2190_v5 = vpop.permute.xlu2 %2189 }
 0x41e   :  { %2321 = vst.msk [vmem:[#allocation3 + $0x1e8] sm:$0xff] %vm2259_vm6, %v2190_v5  ;;  %v2717_v5 = vld [vmem:[#allocation2 + $0x81] sm:$0xff] }
 0x41f   :  { %2529 = vrot.lane.b32.xlu1 %v2363_v1, %s9616_s20 }
 0x420   :  { %2527 = vrot.lane.b32.xlu0 %v2362_v45, %s9616_s20 }
 0x421   :  { %v2188_v12 = vpop.permute.xlu1 %2187 }
 0x422   :  { %2320 = vst.msk [vmem:[#allocation3 + $0x1e0] sm:$0xff] %vm2259_vm6, %v2188_v12  ;;  %v2186_v50 = vpop.permute.xlu0 %2185 }
 0x423   :  { %2319 = vst.msk [vmem:[#allocation3 + $0x1d8] sm:$0xff] %vm2259_vm6, %v2186_v50  ;;  %2519 = vrot.lane.b32.xlu2 %v2358_v55, %s9616_s20  ;;  %v2716_v55 = vld [vmem:[#allocation2 + $0x79] sm:$0xff]  ;;  %v2712_v50 = vld [vmem:[#allocation2 + $0x49] sm:$0xff] }
 0x425   :  { %v2454_v11 = vpop.permute.xlu2 %2453 }
 0x426   :  { %2646 = vst.msk [vmem:[#allocation3] sm:$0xff] %vm2645_vm7, %v2454_v11  ;;  %v2720_v11 = vld [vmem:[#allocation2 + $0xa9] sm:$0xff] }
 0x427   :  { %2535 = vrot.lane.b32.xlu1 %v2366_v18, %s9616_s20 }
 0x428   :  { %2533 = vrot.lane.b32.xlu0 %v2365_v25, %s9616_s20 }
 0x429   :  { %v2194_v30 = vpop.permute.xlu1 %2193 }
 0x42a   :  { %2323 = vst.msk [vmem:[#allocation3 + $0x1f8] sm:$0xff] %vm2259_vm6, %v2194_v30  ;;  %v2192_v39 = vpop.permute.xlu0 %2191 }
 0x42b   :  { %2322 = vst.msk [vmem:[#allocation3 + $0x1f0] sm:$0xff] %vm2259_vm6, %v2192_v39  ;;  %2525 = vrot.lane.b32.xlu2 %v2361_v2, %s9616_s20  ;;  %v2719_v2 = vld [vmem:[#allocation2 + $0x99] sm:$0xff]  ;;  %v2715_v39 = vld [vmem:[#allocation2 + $0x69] sm:$0xff]  ;;  %vm7052_vm6 = vcmask 458112  }
 0x42d   :  { %v2460_v51 = vpop.permute.xlu2 %2459 }
 0x42e   :  { %2649 = vst.msk [vmem:[#allocation3 + $0x18] sm:$0xff] %vm2645_vm7, %v2460_v51  ;;  %v2723_v51 = vld [vmem:[#allocation2 + $0xc9] sm:$0xff] }
 0x42f   :  { %2541 = vrot.lane.b32.xlu1 %v2369_v13, %s9616_s20 }
 0x430   :  { %2539 = vrot.lane.b32.xlu0 %v2368_v43, %s9616_s20 }
 0x431   :  { %v2458_v58 = vpop.permute.xlu1 %2457 }
 0x432   :  { %2648 = vst.msk [vmem:[#allocation3 + $0x10] sm:$0xff] %vm2645_vm7, %v2458_v58  ;;  %v2456_v63 = vpop.permute.xlu0 %2455 }
 0x433   :  { %2647 = vst.msk [vmem:[#allocation3 + $0x8] sm:$0xff] %vm2645_vm7, %v2456_v63  ;;  %2531 = vrot.lane.b32.xlu2 %v2364_v26, %s9616_s20  ;;  %v2722_v26 = vld [vmem:[#allocation2 + $0xc1] sm:$0xff]  ;;  %v2718_v63 = vld [vmem:[#allocation2 + $0x91] sm:$0xff] }
 0x435   :  { %v2466_v7 = vpop.permute.xlu2 %2465 }
 0x436   :  { %2652 = vst.msk [vmem:[#allocation3 + $0x30] sm:$0xff] %vm2645_vm7, %v2466_v7  ;;  %v2726_v7 = vld [vmem:[#allocation2 + $0xf1] sm:$0xff] }
 0x437   :  { %2547 = vrot.lane.b32.xlu1 %v2372_v32, %s9616_s20 }
 0x438   :  { %2545 = vrot.lane.b32.xlu0 %v2371_v40, %s9616_s20 }
 0x439   :  { %v2464_v17 = vpop.permute.xlu1 %2463 }
 0x43a   :  { %2651 = vst.msk [vmem:[#allocation3 + $0x28] sm:$0xff] %vm2645_vm7, %v2464_v17  ;;  %v2462_v52 = vpop.permute.xlu0 %2461 }
 0x43b   :  { %2650 = vst.msk [vmem:[#allocation3 + $0x20] sm:$0xff] %vm2645_vm7, %v2462_v52  ;;  %2537 = vrot.lane.b32.xlu2 %v2367_v15, %s9616_s20  ;;  %v2725_v15 = vld [vmem:[#allocation2 + $0xe1] sm:$0xff]  ;;  %v2721_v52 = vld [vmem:[#allocation2 + $0xb1] sm:$0xff] }
 0x43d   :  { %v2472_v37 = vpop.permute.xlu2 %2471 }
 0x43e   :  { %2655 = vst.msk [vmem:[#allocation3 + $0x48] sm:$0xff] %vm2645_vm7, %v2472_v37  ;;  %v2729_v37 = vld [vmem:[#allocation2 + $0x111] sm:$0xff] }
 0x43f   :  { %2553 = vrot.lane.b32.xlu1 %v2375_v21, %s9616_s20 }
 0x440   :  { %2551 = vrot.lane.b32.xlu0 %v2374_v29, %s9616_s20 }
 0x441   :  { %v2470_v16 = vpop.permute.xlu1 %2469 }
 0x442   :  { %2654 = vst.msk [vmem:[#allocation3 + $0x40] sm:$0xff] %vm2645_vm7, %v2470_v16  ;;  %v2468_v57 = vpop.permute.xlu0 %2467 }
 0x443   :  { %2653 = vst.msk [vmem:[#allocation3 + $0x38] sm:$0xff] %vm2645_vm7, %v2468_v57  ;;  %2543 = vrot.lane.b32.xlu2 %v2370_v48, %s9616_s20  ;;  %v2728_v48 = vld [vmem:[#allocation2 + $0x109] sm:$0xff]  ;;  %v2724_v57 = vld [vmem:[#allocation2 + $0xd9] sm:$0xff] }
 0x445   :  { %v2478_v31 = vpop.permute.xlu2 %2477 }
 0x446   :  { %2658 = vst.msk [vmem:[#allocation3 + $0x60] sm:$0xff] %vm2645_vm7, %v2478_v31  ;;  %v2732_v31 = vld [vmem:[#allocation2 + $0x139] sm:$0xff] }
 0x447   :  { %2559 = vrot.lane.b32.xlu1 %v2378_v3, %s9616_s20 }
 0x448   :  { %2557 = vrot.lane.b32.xlu0 %v2377_v0, %s9616_s20 }
 0x449   :  { %v2476_v20 = vpop.permute.xlu1 %2475 }
 0x44a   :  { %2657 = vst.msk [vmem:[#allocation3 + $0x58] sm:$0xff] %vm2645_vm7, %v2476_v20  ;;  %v2474_v49 = vpop.permute.xlu0 %2473 }
 0x44b   :  { %2656 = vst.msk [vmem:[#allocation3 + $0x50] sm:$0xff] %vm2645_vm7, %v2474_v49  ;;  %2549 = vrot.lane.b32.xlu2 %v2373_v9, %s9616_s20  ;;  %v2731_v9 = vld [vmem:[#allocation2 + $0x129] sm:$0xff]  ;;  %v2727_v49 = vld [vmem:[#allocation2 + $0xf9] sm:$0xff] }
 0x44d   :  { %v2484_v61 = vpop.permute.xlu2 %2483 }
 0x44e   :  { %2661 = vst.msk [vmem:[#allocation3 + $0x78] sm:$0xff] %vm2645_vm7, %v2484_v61  ;;  %v2735_v61 = vld [vmem:[#allocation2 + $0x159] sm:$0xff] }
 0x44f   :  { %2565 = vrot.lane.b32.xlu1 %v2381_v27, %s9616_s20 }
 0x450   :  { %2563 = vrot.lane.b32.xlu0 %v2380_v42, %s9616_s20 }
 0x451   :  { %v2482_v59 = vpop.permute.xlu1 %2481 }
 0x452   :  { %2660 = vst.msk [vmem:[#allocation3 + $0x70] sm:$0xff] %vm2645_vm7, %v2482_v59  ;;  %v2480_v8 = vpop.permute.xlu0 %2479 }
 0x453   :  { %2659 = vst.msk [vmem:[#allocation3 + $0x68] sm:$0xff] %vm2645_vm7, %v2480_v8  ;;  %2555 = vrot.lane.b32.xlu2 %v2376_v4, %s9616_s20  ;;  %v2734_v4 = vld [vmem:[#allocation2 + $0x151] sm:$0xff]  ;;  %v2730_v8 = vld [vmem:[#allocation2 + $0x121] sm:$0xff] }
 0x455   :  { %v2490_v38 = vpop.permute.xlu2 %2489 }
 0x456   :  { %2664 = vst.msk [vmem:[#allocation3 + $0x90] sm:$0xff] %vm2645_vm7, %v2490_v38  ;;  %v2738_v38 = vld [vmem:[#allocation2 + $0x181] sm:$0xff] }
 0x457   :  { %2571 = vrot.lane.b32.xlu1 %v2384_v22, %s9616_s20 }
 0x458   :  { %2569 = vrot.lane.b32.xlu0 %v2383_v19, %s9616_s20 }
 0x459   :  { %v2488_v60 = vpop.permute.xlu1 %2487 }
 0x45a   :  { %2663 = vst.msk [vmem:[#allocation3 + $0x88] sm:$0xff] %vm2645_vm7, %v2488_v60  ;;  %v2486_v14 = vpop.permute.xlu0 %2485 }
 0x45b   :  { %2662 = vst.msk [vmem:[#allocation3 + $0x80] sm:$0xff] %vm2645_vm7, %v2486_v14  ;;  %2561 = vrot.lane.b32.xlu2 %v2379_v47, %s9616_s20  ;;  %v2737_v47 = vld [vmem:[#allocation2 + $0x171] sm:$0xff]  ;;  %v2733_v14 = vld [vmem:[#allocation2 + $0x141] sm:$0xff] }
 0x45d   :  { %v2496_v33 = vpop.permute.xlu2 %2495 }
 0x45e   :  { %2667 = vst.msk [vmem:[#allocation3 + $0xa8] sm:$0xff] %vm2645_vm7, %v2496_v33  ;;  %v2741_v33 = vld [vmem:[#allocation2 + $0x1a1] sm:$0xff] }
 0x45f   :  { %2577 = vrot.lane.b32.xlu1 %v2387_v10, %s9616_s20 }
 0x460   :  { %2575 = vrot.lane.b32.xlu0 %v2386_v28, %s9616_s20 }
 0x461   :  { %v2494_v6 = vpop.permute.xlu1 %2493 }
 0x462   :  { %2666 = vst.msk [vmem:[#allocation3 + $0xa0] sm:$0xff] %vm2645_vm7, %v2494_v6  ;;  %v2492_v53 = vpop.permute.xlu0 %2491 }
 0x463   :  { %2665 = vst.msk [vmem:[#allocation3 + $0x98] sm:$0xff] %vm2645_vm7, %v2492_v53  ;;  %2567 = vrot.lane.b32.xlu2 %v2382_v34, %s9616_s20  ;;  %v2740_v34 = vld [vmem:[#allocation2 + $0x199] sm:$0xff]  ;;  %v2736_v53 = vld [vmem:[#allocation2 + $0x169] sm:$0xff] }
 0x465   :  { %v2502_v36 = vpop.permute.xlu2 %2501 }
 0x466   :  { %2670 = vst.msk [vmem:[#allocation3 + $0xc0] sm:$0xff] %vm2645_vm7, %v2502_v36  ;;  %v2744_v36 = vld [vmem:[#allocation2 + $0x1f9] sm:$0xff] }
 0x467   :  { %2840 = vrot.lane.b32.xlu1 %v2711_v62, %s9617_s21 }
 0x468   :  { %2838 = vrot.lane.b32.xlu0 %v2710_v41, %s9617_s21 }
 0x469   :  { %v2500_v23 = vpop.permute.xlu1 %2499 }
 0x46a   :  { %2669 = vst.msk [vmem:[#allocation3 + $0xb8] sm:$0xff] %vm2645_vm7, %v2500_v23  ;;  %v2498_v46 = vpop.permute.xlu0 %2497 }
 0x46b   :  { %2668 = vst.msk [vmem:[#allocation3 + $0xb0] sm:$0xff] %vm2645_vm7, %v2498_v46  ;;  %2573 = vrot.lane.b32.xlu2 %v2385_v44, %s9616_s20  ;;  %v2743_v44 = vld [vmem:[#allocation2 + $0x1e9] sm:$0xff] }
 0x46c   :  { %v2739_v46 = vld [vmem:[#allocation2 + $0x189] sm:$0xff] }
 0x46d   :  { %v2508_v35 = vpop.permute.xlu2 %2507 }
 0x46e   :  { %2673 = vst.msk [vmem:[#allocation3 + $0xd8] sm:$0xff] %vm2645_vm7, %v2508_v35  ;;  %v2747_v35 = vld [vmem:[#allocation2 + $0x219] sm:$0xff] }
 0x46f   :  { %2846 = vrot.lane.b32.xlu1 %v2714_v54, %s9617_s21 }
 0x470   :  { %2844 = vrot.lane.b32.xlu0 %v2713_v24, %s9617_s21 }
 0x471   :  { %v2506_v1 = vpop.permute.xlu1 %2505 }
 0x472   :  { %2672 = vst.msk [vmem:[#allocation3 + $0xd0] sm:$0xff] %vm2645_vm7, %v2506_v1  ;;  %v2504_v45 = vpop.permute.xlu0 %2503 }
 0x473   :  { %2671 = vst.msk [vmem:[#allocation3 + $0xc8] sm:$0xff] %vm2645_vm7, %v2504_v45  ;;  %2579 = vrot.lane.b32.xlu2 %v2388_v56, %s9616_s20  ;;  %v2746_v56 = vld [vmem:[#allocation2 + $0x211] sm:$0xff]  ;;  %v2742_v45 = vld [vmem:[#allocation2 + $0x1e1] sm:$0xff] }
 0x475   :  { %v2514_v12 = vpop.permute.xlu2 %2513 }
 0x476   :  { %2676 = vst.msk [vmem:[#allocation3 + $0xf0] sm:$0xff] %vm2645_vm7, %v2514_v12  ;;  %v2750_v12 = vld [vmem:[#allocation2 + $0x241] sm:$0xff] }
 0x477   :  { %2852 = vrot.lane.b32.xlu1 %v2717_v5, %s9617_s21 }
 0x478   :  { %2850 = vrot.lane.b32.xlu0 %v2716_v55, %s9617_s21 }
 0x479   :  { %v2512_v18 = vpop.permute.xlu1 %2511 }
 0x47a   :  { %2675 = vst.msk [vmem:[#allocation3 + $0xe8] sm:$0xff] %vm2645_vm7, %v2512_v18  ;;  %v2510_v25 = vpop.permute.xlu0 %2509 }
 0x47b   :  { %2674 = vst.msk [vmem:[#allocation3 + $0xe0] sm:$0xff] %vm2645_vm7, %v2510_v25  ;;  %2842 = vrot.lane.b32.xlu2 %v2712_v50, %s9617_s21  ;;  %v2749_v50 = vld [vmem:[#allocation2 + $0x231] sm:$0xff]  ;;  %v2745_v25 = vld [vmem:[#allocation2 + $0x201] sm:$0xff] }
 0x47d   :  { %v2520_v30 = vpop.permute.xlu2 %2519 }
 0x47e   :  { %2679 = vst.msk [vmem:[#allocation3 + $0x108] sm:$0xff] %vm2645_vm7, %v2520_v30  ;;  %v2753_v30 = vld [vmem:[#allocation2 + $0x261] sm:$0xff] }
 0x47f   :  { %2858 = vrot.lane.b32.xlu1 %v2720_v11, %s9617_s21 }
 0x480   :  { %2856 = vrot.lane.b32.xlu0 %v2719_v2, %s9617_s21 }
 0x481   :  { %v2518_v13 = vpop.permute.xlu1 %2517 }
 0x482   :  { %2678 = vst.msk [vmem:[#allocation3 + $0x100] sm:$0xff] %vm2645_vm7, %v2518_v13  ;;  %v2516_v43 = vpop.permute.xlu0 %2515 }
 0x483   :  { %2677 = vst.msk [vmem:[#allocation3 + $0xf8] sm:$0xff] %vm2645_vm7, %v2516_v43  ;;  %2848 = vrot.lane.b32.xlu2 %v2715_v39, %s9617_s21  ;;  %v2752_v39 = vld [vmem:[#allocation2 + $0x259] sm:$0xff]  ;;  %v2748_v43 = vld [vmem:[#allocation2 + $0x229] sm:$0xff] }
 0x485   :  { %v2526_v58 = vpop.permute.xlu2 %2525 }
 0x486   :  { %2682 = vst.msk [vmem:[#allocation3 + $0x120] sm:$0xff] %vm2645_vm7, %v2526_v58  ;;  %v2756_v58 = vld [vmem:[#allocation2 + $0x289] sm:$0xff] }
 0x487   :  { %2864 = vrot.lane.b32.xlu1 %v2723_v51, %s9617_s21 }
 0x488   :  { %2862 = vrot.lane.b32.xlu0 %v2722_v26, %s9617_s21 }
 0x489   :  { %v2524_v32 = vpop.permute.xlu1 %2523 }
 0x48a   :  { %2681 = vst.msk [vmem:[#allocation3 + $0x118] sm:$0xff] %vm2645_vm7, %v2524_v32  ;;  %v2522_v40 = vpop.permute.xlu0 %2521 }
 0x48b   :  { %2680 = vst.msk [vmem:[#allocation3 + $0x110] sm:$0xff] %vm2645_vm7, %v2522_v40  ;;  %2854 = vrot.lane.b32.xlu2 %v2718_v63, %s9617_s21  ;;  %v2755_v63 = vld [vmem:[#allocation2 + $0x279] sm:$0xff]  ;;  %v2751_v40 = vld [vmem:[#allocation2 + $0x249] sm:$0xff] }
 0x48d   :  { %v2532_v17 = vpop.permute.xlu2 %2531 }
 0x48e   :  { %2685 = vst.msk [vmem:[#allocation3 + $0x138] sm:$0xff] %vm2645_vm7, %v2532_v17  ;;  %v2759_v17 = vld [vmem:[#allocation2 + $0x2a9] sm:$0xff] }
 0x48f   :  { %2870 = vrot.lane.b32.xlu1 %v2726_v7, %s9617_s21 }
 0x490   :  { %2868 = vrot.lane.b32.xlu0 %v2725_v15, %s9617_s21 }
 0x491   :  { %v2530_v21 = vpop.permute.xlu1 %2529 }
 0x492   :  { %2684 = vst.msk [vmem:[#allocation3 + $0x130] sm:$0xff] %vm2645_vm7, %v2530_v21  ;;  %v2528_v29 = vpop.permute.xlu0 %2527 }
 0x493   :  { %2683 = vst.msk [vmem:[#allocation3 + $0x128] sm:$0xff] %vm2645_vm7, %v2528_v29  ;;  %2860 = vrot.lane.b32.xlu2 %v2721_v52, %s9617_s21  ;;  %v2758_v52 = vld [vmem:[#allocation2 + $0x2a1] sm:$0xff]  ;;  %v2754_v29 = vld [vmem:[#allocation2 + $0x271] sm:$0xff] }
 0x495   :  { %v2538_v16 = vpop.permute.xlu2 %2537 }
 0x496   :  { %2688 = vst.msk [vmem:[#allocation3 + $0x150] sm:$0xff] %vm2645_vm7, %v2538_v16  ;;  %v2762_v16 = vld [vmem:[#allocation2 + $0x2d1] sm:$0xff] }
 0x497   :  { %2876 = vrot.lane.b32.xlu1 %v2729_v37, %s9617_s21 }
 0x498   :  { %2874 = vrot.lane.b32.xlu0 %v2728_v48, %s9617_s21 }
 0x499   :  { %v2536_v3 = vpop.permute.xlu1 %2535 }
 0x49a   :  { %2687 = vst.msk [vmem:[#allocation3 + $0x148] sm:$0xff] %vm2645_vm7, %v2536_v3  ;;  %v2534_v0 = vpop.permute.xlu0 %2533 }
 0x49b   :  { %2686 = vst.msk [vmem:[#allocation3 + $0x140] sm:$0xff] %vm2645_vm7, %v2534_v0  ;;  %2866 = vrot.lane.b32.xlu2 %v2724_v57, %s9617_s21  ;;  %v2761_v57 = vld [vmem:[#allocation2 + $0x2c1] sm:$0xff]  ;;  %v2757_v0 = vld [vmem:[#allocation2 + $0x291] sm:$0xff] }
 0x49d   :  { %v2544_v20 = vpop.permute.xlu2 %2543 }
 0x49e   :  { %2691 = vst.msk [vmem:[#allocation3 + $0x168] sm:$0xff] %vm2645_vm7, %v2544_v20  ;;  %v2765_v20 = vld [vmem:[#allocation2 + $0x2f1] sm:$0xff] }
 0x49f   :  { %2882 = vrot.lane.b32.xlu1 %v2732_v31, %s9617_s21 }
 0x4a0   :  { %2880 = vrot.lane.b32.xlu0 %v2731_v9, %s9617_s21 }
 0x4a1   :  { %v2542_v27 = vpop.permute.xlu1 %2541 }
 0x4a2   :  { %2690 = vst.msk [vmem:[#allocation3 + $0x160] sm:$0xff] %vm2645_vm7, %v2542_v27  ;;  %v2540_v42 = vpop.permute.xlu0 %2539 }
 0x4a3   :  { %2689 = vst.msk [vmem:[#allocation3 + $0x158] sm:$0xff] %vm2645_vm7, %v2540_v42  ;;  %2872 = vrot.lane.b32.xlu2 %v2727_v49, %s9617_s21  ;;  %v2764_v49 = vld [vmem:[#allocation2 + $0x2e9] sm:$0xff]  ;;  %v2760_v42 = vld [vmem:[#allocation2 + $0x2b9] sm:$0xff] }
 0x4a5   :  { %v2550_v59 = vpop.permute.xlu2 %2549 }
 0x4a6   :  { %2694 = vst.msk [vmem:[#allocation3 + $0x180] sm:$0xff] %vm2645_vm7, %v2550_v59  ;;  %v2768_v59 = vld [vmem:[#allocation2 + $0x319] sm:$0xff] }
 0x4a7   :  { %2888 = vrot.lane.b32.xlu1 %v2735_v61, %s9617_s21 }
 0x4a8   :  { %2886 = vrot.lane.b32.xlu0 %v2734_v4, %s9617_s21 }
 0x4a9   :  { %v2548_v22 = vpop.permute.xlu1 %2547 }
 0x4aa   :  { %2693 = vst.msk [vmem:[#allocation3 + $0x178] sm:$0xff] %vm2645_vm7, %v2548_v22  ;;  %v2546_v19 = vpop.permute.xlu0 %2545 }
 0x4ab   :  { %2692 = vst.msk [vmem:[#allocation3 + $0x170] sm:$0xff] %vm2645_vm7, %v2546_v19  ;;  %2878 = vrot.lane.b32.xlu2 %v2730_v8, %s9617_s21  ;;  %v2767_v8 = vld [vmem:[#allocation2 + $0x309] sm:$0xff]  ;;  %v2763_v19 = vld [vmem:[#allocation2 + $0x2d9] sm:$0xff] }
 0x4ad   :  { %v2556_v60 = vpop.permute.xlu2 %2555 }
 0x4ae   :  { %2697 = vst.msk [vmem:[#allocation3 + $0x198] sm:$0xff] %vm2645_vm7, %v2556_v60  ;;  %v2771_v60 = vld [vmem:[#allocation2 + $0x339] sm:$0xff] }
 0x4af   :  { %2894 = vrot.lane.b32.xlu1 %v2738_v38, %s9617_s21 }
 0x4b0   :  { %2892 = vrot.lane.b32.xlu0 %v2737_v47, %s9617_s21 }
 0x4b1   :  { %v2554_v10 = vpop.permute.xlu1 %2553 }
 0x4b2   :  { %2696 = vst.msk [vmem:[#allocation3 + $0x190] sm:$0xff] %vm2645_vm7, %v2554_v10  ;;  %v2552_v28 = vpop.permute.xlu0 %2551 }
 0x4b3   :  { %2695 = vst.msk [vmem:[#allocation3 + $0x188] sm:$0xff] %vm2645_vm7, %v2552_v28  ;;  %2884 = vrot.lane.b32.xlu2 %v2733_v14, %s9617_s21  ;;  %v2770_v14 = vld [vmem:[#allocation2 + $0x331] sm:$0xff]  ;;  %v2766_v28 = vld [vmem:[#allocation2 + $0x301] sm:$0xff] }
 0x4b5   :  { %v2562_v6 = vpop.permute.xlu2 %2561 }
 0x4b6   :  { %2700 = vst.msk [vmem:[#allocation3 + $0x1b0] sm:$0xff] %vm2645_vm7, %v2562_v6  ;;  %v3095_v6 = vld [vmem:[#allocation2 + $0x32] sm:$0xff] }
 0x4b7   :  { %2900 = vrot.lane.b32.xlu1 %v2741_v33, %s9617_s21 }
 0x4b8   :  { %2898 = vrot.lane.b32.xlu0 %v2740_v34, %s9617_s21 }
 0x4b9   :  { %v2560_v62 = vpop.permute.xlu1 %2559 }
 0x4ba   :  { %2699 = vst.msk [vmem:[#allocation3 + $0x1a8] sm:$0xff] %vm2645_vm7, %v2560_v62  ;;  %v2558_v41 = vpop.permute.xlu0 %2557 }
 0x4bb   :  { %2698 = vst.msk [vmem:[#allocation3 + $0x1a0] sm:$0xff] %vm2645_vm7, %v2558_v41  ;;  %2890 = vrot.lane.b32.xlu2 %v2736_v53, %s9617_s21  ;;  %v2773_v53 = vld [vmem:[#allocation2 + $0x351] sm:$0xff]  ;;  %v2769_v41 = vld [vmem:[#allocation2 + $0x321] sm:$0xff] }
 0x4bd   :  { %v2568_v23 = vpop.permute.xlu2 %2567 }
 0x4be   :  { %2703 = vst.msk [vmem:[#allocation3 + $0x1c8] sm:$0xff] %vm2645_vm7, %v2568_v23  ;;  %v3098_v23 = vld [vmem:[#allocation2 + $0x52] sm:$0xff] }
 0x4bf   :  { %2906 = vrot.lane.b32.xlu1 %v2744_v36, %s9617_s21 }
 0x4c0   :  { %2904 = vrot.lane.b32.xlu0 %v2743_v44, %s9617_s21 }
 0x4c1   :  { %v2566_v54 = vpop.permute.xlu1 %2565 }
 0x4c2   :  { %2702 = vst.msk [vmem:[#allocation3 + $0x1c0] sm:$0xff] %vm2645_vm7, %v2566_v54  ;;  %v2564_v24 = vpop.permute.xlu0 %2563 }
 0x4c3   :  { %2701 = vst.msk [vmem:[#allocation3 + $0x1b8] sm:$0xff] %vm2645_vm7, %v2564_v24  ;;  %2896 = vrot.lane.b32.xlu2 %v2739_v46, %s9617_s21  ;;  %v3097_v46 = vld [vmem:[#allocation2 + $0x4a] sm:$0xff] }
 0x4c4   :  { %v2772_v24 = vld [vmem:[#allocation2 + $0x349] sm:$0xff] }
 0x4c5   :  { %v2574_v1 = vpop.permute.xlu2 %2573 }
 0x4c6   :  { %2706 = vst.msk [vmem:[#allocation3 + $0x1e0] sm:$0xff] %vm2645_vm7, %v2574_v1  ;;  %v3101_v1 = vld [vmem:[#allocation2 + $0x7a] sm:$0xff] }
 0x4c7   :  { %2912 = vrot.lane.b32.xlu1 %v2747_v35, %s9617_s21 }
 0x4c8   :  { %2910 = vrot.lane.b32.xlu0 %v2746_v56, %s9617_s21 }
 0x4c9   :  { %v2572_v5 = vpop.permute.xlu1 %2571 }
 0x4ca   :  { %2705 = vst.msk [vmem:[#allocation3 + $0x1d8] sm:$0xff] %vm2645_vm7, %v2572_v5  ;;  %v2570_v55 = vpop.permute.xlu0 %2569  ;;  %v3100_v5 = vld [vmem:[#allocation2 + $0x6a] sm:$0xff] }
 0x4cb   :  { %2704 = vst.msk [vmem:[#allocation3 + $0x1d0] sm:$0xff] %vm2645_vm7, %v2570_v55  ;;  %2902 = vrot.lane.b32.xlu2 %v2742_v45, %s9617_s21  ;;  %v3096_v55 = vld [vmem:[#allocation2 + $0x3a] sm:$0xff] }
 0x4cd   :  { %v2580_v18 = vpop.permute.xlu2 %2579 }
 0x4ce   :  { %2709 = vst.msk [vmem:[#allocation3 + $0x1f8] sm:$0xff] %vm2645_vm7, %v2580_v18 }
 0x4cf   :  { %2918 = vrot.lane.b32.xlu1 %v2750_v12, %s9617_s21 }
 0x4d0   :  { %2916 = vrot.lane.b32.xlu0 %v2749_v50, %s9617_s21 }
 0x4d1   :  { %v2578_v11 = vpop.permute.xlu1 %2577 }
 0x4d2   :  { %2708 = vst.msk [vmem:[#allocation3 + $0x1f0] sm:$0xff] %vm2645_vm7, %v2578_v11  ;;  %v2576_v2 = vpop.permute.xlu0 %2575 }
 0x4d3   :  { %2707 = vst.msk [vmem:[#allocation3 + $0x1e8] sm:$0xff] %vm2645_vm7, %v2576_v2  ;;  %2908 = vrot.lane.b32.xlu2 %v2745_v25, %s9617_s21  ;;  %v3099_v25 = vld [vmem:[#allocation2 + $0x62] sm:$0xff]  ;;  %vm7437_vm7 = vcmask 523712  }
 0x4d5   :  { %v2843_v13 = vpop.permute.xlu2 %2842 }
 0x4d6   :  { %3033 = vst.msk [vmem:[#allocation3 + $0x10] sm:$0xff] %vm3030_vm8, %v2843_v13 }
 0x4d7   :  { %2924 = vrot.lane.b32.xlu1 %v2753_v30, %s9617_s21  ;;  %v3103_v30 = vld [vmem:[#allocation2 + $0x92] sm:$0xff] }
 0x4d8   :  { %2922 = vrot.lane.b32.xlu0 %v2752_v39, %s9617_s21 }
 0x4d9   :  { %v2841_v51 = vpop.permute.xlu1 %2840 }
 0x4da   :  { %3032 = vst.msk [vmem:[#allocation3 + $0x8] sm:$0xff] %vm3030_vm8, %v2841_v51  ;;  %v2839_v26 = vpop.permute.xlu0 %2838  ;;  %v3104_v51 = vld [vmem:[#allocation2 + $0x9a] sm:$0xff] }
 0x4db   :  { %3031 = vst.msk [vmem:[#allocation3] sm:$0xff] %vm3030_vm8, %v2839_v26  ;;  %2914 = vrot.lane.b32.xlu2 %v2748_v43, %s9617_s21 }
 0x4dd   :  { %v2849_v32 = vpop.permute.xlu2 %2848 }
 0x4de   :  { %3036 = vst.msk [vmem:[#allocation3 + $0x28] sm:$0xff] %vm3030_vm8, %v2849_v32  ;;  %v3102_v32 = vld [vmem:[#allocation2 + $0x82] sm:$0xff] }
 0x4df   :  { %2930 = vrot.lane.b32.xlu1 %v2756_v58, %s9617_s21 }
 0x4e0   :  { %2928 = vrot.lane.b32.xlu0 %v2755_v63, %s9617_s21 }
 0x4e1   :  { %v2847_v7 = vpop.permute.xlu1 %2846 }
 0x4e2   :  { %3035 = vst.msk [vmem:[#allocation3 + $0x20] sm:$0xff] %vm3030_vm8, %v2847_v7  ;;  %v2845_v15 = vpop.permute.xlu0 %2844 }
 0x4e3   :  { %3034 = vst.msk [vmem:[#allocation3 + $0x18] sm:$0xff] %vm3030_vm8, %v2845_v15  ;;  %2920 = vrot.lane.b32.xlu2 %v2751_v40, %s9617_s21 }
 0x4e5   :  { %v2855_v21 = vpop.permute.xlu2 %2854 }
 0x4e6   :  { %3039 = vst.msk [vmem:[#allocation3 + $0x40] sm:$0xff] %vm3030_vm8, %v2855_v21 }
 0x4e7   :  { %2936 = vrot.lane.b32.xlu1 %v2759_v17, %s9617_s21  ;;  %v3106_v17 = vld [vmem:[#allocation2 + $0xb2] sm:$0xff] }
 0x4e8   :  { %2934 = vrot.lane.b32.xlu0 %v2758_v52, %s9617_s21 }
 0x4e9   :  { %v2853_v37 = vpop.permute.xlu1 %2852 }
 0x4ea   :  { %3038 = vst.msk [vmem:[#allocation3 + $0x38] sm:$0xff] %vm3030_vm8, %v2853_v37  ;;  %v2851_v48 = vpop.permute.xlu0 %2850  ;;  %v3107_v37 = vld [vmem:[#allocation2 + $0xc2] sm:$0xff] }
 0x4eb   :  { %3037 = vst.msk [vmem:[#allocation3 + $0x30] sm:$0xff] %vm3030_vm8, %v2851_v48  ;;  %2926 = vrot.lane.b32.xlu2 %v2754_v29, %s9617_s21 }
 0x4ed   :  { %v2861_v3 = vpop.permute.xlu2 %2860 }
 0x4ee   :  { %3042 = vst.msk [vmem:[#allocation3 + $0x58] sm:$0xff] %vm3030_vm8, %v2861_v3  ;;  %v3105_v3 = vld [vmem:[#allocation2 + $0xaa] sm:$0xff] }
 0x4ef   :  { %2942 = vrot.lane.b32.xlu1 %v2762_v16, %s9617_s21 }
 0x4f0   :  { %2940 = vrot.lane.b32.xlu0 %v2761_v57, %s9617_s21 }
 0x4f1   :  { %v2859_v31 = vpop.permute.xlu1 %2858 }
 0x4f2   :  { %3041 = vst.msk [vmem:[#allocation3 + $0x50] sm:$0xff] %vm3030_vm8, %v2859_v31  ;;  %v2857_v9 = vpop.permute.xlu0 %2856 }
 0x4f3   :  { %3040 = vst.msk [vmem:[#allocation3 + $0x48] sm:$0xff] %vm3030_vm8, %v2857_v9  ;;  %2932 = vrot.lane.b32.xlu2 %v2757_v0, %s9617_s21 }
 0x4f5   :  { %v2867_v27 = vpop.permute.xlu2 %2866 }
 0x4f6   :  { %3045 = vst.msk [vmem:[#allocation3 + $0x70] sm:$0xff] %vm3030_vm8, %v2867_v27 }
 0x4f7   :  { %2948 = vrot.lane.b32.xlu1 %v2765_v20, %s9617_s21  ;;  %v3109_v20 = vld [vmem:[#allocation2 + $0xda] sm:$0xff] }
 0x4f8   :  { %2946 = vrot.lane.b32.xlu0 %v2764_v49, %s9617_s21  ;;  %v3548_v49 = vld [vmem:[%s15281_s1 + $0x20] sm:$0xf] }
 0x4f9   :  { %v2865_v61 = vpop.permute.xlu1 %2864  ;;  %9384 = vmatpush.msk.msra.mxu0 %vm3742_vm9, %v3548_v49  ;;  %9577 = vmatpush.msk.msra.mxu3 %vm3742_vm9, %v3548_v49  ;;  %v3123_v49 = vld [vmem:[#allocation2 + $0x182] sm:$0xff]  ;;  %vm7960_vm9 = vcmask 588800  }
 0x4fa   :  { %3044 = vst.msk [vmem:[#allocation3 + $0x68] sm:$0xff] %vm3030_vm8, %v2865_v61  ;;  %v2863_v4 = vpop.permute.xlu0 %2862 }
 0x4fb   :  { %3043 = vst.msk [vmem:[#allocation3 + $0x60] sm:$0xff] %vm3030_vm8, %v2863_v4  ;;  %2938 = vrot.lane.b32.xlu2 %v2760_v42, %s9617_s21  ;;  %v3547_v4 = vld [vmem:[%s15281_s1 + $0x18] sm:$0xff] }
 0x4fc   :  { %3758 = vmatpush.msra.mxu0 %v3547_v4  ;;  %9578 = vmatpush.msra.mxu3 %v3547_v4 }
 0x4fd   :  { %v2873_v22 = vpop.permute.xlu2 %2872 }
 0x4fe   :  { %3048 = vst.msk [vmem:[#allocation3 + $0x88] sm:$0xff] %vm3030_vm8, %v2873_v22  ;;  %v3545_v22 = vld [vmem:[%s15281_s1 + $0x8] sm:$0xff] }
 0x4ff   :  { %2954 = vrot.lane.b32.xlu1 %v2768_v59, %s9617_s21  ;;  %v3546_v59 = vld [vmem:[%s15281_s1 + $0x10] sm:$0xff] }
 0x500   :  { %2952 = vrot.lane.b32.xlu0 %v2767_v8, %s9617_s21  ;;  %v3110_v8 = vld [vmem:[#allocation2 + $0xe2] sm:$0xff]  ;;  %3759 = vmatpush.msra.mxu0 %v3546_v59 }
 0x501   :  { %v2871_v38 = vpop.permute.xlu1 %2870  ;;  %9579 = vmatpush.msra.mxu3 %v3546_v59 }
 0x502   :  { %3047 = vst.msk [vmem:[#allocation3 + $0x80] sm:$0xff] %vm3030_vm8, %v2871_v38  ;;  %v2869_v47 = vpop.permute.xlu0 %2868  ;;  %v3544_v38 = vld [vmem:[%s15281_s1] sm:$0xff]  ;;  %3760 = vmatpush.msra.mxu0 %v3545_v22 }
 0x503   :  { %3046 = vst.msk [vmem:[#allocation3 + $0x78] sm:$0xff] %vm3030_vm8, %v2869_v47  ;;  %2944 = vrot.lane.b32.xlu2 %v2763_v19, %s9617_s21  ;;  %9580 = vmatpush.msra.mxu3 %v3545_v22  ;;  %v3131_v22 = vld [vmem:[#allocation2 + $0x212] sm:$0xff] }
 0x504   :  { %3761 = vmatpush.msra.mxu0 %v3544_v38 }
 0x505   :  { %v2879_v10 = vpop.permute.xlu2 %2878  ;;  %9581 = vmatpush.msra.mxu3 %v3544_v38  ;;  %v3130_v38 = vld [vmem:[#allocation2 + $0x202] sm:$0xff] }
 0x506   :  { %3051 = vst.msk [vmem:[#allocation3 + $0xa0] sm:$0xff] %vm3030_vm8, %v2879_v10 }
 0x507   :  { %2960 = vrot.lane.b32.xlu1 %v2771_v60, %s9617_s21 }
 0x508   :  { %2958 = vrot.lane.b32.xlu0 %v2770_v14, %s9617_s21  ;;  %v3108_v14 = vld [vmem:[#allocation2 + $0xca] sm:$0xff] }
 0x509   :  { %v2877_v33 = vpop.permute.xlu1 %2876 }
 0x50a   :  { %3050 = vst.msk [vmem:[#allocation3 + $0x98] sm:$0xff] %vm3030_vm8, %v2877_v33  ;;  %v2875_v34 = vpop.permute.xlu0 %2874 }
 0x50b   :  { %3049 = vst.msk [vmem:[#allocation3 + $0x90] sm:$0xff] %vm3030_vm8, %v2875_v34  ;;  %2950 = vrot.lane.b32.xlu2 %v2766_v28, %s9617_s21  ;;  %v3112_v34 = vld [vmem:[#allocation2 + $0xfa] sm:$0xff] }
 0x50d   :  { %v2885_v62 = vpop.permute.xlu2 %2884 }
 0x50e   :  { %3054 = vst.msk [vmem:[#allocation3 + $0xb8] sm:$0xff] %vm3030_vm8, %v2885_v62 }
 0x50f   :  { %3223 = vrot.lane.b32.xlu1 %v3095_v6, %s9618_s22 }
 0x510   :  { %2964 = vrot.lane.b32.xlu0 %v2773_v53, %s9617_s21 }
 0x511   :  { %v2883_v36 = vpop.permute.xlu1 %2882 }
 0x512   :  { %3053 = vst.msk [vmem:[#allocation3 + $0xb0] sm:$0xff] %vm3030_vm8, %v2883_v36  ;;  %v2881_v44 = vpop.permute.xlu0 %2880 }
 0x513   :  { %3052 = vst.msk [vmem:[#allocation3 + $0xa8] sm:$0xff] %vm3030_vm8, %v2881_v44  ;;  %2956 = vrot.lane.b32.xlu2 %v2769_v41, %s9617_s21  ;;  %v3113_v41 = vld [vmem:[#allocation2 + $0x10a] sm:$0xff] }
 0x515   :  { %v2891_v54 = vpop.permute.xlu2 %2890 }
 0x516   :  { %3057 = vst.msk [vmem:[#allocation3 + $0xd0] sm:$0xff] %vm3030_vm8, %v2891_v54 }
 0x517   :  { %3229 = vrot.lane.b32.xlu1 %v3098_v23, %s9618_s22 }
 0x518   :  { %3227 = vrot.lane.b32.xlu0 %v3097_v46, %s9618_s22  ;;  %v3111_v46 = vld [vmem:[#allocation2 + $0xf2] sm:$0xff] }
 0x519   :  { %v2889_v35 = vpop.permute.xlu1 %2888 }
 0x51a   :  { %3056 = vst.msk [vmem:[#allocation3 + $0xc8] sm:$0xff] %vm3030_vm8, %v2889_v35  ;;  %v2887_v56 = vpop.permute.xlu0 %2886 }
 0x51b   :  { %3055 = vst.msk [vmem:[#allocation3 + $0xc0] sm:$0xff] %vm3030_vm8, %v2887_v56  ;;  %2962 = vrot.lane.b32.xlu2 %v2772_v24, %s9617_s21 }
 0x51d   :  { %v2897_v45 = vpop.permute.xlu2 %2896 }
 0x51e   :  { %3060 = vst.msk [vmem:[#allocation3 + $0xe8] sm:$0xff] %vm3030_vm8, %v2897_v45 }
 0x51f   :  { %3235 = vrot.lane.b32.xlu1 %v3101_v1, %s9618_s22  ;;  %v3115_v1 = vld [vmem:[#allocation2 + $0x122] sm:$0xff] }
 0x520   :  { %3233 = vrot.lane.b32.xlu0 %v3100_v5, %s9618_s22 }
 0x521   :  { %v2895_v12 = vpop.permute.xlu1 %2894 }
 0x522   :  { %3059 = vst.msk [vmem:[#allocation3 + $0xe0] sm:$0xff] %vm3030_vm8, %v2895_v12  ;;  %v2893_v50 = vpop.permute.xlu0 %2892  ;;  %v3116_v12 = vld [vmem:[#allocation2 + $0x12a] sm:$0xff] }
 0x523   :  { %3058 = vst.msk [vmem:[#allocation3 + $0xd8] sm:$0xff] %vm3030_vm8, %v2893_v50  ;;  %3225 = vrot.lane.b32.xlu2 %v3096_v55, %s9618_s22 }
 0x525   :  { %v2903_v18 = vpop.permute.xlu2 %2902 }
 0x526   :  { %3063 = vst.msk [vmem:[#allocation3 + $0x100] sm:$0xff] %vm3030_vm8, %v2903_v18 }
 0x527   :  { %3241 = vrot.lane.b32.xlu1 %v3104_v51, %s9618_s22 }
 0x528   :  { %3239 = vrot.lane.b32.xlu0 %v3103_v30, %s9618_s22  ;;  %v3118_v30 = vld [vmem:[#allocation2 + $0x142] sm:$0xff] }
 0x529   :  { %v2901_v11 = vpop.permute.xlu1 %2900 }
 0x52a   :  { %3062 = vst.msk [vmem:[#allocation3 + $0xf8] sm:$0xff] %vm3030_vm8, %v2901_v11  ;;  %v2899_v2 = vpop.permute.xlu0 %2898 }
 0x52b   :  { %3061 = vst.msk [vmem:[#allocation3 + $0xf0] sm:$0xff] %vm3030_vm8, %v2899_v2  ;;  %3231 = vrot.lane.b32.xlu2 %v3099_v25, %s9618_s22  ;;  %v3114_v25 = vld [vmem:[#allocation2 + $0x112] sm:$0xff] }
 0x52d   :  { %v2909_v39 = vpop.permute.xlu2 %2908 }
 0x52e   :  { %3066 = vst.msk [vmem:[#allocation3 + $0x118] sm:$0xff] %vm3030_vm8, %v2909_v39 }
 0x52f   :  { %3247 = vrot.lane.b32.xlu1 %v3107_v37, %s9618_s22 }
 0x530   :  { %3245 = vrot.lane.b32.xlu0 %v3106_v17, %s9618_s22  ;;  %v3122_v17 = vld [vmem:[#allocation2 + $0x172] sm:$0xff] }
 0x531   :  { %v2907_v13 = vpop.permute.xlu1 %2906 }
 0x532   :  { %3065 = vst.msk [vmem:[#allocation3 + $0x110] sm:$0xff] %vm3030_vm8, %v2907_v13  ;;  %v2905_v43 = vpop.permute.xlu0 %2904 }
 0x533   :  { %3064 = vst.msk [vmem:[#allocation3 + $0x108] sm:$0xff] %vm3030_vm8, %v2905_v43  ;;  %3237 = vrot.lane.b32.xlu2 %v3102_v32, %s9618_s22  ;;  %v3119_v43 = vld [vmem:[#allocation2 + $0x152] sm:$0xff] }
 0x535   :  { %v2915_v26 = vpop.permute.xlu2 %2914 }
 0x536   :  { %3069 = vst.msk [vmem:[#allocation3 + $0x130] sm:$0xff] %vm3030_vm8, %v2915_v26 }
 0x537   :  { %3253 = vrot.lane.b32.xlu1 %v3110_v8, %s9618_s22 }
 0x538   :  { %3251 = vrot.lane.b32.xlu0 %v3109_v20, %s9618_s22 }
 0x539   :  { %v2913_v58 = vpop.permute.xlu1 %2912 }
 0x53a   :  { %3068 = vst.msk [vmem:[#allocation3 + $0x128] sm:$0xff] %vm3030_vm8, %v2913_v58  ;;  %v2911_v63 = vpop.permute.xlu0 %2910  ;;  %v3117_v58 = vld [vmem:[#allocation2 + $0x13a] sm:$0xff] }
 0x53b   :  { %3067 = vst.msk [vmem:[#allocation3 + $0x120] sm:$0xff] %vm3030_vm8, %v2911_v63  ;;  %3243 = vrot.lane.b32.xlu2 %v3105_v3, %s9618_s22 }
 0x53d   :  { %v2921_v40 = vpop.permute.xlu2 %2920 }
 0x53e   :  { %3072 = vst.msk [vmem:[#allocation3 + $0x148] sm:$0xff] %vm3030_vm8, %v2921_v40  ;;  %v3121_v40 = vld [vmem:[#allocation2 + $0x16a] sm:$0xff] }
 0x53f   :  { %3259 = vrot.lane.b32.xlu1 %v3113_v41, %s9618_s22  ;;  %v3136_v41 = vld [vmem:[#allocation2 + $0x24a] sm:$0xff] }
 0x540   :  { %3257 = vrot.lane.b32.xlu0 %v3112_v34, %s9618_s22  ;;  %v3137_v34 = vld [vmem:[#allocation2 + $0x25a] sm:$0xff] }
 0x541   :  { %v2919_v7 = vpop.permute.xlu1 %2918 }
 0x542   :  { %3071 = vst.msk [vmem:[#allocation3 + $0x140] sm:$0xff] %vm3030_vm8, %v2919_v7  ;;  %v2917_v15 = vpop.permute.xlu0 %2916 }
 0x543   :  { %3070 = vst.msk [vmem:[#allocation3 + $0x138] sm:$0xff] %vm3030_vm8, %v2917_v15  ;;  %3249 = vrot.lane.b32.xlu2 %v3108_v14, %s9618_s22 }
 0x545   :  { %v2927_v52 = vpop.permute.xlu2 %2926 }
 0x546   :  { %3075 = vst.msk [vmem:[#allocation3 + $0x160] sm:$0xff] %vm3030_vm8, %v2927_v52 }
 0x547   :  { %3265 = vrot.lane.b32.xlu1 %v3116_v12, %s9618_s22  ;;  %v3138_v12 = vld [vmem:[#allocation2 + $0x262] sm:$0xff] }
 0x548   :  { %3263 = vrot.lane.b32.xlu0 %v3115_v1, %s9618_s22  ;;  %v3142_v1 = vld [vmem:[#allocation2 + $0x292] sm:$0xff] }
 0x549   :  { %v2925_v21 = vpop.permute.xlu1 %2924 }
 0x54a   :  { %3074 = vst.msk [vmem:[#allocation3 + $0x158] sm:$0xff] %vm3030_vm8, %v2925_v21  ;;  %v2923_v29 = vpop.permute.xlu0 %2922 }
 0x54b   :  { %3073 = vst.msk [vmem:[#allocation3 + $0x150] sm:$0xff] %vm3030_vm8, %v2923_v29  ;;  %3255 = vrot.lane.b32.xlu2 %v3111_v46, %s9618_s22  ;;  %v3120_v29 = vld [vmem:[#allocation2 + $0x15a] sm:$0xff]  ;;  %v3139_v46 = vld [vmem:[#allocation2 + $0x272] sm:$0xff] }
 0x54d   :  { %v2933_v48 = vpop.permute.xlu2 %2932 }
 0x54e   :  { %3078 = vst.msk [vmem:[#allocation3 + $0x178] sm:$0xff] %vm3030_vm8, %v2933_v48 }
 0x54f   :  { %3271 = vrot.lane.b32.xlu1 %v3119_v43, %s9618_s22 }
 0x550   :  { %3269 = vrot.lane.b32.xlu0 %v3118_v30, %s9618_s22  ;;  %v3141_v30 = vld [vmem:[#allocation2 + $0x28a] sm:$0xff] }
 0x551   :  { %v2931_v16 = vpop.permute.xlu1 %2930 }
 0x552   :  { %3077 = vst.msk [vmem:[#allocation3 + $0x170] sm:$0xff] %vm3030_vm8, %v2931_v16  ;;  %v2929_v57 = vpop.permute.xlu0 %2928  ;;  %v3124_v16 = vld [vmem:[#allocation2 + $0x18a] sm:$0xff] }
 0x553   :  { %3076 = vst.msk [vmem:[#allocation3 + $0x168] sm:$0xff] %vm3030_vm8, %v2929_v57  ;;  %3261 = vrot.lane.b32.xlu2 %v3114_v25, %s9618_s22  ;;  %v3125_v57 = vld [vmem:[#allocation2 + $0x19a] sm:$0xff] }
 0x555   :  { %v2939_v0 = vpop.permute.xlu2 %2938 }
 0x556   :  { %3081 = vst.msk [vmem:[#allocation3 + $0x190] sm:$0xff] %vm3030_vm8, %v2939_v0 }
 0x557   :  { %3277 = vrot.lane.b32.xlu1 %v3122_v17, %s9618_s22 }
 0x558   :  { %3275 = vrot.lane.b32.xlu0 %v3121_v40, %s9618_s22  ;;  %v3148_v40 = vld [vmem:[#allocation2 + $0x2da] sm:$0xff] }
 0x559   :  { %v2937_v31 = vpop.permute.xlu1 %2936 }
 0x55a   :  { %3080 = vst.msk [vmem:[#allocation3 + $0x188] sm:$0xff] %vm3030_vm8, %v2937_v31  ;;  %v2935_v9 = vpop.permute.xlu0 %2934  ;;  %v3128_v31 = vld [vmem:[#allocation2 + $0x1ea] sm:$0xff] }
 0x55b   :  { %3079 = vst.msk [vmem:[#allocation3 + $0x180] sm:$0xff] %vm3030_vm8, %v2935_v9  ;;  %3267 = vrot.lane.b32.xlu2 %v3117_v58, %s9618_s22 }
 0x55d   :  { %v2945_v27 = vpop.permute.xlu2 %2944 }
 0x55e   :  { %3084 = vst.msk [vmem:[#allocation3 + $0x1a8] sm:$0xff] %vm3030_vm8, %v2945_v27 }
 0x55f   :  { %3283 = vrot.lane.b32.xlu1 %v3125_v57, %s9618_s22 }
 0x560   :  { %3281 = vrot.lane.b32.xlu0 %v3124_v16, %s9618_s22 }
 0x561   :  { %v2943_v42 = vpop.permute.xlu1 %2942 }
 0x562   :  { %3083 = vst.msk [vmem:[#allocation3 + $0x1a0] sm:$0xff] %vm3030_vm8, %v2943_v42  ;;  %v2941_v61 = vpop.permute.xlu0 %2940  ;;  %v15355_v42 = vmov 0.0  }
 0x563   :  { %3082 = vst.msk [vmem:[#allocation3 + $0x198] sm:$0xff] %vm3030_vm8, %v2941_v61  ;;  %3273 = vrot.lane.b32.xlu2 %v3120_v29, %s9618_s22  ;;  %v3127_v61 = vld [vmem:[#allocation2 + $0x1e2] sm:$0xff] }
 0x564   :  { %4508 = vst.msk [vmem:[#allocation4 + $0x18] sm:$0xff] %vm3957_vm12, %v15355_v42 }
 0x565   :  { %v2951_v19 = vpop.permute.xlu2 %2950  ;;  %4509 = vst.msk [vmem:[#allocation4 + $0x20] sm:$0xff] %vm3957_vm12, %v15355_v42 }
 0x566   :  { %3087 = vst.msk [vmem:[#allocation3 + $0x1c0] sm:$0xff] %vm3030_vm8, %v2951_v19 }
 0x567   :  { %3289 = vrot.lane.b32.xlu1 %v3128_v31, %s9618_s22  ;;  %4504 = vst.msk [vmem:[#allocation4] sm:$0xff] %vm3957_vm12, %v15355_v42 }
 0x568   :  { %3287 = vrot.lane.b32.xlu0 %v3127_v61, %s9618_s22  ;;  %4505 = vst.msk [vmem:[#allocation4 + $0x8] sm:$0xff] %vm3957_vm12, %v15355_v42 }
 0x569   :  { %v2949_v47 = vpop.permute.xlu1 %2948  ;;  %4511 = vst.msk [vmem:[#allocation4 + $0x30] sm:$0xff] %vm3957_vm12, %v15355_v42 }
 0x56a   :  { %3086 = vst.msk [vmem:[#allocation3 + $0x1b8] sm:$0xff] %vm3030_vm8, %v2949_v47  ;;  %v2947_v60 = vpop.permute.xlu0 %2946  ;;  %v3134_v47 = vld [vmem:[#allocation2 + $0x232] sm:$0xff] }
 0x56b   :  { %3085 = vst.msk [vmem:[#allocation3 + $0x1b0] sm:$0xff] %vm3030_vm8, %v2947_v60  ;;  %3279 = vrot.lane.b32.xlu2 %v3123_v49, %s9618_s22  ;;  %v3152_v49 = vld [vmem:[#allocation2 + $0x30a] sm:$0xff] }
 0x56c   :  { %4512 = vst.msk [vmem:[#allocation4 + $0x38] sm:$0xff] %vm3957_vm12, %v15355_v42 }
 0x56d   :  { %v2957_v10 = vpop.permute.xlu2 %2956  ;;  %4514 = vst.msk [vmem:[#allocation4 + $0x48] sm:$0xff] %vm3957_vm12, %v15355_v42 }
 0x56e   :  { %3090 = vst.msk [vmem:[#allocation3 + $0x1d8] sm:$0xff] %vm3030_vm8, %v2957_v10 }
 0x56f   :  { %4515 = vst.msk [vmem:[#allocation4 + $0x50] sm:$0xff] %vm3957_vm12, %v15355_v42  ;;  %3295 = vrot.lane.b32.xlu1 %v3131_v22, %s9618_s22 }
 0x570   :  { %4517 = vst.msk [vmem:[#allocation4 + $0x60] sm:$0xff] %vm3957_vm12, %v15355_v42  ;;  %3293 = vrot.lane.b32.xlu0 %v3130_v38, %s9618_s22 }
 0x571   :  { %v2955_v28 = vpop.permute.xlu1 %2954  ;;  %4518 = vst.msk [vmem:[#allocation4 + $0x68] sm:$0xff] %vm3957_vm12, %v15355_v42 }
 0x572   :  { %3089 = vst.msk [vmem:[#allocation3 + $0x1d0] sm:$0xff] %vm3030_vm8, %v2955_v28  ;;  %v2953_v33 = vpop.permute.xlu0 %2952  ;;  %v3126_v28 = vld [vmem:[#allocation2 + $0x1a2] sm:$0xff] }
 0x573   :  { %3088 = vst.msk [vmem:[#allocation3 + $0x1c8] sm:$0xff] %vm3030_vm8, %v2953_v33  ;;  %3285 = vrot.lane.b32.xlu2 %v3126_v28, %s9618_s22  ;;  %v3133_v33 = vld [vmem:[#allocation2 + $0x22a] sm:$0xff] }
 0x574   :  { %4520 = vst.msk [vmem:[#allocation4 + $0x78] sm:$0xff] %vm3957_vm12, %v15355_v42 }
 0x575   :  { %v2963_v6 = vpop.permute.xlu2 %2962  ;;  %4521 = vst.msk [vmem:[#allocation4 + $0x80] sm:$0xff] %vm3957_vm12, %v15355_v42 }
 0x576   :  { %3093 = vst.msk [vmem:[#allocation3 + $0x1f0] sm:$0xff] %vm3030_vm8, %v2963_v6 }
 0x577   :  { %4523 = vst.msk [vmem:[#allocation4 + $0x90] sm:$0xff] %vm3957_vm12, %v15355_v42  ;;  %3301 = vrot.lane.b32.xlu1 %v3134_v47, %s9618_s22  ;;  %v3154_v47 = vld [vmem:[#allocation2 + $0x322] sm:$0xff] }
 0x578   :  { %4524 = vst.msk [vmem:[#allocation4 + $0x98] sm:$0xff] %vm3957_vm12, %v15355_v42  ;;  %3299 = vrot.lane.b32.xlu0 %v3133_v33, %s9618_s22 }
 0x579   :  { %v2961_v53 = vpop.permute.xlu1 %2960  ;;  %4526 = vst.msk [vmem:[#allocation4 + $0xa8] sm:$0xff] %vm3957_vm12, %v15355_v42 }
 0x57a   :  { %3092 = vst.msk [vmem:[#allocation3 + $0x1e8] sm:$0xff] %vm3030_vm8, %v2961_v53  ;;  %v2959_v62 = vpop.permute.xlu0 %2958 }
 0x57b   :  { %3091 = vst.msk [vmem:[#allocation3 + $0x1e0] sm:$0xff] %vm3030_vm8, %v2959_v62  ;;  %v3129_v62 = vld [vmem:[#allocation2 + $0x1fa] sm:$0xff] }
 0x57c   :  { %4527 = vst.msk [vmem:[#allocation4 + $0xb0] sm:$0xff] %vm3957_vm12, %v15355_v42  ;;  %3291 = vrot.lane.b32.xlu2 %v3129_v62, %s9618_s22 }
 0x57d   :  { %v3226_v36 = vpop.permute.xlu2 %3225  ;;  %4529 = vst.msk [vmem:[#allocation4 + $0xc0] sm:$0xff] %vm3957_vm12, %v15355_v42 }
 0x57e   :  { %3417 = vst.msk [vmem:[#allocation3 + $0x8] sm:$0xff] %vm3415_vm10, %v3226_v36  ;;  %v3140_v36 = vld [vmem:[#allocation2 + $0x27a] sm:$0xff] }
 0x57f   :  { %4530 = vst.msk [vmem:[#allocation4 + $0xc8] sm:$0xff] %vm3957_vm12, %v15355_v42  ;;  %3307 = vrot.lane.b32.xlu1 %v3137_v34, %s9618_s22 }
 0x580   :  { %4532 = vst.msk [vmem:[#allocation4 + $0xd8] sm:$0xff] %vm3957_vm12, %v15355_v42  ;;  %3305 = vrot.lane.b32.xlu0 %v3136_v41, %s9618_s22 }
 0x581   :  { %v3224_v44 = vpop.permute.xlu1 %3223  ;;  %4533 = vst.msk [vmem:[#allocation4 + $0xe0] sm:$0xff] %vm3957_vm12, %v15355_v42 }
 0x582   :  { %3416 = vst.msk [vmem:[#allocation3] sm:$0xff] %vm3415_vm10, %v3224_v44  ;;  %v2965_v23 = vpop.permute.xlu0 %2964 }
 0x583   :  { %3094 = vst.msk [vmem:[#allocation3 + $0x1f8] sm:$0xff] %vm3030_vm8, %v2965_v23  ;;  %v3132_v23 = vld [vmem:[#allocation2 + $0x21a] sm:$0xff]  ;;  %vm7822_vm8 = vcmask 589312  }
 0x584   :  { %4535 = vst.msk [vmem:[#allocation4 + $0xf0] sm:$0xff] %vm3957_vm12, %v15355_v42  ;;  %3297 = vrot.lane.b32.xlu2 %v3132_v23, %s9618_s22 }
 0x585   :  { %v3232_v54 = vpop.permute.xlu2 %3231  ;;  %v3481_v45 = vld [vmem:[#allocation3 + $0x8] sm:$0xff]  ;;  %4536 = vst.msk [vmem:[#allocation4 + $0xf8] sm:$0xff] %vm3957_vm12, %v15355_v42 }
 0x586   :  { %3420 = vst.msk [vmem:[#allocation3 + $0x20] sm:$0xff] %vm3415_vm10, %v3232_v54  ;;  %v3143_v54 = vld [vmem:[#allocation2 + $0x2a2] sm:$0xff] }
 0x587   :  { %4538 = vst.msk [vmem:[#allocation4 + $0x108] sm:$0xff] %vm3957_vm12, %v15355_v42  ;;  %3313 = vrot.lane.b32.xlu1 %v3140_v36, %s9618_s22 }
 0x588   :  { %4539 = vst.msk [vmem:[#allocation4 + $0x110] sm:$0xff] %vm3957_vm12, %v15355_v42  ;;  %3311 = vrot.lane.b32.xlu0 %v3139_v46, %s9618_s22 }
 0x589   :  { %v3480_v24 = vld [vmem:[#allocation3] sm:$0xff]  ;;  %v3230_v35 = vpop.permute.xlu1 %3229  ;;  %4541 = vst.msk [vmem:[#allocation4 + $0x120] sm:$0xff] %vm3957_vm12, %v15355_v42 }
 0x58a   :  { %9385 = vmatmul.msk.f32.vlgmr.msra.gmra.mxu0 %vm3549_vm11, %v3480_v24  ;;  %v3228_v56 = vpop.permute.xlu0 %3227  ;;  %3419 = vst.msk [vmem:[#allocation3 + $0x18] sm:$0xff] %vm3415_vm10, %v3230_v35 }
 0x58b   :  { %3418 = vst.msk [vmem:[#allocation3 + $0x10] sm:$0xff] %vm3415_vm10, %v3228_v56  ;;  %v3135_v56 = vld [vmem:[#allocation2 + $0x242] sm:$0xff] }
 0x58c   :  { %4542 = vst.msk [vmem:[#allocation4 + $0x128] sm:$0xff] %vm3957_vm12, %v15355_v42  ;;  %3303 = vrot.lane.b32.xlu2 %v3135_v56, %s9618_s22 }
 0x58d   :  { %v3238_v50 = vpop.permute.xlu2 %3237  ;;  %v3484_v13 = vld [vmem:[#allocation3 + $0x20] sm:$0xff]  ;;  %4544 = vst.msk [vmem:[#allocation4 + $0x138] sm:$0xff] %vm3957_vm12, %v15355_v42 }
 0x58e   :  { %3423 = vst.msk [vmem:[#allocation3 + $0x38] sm:$0xff] %vm3415_vm10, %v3238_v50  ;;  %v3145_v50 = vld [vmem:[#allocation2 + $0x2ba] sm:$0xff] }
 0x58f   :  { %4545 = vst.msk [vmem:[#allocation4 + $0x140] sm:$0xff] %vm3957_vm12, %v15355_v42  ;;  %3319 = vrot.lane.b32.xlu1 %v3143_v54, %s9618_s22  ;;  %v3153_v54 = vld [vmem:[#allocation2 + $0x31a] sm:$0xff] }
 0x590   :  { %4547 = vst.msk [vmem:[#allocation4 + $0x150] sm:$0xff] %vm3957_vm12, %v15355_v42  ;;  %3317 = vrot.lane.b32.xlu0 %v3142_v1, %s9618_s22 }
 0x591   :  { %v3236_v5 = vpop.permute.xlu1 %3235  ;;  %v3483_v2 = vld [vmem:[#allocation3 + $0x18] sm:$0xff]  ;;  %4548 = vst.msk [vmem:[#allocation4 + $0x158] sm:$0xff] %vm3957_vm12, %v15355_v42 }
 0x592   :  { %9386 = vmatmul.msk.f32.gmra.mxu0 %vm3549_vm11, %v3481_v45  ;;  %v3234_v55 = vpop.permute.xlu0 %3233  ;;  %3422 = vst.msk [vmem:[#allocation3 + $0x30] sm:$0xff] %vm3415_vm10, %v3236_v5  ;;  %v3482_v18 = vld [vmem:[#allocation3 + $0x10] sm:$0xff] }
 0x593   :  { %3421 = vst.msk [vmem:[#allocation3 + $0x28] sm:$0xff] %vm3415_vm10, %v3234_v55 }
 0x594   :  { %4550 = vst.msk [vmem:[#allocation4 + $0x168] sm:$0xff] %vm3957_vm12, %v15355_v42  ;;  %3309 = vrot.lane.b32.xlu2 %v3138_v12, %s9618_s22 }
 0x595   :  { %v3244_v51 = vpop.permute.xlu2 %3243  ;;  %v3487_v15 = vld [vmem:[#allocation3 + $0x38] sm:$0xff]  ;;  %4551 = vst.msk [vmem:[#allocation4 + $0x170] sm:$0xff] %vm3957_vm12, %v15355_v42 }
 0x596   :  { %3426 = vst.msk [vmem:[#allocation3 + $0x50] sm:$0xff] %vm3415_vm10, %v3244_v51 }
 0x597   :  { %4553 = vst.msk [vmem:[#allocation4 + $0x180] sm:$0xff] %vm3957_vm12, %v15355_v42 }
 0x598   :  { %4554 = vst.msk [vmem:[#allocation4 + $0x188] sm:$0xff] %vm3957_vm12, %v15355_v42  ;;  %3323 = vrot.lane.b32.xlu0 %v3145_v50, %s9618_s22  ;;  %v3157_v50 = vld [vmem:[#allocation2 + $0x34a] sm:$0xff] }
 0x599   :  { %v3242_v39 = vpop.permute.xlu1 %3241  ;;  %v3486_v32 = vld [vmem:[#allocation3 + $0x30] sm:$0xff]  ;;  %4556 = vst.msk [vmem:[#allocation4 + $0x198] sm:$0xff] %vm3957_vm12, %v15355_v42 }
 0x59a   :  { %9387 = vmatmul.msk.f32.gmra.mxu0 %vm3549_vm11, %v3482_v18  ;;  %v3240_v11 = vpop.permute.xlu0 %3239  ;;  %3425 = vst.msk [vmem:[#allocation3 + $0x48] sm:$0xff] %vm3415_vm10, %v3242_v39  ;;  %v3485_v26 = vld [vmem:[#allocation3 + $0x28] sm:$0xff] }
 0x59b   :  { %3424 = vst.msk [vmem:[#allocation3 + $0x40] sm:$0xff] %vm3415_vm10, %v3240_v11  ;;  %v3146_v39 = vld [vmem:[#allocation2 + $0x2c2] sm:$0xff] }
 0x59c   :  { %4557 = vst.msk [vmem:[#allocation4 + $0x1a0] sm:$0xff] %vm3957_vm12, %v15355_v42  ;;  %3315 = vrot.lane.b32.xlu2 %v3141_v30, %s9618_s22  ;;  %3325 = vrot.lane.b32.xlu1 %v3146_v39, %s9618_s22  ;;  %v3158_v39 = vld [vmem:[#allocation2 + $0x352] sm:$0xff] }
 0x59d   :  { %v3250_v52 = vpop.permute.xlu2 %3249  ;;  %v3490_v0 = vld [vmem:[#allocation3 + $0x50] sm:$0xff]  ;;  %4559 = vst.msk [vmem:[#allocation4 + $0x1b0] sm:$0xff] %vm3957_vm12, %v15355_v42 }
 0x59e   :  { %3429 = vst.msk [vmem:[#allocation3 + $0x68] sm:$0xff] %vm3415_vm10, %v3250_v52  ;;  %v3149_v52 = vld [vmem:[#allocation2 + $0x2ea] sm:$0xff] }
 0x59f   :  { %4560 = vst.msk [vmem:[#allocation4 + $0x1b8] sm:$0xff] %vm3957_vm12, %v15355_v42 }
 0x5a0   :  { %4562 = vst.msk [vmem:[#allocation4 + $0x1c8] sm:$0xff] %vm3957_vm12, %v15355_v42  ;;  %3329 = vrot.lane.b32.xlu0 %v3148_v40, %s9618_s22  ;;  %v3156_v40 = vld [vmem:[#allocation2 + $0x33a] sm:$0xff] }
 0x5a1   :  { %v3248_v7 = vpop.permute.xlu1 %3247  ;;  %v3489_v48 = vld [vmem:[#allocation3 + $0x48] sm:$0xff]  ;;  %4563 = vst.msk [vmem:[#allocation4 + $0x1d0] sm:$0xff] %vm3957_vm12, %v15355_v42 }
 0x5a2   :  { %9388 = vmatmul.msk.f32.gmra.mxu0 %vm3549_vm11, %v3483_v2  ;;  %v3246_v63 = vpop.permute.xlu0 %3245  ;;  %3428 = vst.msk [vmem:[#allocation3 + $0x60] sm:$0xff] %vm3415_vm10, %v3248_v7  ;;  %v3488_v21 = vld [vmem:[#allocation3 + $0x40] sm:$0xff] }
 0x5a3   :  { %3427 = vst.msk [vmem:[#allocation3 + $0x58] sm:$0xff] %vm3415_vm10, %v3246_v63 }
 0x5a4   :  { %4565 = vst.msk [vmem:[#allocation4 + $0x1e0] sm:$0xff] %vm3957_vm12, %v15355_v42  ;;  %3331 = vrot.lane.b32.xlu1 %v3149_v52, %s9618_s22 }
 0x5a5   :  { %v3256_v9 = vpop.permute.xlu2 %3255  ;;  %v3493_v4 = vld [vmem:[#allocation3 + $0x68] sm:$0xff]  ;;  %4566 = vst.msk [vmem:[#allocation4 + $0x1e8] sm:$0xff] %vm3957_vm12, %v15355_v42 }
 0x5a6   :  { %3432 = vst.msk [vmem:[#allocation3 + $0x80] sm:$0xff] %vm3415_vm10, %v3256_v9 }
 0x5a7   :  { %4568 = vst.msk [vmem:[#allocation4 + $0x1f8] sm:$0xff] %vm3957_vm12, %v15355_v42 }
 0x5a8   :  { %4569 = vst.msk [vmem:[#allocation4 + $0x200] sm:$0xff] %vm3957_vm12, %v15355_v42 }
 0x5a9   :  { %v3254_v3 = vpop.permute.xlu1 %3253  ;;  %v3492_v27 = vld [vmem:[#allocation3 + $0x60] sm:$0xff]  ;;  %4571 = vst.msk [vmem:[#allocation4 + $0x210] sm:$0xff] %vm3957_vm12, %v15355_v42 }
 0x5aa   :  { %9389 = vmatmul.msk.f32.gmra.mxu0 %vm3549_vm11, %v3484_v13  ;;  %v3252_v37 = vpop.permute.xlu0 %3251  ;;  %3431 = vst.msk [vmem:[#allocation3 + $0x78] sm:$0xff] %vm3415_vm10, %v3254_v3  ;;  %v3491_v20 = vld [vmem:[#allocation3 + $0x58] sm:$0xff]  ;;  %v3151_v3 = vld [vmem:[#allocation2 + $0x302] sm:$0xff] }
 0x5ab   :  { %3430 = vst.msk [vmem:[#allocation3 + $0x70] sm:$0xff] %vm3415_vm10, %v3252_v37  ;;  %v3147_v37 = vld [vmem:[#allocation2 + $0x2d2] sm:$0xff]  ;;  %3335 = vrot.lane.b32.xlu0 %v3151_v3, %s9618_s22 }
 0x5ac   :  { %4572 = vst.msk [vmem:[#allocation4 + $0x218] sm:$0xff] %vm3957_vm12, %v15355_v42  ;;  %3337 = vrot.lane.b32.xlu1 %v3152_v49, %s9618_s22 }
 0x5ad   :  { %v3496_v19 = vld [vmem:[#allocation3 + $0x80] sm:$0xff]  ;;  %4574 = vst.msk [vmem:[#allocation4 + $0x228] sm:$0xff] %vm3957_vm12, %v15355_v42  ;;  %v3262_v45 = vpop.permute.xlu2 %3261 }
 0x5ae   :  { %4575 = vst.msk [vmem:[#allocation4 + $0x230] sm:$0xff] %vm3957_vm12, %v15355_v42 }
 0x5af   :  { %4577 = vst.msk [vmem:[#allocation4 + $0x240] sm:$0xff] %vm3957_vm12, %v15355_v42 }
 0x5b0   :  { %4578 = vst.msk [vmem:[#allocation4 + $0x248] sm:$0xff] %vm3957_vm12, %v15355_v42 }
 0x5b1   :  { %v3495_v8 = vld [vmem:[#allocation3 + $0x78] sm:$0xff]  ;;  %4580 = vst.msk [vmem:[#allocation4 + $0x258] sm:$0xff] %vm3957_vm12, %v15355_v42  ;;  %v3260_v35 = vpop.permute.xlu1 %3259 }
 0x5b2   :  { %9390 = vmatmul.msk.f32.gmra.mxu0 %vm3549_vm11, %v3485_v26  ;;  %v3494_v59 = vld [vmem:[#allocation3 + $0x70] sm:$0xff]  ;;  %4581 = vst.msk [vmem:[#allocation4 + $0x260] sm:$0xff] %vm3957_vm12, %v15355_v42  ;;  %v3258_v14 = vpop.permute.xlu0 %3257 }
 0x5b3   :  { %4583 = vst.msk [vmem:[#allocation4 + $0x270] sm:$0xff] %vm3957_vm12, %v15355_v42  ;;  %v3144_v26 = vld [vmem:[#allocation2 + $0x2aa] sm:$0xff]  ;;  %3341 = vrot.lane.b32.xlu0 %v3154_v47, %s9618_s22 }
 0x5b4   :  { %4584 = vst.msk [vmem:[#allocation4 + $0x278] sm:$0xff] %vm3957_vm12, %v15355_v42  ;;  %3321 = vrot.lane.b32.xlu2 %v3144_v26, %s9618_s22 }
 0x5b5   :  { %4586 = vst.msk [vmem:[#allocation4 + $0x288] sm:$0xff] %vm3957_vm12, %v15355_v42  ;;  %v3268_v25 = vpop.permute.xlu2 %3267 }
 0x5b6   :  { %4587 = vst.msk [vmem:[#allocation4 + $0x290] sm:$0xff] %vm3957_vm12, %v15355_v42 }
 0x5b7   :  { %4589 = vst.msk [vmem:[#allocation4 + $0x2a0] sm:$0xff] %vm3957_vm12, %v15355_v42 }
 0x5b8   :  { %4590 = vst.msk [vmem:[#allocation4 + $0x2a8] sm:$0xff] %vm3957_vm12, %v15355_v42 }
 0x5b9   :  { %4592 = vst.msk [vmem:[#allocation4 + $0x2b8] sm:$0xff] %vm3957_vm12, %v15355_v42  ;;  %v3266_v55 = vpop.permute.xlu1 %3265 }
 0x5ba   :  { %9391 = vmatmul.msk.f32.gmra.mxu0 %vm3549_vm11, %v3486_v32  ;;  %4593 = vst.msk [vmem:[#allocation4 + $0x2c0] sm:$0xff] %vm3957_vm12, %v15355_v42  ;;  %v3264_v5 = vpop.permute.xlu0 %3263 }
 0x5bb   :  { %4595 = vst.msk [vmem:[#allocation4 + $0x2d0] sm:$0xff] %vm3957_vm12, %v15355_v42  ;;  %3347 = vrot.lane.b32.xlu0 %v3157_v50, %s9618_s22 }
 0x5bc   :  { %4596 = vst.msk [vmem:[#allocation4 + $0x2d8] sm:$0xff] %vm3957_vm12, %v15355_v42  ;;  %3327 = vrot.lane.b32.xlu2 %v3147_v37, %s9618_s22 }
 0x5bd   :  { %4598 = vst.msk [vmem:[#allocation4 + $0x2e8] sm:$0xff] %vm3957_vm12, %v15355_v42  ;;  %v3274_v58 = vpop.permute.xlu2 %3273 }
 0x5be   :  { %4599 = vst.msk [vmem:[#allocation4 + $0x2f0] sm:$0xff] %vm3957_vm12, %v15355_v42 }
 0x5bf   :  { %4601 = vst.msk [vmem:[#allocation4 + $0x300] sm:$0xff] %vm3957_vm12, %v15355_v42 }
 0x5c0   :  { %4602 = vst.msk [vmem:[#allocation4 + $0x308] sm:$0xff] %vm3957_vm12, %v15355_v42 }
 0x5c1   :  { %4604 = vst.msk [vmem:[#allocation4 + $0x318] sm:$0xff] %vm3957_vm12, %v15355_v42  ;;  %v3272_v13 = vpop.permute.xlu1 %3271 }
 0x5c2   :  { %9392 = vmatmul.msk.f32.gmra.mxu0 %vm3549_vm11, %v3487_v15  ;;  %4605 = vst.msk [vmem:[#allocation4 + $0x320] sm:$0xff] %vm3957_vm12, %v15355_v42  ;;  %v3270_v11 = vpop.permute.xlu0 %3269 }
 0x5c3   :  { %4607 = vst.msk [vmem:[#allocation4 + $0x330] sm:$0xff] %vm3957_vm12, %v15355_v42 }
 0x5c4   :  { %4608 = vst.msk [vmem:[#allocation4 + $0x338] sm:$0xff] %vm3957_vm12, %v15355_v42 }
 0x5c5   :  { %4610 = vst.msk [vmem:[#allocation4 + $0x348] sm:$0xff] %vm3957_vm12, %v15355_v42 }
 0x5c6   :  { %4611 = vst.msk [vmem:[#allocation4 + $0x350] sm:$0xff] %vm3957_vm12, %v15355_v42 }
 0x5c7   :  { %3433 = vst.msk [vmem:[#allocation3 + $0x88] sm:$0xff] %vm3415_vm10, %v3258_v14 }
 0x5c8   :  { %4510 = vst.msk [vmem:[#allocation4 + $0x28] sm:$0x3] %vm4506_vm13, %v15355_v42 }
 0x5c9   :  { %4507 = vst.msk [vmem:[#allocation4 + $0x10] sm:$0x3] %vm4506_vm13, %v15355_v42 }
 0x5ca   :  { %9393 = vmatmul.msk.f32.gmra.mxu0 %vm3549_vm11, %v3488_v21  ;;  %4513 = vst.msk [vmem:[#allocation4 + $0x40] sm:$0x3] %vm4506_vm13, %v15355_v42  ;;  %v3276_v7 = vpop.permute.xlu0 %3275  ;;  %v3278_v21 = vpop.permute.xlu1 %3277 }
 0x5cb   :  { %4516 = vst.msk [vmem:[#allocation4 + $0x58] sm:$0x3] %vm4506_vm13, %v15355_v42 }
 0x5cc   :  { %4519 = vst.msk [vmem:[#allocation4 + $0x70] sm:$0x3] %vm4506_vm13, %v15355_v42 }
 0x5cd   :  { %4522 = vst.msk [vmem:[#allocation4 + $0x88] sm:$0x3] %vm4506_vm13, %v15355_v42 }
 0x5ce   :  { %4525 = vst.msk [vmem:[#allocation4 + $0xa0] sm:$0x3] %vm4506_vm13, %v15355_v42  ;;  %v3497_v6 = vld [vmem:[#allocation3 + $0x88] sm:$0xff] }
 0x5cf   :  { %4528 = vst.msk [vmem:[#allocation4 + $0xb8] sm:$0x3] %vm4506_vm13, %v15355_v42 }
 0x5d0   :  { %4531 = vst.msk [vmem:[#allocation4 + $0xd0] sm:$0x3] %vm4506_vm13, %v15355_v42 }
 0x5d1   :  { %4534 = vst.msk [vmem:[#allocation4 + $0xe8] sm:$0x3] %vm4506_vm13, %v15355_v42 }
 0x5d2   :  { %9394 = vmatmul.msk.f32.gmra.mxu0 %vm3549_vm11, %v3489_v48  ;;  %4537 = vst.msk [vmem:[#allocation4 + $0x100] sm:$0x3] %vm4506_vm13, %v15355_v42  ;;  %v3280_v48 = vpop.permute.xlu2 %3279 }
 0x5d3   :  { %4540 = vst.msk [vmem:[#allocation4 + $0x118] sm:$0x3] %vm4506_vm13, %v15355_v42 }
 0x5d4   :  { %4543 = vst.msk [vmem:[#allocation4 + $0x130] sm:$0x3] %vm4506_vm13, %v15355_v42 }
 0x5d5   :  { %4546 = vst.msk [vmem:[#allocation4 + $0x148] sm:$0x3] %vm4506_vm13, %v15355_v42 }
 0x5d6   :  { %4549 = vst.msk [vmem:[#allocation4 + $0x160] sm:$0x3] %vm4506_vm13, %v15355_v42 }
 0x5d7   :  { %4552 = vst.msk [vmem:[#allocation4 + $0x178] sm:$0x3] %vm4506_vm13, %v15355_v42 }
 0x5d8   :  { %4555 = vst.msk [vmem:[#allocation4 + $0x190] sm:$0x3] %vm4506_vm13, %v15355_v42 }
 0x5d9   :  { %4558 = vst.msk [vmem:[#allocation4 + $0x1a8] sm:$0x3] %vm4506_vm13, %v15355_v42 }
 0x5da   :  { %9395 = vmatmul.msk.f32.gmra.mxu0 %vm3549_vm11, %v3490_v0  ;;  %4561 = vst.msk [vmem:[#allocation4 + $0x1c0] sm:$0x3] %vm4506_vm13, %v15355_v42  ;;  %v3282_v0 = vpop.permute.xlu0 %3281  ;;  %v3286_v61 = vpop.permute.xlu2 %3285 }
 0x5db   :  { %4564 = vst.msk [vmem:[#allocation4 + $0x1d8] sm:$0x3] %vm4506_vm13, %v15355_v42 }
 0x5dc   :  { %4567 = vst.msk [vmem:[#allocation4 + $0x1f0] sm:$0x3] %vm4506_vm13, %v15355_v42 }
 0x5dd   :  { %4570 = vst.msk [vmem:[#allocation4 + $0x208] sm:$0x3] %vm4506_vm13, %v15355_v42 }
 0x5de   :  { %4573 = vst.msk [vmem:[#allocation4 + $0x220] sm:$0x3] %vm4506_vm13, %v15355_v42 }
 0x5df   :  { %4576 = vst.msk [vmem:[#allocation4 + $0x238] sm:$0x3] %vm4506_vm13, %v15355_v42 }
 0x5e0   :  { %4579 = vst.msk [vmem:[#allocation4 + $0x250] sm:$0x3] %vm4506_vm13, %v15355_v42 }
 0x5e1   :  { %4582 = vst.msk [vmem:[#allocation4 + $0x268] sm:$0x3] %vm4506_vm13, %v15355_v42 }
 0x5e2   :  { %9396 = vmatmul.msk.f32.gmra.mxu0 %vm3549_vm11, %v3491_v20  ;;  %4585 = vst.msk [vmem:[#allocation4 + $0x280] sm:$0x3] %vm4506_vm13, %v15355_v42  ;;  %v3284_v20 = vpop.permute.xlu1 %3283  ;;  %v3288_v38 = vpop.permute.xlu0 %3287 }
 0x5e3   :  { %4588 = vst.msk [vmem:[#allocation4 + $0x298] sm:$0x3] %vm4506_vm13, %v15355_v42 }
 0x5e4   :  { %4591 = vst.msk [vmem:[#allocation4 + $0x2b0] sm:$0x3] %vm4506_vm13, %v15355_v42 }
 0x5e5   :  { %4594 = vst.msk [vmem:[#allocation4 + $0x2c8] sm:$0x3] %vm4506_vm13, %v15355_v42 }
 0x5e6   :  { %4597 = vst.msk [vmem:[#allocation4 + $0x2e0] sm:$0x3] %vm4506_vm13, %v15355_v42 }
 0x5e7   :  { %4600 = vst.msk [vmem:[#allocation4 + $0x2f8] sm:$0x3] %vm4506_vm13, %v15355_v42 }
 0x5e8   :  { %4603 = vst.msk [vmem:[#allocation4 + $0x310] sm:$0x3] %vm4506_vm13, %v15355_v42 }
 0x5e9   :  { %4606 = vst.msk [vmem:[#allocation4 + $0x328] sm:$0x3] %vm4506_vm13, %v15355_v42 }
 0x5ea   :  { %9397 = vmatmul.msk.f32.gmra.mxu0 %vm3549_vm11, %v3492_v27  ;;  %4609 = vst.msk [vmem:[#allocation4 + $0x340] sm:$0x3] %vm4506_vm13, %v15355_v42  ;;  %v3294_v34 = vpop.permute.xlu0 %3293 }
 0x5eb   :  { %4612 = vst.msk [vmem:[#allocation4 + $0x358] sm:$0x3] %vm4506_vm13, %v15355_v42 }
 0x5ec   :  { %3434 = vst.msk [vmem:[#allocation3 + $0x90] sm:$0xff] %vm3415_vm10, %v3260_v35 }
 0x5ed   :  { %3435 = vst.msk [vmem:[#allocation3 + $0x98] sm:$0xff] %vm3415_vm10, %v3262_v45 }
 0x5ee   :  { %3436 = vst.msk [vmem:[#allocation3 + $0xa0] sm:$0xff] %vm3415_vm10, %v3264_v5 }
 0x5ef   :  { %3437 = vst.msk [vmem:[#allocation3 + $0xa8] sm:$0xff] %vm3415_vm10, %v3266_v55 }
 0x5f0   :  { %3438 = vst.msk [vmem:[#allocation3 + $0xb0] sm:$0xff] %vm3415_vm10, %v3268_v25 }
 0x5f1   :  { %3439 = vst.msk [vmem:[#allocation3 + $0xb8] sm:$0xff] %vm3415_vm10, %v3270_v11 }
 0x5f2   :  { %9398 = vmatmul.msk.f32.gmra.mxu0 %vm3549_vm11, %v3493_v4  ;;  %3440 = vst.msk [vmem:[#allocation3 + $0xc0] sm:$0xff] %vm3415_vm10, %v3272_v13  ;;  %v3290_v4 = vpop.permute.xlu1 %3289  ;;  %v3300_v46 = vpop.permute.xlu0 %3299 }
 0x5f3   :  { %v3498_v2 = vld [vmem:[#allocation3 + $0x90] sm:$0xff]  ;;  %3441 = vst.msk [vmem:[#allocation3 + $0xc8] sm:$0xff] %vm3415_vm10, %v3274_v58 }
 0x5f4   :  { %v3499_v51 = vld [vmem:[#allocation3 + $0x98] sm:$0xff]  ;;  %3442 = vst.msk [vmem:[#allocation3 + $0xd0] sm:$0xff] %vm3415_vm10, %v3276_v7 }
 0x5f5   :  { %v3500_v63 = vld [vmem:[#allocation3 + $0xa0] sm:$0xff]  ;;  %3443 = vst.msk [vmem:[#allocation3 + $0xd8] sm:$0xff] %vm3415_vm10, %v3278_v21 }
 0x5f6   :  { %v3501_v15 = vld [vmem:[#allocation3 + $0xa8] sm:$0xff]  ;;  %3444 = vst.msk [vmem:[#allocation3 + $0xe0] sm:$0xff] %vm3415_vm10, %v3280_v48 }
 0x5f7   :  { %v3502_v29 = vld [vmem:[#allocation3 + $0xb0] sm:$0xff]  ;;  %3445 = vst.msk [vmem:[#allocation3 + $0xe8] sm:$0xff] %vm3415_vm10, %v3282_v0 }
 0x5f8   :  { %v3503_v57 = vld [vmem:[#allocation3 + $0xb8] sm:$0xff]  ;;  %3446 = vst.msk [vmem:[#allocation3 + $0xf0] sm:$0xff] %vm3415_vm10, %v3284_v20 }
 0x5f9   :  { %v3504_v9 = vld [vmem:[#allocation3 + $0xc0] sm:$0xff]  ;;  %3447 = vst.msk [vmem:[#allocation3 + $0xf8] sm:$0xff] %vm3415_vm10, %v3286_v61 }
 0x5fa   :  { %9399 = vmatmul.msk.f32.gmra.mxu0 %vm3549_vm11, %v3494_v59  ;;  %v3505_v27 = vld [vmem:[#allocation3 + $0xc8] sm:$0xff]  ;;  %v3150_v59 = vld [vmem:[#allocation2 + $0x2f2] sm:$0xff]  ;;  %3449 = vst.msk [vmem:[#allocation3 + $0x108] sm:$0xff] %vm3415_vm10, %v3290_v4  ;;  %v3296_v14 = vpop.permute.xlu1 %3295  ;;  %v3306_v5 = vpop.permute.xlu0 %3305 }
 0x5fb   :  { %3333 = vrot.lane.b32.xlu2 %v3150_v59, %s9618_s22  ;;  %3448 = vst.msk [vmem:[#allocation3 + $0x100] sm:$0xff] %vm3415_vm10, %v3288_v38 }
 0x5fc   :  { %3452 = vst.msk [vmem:[#allocation3 + $0x120] sm:$0xff] %vm3415_vm10, %v3296_v14  ;;  %v3507_v28 = vld [vmem:[#allocation3 + $0xd8] sm:$0xff] }
 0x5fd   :  { %3451 = vst.msk [vmem:[#allocation3 + $0x118] sm:$0xff] %vm3415_vm10, %v3294_v34  ;;  %v3508_v36 = vld [vmem:[#allocation3 + $0xe0] sm:$0xff] }
 0x5fe   :  { %3454 = vst.msk [vmem:[#allocation3 + $0x130] sm:$0xff] %vm3415_vm10, %v3300_v46  ;;  %v3509_v1 = vld [vmem:[#allocation3 + $0xe8] sm:$0xff] }
 0x5ff   :  { %3457 = vst.msk [vmem:[#allocation3 + $0x148] sm:$0xff] %vm3415_vm10, %v3306_v5  ;;  %v3510_v25 = vld [vmem:[#allocation3 + $0xf0] sm:$0xff] }
 0x600   :  { %v3511_v13 = vld [vmem:[#allocation3 + $0xf8] sm:$0xff] }
 0x602   :  { %9400 = vmatmul.msk.f32.gmra.mxu0 %vm3549_vm11, %v3495_v8  ;;  %v3506_v8 = vld [vmem:[#allocation3 + $0xd0] sm:$0xff]  ;;  %v3302_v62 = vpop.permute.xlu1 %3301  ;;  %v3512_v7 = vld [vmem:[#allocation3 + $0x100] sm:$0xff] }
 0x603   :  { %3455 = vst.msk [vmem:[#allocation3 + $0x138] sm:$0xff] %vm3415_vm10, %v3302_v62  ;;  %3339 = vrot.lane.b32.xlu2 %v3153_v54, %s9618_s22  ;;  %v3516_v59 = vld [vmem:[#allocation3 + $0x120] sm:$0xff] }
 0x604   :  { %v3515_v49 = vld [vmem:[#allocation3 + $0x118] sm:$0xff] }
 0x605   :  { %v3518_v34 = vld [vmem:[#allocation3 + $0x130] sm:$0xff] }
 0x606   :  { %v3521_v50 = vld [vmem:[#allocation3 + $0x148] sm:$0xff] }
 0x607   :  { %v11542_v60 = vpop.f32.mrf.mxu0 }
 0x60a   :  { %9401 = vmatmul.msk.f32.gmra.mxu0 %vm3549_vm11, %v3496_v19  ;;  %v3292_v19 = vpop.permute.xlu2 %3291  ;;  %v3308_v35 = vpop.permute.xlu1 %3307 }
 0x60b   :  { %3450 = vst.msk [vmem:[#allocation3 + $0x110] sm:$0xff] %vm3415_vm10, %v3292_v19  ;;  %3345 = vrot.lane.b32.xlu2 %v3156_v40, %s9618_s22 }
 0x60c   :  { %3458 = vst.msk [vmem:[#allocation3 + $0x150] sm:$0xff] %vm3415_vm10, %v3308_v35 }
 0x60f   :  { %v11566_v10 = vpop.f32.mrf.mxu0 }
 0x612   :  { %9402 = vmatmul.msk.f32.gmra.mxu0 %vm3549_vm11, %v3497_v6  ;;  %v3298_v33 = vpop.permute.xlu2 %3297  ;;  %v3155_v6 = vld [vmem:[#allocation2 + $0x332] sm:$0xff]  ;;  %v3314_v55 = vpop.permute.xlu1 %3313 }
 0x613   :  { %3453 = vst.msk [vmem:[#allocation3 + $0x128] sm:$0xff] %vm3415_vm10, %v3298_v33  ;;  %3343 = vrot.lane.b32.xlu1 %v3155_v6, %s9618_s22  ;;  %v3514_v3 = vld [vmem:[#allocation3 + $0x110] sm:$0xff] }
 0x614   :  { %3461 = vst.msk [vmem:[#allocation3 + $0x168] sm:$0xff] %vm3415_vm10, %v3314_v55 }
 0x617   :  { %v11591_v53 = vpop.f32.mrf.mxu0 }
 0x61a   :  { %9403 = vmatmul.msk.f32.gmra.mxu0 %vm3549_vm11, %v3498_v2  ;;  %v3304_v23 = vpop.permute.xlu2 %3303  ;;  %v3312_v2 = vpop.permute.xlu0 %3311  ;;  %v3517_v47 = vld [vmem:[#allocation3 + $0x128] sm:$0xff] }
 0x61b   :  { %3456 = vst.msk [vmem:[#allocation3 + $0x140] sm:$0xff] %vm3415_vm10, %v3304_v23  ;;  %v3320_v30 = vpop.permute.xlu1 %3319  ;;  %3349 = vrot.lane.b32.xlu1 %v3158_v39, %s9618_s22  ;;  %v3519_v23 = vld [vmem:[#allocation3 + $0x138] sm:$0xff] }
 0x61c   :  { %3460 = vst.msk [vmem:[#allocation3 + $0x160] sm:$0xff] %vm3415_vm10, %v3312_v2 }
 0x61d   :  { %3464 = vst.msk [vmem:[#allocation3 + $0x180] sm:$0xff] %vm3415_vm10, %v3320_v30  ;;  %v3522_v30 = vld [vmem:[#allocation3 + $0x150] sm:$0xff] }
 0x61f   :  { %v11616_v44 = vpop.f32.mrf.mxu0 }
 0x622   :  { %9404 = vmatmul.msk.f32.gmra.mxu0 %vm3549_vm11, %v3499_v51  ;;  %v3310_v45 = vpop.permute.xlu2 %3309  ;;  %v3318_v58 = vpop.permute.xlu0 %3317 }
 0x623   :  { %3459 = vst.msk [vmem:[#allocation3 + $0x158] sm:$0xff] %vm3415_vm10, %v3310_v45  ;;  %v3326_v37 = vpop.permute.xlu1 %3325 }
 0x624   :  { %3463 = vst.msk [vmem:[#allocation3 + $0x178] sm:$0xff] %vm3415_vm10, %v3318_v58 }
 0x625   :  { %3467 = vst.msk [vmem:[#allocation3 + $0x198] sm:$0xff] %vm3415_vm10, %v3326_v37 }
 0x627   :  { %v11641_v24 = vpop.f32.mrf.mxu0 }
 0x62a   :  { %9405 = vmatmul.msk.f32.gmra.mxu0 %vm3549_vm11, %v3500_v63  ;;  %v3316_v11 = vpop.permute.xlu2 %3315  ;;  %v3528_v63 = vld [vmem:[#allocation3 + $0x180] sm:$0xff]  ;;  %v3523_v58 = vld [vmem:[#allocation3 + $0x158] sm:$0xff] }
 0x62b   :  { %3462 = vst.msk [vmem:[#allocation3 + $0x170] sm:$0xff] %vm3415_vm10, %v3316_v11  ;;  %9433 = vmatmul.msk.f32.vlgmr.msra.gmra.mxu3 %vm3549_vm11, %v3528_v63 }
 0x62f   :  { %v11663_v18 = vpop.f32.mrf.mxu0 }
 0x632   :  { %9406 = vmatmul.msk.f32.gmra.mxu0 %vm3549_vm11, %v3501_v15  ;;  %v3322_v26 = vpop.permute.xlu2 %3321  ;;  %v3324_v15 = vpop.permute.xlu0 %3323 }
 0x633   :  { %3465 = vst.msk [vmem:[#allocation3 + $0x188] sm:$0xff] %vm3415_vm10, %v3322_v26 }
 0x634   :  { %3466 = vst.msk [vmem:[#allocation3 + $0x190] sm:$0xff] %vm3415_vm10, %v3324_v15  ;;  %v3524_v15 = vld [vmem:[#allocation3 + $0x160] sm:$0xff] }
 0x637   :  { %v11675_v43 = vpop.f32.mrf.mxu0 }
 0x63a   :  { %9407 = vmatmul.msk.f32.gmra.mxu0 %vm3549_vm11, %v3502_v29  ;;  %v3529_v52 = vld [vmem:[#allocation3 + $0x188] sm:$0xff]  ;;  %v3328_v0 = vpop.permute.xlu2 %3327 }
 0x63b   :  { %9434 = vmatmul.msk.f32.gmra.mxu3 %vm3549_vm11, %v3529_v52  ;;  %v3513_v29 = vld [vmem:[#allocation3 + $0x108] sm:$0xff]  ;;  %v3530_v48 = vld [vmem:[#allocation3 + $0x190] sm:$0xff]  ;;  %3468 = vst.msk [vmem:[#allocation3 + $0x1a0] sm:$0xff] %vm3415_vm10, %v3328_v0 }
 0x63f   :  { %v11680_v32 = vpop.f32.mrf.mxu0 }
 0x642   :  { %9408 = vmatmul.msk.f32.gmra.mxu0 %vm3549_vm11, %v3503_v57  ;;  %v3532_v61 = vld [vmem:[#allocation3 + $0x1a0] sm:$0xff] }
 0x643   :  { %9435 = vmatmul.msk.f32.gmra.mxu3 %vm3549_vm11, %v3530_v48  ;;  %v3525_v48 = vld [vmem:[#allocation3 + $0x168] sm:$0xff] }
 0x647   :  { %v11685_v17 = vpop.f32.mrf.mxu0 }
 0x64a   :  { %9409 = vmatmul.msk.f32.gmra.mxu0 %vm3549_vm11, %v3504_v9  ;;  %v3531_v9 = vld [vmem:[#allocation3 + $0x198] sm:$0xff] }
 0x64b   :  { %9436 = vmatmul.msk.f32.gmra.mxu3 %vm3549_vm11, %v3531_v9 }
 0x64f   :  { %v11691_v16 = vpop.f32.mrf.mxu0 }
 0x652   :  { %9410 = vmatmul.msk.f32.gmra.mxu0 %vm3549_vm11, %v3505_v27  ;;  %v3330_v27 = vpop.permute.xlu0 %3329 }
 0x653   :  { %3469 = vst.msk [vmem:[#allocation3 + $0x1a8] sm:$0xff] %vm3415_vm10, %v3330_v27  ;;  %9437 = vmatmul.msk.f32.gmra.mxu3 %vm3549_vm11, %v3532_v61 }
 0x655   :  { %v3334_v14 = vpop.permute.xlu2 %3333 }
 0x656   :  { %3471 = vst.msk [vmem:[#allocation3 + $0x1b8] sm:$0xff] %vm3415_vm10, %v3334_v14 }
 0x657   :  { %v11698_v31 = vpop.f32.mrf.mxu0 }
 0x65a   :  { %9411 = vmatmul.msk.f32.gmra.mxu0 %vm3549_vm11, %v3506_v8  ;;  %v3332_v8 = vpop.permute.xlu1 %3331  ;;  %v3533_v19 = vld [vmem:[#allocation3 + $0x1a8] sm:$0xff]  ;;  %v3336_v6 = vpop.permute.xlu0 %3335 }
 0x65b   :  { %3470 = vst.msk [vmem:[#allocation3 + $0x1b0] sm:$0xff] %vm3415_vm10, %v3332_v8  ;;  %9438 = vmatmul.msk.f32.gmra.mxu3 %vm3549_vm11, %v3533_v19 }
 0x65c   :  { %3472 = vst.msk [vmem:[#allocation3 + $0x1c0] sm:$0xff] %vm3415_vm10, %v3336_v6 }
 0x65d   :  { %v3535_v62 = vld [vmem:[#allocation3 + $0x1b8] sm:$0xff]  ;;  %v3340_v45 = vpop.permute.xlu2 %3339 }
 0x65e   :  { %3474 = vst.msk [vmem:[#allocation3 + $0x1d0] sm:$0xff] %vm3415_vm10, %v3340_v45  ;;  %v3958_v45 = vsel %vm3957_vm12, %v11542_v60, 0.0 }
 0x65f   :  { %v11703_v42 = vpop.f32.mrf.mxu0 }
 0x662   :  { %9412 = vmatmul.msk.f32.gmra.mxu0 %vm3549_vm11, %v3507_v28  ;;  %v3534_v28 = vld [vmem:[#allocation3 + $0x1b0] sm:$0xff]  ;;  %v3338_v46 = vpop.permute.xlu1 %3337 }
 0x663   :  { %9439 = vmatmul.msk.f32.gmra.mxu3 %vm3549_vm11, %v3534_v28  ;;  %v3536_v54 = vld [vmem:[#allocation3 + $0x1c0] sm:$0xff]  ;;  %3473 = vst.msk [vmem:[#allocation3 + $0x1c8] sm:$0xff] %vm3415_vm10, %v3338_v46  ;;  %v4092_v46 = vmul.f32 %v11542_v60, %v11542_v60 }
 0x665   :  { %v3538_v11 = vld [vmem:[#allocation3 + $0x1d0] sm:$0xff]  ;;  %v3346_v63 = vpop.permute.xlu2 %3345 }
 0x666   :  { %3477 = vst.msk [vmem:[#allocation3 + $0x1e8] sm:$0xff] %vm3415_vm10, %v3346_v63 }
 0x667   :  { %v11709_v22 = vpop.f32.mrf.mxu0 }
 0x668   :  { %15356 = vst [vmem:[#allocation8_spill] sm:$0xff] %v11709_v22 }
 0x66a   :  { %9413 = vmatmul.msk.f32.gmra.mxu0 %vm3549_vm11, %v3508_v36  ;;  %v3537_v5 = vld [vmem:[#allocation3 + $0x1c8] sm:$0xff] }
 0x66b   :  { %9440 = vmatmul.msk.f32.gmra.mxu3 %vm3549_vm11, %v3535_v62  ;;  %v4093_v62 = vmul.f32 %v11566_v10, %v11566_v10 }
 0x66f   :  { %v11719_v41 = vpop.f32.mrf.mxu0 }
 0x670   :  { %15357 = vst [vmem:[#allocation6_spill] sm:$0xff] %v11719_v41 }
 0x672   :  { %9414 = vmatmul.msk.f32.gmra.mxu0 %vm3549_vm11, %v3509_v1  ;;  %v3520_v1 = vld [vmem:[#allocation3 + $0x140] sm:$0xff] }
 0x673   :  { %9441 = vmatmul.msk.f32.gmra.mxu3 %vm3549_vm11, %v3536_v54  ;;  %v3959_v54 = vsel %vm3957_vm12, %v11566_v10, 0.0 }
 0x677   :  { %v11728_v56 = vpop.f32.mrf.mxu0 }
 0x678   :  { %15358 = vst [vmem:[#allocation7_spill] sm:$0xff] %v11728_v56 }
 0x67a   :  { %9415 = vmatmul.msk.f32.gmra.mxu0 %vm3549_vm11, %v3510_v25  ;;  %v3342_v25 = vpop.permute.xlu0 %3341 }
 0x67b   :  { %9442 = vmatmul.msk.f32.gmra.mxu3 %vm3549_vm11, %v3537_v5  ;;  %3475 = vst.msk [vmem:[#allocation3 + $0x1d8] sm:$0xff] %vm3415_vm10, %v3342_v25  ;;  %v4157_v5 = vsel %vm3957_vm12, %v4093_v62, 0.0  ;;  %v4095_v25 = vmul.f32 %v11616_v44, %v11616_v44 }
 0x67f   :  { %v11734_v12 = vpop.f32.mrf.mxu0 }
 0x680   :  { %15359 = vst [vmem:[#allocation9_spill] sm:$0xff] %v11734_v12 }
 0x682   :  { %9416 = vmatmul.msk.f32.gmra.mxu0 %vm3549_vm11, %v3511_v13  ;;  %v3539_v13 = vld [vmem:[#allocation3 + $0x1d8] sm:$0xff]  ;;  %v3348_v52 = vpop.permute.xlu0 %3347 }
 0x683   :  { %9443 = vmatmul.msk.f32.gmra.mxu3 %vm3549_vm11, %v3538_v11  ;;  %3478 = vst.msk [vmem:[#allocation3 + $0x1f0] sm:$0xff] %vm3415_vm10, %v3348_v52  ;;  %v3960_v11 = vadd.f32 %v3959_v54, %v3958_v45  ;;  %v4161_v52 = vsel %vm3957_vm12, %v4095_v25, 0.0  ;;  %v3969_v45 = vsel %vm3957_vm12, %v11675_v43, 0.0 }
 0x685   :  { %v3344_v39 = vpop.permute.xlu1 %3343 }
 0x686   :  { %3476 = vst.msk [vmem:[#allocation3 + $0x1e0] sm:$0xff] %vm3415_vm10, %v3344_v39 }
 0x687   :  { %v11743_v51 = vpop.f32.mrf.mxu0 }
 0x688   :  { %15360 = vst [vmem:[#allocation10_spill] sm:$0xff] %v11743_v51 }
 0x68a   :  { %9417 = vmatmul.msk.f32.gmra.mxu0 %vm3549_vm11, %v3512_v7  ;;  %v3542_v0 = vld [vmem:[#allocation3 + $0x1f0] sm:$0xff] }
 0x68b   :  { %9444 = vmatmul.msk.f32.gmra.mxu3 %vm3549_vm11, %v3539_v13  ;;  %v3963_v13 = vsel %vm3957_vm12, %v11616_v44, 0.0 }
 0x68d   :  { %v3540_v40 = vld [vmem:[#allocation3 + $0x1e0] sm:$0xff] }
 0x68f   :  { %v11751_v21 = vpop.f32.mrf.mxu0 }
 0x690   :  { %15361 = vst [vmem:[#allocation11_spill] sm:$0xff] %v11751_v21 }
 0x692   :  { %9418 = vmatmul.msk.f32.gmra.mxu0 %vm3549_vm11, %v3513_v29  ;;  %v3541_v29 = vld [vmem:[#allocation3 + $0x1e8] sm:$0xff] }
 0x693   :  { %9445 = vmatmul.msk.f32.gmra.mxu3 %vm3549_vm11, %v3540_v40 }
 0x697   :  { %v11757_v57 = vpop.f32.mrf.mxu0 }
 0x698   :  { %15362 = vst [vmem:[#allocation12_spill] sm:$0xff] %v11757_v57 }
 0x69a   :  { %9419 = vmatmul.msk.f32.gmra.mxu0 %vm3549_vm11, %v3514_v3  ;;  %v3350_v3 = vpop.permute.xlu1 %3349 }
 0x69b   :  { %9446 = vmatmul.msk.f32.gmra.mxu3 %vm3549_vm11, %v3541_v29  ;;  %3479 = vst.msk [vmem:[#allocation3 + $0x1f8] sm:$0xff] %vm3415_vm10, %v3350_v3  ;;  %v3965_v29 = vsel %vm3957_vm12, %v11641_v24, 0.0 }
 0x69f   :  { %v11762_v20 = vpop.f32.mrf.mxu0 }
 0x6a0   :  { %15363 = vst [vmem:[#allocation13_spill] sm:$0xff] %v11762_v20 }
 0x6a2   :  { %9420 = vmatmul.msk.f32.gmra.mxu0 %vm3549_vm11, %v3515_v49  ;;  %v3526_v49 = vld [vmem:[#allocation3 + $0x170] sm:$0xff]  ;;  %v3543_v27 = vld [vmem:[#allocation3 + $0x1f8] sm:$0xff] }
 0x6a3   :  { %9447 = vmatmul.msk.f32.gmra.mxu3 %vm3549_vm11, %v3542_v0 }
 0x6a7   :  { %v11767_v4 = vpop.f32.mrf.mxu0 }
 0x6a8   :  { %15364 = vst [vmem:[#allocation14_spill] sm:$0xff] %v11767_v4 }
 0x6aa   :  { %9421 = vmatmul.msk.f32.gmra.mxu0 %vm3549_vm11, %v3516_v59  ;;  %v3527_v59 = vld [vmem:[#allocation3 + $0x178] sm:$0xff] }
 0x6ab   :  { %9448 = vmatmul.msk.f32.gmra.mxu3 %vm3549_vm11, %v3543_v27  ;;  %v3967_v27 = vsel %vm3957_vm12, %v11663_v18, 0.0 }
 0x6ae   :  { %v11826_v19 = vpop.f32.mrf.mxu3 }
 0x6af   :  { %v11772_v38 = vpop.f32.mrf.mxu0 }
 0x6b0   :  { %15365 = vst [vmem:[#allocation15_spill] sm:$0xff] %v11772_v38 }
 0x6b2   :  { %9422 = vmatmul.msk.f32.gmra.mxu0 %vm3549_vm11, %v3517_v47 }
 0x6b7   :  { %v11777_v33 = vpop.f32.mrf.mxu0 }
 0x6b8   :  { %15366 = vst [vmem:[#allocation16_spill] sm:$0xff] %v11777_v33 }
 0x6ba   :  { %9423 = vmatmul.msk.f32.gmra.mxu0 %vm3549_vm11, %v3518_v34 }
 0x6be   :  { %v11830_v14 = vpop.f32.mrf.mxu3 }
 0x6bf   :  { %v11782_v36 = vpop.f32.mrf.mxu0 }
 0x6c0   :  { %15367 = vst [vmem:[#allocation17_spill] sm:$0xff] %v11782_v36 }
 0x6c2   :  { %9424 = vmatmul.msk.f32.gmra.mxu0 %vm3549_vm11, %v3519_v23 }
 0x6c6   :  { %v11834_v34 = vpop.f32.mrf.mxu3 }
 0x6c7   :  { %v11787_v35 = vpop.f32.mrf.mxu0 }
 0x6c8   :  { %15368 = vst [vmem:[#allocation18_spill] sm:$0xff] %v11787_v35 }
 0x6ca   :  { %9425 = vmatmul.msk.f32.gmra.mxu0 %vm3549_vm11, %v3520_v1  ;;  %v4094_v1 = vmul.f32 %v11591_v53, %v11591_v53 }
 0x6cc   :  { %v4159_v39 = vsel %vm3957_vm12, %v4094_v1, 0.0 }
 0x6ce   :  { %v11840_v23 = vpop.f32.mrf.mxu3 }
 0x6cf   :  { %v11792_v55 = vpop.f32.mrf.mxu0 }
 0x6d0   :  { %15369 = vst [vmem:[#allocation19_spill] sm:$0xff] %v11792_v55 }
 0x6d2   :  { %9426 = vmatmul.msk.f32.gmra.mxu0 %vm3549_vm11, %v3521_v50  ;;  %v3961_v50 = vsel %vm3957_vm12, %v11591_v53, 0.0 }
 0x6d3   :  { %v3962_v40 = vadd.f32 %v3961_v50, %v3960_v11 }
 0x6d5   :  { %v3964_v0 = vadd.f32 %v3963_v13, %v3962_v40 }
 0x6d6   :  { %v11873_v54 = vpop.f32.mrf.mxu3 }
 0x6d7   :  { %v11797_v2 = vpop.f32.mrf.mxu0 }
 0x6d8   :  { %15370 = vst [vmem:[#allocation20_spill] sm:$0xff] %v11797_v2 }
 0x6da   :  { %9427 = vmatmul.msk.f32.gmra.mxu0 %vm3549_vm11, %v3522_v30  ;;  %v4156_v30 = vsel %vm3957_vm12, %v4092_v46, 0.0  ;;  %v3966_v46 = vadd.f32 %v3965_v29, %v3964_v0  ;;  %v4101_v29 = vmul.f32 %v11691_v16, %v11691_v16 }
 0x6db   :  { %v4158_v63 = vadd.f32 %v4157_v5, %v4156_v30  ;;  %v4099_v5 = vmul.f32 %v11680_v32, %v11680_v32  ;;  %v3971_v30 = vsel %vm3957_vm12, %v11680_v32, 0.0 }
 0x6dc   :  { %v3968_v25 = vadd.f32 %v3967_v27, %v3966_v46  ;;  %v4102_v27 = vmul.f32 %v11698_v31, %v11698_v31  ;;  %v4173_v46 = vsel %vm3957_vm12, %v4101_v29, 0.0  ;;  %v3981_v29 = vsel %vm3957_vm12, %v11709_v22, 0.0 }
 0x6dd   :  { %v4160_v3 = vadd.f32 %v4159_v39, %v4158_v63  ;;  %v4100_v39 = vmul.f32 %v11685_v17, %v11685_v17  ;;  %v4169_v40 = vsel %vm3957_vm12, %v4099_v5, 0.0 }
 0x6df   :  { %v11802_v26 = vpop.f32.mrf.mxu0  ;;  %v4162_v62 = vadd.f32 %v4161_v52, %v4160_v3  ;;  %v3973_v52 = vsel %vm3957_vm12, %v11685_v17, 0.0  ;;  %v4171_v0 = vsel %vm3957_vm12, %v4100_v39, 0.0  ;;  %v4104_v39 = vmul.f32 %v11709_v22, %v11709_v22 }
 0x6e0   :  { %15371 = vst [vmem:[#allocation21_spill] sm:$0xff] %v11802_v26 }
 0x6e2   :  { %9428 = vmatmul.msk.f32.gmra.mxu0 %vm3549_vm11, %v3523_v58  ;;  %v4096_v58 = vmul.f32 %v11641_v24, %v11641_v24 }
 0x6e7   :  { %v11807_v7 = vpop.f32.mrf.mxu0 }
 0x6e8   :  { %15372 = vst [vmem:[#allocation22_spill] sm:$0xff] %v11807_v7 }
 0x6ea   :  { %9429 = vmatmul.msk.f32.gmra.mxu0 %vm3549_vm11, %v3524_v15 }
 0x6ef   :  { %v11812_v37 = vpop.f32.mrf.mxu0 }
 0x6f0   :  { %15373 = vst [vmem:[#allocation23_spill] sm:$0xff] %v11812_v37 }
 0x6f2   :  { %9430 = vmatmul.msk.f32.gmra.mxu0 %vm3549_vm11, %v3525_v48  ;;  %v4097_v48 = vmul.f32 %v11663_v18, %v11663_v18 }
 0x6f4   :  { %v4165_v1 = vsel %vm3957_vm12, %v4097_v48, 0.0 }
 0x6f7   :  { %v11817_v9 = vpop.f32.mrf.mxu0 }
 0x6f8   :  { %15374 = vst [vmem:[#allocation24_spill] sm:$0xff] %v11817_v9 }
 0x6fa   :  { %9431 = vmatmul.msk.f32.gmra.mxu0 %vm3549_vm11, %v3526_v49  ;;  %v4163_v49 = vsel %vm3957_vm12, %v4096_v58, 0.0  ;;  %v3970_v58 = vadd.f32 %v3969_v45, %v3968_v25  ;;  %v4103_v45 = vmul.f32 %v11703_v42, %v11703_v42  ;;  %v11902_v25 = vpop.f32.mrf.mxu3 }
 0x6fb   :  { %v4164_v50 = vadd.f32 %v4163_v49, %v4162_v62  ;;  %v3975_v49 = vsel %vm3957_vm12, %v11691_v16, 0.0 }
 0x6fc   :  { %v3972_v3 = vadd.f32 %v3971_v30, %v3970_v58  ;;  %v3979_v30 = vsel %vm3957_vm12, %v11703_v42, 0.0 }
 0x6fd   :  { %v4166_v13 = vadd.f32 %v4165_v1, %v4164_v50  ;;  %v3977_v1 = vsel %vm3957_vm12, %v11698_v31, 0.0 }
 0x6fe   :  { %v3974_v62 = vadd.f32 %v3973_v52, %v3972_v3  ;;  %v4177_v52 = vsel %vm3957_vm12, %v4103_v45, 0.0  ;;  %v3985_v45 = vsel %vm3957_vm12, %v11728_v56, 0.0 }
 0x6ff   :  { %v11821_v61 = vpop.f32.mrf.mxu0 }
 0x700   :  { %15375 = vst [vmem:[#allocation25_spill] sm:$0xff] %v11821_v61  ;;  %v3976_v50 = vadd.f32 %v3975_v49, %v3974_v62  ;;  %v4179_v49 = vsel %vm3957_vm12, %v4104_v39, 0.0  ;;  %v3987_v39 = vsel %vm3957_vm12, %v11734_v12, 0.0 }
 0x702   :  { %9432 = vmatmul.msk.f32.gmra.mxu0 %vm3549_vm11, %v3527_v59  ;;  %v4098_v59 = vmul.f32 %v11675_v43, %v11675_v43  ;;  %v3978_v58 = vadd.f32 %v3977_v1, %v3976_v50 }
 0x704   :  { %v4167_v11 = vsel %vm3957_vm12, %v4098_v59, 0.0 }
 0x705   :  { %v4168_v48 = vadd.f32 %v4167_v11, %v4166_v13  ;;  %v4175_v11 = vsel %vm3957_vm12, %v4102_v27, 0.0  ;;  %v3983_v27 = vsel %vm3957_vm12, %v11719_v41, 0.0 }
 0x707   :  { %v11824_v8 = vpop.f32.mrf.mxu0  ;;  %v4170_v59 = vadd.f32 %v4169_v40, %v4168_v48  ;;  %v4105_v48 = vmul.f32 %v11719_v41, %v11719_v41 }
 0x708   :  { %15376 = vst [vmem:[#allocation26_spill] sm:$0xff] %v11824_v8 }
 0x709   :  { %v4172_v5 = vadd.f32 %v4171_v0, %v4170_v59  ;;  %v3980_v0 = vadd.f32 %v3979_v30, %v3978_v58  ;;  %v4106_v59 = vmul.f32 %v11728_v56, %v11728_v56  ;;  %v4181_v1 = vsel %vm3957_vm12, %v4105_v48, 0.0  ;;  %v11933_v48 = vpop.f32.mrf.mxu3 }
 0x70b   :  { %v4174_v13 = vadd.f32 %v4173_v46, %v4172_v5  ;;  %v3982_v46 = vadd.f32 %v3981_v29, %v3980_v0  ;;  %v4107_v5 = vmul.f32 %v11734_v12, %v11734_v12  ;;  %v4183_v30 = vsel %vm3957_vm12, %v4106_v59, 0.0 }
 0x70c   :  { %v3989_v0 = vsel %vm3957_vm12, %v11743_v51, 0.0 }
 0x70d   :  { %v4176_v3 = vadd.f32 %v4175_v11, %v4174_v13  ;;  %v3984_v11 = vadd.f32 %v3983_v27, %v3982_v46  ;;  %v4108_v13 = vmul.f32 %v11743_v51, %v11743_v51  ;;  %v3991_v46 = vsel %vm3957_vm12, %v11751_v21, 0.0 }
 0x70e   :  { %v4111_v51 = vmul.f32 %v11762_v20, %v11762_v20 }
 0x70f   :  { %v11828_v47 = vpop.f32.mrf.mxu0  ;;  %v4178_v62 = vadd.f32 %v4177_v52, %v4176_v3  ;;  %v3986_v52 = vadd.f32 %v3985_v45, %v3984_v11  ;;  %v4185_v3 = vsel %vm3957_vm12, %v4107_v5, 0.0  ;;  %v3993_v11 = vsel %vm3957_vm12, %v11757_v57, 0.0 }
 0x710   :  { %15377 = vst [vmem:[#allocation27_spill] sm:$0xff] %v11828_v47 }
 0x711   :  { %v4180_v50 = vadd.f32 %v4179_v49, %v4178_v62  ;;  %v4109_v49 = vmul.f32 %v11751_v21, %v11751_v21  ;;  %v3988_v59 = vadd.f32 %v3987_v39, %v3986_v52  ;;  %v4187_v62 = vsel %vm3957_vm12, %v4108_v13, 0.0 }
 0x712   :  { %v4112_v52 = vmul.f32 %v11767_v4, %v11767_v4 }
 0x713   :  { %v4182_v58 = vadd.f32 %v4181_v1, %v4180_v50  ;;  %v4110_v1 = vmul.f32 %v11757_v57, %v11757_v57  ;;  %v3990_v50 = vadd.f32 %v3989_v0, %v3988_v59  ;;  %v4189_v5 = vsel %vm3957_vm12, %v4109_v49, 0.0 }
 0x714   :  { %v4193_v49 = vsel %vm3957_vm12, %v4111_v51, 0.0  ;;  %v3997_v59 = vsel %vm3957_vm12, %v11767_v4, 0.0  ;;  %v4001_v4 = vsel %vm3957_vm12, %v11777_v33, 0.0 }
 0x715   :  { %v4184_v27 = vadd.f32 %v4183_v30, %v4182_v58  ;;  %v3992_v39 = vadd.f32 %v3991_v46, %v3990_v50  ;;  %v4191_v13 = vsel %vm3957_vm12, %v4110_v1, 0.0  ;;  %v3995_v58 = vsel %vm3957_vm12, %v11762_v20, 0.0 }
 0x716   :  { %v4195_v50 = vsel %vm3957_vm12, %v4112_v52, 0.0 }
 0x717   :  { %v11832_v28 = vpop.f32.mrf.mxu0  ;;  %v4186_v45 = vadd.f32 %v4185_v3, %v4184_v27  ;;  %v3994_v0 = vadd.f32 %v3993_v11, %v3992_v39  ;;  %v4114_v11 = vmul.f32 %v11777_v33, %v11777_v33 }
 0x718   :  { %15378 = vst [vmem:[#allocation28_spill] sm:$0xff] %v11832_v28 }
 0x719   :  { %v4188_v30 = vadd.f32 %v4187_v62, %v4186_v45  ;;  %v4113_v62 = vmul.f32 %v11772_v38, %v11772_v38  ;;  %v3996_v1 = vadd.f32 %v3995_v58, %v3994_v0  ;;  %v11962_v45 = vpop.f32.mrf.mxu3  ;;  %v4199_v52 = vsel %vm3957_vm12, %v4114_v11, 0.0 }
 0x71a   :  { %v4003_v0 = vsel %vm3957_vm12, %v11782_v36, 0.0 }
 0x71b   :  { %v4190_v3 = vadd.f32 %v4189_v5, %v4188_v30  ;;  %v3999_v5 = vsel %vm3957_vm12, %v11772_v38, 0.0  ;;  %v3998_v51 = vadd.f32 %v3997_v59, %v3996_v1  ;;  %v4197_v39 = vsel %vm3957_vm12, %v4113_v62, 0.0 }
 0x71c   :  { %v4116_v38 = vmul.f32 %v11787_v35, %v11787_v35  ;;  %v4005_v1 = vsel %vm3957_vm12, %v11787_v35, 0.0  ;;  %v4009_v35 = vsel %vm3957_vm12, %v11797_v2, 0.0 }
 0x71d   :  { %v4192_v46 = vadd.f32 %v4191_v13, %v4190_v3  ;;  %v4115_v13 = vmul.f32 %v11782_v36, %v11782_v36  ;;  %v4000_v3 = vadd.f32 %v3999_v5, %v3998_v51  ;;  %v4007_v51 = vsel %vm3957_vm12, %v11792_v55, 0.0 }
 0x71f   :  { %v11836_v6 = vpop.f32.mrf.mxu0  ;;  %v4194_v30 = vadd.f32 %v4193_v49, %v4192_v46  ;;  %v4002_v59 = vadd.f32 %v4001_v4, %v4000_v3  ;;  %v4201_v62 = vsel %vm3957_vm12, %v4115_v13, 0.0  ;;  %v4118_v4 = vmul.f32 %v11797_v2, %v11797_v2 }
 0x720   :  { %15379 = vst [vmem:[#allocation29_spill] sm:$0xff] %v11836_v6  ;;  %v4013_v2 = vsel %vm3957_vm12, %v11807_v7, 0.0 }
 0x721   :  { %v4196_v58 = vadd.f32 %v4195_v50, %v4194_v30  ;;  %v4117_v50 = vmul.f32 %v11792_v55, %v11792_v55  ;;  %v4004_v11 = vadd.f32 %v4003_v0, %v4002_v59  ;;  %v4203_v30 = vsel %vm3957_vm12, %v4116_v38, 0.0  ;;  %v11991_v3 = vpop.f32.mrf.mxu3 }
 0x722   :  { %v4011_v59 = vsel %vm3957_vm12, %v11802_v26, 0.0 }
 0x723   :  { %v4198_v49 = vadd.f32 %v4197_v39, %v4196_v58  ;;  %v4006_v39 = vadd.f32 %v4005_v1, %v4004_v11  ;;  %v4205_v13 = vsel %vm3957_vm12, %v4117_v50, 0.0 }
 0x725   :  { %v4200_v5 = vadd.f32 %v4199_v52, %v4198_v49  ;;  %v4119_v52 = vmul.f32 %v11802_v26, %v11802_v26  ;;  %v4008_v38 = vadd.f32 %v4007_v51, %v4006_v39  ;;  %v4207_v49 = vsel %vm3957_vm12, %v4118_v4, 0.0 }
 0x726   :  { %v4140_v26 = vmul.f32 %v11826_v19, %v11826_v19 }
 0x727   :  { %v11861_v15 = vpop.f32.mrf.mxu0  ;;  %v4202_v58 = vadd.f32 %v4201_v62, %v4200_v5  ;;  %v4120_v62 = vmul.f32 %v11807_v7, %v11807_v7  ;;  %v4010_v5 = vadd.f32 %v4009_v35, %v4008_v38  ;;  %v4209_v50 = vsel %vm3957_vm12, %v4119_v52, 0.0 }
 0x728   :  { %15380 = vst [vmem:[#allocation30_spill] sm:$0xff] %v11861_v15  ;;  %v4122_v35 = vmul.f32 %v11817_v9, %v11817_v9  ;;  %v4017_v38 = vsel %vm3957_vm12, %v11817_v9, 0.0  ;;  %v4123_v7 = vmul.f32 %v11821_v61, %v11821_v61 }
 0x729   :  { %v4204_v0 = vadd.f32 %v4203_v30, %v4202_v58  ;;  %v4121_v30 = vmul.f32 %v11812_v37, %v11812_v37  ;;  %v4012_v4 = vadd.f32 %v4011_v59, %v4010_v5  ;;  %v4211_v39 = vsel %vm3957_vm12, %v4120_v62, 0.0 }
 0x72a   :  { %v4015_v58 = vsel %vm3957_vm12, %v11812_v37, 0.0  ;;  %v4215_v62 = vsel %vm3957_vm12, %v4122_v35, 0.0  ;;  %v4019_v5 = vsel %vm3957_vm12, %v11821_v61, 0.0  ;;  %v4023_v61 = vsel %vm3957_vm12, %v11828_v47, 0.0 }
 0x72b   :  { %v4206_v1 = vadd.f32 %v4205_v13, %v4204_v0  ;;  %v4014_v0 = vadd.f32 %v4013_v2, %v4012_v4  ;;  %v4213_v52 = vsel %vm3957_vm12, %v4121_v30, 0.0  ;;  %v4124_v2 = vmul.f32 %v11824_v8, %v11824_v8 }
 0x72c   :  { %v4217_v4 = vsel %vm3957_vm12, %v4123_v7, 0.0 }
 0x72d   :  { %v4208_v51 = vadd.f32 %v4207_v49, %v4206_v1  ;;  %v4016_v59 = vadd.f32 %v4015_v58, %v4014_v0  ;;  %v12020_v1 = vpop.f32.mrf.mxu3  ;;  %v4125_v58 = vmul.f32 %v11828_v47, %v11828_v47  ;;  %v4219_v0 = vsel %vm3957_vm12, %v4124_v2, 0.0 }
 0x72f   :  { %v11885_v63 = vpop.f32.mrf.mxu0  ;;  %v4210_v13 = vadd.f32 %v4209_v50, %v4208_v51  ;;  %v4018_v30 = vadd.f32 %v4017_v38, %v4016_v59  ;;  %v4221_v7 = vsel %vm3957_vm12, %v4125_v58, 0.0  ;;  %v4025_v59 = vsel %vm3957_vm12, %v11832_v28, 0.0 }
 0x731   :  { %v4212_v49 = vadd.f32 %v4211_v39, %v4210_v13  ;;  %v4021_v39 = vsel %vm3957_vm12, %v11824_v8, 0.0  ;;  %v4020_v35 = vadd.f32 %v4019_v5, %v4018_v30  ;;  %v4127_v8 = vmul.f32 %v11836_v6, %v11836_v6 }
 0x732   :  { %v4128_v30 = vmul.f32 %v11861_v15, %v11861_v15 }
 0x733   :  { %v4214_v50 = vadd.f32 %v4213_v52, %v4212_v49  ;;  %v4126_v52 = vmul.f32 %v11832_v28, %v11832_v28  ;;  %v4022_v49 = vadd.f32 %v4021_v39, %v4020_v35  ;;  %v4225_v35 = vsel %vm3957_vm12, %v4127_v8, 0.0 }
 0x735   :  { %v4216_v13 = vadd.f32 %v4215_v62, %v4214_v50  ;;  %v4024_v5 = vadd.f32 %v4023_v61, %v4022_v49  ;;  %v4223_v2 = vsel %vm3957_vm12, %v4126_v52, 0.0  ;;  %v4027_v50 = vsel %vm3957_vm12, %v11836_v6, 0.0  ;;  %v12051_v58 = vpop.f32.mrf.mxu3 }
 0x736   :  { %v4129_v61 = vmul.f32 %v11885_v63, %v11885_v63  ;;  %v4227_v49 = vsel %vm3957_vm12, %v4128_v30, 0.0 }
 0x737   :  { %v11909_v40 = vpop.f32.mrf.mxu0  ;;  %v4218_v38 = vadd.f32 %v4217_v4, %v4216_v13  ;;  %v4026_v39 = vadd.f32 %v4025_v59, %v4024_v5 }
 0x738   :  { %v4130_v59 = vmul.f32 %v11909_v40, %v11909_v40  ;;  %v4229_v8 = vsel %vm3957_vm12, %v4129_v61, 0.0 }
 0x739   :  { %v4220_v62 = vadd.f32 %v4219_v0, %v4218_v38  ;;  %v4029_v0 = vsel %vm3957_vm12, %v11861_v15, 0.0  ;;  %v4028_v38 = vadd.f32 %v4027_v50, %v4026_v39  ;;  %v4033_v15 = vsel %vm3957_vm12, %v11909_v40, 0.0 }
 0x73a   :  { %v4231_v30 = vsel %vm3957_vm12, %v4130_v59, 0.0 }
 0x73b   :  { %v4222_v4 = vadd.f32 %v4221_v7, %v4220_v62  ;;  %v4031_v7 = vsel %vm3957_vm12, %v11885_v63, 0.0  ;;  %v4030_v5 = vadd.f32 %v4029_v0, %v4028_v38 }
 0x73d   :  { %v4224_v52 = vadd.f32 %v4223_v2, %v4222_v4  ;;  %v4032_v50 = vadd.f32 %v4031_v7, %v4030_v5 }
 0x73f   :  { %v11931_v29 = vpop.f32.mrf.mxu0  ;;  %v4226_v62 = vadd.f32 %v4225_v35, %v4224_v52  ;;  %v4034_v0 = vadd.f32 %v4033_v15, %v4032_v50 }
 0x740   :  { %v4131_v6 = vmul.f32 %v11931_v29, %v11931_v29  ;;  %v4035_v4 = vsel %vm3957_vm12, %v11931_v29, 0.0 }
 0x741   :  { %v4228_v2 = vadd.f32 %v4227_v49, %v4226_v62  ;;  %v4036_v59 = vadd.f32 %v4035_v4, %v4034_v0  ;;  %v12080_v62 = vpop.f32.mrf.mxu3 }
 0x742   :  { %v4233_v61 = vsel %vm3957_vm12, %v4131_v6, 0.0 }
 0x743   :  { %v4230_v35 = vadd.f32 %v4229_v8, %v4228_v2 }
 0x745   :  { %v4232_v7 = vadd.f32 %v4231_v30, %v4230_v35 }
 0x747   :  { %v11955_v27 = vpop.f32.mrf.mxu0  ;;  %v4234_v2 = vadd.f32 %v4233_v61, %v4232_v7 }
 0x748   :  { %v4132_v39 = vmul.f32 %v11955_v27, %v11955_v27  ;;  %v4037_v38 = vsel %vm3957_vm12, %v11955_v27, 0.0 }
 0x749   :  { %v4038_v6 = vadd.f32 %v4037_v38, %v4036_v59 }
 0x74a   :  { %v4235_v5 = vsel %vm3957_vm12, %v4132_v39, 0.0 }
 0x74b   :  { %v4236_v4 = vadd.f32 %v4235_v5, %v4234_v2 }
 0x74f   :  { %v11979_v46 = vpop.f32.mrf.mxu0 }
 0x750   :  { %v4133_v49 = vmul.f32 %v11979_v46, %v11979_v46  ;;  %v4039_v8 = vsel %vm3957_vm12, %v11979_v46, 0.0 }
 0x751   :  { %v4040_v35 = vadd.f32 %v4039_v8, %v4038_v6 }
 0x752   :  { %v4237_v50 = vsel %vm3957_vm12, %v4133_v49, 0.0 }
 0x753   :  { %v4238_v61 = vadd.f32 %v4237_v50, %v4236_v4 }
 0x757   :  { %v12003_v11 = vpop.f32.mrf.mxu0 }
 0x758   :  { %v4134_v15 = vmul.f32 %v12003_v11, %v12003_v11  ;;  %v4041_v28 = vsel %vm3957_vm12, %v12003_v11, 0.0 }
 0x759   :  { %v4042_v38 = vadd.f32 %v4041_v28, %v4040_v35  ;;  %v12109_v35 = vpop.f32.mrf.mxu3 }
 0x75a   :  { %v4239_v39 = vsel %vm3957_vm12, %v4134_v15, 0.0 }
 0x75b   :  { %v4240_v8 = vadd.f32 %v4239_v39, %v4238_v61 }
 0x75f   :  { %v12027_v51 = vpop.f32.mrf.mxu0 }
 0x760   :  { %v4135_v30 = vmul.f32 %v12027_v51, %v12027_v51  ;;  %v4043_v0 = vsel %vm3957_vm12, %v12027_v51, 0.0 }
 0x761   :  { %v4044_v15 = vadd.f32 %v4043_v0, %v4042_v38 }
 0x762   :  { %v4241_v49 = vsel %vm3957_vm12, %v4135_v30, 0.0 }
 0x763   :  { %v4242_v50 = vadd.f32 %v4241_v49, %v4240_v8 }
 0x767   :  { %v12049_v13 = vpop.f32.mrf.mxu0 }
 0x768   :  { %v4136_v47 = vmul.f32 %v12049_v13, %v12049_v13  ;;  %v4045_v59 = vsel %vm3957_vm12, %v12049_v13, 0.0 }
 0x769   :  { %v4046_v4 = vadd.f32 %v4045_v59, %v4044_v15  ;;  %v4141_v15 = vmul.f32 %v11830_v14, %v11830_v14 }
 0x76a   :  { %v4243_v2 = vsel %vm3957_vm12, %v4136_v47, 0.0 }
 0x76b   :  { %v4244_v37 = vadd.f32 %v4243_v2, %v4242_v50  ;;  %v4142_v50 = vmul.f32 %v11834_v34, %v11834_v34 }
 0x76f   :  { %v12073_v52 = vpop.f32.mrf.mxu0 }
 0x770   :  { %v4137_v5 = vmul.f32 %v12073_v52, %v12073_v52  ;;  %v4047_v6 = vsel %vm3957_vm12, %v12073_v52, 0.0 }
 0x771   :  { %v4048_v39 = vadd.f32 %v4047_v6, %v4046_v4  ;;  %v4251_v4 = vsel %vm3957_vm12, %v4140_v26, 0.0  ;;  %v4144_v26 = vmul.f32 %v11873_v54, %v11873_v54 }
 0x772   :  { %v4245_v30 = vsel %vm3957_vm12, %v4137_v5, 0.0 }
 0x773   :  { %v4246_v47 = vadd.f32 %v4245_v30, %v4244_v37  ;;  %v4053_v37 = vsel %vm3957_vm12, %v11826_v19, 0.0 }
 0x777   :  { %v12097_v7 = vpop.f32.mrf.mxu0 }
 0x778   :  { %v4138_v28 = vmul.f32 %v12097_v7, %v12097_v7  ;;  %v4049_v9 = vsel %vm3957_vm12, %v12097_v7, 0.0 }
 0x779   :  { %v4050_v61 = vadd.f32 %v4049_v9, %v4048_v39 }
 0x77a   :  { %v4247_v0 = vsel %vm3957_vm12, %v4138_v28, 0.0  ;;  %v4055_v28 = vsel %vm3957_vm12, %v11830_v14, 0.0 }
 0x77b   :  { %v4248_v5 = vadd.f32 %v4247_v0, %v4246_v47  ;;  %v12133_v0 = vpop.f32.mrf.mxu3  ;;  %v4253_v47 = vsel %vm3957_vm12, %v4141_v15, 0.0 }
 0x77f   :  { %v12115_v38 = vpop.f32.mrf.mxu0 }
 0x780   :  { %v4051_v49 = vsel %vm3957_vm12, %v12115_v38, 0.0  ;;  %v4139_v59 = vmul.f32 %v12115_v38, %v12115_v38 }
 0x781   :  { %v4052_v8 = vadd.f32 %v4051_v49, %v4050_v61  ;;  %v4057_v61 = vsel %vm3957_vm12, %v11834_v34, 0.0  ;;  %v4143_v49 = vmul.f32 %v11840_v23, %v11840_v23 }
 0x782   :  { %v4249_v9 = vsel %vm3957_vm12, %v4139_v59, 0.0 }
 0x783   :  { %v4054_v2 = vadd.f32 %v4053_v37, %v4052_v8  ;;  %v4250_v6 = vadd.f32 %v4249_v9, %v4248_v5  ;;  %v4255_v8 = vsel %vm3957_vm12, %v4142_v50, 0.0  ;;  %v4059_v37 = vsel %vm3957_vm12, %v11840_v23, 0.0 }
 0x784   :  { %v4257_v15 = vsel %vm3957_vm12, %v4143_v49, 0.0  ;;  %v4259_v50 = vsel %vm3957_vm12, %v4144_v26, 0.0 }
 0x785   :  { %v4056_v30 = vadd.f32 %v4055_v28, %v4054_v2  ;;  %v4252_v39 = vadd.f32 %v4251_v4, %v4250_v6  ;;  %v4061_v6 = vsel %vm3957_vm12, %v11873_v54, 0.0  ;;  %v4145_v28 = vmul.f32 %v11902_v25, %v11902_v25 }
 0x787   :  { %v4058_v59 = vadd.f32 %v4057_v61, %v4056_v30  ;;  %v4254_v5 = vadd.f32 %v4253_v47, %v4252_v39  ;;  %v4063_v39 = vsel %vm3957_vm12, %v11902_v25, 0.0  ;;  %v4146_v47 = vmul.f32 %v11933_v48, %v11933_v48 }
 0x788   :  { %v4261_v49 = vsel %vm3957_vm12, %v4145_v28, 0.0 }
 0x789   :  { %v4060_v9 = vadd.f32 %v4059_v37, %v4058_v59  ;;  %v4256_v2 = vadd.f32 %v4255_v8, %v4254_v5  ;;  %v4065_v5 = vsel %vm3957_vm12, %v11933_v48, 0.0  ;;  %v4147_v8 = vmul.f32 %v11962_v45, %v11962_v45 }
 0x78a   :  { %v4263_v26 = vsel %vm3957_vm12, %v4146_v47, 0.0 }
 0x78b   :  { %v4062_v4 = vadd.f32 %v4061_v6, %v4060_v9  ;;  %v4258_v30 = vadd.f32 %v4257_v15, %v4256_v2  ;;  %v12160_v2 = vpop.f32.mrf.mxu3  ;;  %v4067_v15 = vsel %vm3957_vm12, %v11962_v45, 0.0  ;;  %v4148_v6 = vmul.f32 %v11991_v3, %v11991_v3 }
 0x78c   :  { %v4081_v55 = vsel %vm3957_vm12, %v12160_v2, 0.0 }
 0x78d   :  { %v4064_v61 = vadd.f32 %v4063_v39, %v4062_v4  ;;  %v4260_v59 = vadd.f32 %v4259_v50, %v4258_v30  ;;  %v4265_v30 = vsel %vm3957_vm12, %v4147_v8, 0.0  ;;  %v4069_v50 = vsel %vm3957_vm12, %v11991_v3, 0.0 }
 0x78e   :  { %v4149_v39 = vmul.f32 %v12020_v1, %v12020_v1  ;;  %v4267_v47 = vsel %vm3957_vm12, %v4148_v6, 0.0 }
 0x78f   :  { %v4262_v37 = vadd.f32 %v4261_v49, %v4260_v59  ;;  %v4066_v9 = vadd.f32 %v4065_v5, %v4064_v61  ;;  %v4071_v49 = vsel %vm3957_vm12, %v12020_v1, 0.0  ;;  %v4150_v5 = vmul.f32 %v12051_v58, %v12051_v58 }
 0x790   :  { %v4269_v8 = vsel %vm3957_vm12, %v4149_v39, 0.0 }
 0x791   :  { %v4068_v4 = vadd.f32 %v4067_v15, %v4066_v9  ;;  %v4264_v28 = vadd.f32 %v4263_v26, %v4262_v37  ;;  %v4073_v26 = vsel %vm3957_vm12, %v12051_v58, 0.0  ;;  %v4151_v15 = vmul.f32 %v12080_v62, %v12080_v62 }
 0x792   :  { %v4271_v6 = vsel %vm3957_vm12, %v4150_v5, 0.0 }
 0x793   :  { %v4070_v61 = vadd.f32 %v4069_v50, %v4068_v4  ;;  %v4266_v59 = vadd.f32 %v4265_v30, %v4264_v28  ;;  %v4075_v30 = vsel %vm3957_vm12, %v12080_v62, 0.0  ;;  %v4152_v50 = vmul.f32 %v12109_v35, %v12109_v35 }
 0x794   :  { %v4273_v39 = vsel %vm3957_vm12, %v4151_v15, 0.0 }
 0x795   :  { %v4072_v9 = vadd.f32 %v4071_v49, %v4070_v61  ;;  %v4268_v37 = vadd.f32 %v4267_v47, %v4266_v59  ;;  %v3952_v47 = vpop.f32.mrf.mxu3  ;;  %v4077_v49 = vsel %vm3957_vm12, %v12109_v35, 0.0  ;;  %v4275_v5 = vsel %vm3957_vm12, %v4152_v50, 0.0 }
 0x796   :  { %v4083_v36 = vsel %vm3957_vm12, %v3952_v47, 0.0 }
 0x797   :  { %v4074_v4 = vadd.f32 %v4073_v26, %v4072_v9  ;;  %v4270_v28 = vadd.f32 %v4269_v8, %v4268_v37  ;;  %v4153_v9 = vmul.f32 %v12133_v0, %v12133_v0  ;;  %v4079_v26 = vsel %vm3957_vm12, %v12133_v0, 0.0 }
 0x799   :  { %v4076_v61 = vadd.f32 %v4075_v30, %v4074_v4  ;;  %v4272_v59 = vadd.f32 %v4271_v6, %v4270_v28  ;;  %v4154_v4 = vmul.f32 %v12160_v2, %v12160_v2  ;;  %v4155_v28 = vmul.f32 %v3952_v47, %v3952_v47 }
 0x79a   :  { %v4277_v15 = vsel %vm3957_vm12, %v4153_v9, 0.0 }
 0x79b   :  { %v4274_v37 = vadd.f32 %v4273_v39, %v4272_v59  ;;  %v4078_v8 = vadd.f32 %v4077_v49, %v4076_v61  ;;  %v4279_v50 = vsel %vm3957_vm12, %v4154_v4, 0.0  ;;  %v4281_v39 = vsel %vm3957_vm12, %v4155_v28, 0.0 }
 0x79d   :  { %v4276_v6 = vadd.f32 %v4275_v5, %v4274_v37  ;;  %v4080_v30 = vadd.f32 %v4079_v26, %v4078_v8 }
 0x79f   :  { %v4278_v59 = vadd.f32 %v4277_v15, %v4276_v6  ;;  %v4082_v61 = vadd.f32 %v4081_v55, %v4080_v30 }
 0x7a1   :  { %v4280_v49 = vadd.f32 %v4279_v50, %v4278_v59  ;;  %v4084_v33 = vadd.f32 %v4083_v36, %v4082_v61  ;;  %v4806_v59 = vld [vmem:[#allocation4 + $0x1] sm:$0xff] }
 0x7a2   :  { %4934 = vrot.lane.b32.xlu2 %v4806_v59, %s9612_s30 }
 0x7a3   :  { %v4085_v20 = vrot.slane %v4084_v33, 4  ;;  %v4282_v57 = vadd.f32 %v4281_v39, %v4280_v49 }
 0x7a5   :  { %v4086_v21 = vadd.f32 %v4085_v20, %v4084_v33  ;;  %v4283_v37 = vrot.slane %v4282_v57, 4  ;;  %v3956_v33 = vld [vmem:[%s15283_s3] sm:$0x1]  ;;  %s9620_s3 = smov 64  }
 0x7a7   :  { %v4087_v8 = vrot.slane %v4086_v21, 2  ;;  %v4284_v5 = vadd.f32 %v4283_v37, %v4282_v57  ;;  %v4807_v37 = vld [vmem:[#allocation4 + $0x9] sm:$0xff] }
 0x7a8   :  { %4936 = vrot.lane.b32.xlu0 %v4807_v37, %s9612_s30 }
 0x7a9   :  { %v4088_v9 = vadd.f32 %v4087_v8, %v4086_v21  ;;  %v4285_v26 = vrot.slane %v4284_v5, 2 }
 0x7ab   :  { %v4089_v12 = vrot.slane %v4088_v9, 1  ;;  %v4286_v56 = vadd.f32 %v4285_v26, %v4284_v5 }
 0x7ad   :  { %v4090_v41 = vadd.f32 %v4089_v12, %v4088_v9  ;;  %v4287_v22 = vrot.slane %v4286_v56, 1  ;;  %v3955_v12 = vld [vmem:[%s15282_s2] sm:$0x1]  ;;  %s9619_s2 = smov 40  }
 0x7af   :  { %v4091_v6 = vmul.f32 0.001953125, %v4090_v41  ;;  %v4288_v55 = vadd.f32 %v4287_v22, %v4286_v56 }
 0x7b1   :  { %v4289_v30 = vmul.f32 0.001953125, %v4288_v55  ;;  %v4290_v4 = vmul.f32 %v4091_v6, %v4091_v6 }
 0x7b3   :  { %v4291_v15 = vsub.f32 %v4289_v30, %v4290_v4 }
 0x7b5   :  { %v4292_v28 = vadd.f32 1e-05, %v4291_v15 }
 0x7b7   :  { %9606 = vrsqrt.f32 %v4292_v28  ;;  %vm4299_vm15 = vweird.f32 %v4292_v28 }
 0x7bd   :  { %v9607_v36 = vpop.eup %9606 }
 0x7be   :  { %v4294_v61 = vmul.f32 %v9607_v36, %v4292_v28  ;;  %vm4300_vm14 = vweird.f32 %v9607_v36 }
 0x7bf   :  { %vm4301_vm0 = vmor %vm4299_vm15, %vm4300_vm14 }
 0x7c0   :  { %v4295_v20 = vmul.f32 %v9607_v36, %v4294_v61 }
 0x7c2   :  { %v4296_v57 = vmul.f32 0.5, %v4295_v20 }
 0x7c4   :  { %v4297_v21 = vsub.f32 1.5, %v4296_v57 }
 0x7c6   :  { %v4298_v41 = vmul.f32 %v9607_v36, %v4297_v21 }
 0x7c8   :  { %v4302_v22 = vsel %vm4301_vm0, %v9607_v36, %v4298_v41 }
 0x7c9   :  { %v4303_v56 = vmul.f32 %v4302_v22, %v3955_v12 }
 0x7cb   :  { %v4304_v50 = vmul.f32 %v4303_v56, %v4091_v6  ;;  %v12210_v39 = vperm.slane %v4303_v56, 0 }
 0x7cd   :  { %v4305_v49 = vsub.f32 %v3956_v33, %v4304_v50  ;;  %v4372_v8 = vmul.f32 %v12210_v39, %v3952_v47  ;;  %v4309_v55 = vmul.f32 %v12210_v39, %v11542_v60  ;;  %v4310_v6 = vmul.f32 %v12210_v39, %v11566_v10 }
 0x7ce   :  { %v4311_v30 = vmul.f32 %v12210_v39, %v11591_v53  ;;  %v4312_v4 = vmul.f32 %v12210_v39, %v11616_v44  ;;  %v4313_v47 = vmul.f32 %v12210_v39, %v11641_v24  ;;  %v4314_v15 = vmul.f32 %v12210_v39, %v11663_v18 }
 0x7cf   :  { %v12214_v5 = vperm.slane %v4305_v49, 0  ;;  %v4315_v28 = vmul.f32 %v12210_v39, %v11675_v43  ;;  %v12234_v60 = vmul.f32 %v12210_v39, %v11680_v32  ;;  %v12238_v10 = vmul.f32 %v12210_v39, %v11685_v17 }
 0x7d0   :  { %v12242_v53 = vmul.f32 %v12210_v39, %v11691_v16  ;;  %v4346_v44 = vmul.f32 %v12210_v39, %v11885_v63  ;;  %v4347_v24 = vmul.f32 %v12210_v39, %v11909_v40  ;;  %v4348_v18 = vmul.f32 %v12210_v39, %v11931_v29 }
 0x7d1   :  { %v4439_v9 = vadd.f32 %v12214_v5, %v4372_v8  ;;  %v4349_v43 = vmul.f32 %v12210_v39, %v11955_v27  ;;  %v4350_v32 = vmul.f32 %v12210_v39, %v11979_v46  ;;  %v4351_v17 = vmul.f32 %v12210_v39, %v12003_v11 }
 0x7d2   :  { %v4352_v16 = vmul.f32 %v12210_v39, %v12027_v51  ;;  %v4353_v63 = vmul.f32 %v12210_v39, %v12049_v13  ;;  %v4354_v40 = vmul.f32 %v12210_v39, %v12073_v52  ;;  %v4355_v29 = vmul.f32 %v12210_v39, %v12097_v7 }
 0x7d3   :  { %v4503_v26 = vmax.f32 %v4439_v9, 0.0  ;;  %v4356_v27 = vmul.f32 %v12210_v39, %v12115_v38  ;;  %v4357_v46 = vmul.f32 %v12210_v39, %v11826_v19  ;;  %v4358_v11 = vmul.f32 %v12210_v39, %v11830_v14 }
 0x7d4   :  { %v4359_v51 = vmul.f32 %v12210_v39, %v11834_v34  ;;  %v4360_v13 = vmul.f32 %v12210_v39, %v11840_v23  ;;  %v4361_v52 = vmul.f32 %v12210_v39, %v11873_v54  ;;  %v4362_v7 = vmul.f32 %v12210_v39, %v11902_v25 }
 0x7d5   :  { %4677 = vst.msk [vmem:[#allocation4 + $0x339] sm:$0xff] %vm3957_vm12, %v4503_v26  ;;  %v4363_v38 = vmul.f32 %v12210_v39, %v11933_v48  ;;  %v4364_v19 = vmul.f32 %v12210_v39, %v11962_v45  ;;  %v4365_v14 = vmul.f32 %v12210_v39, %v11991_v3  ;;  %v4366_v34 = vmul.f32 %v12210_v39, %v12020_v1 }
 0x7d6   :  { %v4367_v23 = vmul.f32 %v12210_v39, %v12051_v58  ;;  %v4368_v54 = vmul.f32 %v12210_v39, %v12080_v62  ;;  %v4369_v25 = vmul.f32 %v12210_v39, %v12109_v35  ;;  %v4370_v48 = vmul.f32 %v12210_v39, %v12133_v0 }
 0x7d7   :  { %v4371_v45 = vmul.f32 %v12210_v39, %v12160_v2  ;;  %v4376_v3 = vadd.f32 %v12214_v5, %v4309_v55  ;;  %v4377_v36 = vadd.f32 %v12214_v5, %v4310_v6  ;;  %v4378_v1 = vadd.f32 %v12214_v5, %v4311_v30 }
 0x7d8   :  { %v4379_v58 = vadd.f32 %v12214_v5, %v4312_v4  ;;  %v4380_v59 = vadd.f32 %v12214_v5, %v4313_v47  ;;  %v4381_v62 = vadd.f32 %v12214_v5, %v4314_v15  ;;  %v4382_v35 = vadd.f32 %v12214_v5, %v4315_v28 }
 0x7d9   :  { %v12304_v61 = vadd.f32 %v12214_v5, %v4346_v44  ;;  %v12307_v0 = vadd.f32 %v12214_v5, %v4347_v24  ;;  %v12310_v2 = vadd.f32 %v12214_v5, %v4348_v18  ;;  %v12313_v20 = vadd.f32 %v12214_v5, %v4349_v43 }
 0x7da   :  { %v12316_v57 = vadd.f32 %v12214_v5, %v4350_v32  ;;  %v12319_v21 = vadd.f32 %v12214_v5, %v4351_v17  ;;  %v12322_v12 = vadd.f32 %v12214_v5, %v4352_v16  ;;  %v12325_v41 = vadd.f32 %v12214_v5, %v4353_v63 }
 0x7db   :  { %v12328_v22 = vadd.f32 %v12214_v5, %v4354_v40  ;;  %v12331_v56 = vadd.f32 %v12214_v5, %v4355_v29  ;;  %v12334_v33 = vadd.f32 %v12214_v5, %v4356_v27  ;;  %v12337_v50 = vadd.f32 %v12214_v5, %v4357_v46 }
 0x7dc   :  { %v12340_v49 = vadd.f32 %v12214_v5, %v4358_v11  ;;  %v12343_v37 = vadd.f32 %v12214_v5, %v4359_v51  ;;  %v12346_v8 = vadd.f32 %v12214_v5, %v4360_v13  ;;  %v12349_v9 = vadd.f32 %v12214_v5, %v4361_v52 }
 0x7dd   :  { %v12352_v26 = vadd.f32 %v12214_v5, %v4362_v7  ;;  %v12355_v55 = vadd.f32 %v12214_v5, %v4363_v38  ;;  %v12358_v6 = vadd.f32 %v12214_v5, %v4364_v19  ;;  %v12361_v30 = vadd.f32 %v12214_v5, %v4365_v14 }
 0x7de   :  { %v12364_v4 = vadd.f32 %v12214_v5, %v4366_v34  ;;  %v12367_v47 = vadd.f32 %v12214_v5, %v4367_v23  ;;  %v12370_v15 = vadd.f32 %v12214_v5, %v4368_v54  ;;  %v12373_v28 = vadd.f32 %v12214_v5, %v4369_v25  ;;  %v15384_v34 = vld [vmem:[#allocation9_spill] sm:$0xff] }
 0x7df   :  { %v12376_v44 = vadd.f32 %v12214_v5, %v4370_v48  ;;  %v12379_v24 = vadd.f32 %v12214_v5, %v4371_v45  ;;  %v4440_v18 = vmax.f32 %v4376_v3, 0.0  ;;  %v4383_v43 = vadd.f32 %v12214_v5, %v12234_v60  ;;  %v15381_v60 = vld [vmem:[#allocation8_spill] sm:$0xff]  ;;  %v15385_v48 = vld [vmem:[#allocation10_spill] sm:$0xff] }
 0x7e0   :  { %v4441_v32 = vmax.f32 %v4377_v36, 0.0  ;;  %v4442_v17 = vmax.f32 %v4378_v1, 0.0  ;;  %v4443_v16 = vmax.f32 %v4379_v58, 0.0  ;;  %v4319_v63 = vmul.f32 %v12210_v39, %v11698_v31  ;;  %v15386_v1 = vld [vmem:[#allocation11_spill] sm:$0xff] }
 0x7e1   :  { %v4384_v40 = vadd.f32 %v12214_v5, %v12238_v10  ;;  %v4444_v29 = vmax.f32 %v4380_v59, 0.0  ;;  %4614 = vst.msk [vmem:[#allocation4 + $0x19] sm:$0xff] %vm3957_vm12, %v4440_v18  ;;  %v4320_v27 = vmul.f32 %v12210_v39, %v11703_v42  ;;  %v4385_v46 = vadd.f32 %v12214_v5, %v12242_v53  ;;  %v15382_v10 = vld [vmem:[#allocation6_spill] sm:$0xff]  ;;  %v15383_v53 = vld [vmem:[#allocation7_spill] sm:$0xff] }
 0x7e2   :  { %v4445_v11 = vmax.f32 %v4381_v62, 0.0  ;;  %4616 = vst.msk [vmem:[#allocation4 + $0x31] sm:$0xff] %vm3957_vm12, %v4442_v17  ;;  %v4321_v51 = vmul.f32 %v12210_v39, %v15381_v60  ;;  %v4386_v31 = vadd.f32 %v12214_v5, %v4319_v63  ;;  %v4446_v13 = vmax.f32 %v4382_v35, 0.0  ;;  %v15387_v35 = vld [vmem:[#allocation12_spill] sm:$0xff] }
 0x7e3   :  { %4615 = vst.msk [vmem:[#allocation4 + $0x21] sm:$0xff] %vm3957_vm12, %v4441_v32  ;;  %v4322_v52 = vmul.f32 %v12210_v39, %v15382_v10  ;;  %v4387_v7 = vadd.f32 %v12214_v5, %v4320_v27  ;;  %v4447_v42 = vmax.f32 %v4383_v43, 0.0  ;;  %v4323_v38 = vmul.f32 %v12210_v39, %v15383_v53  ;;  %v15389_v27 = vld [vmem:[#allocation14_spill] sm:$0xff] }
 0x7e4   :  { %4617 = vst.msk [vmem:[#allocation4 + $0x39] sm:$0xff] %vm3957_vm12, %v4443_v16  ;;  %v4388_v19 = vadd.f32 %v12214_v5, %v4321_v51  ;;  %v4448_v14 = vmax.f32 %v4384_v40, 0.0  ;;  %v4324_v23 = vmul.f32 %v12210_v39, %v15384_v34  ;;  %v4449_v25 = vmax.f32 %v4385_v46, 0.0  ;;  %v15388_v16 = vld [vmem:[#allocation13_spill] sm:$0xff]  ;;  %v15390_v51 = vld [vmem:[#allocation15_spill] sm:$0xff] }
 0x7e5   :  { %4618 = vst.msk [vmem:[#allocation4 + $0x49] sm:$0xff] %vm3957_vm12, %v4444_v29  ;;  %v4389_v54 = vadd.f32 %v12214_v5, %v4322_v52  ;;  %v4325_v45 = vmul.f32 %v12210_v39, %v15385_v48  ;;  %v4390_v3 = vadd.f32 %v12214_v5, %v4323_v38  ;;  %v4450_v36 = vmax.f32 %v4386_v31, 0.0  ;;  %v15391_v52 = vld [vmem:[#allocation16_spill] sm:$0xff]  ;;  %v15392_v38 = vld [vmem:[#allocation17_spill] sm:$0xff] }
 0x7e6   :  { %4619 = vst.msk [vmem:[#allocation4 + $0x51] sm:$0xff] %vm3957_vm12, %v4445_v11  ;;  %v4326_v58 = vmul.f32 %v12210_v39, %v15386_v1  ;;  %v4391_v59 = vadd.f32 %v12214_v5, %v4324_v23  ;;  %v4451_v62 = vmax.f32 %v4387_v7, 0.0  ;;  %v4327_v18 = vmul.f32 %v12210_v39, %v15387_v35  ;;  %v15393_v23 = vld [vmem:[#allocation18_spill] sm:$0xff] }
 0x7e7   :  { %4620 = vst.msk [vmem:[#allocation4 + $0x61] sm:$0xff] %vm3957_vm12, %v4446_v13  ;;  %v4392_v43 = vadd.f32 %v12214_v5, %v4325_v45  ;;  %v4452_v32 = vmax.f32 %v4388_v19, 0.0  ;;  %v4328_v63 = vmul.f32 %v12210_v39, %v15388_v16  ;;  %v4453_v29 = vmax.f32 %v4389_v54, 0.0  ;;  %v15394_v45 = vld [vmem:[#allocation19_spill] sm:$0xff]  ;;  %v15397_v16 = vld [vmem:[#allocation22_spill] sm:$0xff] }
 0x7e8   :  { %4621 = vst.msk [vmem:[#allocation4 + $0x69] sm:$0xff] %vm3957_vm12, %v4447_v42  ;;  %v4393_v40 = vadd.f32 %v12214_v5, %v4326_v58  ;;  %v4329_v46 = vmul.f32 %v12210_v39, %v15389_v27  ;;  %v4394_v11 = vadd.f32 %v12214_v5, %v4327_v18  ;;  %v4454_v60 = vmax.f32 %v4390_v3, 0.0  ;;  %v15395_v58 = vld [vmem:[#allocation20_spill] sm:$0xff]  ;;  %v15396_v18 = vld [vmem:[#allocation21_spill] sm:$0xff]  ;;  %v15398_v27 = vld [vmem:[#allocation23_spill] sm:$0xff] }
 0x7e9   :  { %v4810_v17 = vld [vmem:[#allocation4 + $0x31] sm:$0xff]  ;;  %4622 = vst.msk [vmem:[#allocation4 + $0x79] sm:$0xff] %vm3957_vm12, %v4448_v14  ;;  %v4330_v31 = vmul.f32 %v12210_v39, %v15390_v51  ;;  %v4395_v13 = vadd.f32 %v12214_v5, %v4328_v63  ;;  %v4455_v10 = vmax.f32 %v4391_v59, 0.0  ;;  %v4331_v7 = vmul.f32 %v12210_v39, %v15391_v52 }
 0x7ea   :  { %4942 = vrot.lane.b32.xlu0 %v4810_v17, %s9612_s30  ;;  %4623 = vst.msk [vmem:[#allocation4 + $0x81] sm:$0xff] %vm3957_vm12, %v4449_v25  ;;  %v4396_v42 = vadd.f32 %v12214_v5, %v4329_v46  ;;  %v4456_v53 = vmax.f32 %v4392_v43, 0.0  ;;  %v4332_v19 = vmul.f32 %v12210_v39, %v15392_v38  ;;  %v4457_v34 = vmax.f32 %v4393_v40, 0.0  ;;  %v15399_v51 = vld [vmem:[#allocation24_spill] sm:$0xff]  ;;  %v15400_v52 = vld [vmem:[#allocation25_spill] sm:$0xff]  ;;  %v15401_v38 = vld [vmem:[#allocation26_spill] sm:$0xff] }
 0x7eb   :  { %4624 = vst.msk [vmem:[#allocation4 + $0x91] sm:$0xff] %vm3957_vm12, %v4450_v36  ;;  %v4397_v14 = vadd.f32 %v12214_v5, %v4330_v31  ;;  %v4333_v54 = vmul.f32 %v12210_v39, %v15393_v23  ;;  %v4398_v25 = vadd.f32 %v12214_v5, %v4331_v7  ;;  %v4458_v48 = vmax.f32 %v4394_v11, 0.0  ;;  %v15402_v23 = vld [vmem:[#allocation27_spill] sm:$0xff] }
 0x7ec   :  { %4625 = vst.msk [vmem:[#allocation4 + $0x99] sm:$0xff] %vm3957_vm12, %v4451_v62  ;;  %v4334_v3 = vmul.f32 %v12210_v39, %v15394_v45  ;;  %v4399_v36 = vadd.f32 %v12214_v5, %v4332_v19  ;;  %v4459_v1 = vmax.f32 %v4395_v13, 0.0  ;;  %v4335_v59 = vmul.f32 %v12210_v39, %v15395_v58  ;;  %v15403_v45 = vld [vmem:[#allocation28_spill] sm:$0xff]  ;;  %v15404_v58 = vld [vmem:[#allocation29_spill] sm:$0xff] }
 0x7ed   :  { %4626 = vst.msk [vmem:[#allocation4 + $0xa9] sm:$0xff] %vm3957_vm12, %v4452_v32  ;;  %v4400_v62 = vadd.f32 %v12214_v5, %v4333_v54  ;;  %v4460_v35 = vmax.f32 %v4396_v42, 0.0  ;;  %v4336_v43 = vmul.f32 %v12210_v39, %v15396_v18  ;;  %v4461_v17 = vmax.f32 %v4397_v14, 0.0  ;;  %v15405_v18 = vld [vmem:[#allocation30_spill] sm:$0xff] }
 0x7ee   :  { %4627 = vst.msk [vmem:[#allocation4 + $0xb1] sm:$0xff] %vm3957_vm12, %v4453_v29  ;;  %v4401_v32 = vadd.f32 %v12214_v5, %v4334_v3  ;;  %v4337_v63 = vmul.f32 %v12210_v39, %v15397_v16  ;;  %v4402_v40 = vadd.f32 %v12214_v5, %v4335_v59  ;;  %v4462_v29 = vmax.f32 %v4398_v25, 0.0 }
 0x7ef   :  { %4628 = vst.msk [vmem:[#allocation4 + $0xc1] sm:$0xff] %vm3957_vm12, %v4454_v60  ;;  %v4338_v46 = vmul.f32 %v12210_v39, %v15398_v27  ;;  %v4403_v11 = vadd.f32 %v12214_v5, %v4336_v43  ;;  %v4463_v60 = vmax.f32 %v4399_v36, 0.0  ;;  %v4339_v31 = vmul.f32 %v12210_v39, %v15399_v51  ;;  %v4813_v51 = vld [vmem:[#allocation4 + $0x51] sm:$0xff] }
 0x7f0   :  { %4629 = vst.msk [vmem:[#allocation4 + $0xc9] sm:$0xff] %vm3957_vm12, %v4455_v10  ;;  %v4404_v13 = vadd.f32 %v12214_v5, %v4337_v63  ;;  %v4464_v10 = vmax.f32 %v4400_v62, 0.0  ;;  %v4340_v7 = vmul.f32 %v12210_v39, %v15400_v52  ;;  %v4341_v19 = vmul.f32 %v12210_v39, %v15401_v38 }
 0x7f1   :  { %4630 = vst.msk [vmem:[#allocation4 + $0xd9] sm:$0xff] %vm3957_vm12, %v4456_v53  ;;  %v4405_v42 = vadd.f32 %v12214_v5, %v4338_v46  ;;  %v4465_v53 = vmax.f32 %v4401_v32, 0.0  ;;  %v4406_v14 = vadd.f32 %v12214_v5, %v4339_v31  ;;  %v4342_v54 = vmul.f32 %v12210_v39, %v15402_v23 }
 0x7f2   :  { %4631 = vst.msk [vmem:[#allocation4 + $0xe1] sm:$0xff] %vm3957_vm12, %v4457_v34  ;;  %v4466_v34 = vmax.f32 %v4402_v40, 0.0  ;;  %v4407_v25 = vadd.f32 %v12214_v5, %v4340_v7  ;;  %v4343_v3 = vmul.f32 %v12210_v39, %v15403_v45  ;;  %v4408_v36 = vadd.f32 %v12214_v5, %v4341_v19  ;;  %4948 = vrot.lane.b32.xlu0 %v4813_v51, %s9612_s30  ;;  %v4815_v19 = vld [vmem:[#allocation4 + $0x69] sm:$0xff]  ;;  %v4818_v23 = vld [vmem:[#allocation4 + $0x91] sm:$0xff] }
 0x7f3   :  { %4632 = vst.msk [vmem:[#allocation4 + $0xf1] sm:$0xff] %vm3957_vm12, %v4458_v48  ;;  %v4467_v48 = vmax.f32 %v4403_v11, 0.0  ;;  %v4344_v59 = vmul.f32 %v12210_v39, %v15404_v58  ;;  %v4409_v62 = vadd.f32 %v12214_v5, %v4342_v54  ;;  %v4345_v43 = vmul.f32 %v12210_v39, %v15405_v18  ;;  %v4809_v39 = vld [vmem:[#allocation4 + $0x21] sm:$0xff]  ;;  %v4808_v11 = vld [vmem:[#allocation4 + $0x19] sm:$0xff]  ;;  %v12580_v45 = vld [vmem:[#allocation4 + $0x30] sm:$0xff] }
 0x7f4   :  { %4633 = vst.msk [vmem:[#allocation4 + $0xf9] sm:$0xff] %vm3957_vm12, %v4459_v1  ;;  %v4468_v1 = vmax.f32 %v4404_v13, 0.0  ;;  %v4410_v32 = vadd.f32 %v12214_v5, %v4343_v3  ;;  %v4471_v63 = vmax.f32 %v4407_v25, 0.0  ;;  %4940 = vrot.lane.b32.xlu2 %v4809_v39, %s9612_s30  ;;  %4938 = vrot.lane.b32.xlu1 %v4808_v11, %s9612_s30  ;;  %v4477_v31 = vmax.f32 %v12304_v61, 0.0  ;;  %v12585_v3 = vld [vmem:[#allocation4 + $0x90] sm:$0xff]  ;;  %v12646_v51 = vld [vmem:[#allocation4 + $0xa8] sm:$0xff] }
 0x7f5   :  { %4634 = vst.msk [vmem:[#allocation4 + $0x109] sm:$0xff] %vm3957_vm12, %v4460_v35  ;;  %v4469_v35 = vmax.f32 %v4405_v42, 0.0  ;;  %v4411_v16 = vadd.f32 %v12214_v5, %v4344_v59  ;;  %v4412_v40 = vadd.f32 %v12214_v5, %v4345_v43  ;;  %v4473_v27 = vmax.f32 %v4409_v62, 0.0  ;;  %v4812_v42 = vld [vmem:[#allocation4 + $0x49] sm:$0xff]  ;;  %v4821_v25 = vld [vmem:[#allocation4 + $0xb1] sm:$0xff] }
 0x7f6   :  { %4635 = vst.msk [vmem:[#allocation4 + $0x111] sm:$0xff] %vm3957_vm12, %v4461_v17  ;;  %v4470_v17 = vmax.f32 %v4406_v14, 0.0  ;;  %v4474_v46 = vmax.f32 %v4410_v32, 0.0  ;;  %v4478_v13 = vmax.f32 %v12307_v0, 0.0  ;;  %v4480_v52 = vmax.f32 %v12313_v20, 0.0  ;;  %v4811_v0 = vld [vmem:[#allocation4 + $0x39] sm:$0xff] }
 0x7f7   :  { %4636 = vst.msk [vmem:[#allocation4 + $0x121] sm:$0xff] %vm3957_vm12, %v4462_v29  ;;  %v4472_v29 = vmax.f32 %v4408_v36, 0.0  ;;  %v4476_v5 = vmax.f32 %v4412_v40, 0.0  ;;  %v4481_v7 = vmax.f32 %v12316_v57, 0.0  ;;  %v4482_v61 = vmax.f32 %v12319_v21, 0.0  ;;  %v12589_v36 = vld [vmem:[#allocation4 + $0x18] sm:$0xff] }
 0x7f8   :  { %4637 = vst.msk [vmem:[#allocation4 + $0x129] sm:$0xff] %vm3957_vm12, %v4463_v60  ;;  %v4475_v60 = vmax.f32 %v4411_v16, 0.0  ;;  %v4484_v20 = vmax.f32 %v12325_v41, 0.0  ;;  %v4485_v57 = vmax.f32 %v12328_v22, 0.0  ;;  %v4486_v21 = vmax.f32 %v12331_v56, 0.0  ;;  %v4814_v56 = vld [vmem:[#allocation4 + $0x61] sm:$0xff] }
 0x7f9   :  { %4638 = vst.msk [vmem:[#allocation4 + $0x139] sm:$0xff] %vm3957_vm12, %v4464_v10  ;;  %v4479_v10 = vmax.f32 %v12310_v2, 0.0  ;;  %v4816_v2 = vld [vmem:[#allocation4 + $0x79] sm:$0xff]  ;;  %v4488_v38 = vmax.f32 %v12337_v50, 0.0  ;;  %v4489_v41 = vmax.f32 %v12340_v49, 0.0  ;;  %v4490_v22 = vmax.f32 %v12343_v37, 0.0 }
 0x7fa   :  { %4639 = vst.msk [vmem:[#allocation4 + $0x141] sm:$0xff] %vm3957_vm12, %v4465_v53  ;;  %v4483_v53 = vmax.f32 %v12322_v12, 0.0  ;;  %4954 = vrot.lane.b32.xlu0 %v4816_v2, %s9612_s30  ;;  %v4487_v12 = vmax.f32 %v12334_v33, 0.0  ;;  %v4491_v14 = vmax.f32 %v12346_v8, 0.0  ;;  %v4819_v33 = vld [vmem:[#allocation4 + $0x99] sm:$0xff]  ;;  %v4492_v50 = vmax.f32 %v12349_v9, 0.0 }
 0x7fb   :  { %4640 = vst.msk [vmem:[#allocation4 + $0x151] sm:$0xff] %vm3957_vm12, %v4466_v34  ;;  %v4493_v49 = vmax.f32 %v12352_v26, 0.0  ;;  %v4494_v37 = vmax.f32 %v12355_v55, 0.0  ;;  %v4495_v8 = vmax.f32 %v12358_v6, 0.0  ;;  %v4496_v34 = vmax.f32 %v12361_v30, 0.0  ;;  %v4817_v55 = vld [vmem:[#allocation4 + $0x81] sm:$0xff] }
 0x7fc   :  { %4641 = vst.msk [vmem:[#allocation4 + $0x159] sm:$0xff] %vm3957_vm12, %v4467_v48  ;;  %4946 = vrot.lane.b32.xlu2 %v4812_v42, %s9612_s30  ;;  %4944 = vrot.lane.b32.xlu1 %v4811_v0, %s9612_s30  ;;  %v4497_v9 = vmax.f32 %v12364_v4, 0.0  ;;  %v4498_v26 = vmax.f32 %v12367_v47, 0.0  ;;  %v4499_v54 = vmax.f32 %v12370_v15, 0.0  ;;  %v4822_v6 = vld [vmem:[#allocation4 + $0xc1] sm:$0xff]  ;;  %v4500_v30 = vmax.f32 %v12373_v28, 0.0 }
 0x7fd   :  { %4642 = vst.msk [vmem:[#allocation4 + $0x169] sm:$0xff] %vm3957_vm12, %v4468_v1  ;;  %v4501_v4 = vmax.f32 %v12376_v44, 0.0  ;;  %v4502_v47 = vmax.f32 %v12379_v24, 0.0  ;;  %v12568_v15 = vld [vmem:[#allocation4 + $0x20] sm:$0xff]  ;;  %v12571_v28 = vld [vmem:[#allocation4 + $0x48] sm:$0xff]  ;;  %v12593_v1 = vld [vmem:[#allocation4 + $0x50] sm:$0xff] }
 0x7fe   :  { %4643 = vst.msk [vmem:[#allocation4 + $0x171] sm:$0xff] %vm3957_vm12, %v4469_v35  ;;  %v4820_v44 = vld [vmem:[#allocation4 + $0xa9] sm:$0xff]  ;;  %v4825_v24 = vld [vmem:[#allocation4 + $0xe1] sm:$0xff]  ;;  %v12601_v59 = vld [vmem:[#allocation4 + $0x38] sm:$0xff] }
 0x7ff   :  { %4644 = vst.msk [vmem:[#allocation4 + $0x181] sm:$0xff] %vm3957_vm12, %v4470_v17  ;;  %v12574_v48 = vld [vmem:[#allocation4 + $0x68] sm:$0xff]  ;;  %v12597_v58 = vld [vmem:[#allocation4 + $0xb0] sm:$0xff]  ;;  %v12605_v62 = vld [vmem:[#allocation4 + $0x78] sm:$0xff] }
 0x800   :  { %4645 = vst.msk [vmem:[#allocation4 + $0x189] sm:$0xff] %vm3957_vm12, %v4471_v63  ;;  %v4824_v35 = vld [vmem:[#allocation4 + $0xd9] sm:$0xff]  ;;  %v4823_v18 = vld [vmem:[#allocation4 + $0xc9] sm:$0xff]  ;;  %v4826_v39 = vld [vmem:[#allocation4 + $0xf1] sm:$0xff] }
 0x801   :  { %4646 = vst.msk [vmem:[#allocation4 + $0x1c9] sm:$0xff] %vm3957_vm12, %v4472_v29  ;;  %v12609_v43 = vld [vmem:[#allocation4 + $0xd8] sm:$0xff]  ;;  %v4828_v32 = vld [vmem:[#allocation4 + $0x109] sm:$0xff]  ;;  %v12615_v17 = vld [vmem:[#allocation4 + $0x60] sm:$0xff] }
 0x802   :  { %4647 = vst.msk [vmem:[#allocation4 + $0x1d1] sm:$0xff] %vm3957_vm12, %v4473_v27  ;;  %4960 = vrot.lane.b32.xlu0 %v4819_v33, %s9612_s30  ;;  %v12620_v16 = vld [vmem:[#allocation4 + $0x98] sm:$0xff]  ;;  %v12628_v40 = vld [vmem:[#allocation4 + $0x80] sm:$0xff]  ;;  %v4831_v11 = vld [vmem:[#allocation4 + $0x129] sm:$0xff] }
 0x803   :  { %4648 = vst.msk [vmem:[#allocation4 + $0x1e1] sm:$0xff] %vm3957_vm12, %v4474_v46  ;;  %v12624_v63 = vld [vmem:[#allocation4 + $0xf8] sm:$0xff]  ;;  %v12632_v29 = vld [vmem:[#allocation4 + $0xc0] sm:$0xff] }
 0x804   :  { %4649 = vst.msk [vmem:[#allocation4 + $0x1e9] sm:$0xff] %vm3957_vm12, %v4475_v60  ;;  %4952 = vrot.lane.b32.xlu2 %v4815_v19, %s9612_s30  ;;  %4950 = vrot.lane.b32.xlu1 %v4814_v56, %s9612_s30  ;;  %v12636_v27 = vld [vmem:[#allocation4 + $0x120] sm:$0xff]  ;;  %v4829_v0 = vld [vmem:[#allocation4 + $0x111] sm:$0xff] }
 0x805   :  { %4650 = vst.msk [vmem:[#allocation4 + $0x1f9] sm:$0xff] %vm3957_vm12, %v4476_v5  ;;  %v4827_v46 = vld [vmem:[#allocation4 + $0xf9] sm:$0xff]  ;;  %v4935_v5 = vpop.permute.xlu2 %4934  ;;  %v4830_v42 = vld [vmem:[#allocation4 + $0x121] sm:$0xff]  ;;  %v4834_v2 = vld [vmem:[#allocation4 + $0x151] sm:$0xff] }
 0x806   :  { %4651 = vst.msk [vmem:[#allocation4 + $0x201] sm:$0xff] %vm3957_vm12, %v4477_v31  ;;  %v4678_v60 = vld [vmem:[#allocation4] sm:$0xff]  ;;  %v4837_v33 = vld [vmem:[#allocation4 + $0x171] sm:$0xff] }
 0x807   :  { %4652 = vst.msk [vmem:[#allocation4 + $0x211] sm:$0xff] %vm3957_vm12, %v4478_v13  ;;  %v12650_v31 = vld [vmem:[#allocation4 + $0xe0] sm:$0xff] }
 0x808   :  { %4653 = vst.msk [vmem:[#allocation4 + $0x219] sm:$0xff] %vm3957_vm12, %v4479_v10  ;;  %v12653_v13 = vld [vmem:[#allocation4 + $0x140] sm:$0xff]  ;;  %v12657_v10 = vld [vmem:[#allocation4 + $0xc8] sm:$0xff] }
 0x809   :  { %4654 = vst.msk [vmem:[#allocation4 + $0x229] sm:$0xff] %vm3957_vm12, %v4480_v52  ;;  %v12661_v52 = vld [vmem:[#allocation4 + $0x108] sm:$0xff]  ;;  %v4832_v56 = vld [vmem:[#allocation4 + $0x139] sm:$0xff] }
 0x80a   :  { %4655 = vst.msk [vmem:[#allocation4 + $0x231] sm:$0xff] %vm3957_vm12, %v4481_v7  ;;  %4966 = vrot.lane.b32.xlu0 %v4822_v6, %s9612_s30  ;;  %v12665_v7 = vld [vmem:[#allocation4 + $0x168] sm:$0xff] }
 0x80b   :  { %4656 = vst.msk [vmem:[#allocation4 + $0x241] sm:$0xff] %vm3957_vm12, %v4482_v61  ;;  %v12669_v61 = vld [vmem:[#allocation4 + $0xf0] sm:$0xff]  ;;  %v4833_v19 = vld [vmem:[#allocation4 + $0x141] sm:$0xff] }
 0x80c   :  { %4657 = vst.msk [vmem:[#allocation4 + $0x249] sm:$0xff] %vm3957_vm12, %v4483_v53  ;;  %4958 = vrot.lane.b32.xlu2 %v4818_v23, %s9612_s30  ;;  %4956 = vrot.lane.b32.xlu1 %v4817_v55, %s9612_s30  ;;  %v12673_v53 = vld [vmem:[#allocation4 + $0x128] sm:$0xff]  ;;  %v4835_v23 = vld [vmem:[#allocation4 + $0x159] sm:$0xff] }
 0x80d   :  { %4658 = vst.msk [vmem:[#allocation4 + $0x259] sm:$0xff] %vm3957_vm12, %v4484_v20  ;;  %v12679_v20 = vld [vmem:[#allocation4 + $0x110] sm:$0xff]  ;;  %v12745_v6 = vld [vmem:[#allocation4 + $0x1f8] sm:$0xff] }
 0x80e   :  { %4659 = vst.msk [vmem:[#allocation4 + $0x261] sm:$0xff] %vm3957_vm12, %v4485_v57  ;;  %v12684_v57 = vld [vmem:[#allocation4 + $0x150] sm:$0xff] }
 0x80f   :  { %4660 = vst.msk [vmem:[#allocation4 + $0x271] sm:$0xff] %vm3957_vm12, %v4486_v21  ;;  %v12688_v21 = vld [vmem:[#allocation4 + $0x1e0] sm:$0xff]  ;;  %v4840_v55 = vld [vmem:[#allocation4 + $0x1c9] sm:$0xff] }
 0x810   :  { %4661 = vst.msk [vmem:[#allocation4 + $0x279] sm:$0xff] %vm3957_vm12, %v4487_v12  ;;  %v12692_v12 = vld [vmem:[#allocation4 + $0x138] sm:$0xff] }
 0x811   :  { %4662 = vst.msk [vmem:[#allocation4 + $0x289] sm:$0xff] %vm3957_vm12, %v4488_v38  ;;  %v12696_v38 = vld [vmem:[#allocation4 + $0x170] sm:$0xff] }
 0x812   :  { %4663 = vst.msk [vmem:[#allocation4 + $0x291] sm:$0xff] %vm3957_vm12, %v4489_v41  ;;  %4972 = vrot.lane.b32.xlu0 %v4825_v24, %s9612_s30  ;;  %v12700_v41 = vld [vmem:[#allocation4 + $0x200] sm:$0xff] }
 0x813   :  { %4664 = vst.msk [vmem:[#allocation4 + $0x2a1] sm:$0xff] %vm3957_vm12, %v4490_v22  ;;  %v12704_v22 = vld [vmem:[#allocation4 + $0x158] sm:$0xff] }
 0x814   :  { %4665 = vst.msk [vmem:[#allocation4 + $0x2a9] sm:$0xff] %vm3957_vm12, %v4491_v14  ;;  %4964 = vrot.lane.b32.xlu2 %v4821_v25, %s9612_s30  ;;  %4962 = vrot.lane.b32.xlu1 %v4820_v44, %s9612_s30  ;;  %v12708_v14 = vld [vmem:[#allocation4 + $0x1c8] sm:$0xff]  ;;  %v12756_v25 = vld [vmem:[#allocation4 + $0x218] sm:$0xff] }
 0x815   :  { %4666 = vst.msk [vmem:[#allocation4 + $0x2b9] sm:$0xff] %vm3957_vm12, %v4492_v50  ;;  %v12714_v50 = vld [vmem:[#allocation4 + $0x228] sm:$0xff]  ;;  %v12760_v44 = vld [vmem:[#allocation4 + $0x258] sm:$0xff] }
 0x816   :  { %4667 = vst.msk [vmem:[#allocation4 + $0x2c1] sm:$0xff] %vm3957_vm12, %v4493_v49  ;;  %v12719_v49 = vld [vmem:[#allocation4 + $0x1e8] sm:$0xff]  ;;  %v4839_v24 = vld [vmem:[#allocation4 + $0x1b9] sm:$0xff] }
 0x817   :  { %4668 = vst.msk [vmem:[#allocation4 + $0x2d1] sm:$0xff] %vm3957_vm12, %v4494_v37  ;;  %v12723_v37 = vld [vmem:[#allocation4 + $0x248] sm:$0xff] }
 0x818   :  { %4669 = vst.msk [vmem:[#allocation4 + $0x2d9] sm:$0xff] %vm3957_vm12, %v4495_v8  ;;  %v12727_v8 = vld [vmem:[#allocation4 + $0x1d0] sm:$0xff] }
 0x819   :  { %4670 = vst.msk [vmem:[#allocation4 + $0x2e9] sm:$0xff] %vm3957_vm12, %v4496_v34  ;;  %v12731_v34 = vld [vmem:[#allocation4 + $0x210] sm:$0xff] }
 0x81a   :  { %4671 = vst.msk [vmem:[#allocation4 + $0x2f1] sm:$0xff] %vm3957_vm12, %v4497_v9  ;;  %4978 = vrot.lane.b32.xlu0 %v4828_v32, %s9612_s30  ;;  %v12735_v9 = vld [vmem:[#allocation4 + $0x270] sm:$0xff]  ;;  %v12768_v32 = vld [vmem:[#allocation4 + $0x240] sm:$0xff] }
 0x81b   :  { %4672 = vst.msk [vmem:[#allocation4 + $0x301] sm:$0xff] %vm3957_vm12, %v4498_v26  ;;  %v4836_v26 = vld [vmem:[#allocation4 + $0x169] sm:$0xff] }
 0x81c   :  { %4673 = vst.msk [vmem:[#allocation4 + $0x309] sm:$0xff] %vm3957_vm12, %v4499_v54  ;;  %4970 = vrot.lane.b32.xlu2 %v4824_v35, %s9612_s30  ;;  %4968 = vrot.lane.b32.xlu1 %v4823_v18, %s9612_s30  ;;  %v4679_v54 = vld [vmem:[#allocation4 + $0x8] sm:$0xff]  ;;  %v4838_v35 = vld [vmem:[#allocation4 + $0x1b1] sm:$0xff] }
 0x81d   :  { %4674 = vst.msk [vmem:[#allocation4 + $0x319] sm:$0xff] %vm3957_vm12, %v4500_v30  ;;  %v4937_v30 = vpop.permute.xlu0 %4936  ;;  %v12764_v18 = vld [vmem:[#allocation4 + $0x2b8] sm:$0xff] }
 0x81e   :  { %4675 = vst.msk [vmem:[#allocation4 + $0x321] sm:$0xff] %vm3957_vm12, %v4501_v4  ;;  %v12749_v4 = vld [vmem:[#allocation4 + $0x230] sm:$0xff] }
 0x81f   :  { %4676 = vst.msk [vmem:[#allocation4 + $0x331] sm:$0xff] %vm3957_vm12, %v4502_v47  ;;  %v12752_v47 = vld [vmem:[#allocation4 + $0x290] sm:$0xff] }
 0x820   :  { %4745 = vst.msk [vmem:[#allocation5 + $0x18] sm:$0xff] %vm3957_vm12, %v12568_v15 }
 0x821   :  { %4748 = vst.msk [vmem:[#allocation5 + $0x30] sm:$0xff] %vm3957_vm12, %v12571_v28 }
 0x822   :  { %4751 = vst.msk [vmem:[#allocation5 + $0x48] sm:$0xff] %vm3957_vm12, %v12574_v48  ;;  %4984 = vrot.lane.b32.xlu0 %v4831_v11, %s9612_s30  ;;  %v12778_v11 = vld [vmem:[#allocation4 + $0x2d8] sm:$0xff] }
 0x823   :  { %4746 = vst.msk [vmem:[#allocation5 + $0x20] sm:$0xff] %vm3957_vm12, %v12580_v45 }
 0x824   :  { %4754 = vst.msk [vmem:[#allocation5 + $0x60] sm:$0xff] %vm3957_vm12, %v12585_v3  ;;  %4976 = vrot.lane.b32.xlu2 %v4827_v46, %s9612_s30  ;;  %4974 = vrot.lane.b32.xlu1 %v4826_v39, %s9612_s30  ;;  %v12772_v46 = vld [vmem:[#allocation4 + $0x278] sm:$0xff]  ;;  %v4843_v39 = vld [vmem:[#allocation4 + $0x1e9] sm:$0xff] }
 0x825   :  { %4744 = vst.msk [vmem:[#allocation5 + $0x10] sm:$0xff] %vm3957_vm12, %v12589_v36 }
 0x826   :  { %4749 = vst.msk [vmem:[#allocation5 + $0x38] sm:$0xff] %vm3957_vm12, %v12593_v1 }
 0x827   :  { %4757 = vst.msk [vmem:[#allocation5 + $0x78] sm:$0xff] %vm3957_vm12, %v12597_v58 }
 0x828   :  { %4747 = vst.msk [vmem:[#allocation5 + $0x28] sm:$0xff] %vm3957_vm12, %v12601_v59 }
 0x829   :  { %4752 = vst.msk [vmem:[#allocation5 + $0x50] sm:$0xff] %vm3957_vm12, %v12605_v62 }
 0x82a   :  { %4760 = vst.msk [vmem:[#allocation5 + $0x90] sm:$0xff] %vm3957_vm12, %v12609_v43  ;;  %4990 = vrot.lane.b32.xlu0 %v4834_v2, %s9612_s30  ;;  %v12799_v2 = vld [vmem:[#allocation4 + $0x2c0] sm:$0xff] }
 0x82b   :  { %4750 = vst.msk [vmem:[#allocation5 + $0x40] sm:$0xff] %vm3957_vm12, %v12615_v17 }
 0x82c   :  { %4755 = vst.msk [vmem:[#allocation5 + $0x68] sm:$0xff] %vm3957_vm12, %v12620_v16  ;;  %4982 = vrot.lane.b32.xlu2 %v4830_v42, %s9612_s30  ;;  %4980 = vrot.lane.b32.xlu1 %v4829_v0, %s9612_s30  ;;  %v12791_v42 = vld [vmem:[#allocation4 + $0x300] sm:$0xff]  ;;  %v12795_v0 = vld [vmem:[#allocation4 + $0x288] sm:$0xff] }
 0x82d   :  { %4763 = vst.msk [vmem:[#allocation5 + $0xa8] sm:$0xff] %vm3957_vm12, %v12624_v63 }
 0x82e   :  { %4753 = vst.msk [vmem:[#allocation5 + $0x58] sm:$0xff] %vm3957_vm12, %v12628_v40 }
 0x82f   :  { %4758 = vst.msk [vmem:[#allocation5 + $0x80] sm:$0xff] %vm3957_vm12, %v12632_v29 }
 0x830   :  { %4766 = vst.msk [vmem:[#allocation5 + $0xc0] sm:$0xff] %vm3957_vm12, %v12636_v27 }
 0x831   :  { %4742 = vst.msk [vmem:[#allocation5] sm:$0xff] %vm3957_vm12, %v4678_v60  ;;  %v12783_v60 = vld [vmem:[#allocation4 + $0x260] sm:$0xff] }
 0x832   :  { %5127 = vst.msk [vmem:[#allocation5] sm:$0xff] %vm5126_vm1, %v4935_v5  ;;  %4996 = vrot.lane.b32.xlu0 %v4837_v33, %s9612_s30  ;;  %v12787_v5 = vld [vmem:[#allocation4 + $0x2a0] sm:$0xff]  ;;  %v4841_v33 = vld [vmem:[#allocation4 + $0x1d1] sm:$0xff] }
 0x833   :  { %4756 = vst.msk [vmem:[#allocation5 + $0x70] sm:$0xff] %vm3957_vm12, %v12646_v51 }
 0x834   :  { %4761 = vst.msk [vmem:[#allocation5 + $0x98] sm:$0xff] %vm3957_vm12, %v12650_v31  ;;  %4988 = vrot.lane.b32.xlu2 %v4833_v19, %s9612_s30  ;;  %4986 = vrot.lane.b32.xlu1 %v4832_v56, %s9612_s30  ;;  %v12803_v19 = vld [vmem:[#allocation4 + $0x320] sm:$0xff] }
 0x835   :  { %4769 = vst.msk [vmem:[#allocation5 + $0xd8] sm:$0xff] %vm3957_vm12, %v12653_v13  ;;  %v4842_v56 = vld [vmem:[#allocation4 + $0x1e1] sm:$0xff] }
 0x836   :  { %4759 = vst.msk [vmem:[#allocation5 + $0x88] sm:$0xff] %vm3957_vm12, %v12657_v10 }
 0x837   :  { %4764 = vst.msk [vmem:[#allocation5 + $0xb0] sm:$0xff] %vm3957_vm12, %v12661_v52 }
 0x838   :  { %4772 = vst.msk [vmem:[#allocation5 + $0xf0] sm:$0xff] %vm3957_vm12, %v12665_v7 }
 0x839   :  { %4762 = vst.msk [vmem:[#allocation5 + $0xa0] sm:$0xff] %vm3957_vm12, %v12669_v61 }
 0x83a   :  { %4767 = vst.msk [vmem:[#allocation5 + $0xc8] sm:$0xff] %vm3957_vm12, %v12673_v53  ;;  %5002 = vrot.lane.b32.xlu0 %v4840_v55, %s9612_s30  ;;  %v12816_v55 = vld [vmem:[#allocation4 + $0x2e8] sm:$0xff] }
 0x83b   :  { %4765 = vst.msk [vmem:[#allocation5 + $0xb8] sm:$0xff] %vm3957_vm12, %v12679_v20 }
 0x83c   :  { %4770 = vst.msk [vmem:[#allocation5 + $0xe0] sm:$0xff] %vm3957_vm12, %v12684_v57  ;;  %4994 = vrot.lane.b32.xlu2 %v4836_v26, %s9612_s30  ;;  %4992 = vrot.lane.b32.xlu1 %v4835_v23, %s9612_s30  ;;  %v12807_v26 = vld [vmem:[#allocation4 + $0x2a8] sm:$0xff]  ;;  %v4846_v23 = vld [vmem:[#allocation4 + $0x211] sm:$0xff] }
 0x83d   :  { %4778 = vst.msk [vmem:[#allocation5 + $0x120] sm:$0xff] %vm3957_vm12, %v12688_v21 }
 0x83e   :  { %4768 = vst.msk [vmem:[#allocation5 + $0xd0] sm:$0xff] %vm3957_vm12, %v12692_v12 }
 0x83f   :  { %4773 = vst.msk [vmem:[#allocation5 + $0xf8] sm:$0xff] %vm3957_vm12, %v12696_v38 }
 0x840   :  { %4781 = vst.msk [vmem:[#allocation5 + $0x138] sm:$0xff] %vm3957_vm12, %v12700_v41 }
 0x841   :  { %4771 = vst.msk [vmem:[#allocation5 + $0xe8] sm:$0xff] %vm3957_vm12, %v12704_v22 }
 0x842   :  { %4776 = vst.msk [vmem:[#allocation5 + $0x110] sm:$0xff] %vm3957_vm12, %v12708_v14  ;;  %5008 = vrot.lane.b32.xlu0 %v4843_v39, %s9612_s30  ;;  %v12828_v39 = vld [vmem:[#allocation4 + $0x2f0] sm:$0xff] }
 0x843   :  { %4784 = vst.msk [vmem:[#allocation5 + $0x150] sm:$0xff] %vm3957_vm12, %v12714_v50 }
 0x844   :  { %4779 = vst.msk [vmem:[#allocation5 + $0x128] sm:$0xff] %vm3957_vm12, %v12719_v49  ;;  %5000 = vrot.lane.b32.xlu2 %v4839_v24, %s9612_s30  ;;  %4998 = vrot.lane.b32.xlu1 %v4838_v35, %s9612_s30  ;;  %v12825_v35 = vld [vmem:[#allocation4 + $0x308] sm:$0xff] }
 0x845   :  { %4787 = vst.msk [vmem:[#allocation5 + $0x168] sm:$0xff] %vm3957_vm12, %v12723_v37 }
 0x846   :  { %4777 = vst.msk [vmem:[#allocation5 + $0x118] sm:$0xff] %vm3957_vm12, %v12727_v8 }
 0x847   :  { %4782 = vst.msk [vmem:[#allocation5 + $0x140] sm:$0xff] %vm3957_vm12, %v12731_v34 }
 0x848   :  { %4790 = vst.msk [vmem:[#allocation5 + $0x180] sm:$0xff] %vm3957_vm12, %v12735_v9 }
 0x849   :  { %4743 = vst.msk [vmem:[#allocation5 + $0x8] sm:$0xff] %vm3957_vm12, %v4679_v54 }
 0x84a   :  { %5128 = vst.msk [vmem:[#allocation5 + $0x8] sm:$0xff] %vm5126_vm1, %v4937_v30  ;;  %5014 = vrot.lane.b32.xlu0 %v4846_v23, %s9612_s30  ;;  %v12821_v30 = vld [vmem:[#allocation4 + $0x2d0] sm:$0xff]  ;;  %v4844_v23 = vld [vmem:[#allocation4 + $0x1f9] sm:$0xff] }
 0x84b   :  { %4780 = vst.msk [vmem:[#allocation5 + $0x130] sm:$0xff] %vm3957_vm12, %v12745_v6 }
 0x84c   :  { %4785 = vst.msk [vmem:[#allocation5 + $0x158] sm:$0xff] %vm3957_vm12, %v12749_v4  ;;  %5006 = vrot.lane.b32.xlu2 %v4842_v56, %s9612_s30  ;;  %5004 = vrot.lane.b32.xlu1 %v4841_v33, %s9612_s30  ;;  %v12832_v56 = vld [vmem:[#allocation4 + $0x318] sm:$0xff]  ;;  %v4845_v33 = vld [vmem:[#allocation4 + $0x201] sm:$0xff] }
 0x84d   :  { %4793 = vst.msk [vmem:[#allocation5 + $0x198] sm:$0xff] %vm3957_vm12, %v12752_v47 }
 0x84e   :  { %4783 = vst.msk [vmem:[#allocation5 + $0x148] sm:$0xff] %vm3957_vm12, %v12756_v25  ;;  %v4941_v54 = vpop.permute.xlu2 %4940 }
 0x84f   :  { %4788 = vst.msk [vmem:[#allocation5 + $0x170] sm:$0xff] %vm3957_vm12, %v12760_v44 }
 0x850   :  { %4796 = vst.msk [vmem:[#allocation5 + $0x1b0] sm:$0xff] %vm3957_vm12, %v12764_v18 }
 0x851   :  { %4786 = vst.msk [vmem:[#allocation5 + $0x160] sm:$0xff] %vm3957_vm12, %v12768_v32 }
 0x852   :  { %4791 = vst.msk [vmem:[#allocation5 + $0x188] sm:$0xff] %vm3957_vm12, %v12772_v46 }
 0x853   :  { %4799 = vst.msk [vmem:[#allocation5 + $0x1c8] sm:$0xff] %vm3957_vm12, %v12778_v11 }
 0x854   :  { %15406 = vst [vmem:[#allocation8_spill] sm:$0xff] %v12791_v42  ;;  %5012 = vrot.lane.b32.xlu2 %v4845_v33, %s9612_s30  ;;  %5010 = vrot.lane.b32.xlu1 %v4844_v23, %s9612_s30  ;;  %v4852_v33 = vld [vmem:[#allocation4 + $0x259] sm:$0xff] }
 0x855   :  { %4789 = vst.msk [vmem:[#allocation5 + $0x178] sm:$0xff] %vm3957_vm12, %v12783_v60 }
 0x856   :  { %4794 = vst.msk [vmem:[#allocation5 + $0x1a0] sm:$0xff] %vm3957_vm12, %v12787_v5 }
 0x857   :  { %4802 = vst.msk [vmem:[#allocation5 + $0x1e0] sm:$0xff] %vm3957_vm12, %v12791_v42  ;;  %v4847_v42 = vld [vmem:[#allocation4 + $0x219] sm:$0xff] }
 0x858   :  { %15407 = vst [vmem:[#allocation6_spill] sm:$0xff] %v12803_v19 }
 0x859   :  { %4792 = vst.msk [vmem:[#allocation5 + $0x190] sm:$0xff] %vm3957_vm12, %v12795_v0 }
 0x85a   :  { %4797 = vst.msk [vmem:[#allocation5 + $0x1b8] sm:$0xff] %vm3957_vm12, %v12799_v2 }
 0x85b   :  { %4805 = vst.msk [vmem:[#allocation5 + $0x1f8] sm:$0xff] %vm3957_vm12, %v12803_v19  ;;  %v4848_v19 = vld [vmem:[#allocation4 + $0x229] sm:$0xff] }
 0x85c   :  { %4795 = vst.msk [vmem:[#allocation5 + $0x1a8] sm:$0xff] %vm3957_vm12, %v12807_v26  ;;  %v4943_v24 = vpop.permute.xlu0 %4942  ;;  %5018 = vrot.lane.b32.xlu2 %v4848_v19, %s9612_s30  ;;  %5016 = vrot.lane.b32.xlu1 %v4847_v42, %s9612_s30  ;;  %v4854_v19 = vld [vmem:[#allocation4 + $0x271] sm:$0xff] }
 0x85d   :  { %5130 = vst.msk [vmem:[#allocation5 + $0x18] sm:$0xff] %vm5126_vm1, %v4941_v54  ;;  %v4849_v54 = vld [vmem:[#allocation4 + $0x231] sm:$0xff] }
 0x85e   :  { %4800 = vst.msk [vmem:[#allocation5 + $0x1d0] sm:$0xff] %vm3957_vm12, %v12816_v55  ;;  %5020 = vrot.lane.b32.xlu0 %v4849_v54, %s9612_s30  ;;  %v4850_v54 = vld [vmem:[#allocation4 + $0x241] sm:$0xff] }
 0x85f   :  { %15408 = vst [vmem:[#allocation7_spill] sm:$0xff] %v12825_v35 }
 0x860   :  { %5131 = vst.msk [vmem:[#allocation5 + $0x20] sm:$0xff] %vm5126_vm1, %v4943_v24  ;;  %v4947_v24 = vpop.permute.xlu2 %4946 }
 0x861   :  { %15409 = vst [vmem:[#allocation9_spill] sm:$0xff] %v12828_v39 }
 0x862   :  { %4798 = vst.msk [vmem:[#allocation5 + $0x1c0] sm:$0xff] %vm3957_vm12, %v12821_v30 }
 0x863   :  { %15410 = vst [vmem:[#allocation10_spill] sm:$0xff] %v12832_v56 }
 0x864   :  { %4803 = vst.msk [vmem:[#allocation5 + $0x1e8] sm:$0xff] %vm3957_vm12, %v12825_v35  ;;  %5022 = vrot.lane.b32.xlu1 %v4850_v54, %s9612_s30  ;;  %v4949_v42 = vpop.permute.xlu0 %4948 }
 0x865   :  { %4801 = vst.msk [vmem:[#allocation5 + $0x1d8] sm:$0xff] %vm3957_vm12, %v12828_v39  ;;  %v4851_v39 = vld [vmem:[#allocation4 + $0x249] sm:$0xff] }
 0x866   :  { %4804 = vst.msk [vmem:[#allocation5 + $0x1f0] sm:$0xff] %vm3957_vm12, %v12832_v56  ;;  %5026 = vrot.lane.b32.xlu0 %v4852_v33, %s9612_s30  ;;  %5024 = vrot.lane.b32.xlu2 %v4851_v39, %s9612_s30  ;;  %v4855_v56 = vld [vmem:[#allocation4 + $0x279] sm:$0xff]  ;;  %v4939_v35 = vpop.permute.xlu1 %4938  ;;  %v4853_v33 = vld [vmem:[#allocation4 + $0x261] sm:$0xff] }
 0x867   :  { %5133 = vst.msk [vmem:[#allocation5 + $0x30] sm:$0xff] %vm5126_vm1, %v4947_v24  ;;  %v4858_v39 = vld [vmem:[#allocation4 + $0x2a1] sm:$0xff] }
 0x868   :  { %v4953_v23 = vpop.permute.xlu2 %4952  ;;  %5129 = vst.msk [vmem:[#allocation5 + $0x10] sm:$0xff] %vm5126_vm1, %v4939_v35  ;;  %v4857_v35 = vld [vmem:[#allocation4 + $0x291] sm:$0xff] }
 0x869   :  { %5136 = vst.msk [vmem:[#allocation5 + $0x48] sm:$0xff] %vm5126_vm1, %v4953_v23 }
 0x86a   :  { %5134 = vst.msk [vmem:[#allocation5 + $0x38] sm:$0xff] %vm5126_vm1, %v4949_v42  ;;  %v4861_v42 = vld [vmem:[#allocation4 + $0x2c1] sm:$0xff] }
 0x86c   :  { %5028 = vrot.lane.b32.xlu1 %v4853_v33, %s9612_s30  ;;  %v4955_v54 = vpop.permute.xlu0 %4954 }
 0x86d   :  { %5137 = vst.msk [vmem:[#allocation5 + $0x50] sm:$0xff] %vm5126_vm1, %v4955_v54  ;;  %v4864_v54 = vld [vmem:[#allocation4 + $0x2e9] sm:$0xff] }
 0x86e   :  { %5032 = vrot.lane.b32.xlu0 %v4855_v56, %s9612_s30  ;;  %5030 = vrot.lane.b32.xlu2 %v4854_v19, %s9612_s30  ;;  %v4945_v56 = vpop.permute.xlu1 %4944 }
 0x86f   :  { %5132 = vst.msk [vmem:[#allocation5 + $0x28] sm:$0xff] %vm5126_vm1, %v4945_v56  ;;  %v4859_v56 = vld [vmem:[#allocation4 + $0x2a9] sm:$0xff] }
 0x870   :  { %v4959_v24 = vpop.permute.xlu2 %4958 }
 0x871   :  { %5139 = vst.msk [vmem:[#allocation5 + $0x60] sm:$0xff] %vm5126_vm1, %v4959_v24  ;;  %v4856_v24 = vld [vmem:[#allocation4 + $0x289] sm:$0xff] }
 0x874   :  { %5034 = vrot.lane.b32.xlu1 %v4856_v24, %s9612_s30 }
 0x876   :  { %5038 = vrot.lane.b32.xlu0 %v4858_v39, %s9612_s30  ;;  %5036 = vrot.lane.b32.xlu2 %v4857_v35, %s9612_s30  ;;  %v4951_v33 = vpop.permute.xlu1 %4950  ;;  %v4961_v39 = vpop.permute.xlu0 %4960  ;;  %v4711_v35 = vld [vmem:[#allocation4 + $0x1b8] sm:$0xff] }
 0x877   :  { %5135 = vst.msk [vmem:[#allocation5 + $0x40] sm:$0xff] %vm5126_vm1, %v4951_v33  ;;  %v4863_v33 = vld [vmem:[#allocation4 + $0x2d9] sm:$0xff] }
 0x878   :  { %v4965_v23 = vpop.permute.xlu2 %4964  ;;  %5140 = vst.msk [vmem:[#allocation5 + $0x68] sm:$0xff] %vm5126_vm1, %v4961_v39  ;;  %v4862_v39 = vld [vmem:[#allocation4 + $0x2d1] sm:$0xff] }
 0x879   :  { %5142 = vst.msk [vmem:[#allocation5 + $0x78] sm:$0xff] %vm5126_vm1, %v4965_v23  ;;  %v4860_v23 = vld [vmem:[#allocation4 + $0x2b9] sm:$0xff] }
 0x87a   :  { %4775 = vst.msk [vmem:[#allocation5 + $0x108] sm:$0xff] %vm3957_vm12, %v4711_v35 }
 0x87c   :  { %5040 = vrot.lane.b32.xlu1 %v4859_v56, %s9612_s30 }
 0x87e   :  { %5044 = vrot.lane.b32.xlu0 %v4861_v42, %s9612_s30  ;;  %5042 = vrot.lane.b32.xlu2 %v4860_v23, %s9612_s30  ;;  %v4957_v42 = vpop.permute.xlu1 %4956  ;;  %v4867_v23 = vld [vmem:[#allocation4 + $0x309] sm:$0xff] }
 0x87f   :  { %5138 = vst.msk [vmem:[#allocation5 + $0x58] sm:$0xff] %vm5126_vm1, %v4957_v42  ;;  %v4866_v42 = vld [vmem:[#allocation4 + $0x301] sm:$0xff] }
 0x880   :  { %v4971_v19 = vpop.permute.xlu2 %4970 }
 0x881   :  { %5145 = vst.msk [vmem:[#allocation5 + $0x90] sm:$0xff] %vm5126_vm1, %v4971_v19  ;;  %v4967_v19 = vpop.permute.xlu0 %4966 }
 0x882   :  { %5143 = vst.msk [vmem:[#allocation5 + $0x80] sm:$0xff] %vm5126_vm1, %v4967_v19  ;;  %v4865_v19 = vld [vmem:[#allocation4 + $0x2f1] sm:$0xff] }
 0x884   :  { %5046 = vrot.lane.b32.xlu1 %v4862_v39, %s9612_s30 }
 0x886   :  { %5050 = vrot.lane.b32.xlu0 %v4864_v54, %s9612_s30  ;;  %5048 = vrot.lane.b32.xlu2 %v4863_v33, %s9612_s30  ;;  %v4963_v54 = vpop.permute.xlu1 %4962 }
 0x887   :  { %5141 = vst.msk [vmem:[#allocation5 + $0x70] sm:$0xff] %vm5126_vm1, %v4963_v54  ;;  %v4868_v54 = vld [vmem:[#allocation4 + $0x319] sm:$0xff] }
 0x888   :  { %v4977_v24 = vpop.permute.xlu2 %4976 }
 0x889   :  { %5148 = vst.msk [vmem:[#allocation5 + $0xa8] sm:$0xff] %vm5126_vm1, %v4977_v24  ;;  %v4973_v35 = vpop.permute.xlu0 %4972  ;;  %v5191_v24 = vld [vmem:[#allocation4 + $0x2] sm:$0xff] }
 0x88a   :  { %5146 = vst.msk [vmem:[#allocation5 + $0x98] sm:$0xff] %vm5126_vm1, %v4973_v35  ;;  %v5194_v35 = vld [vmem:[#allocation4 + $0x22] sm:$0xff] }
 0x88c   :  { %5052 = vrot.lane.b32.xlu1 %v4865_v19, %s9612_s30 }
 0x88e   :  { %5056 = vrot.lane.b32.xlu0 %v4867_v23, %s9612_s30  ;;  %5054 = vrot.lane.b32.xlu2 %v4866_v42, %s9612_s30  ;;  %v4969_v39 = vpop.permute.xlu1 %4968 }
 0x88f   :  { %5144 = vst.msk [vmem:[#allocation5 + $0x88] sm:$0xff] %vm5126_vm1, %v4969_v39  ;;  %v5192_v39 = vld [vmem:[#allocation4 + $0xa] sm:$0xff] }
 0x890   :  { %v4983_v56 = vpop.permute.xlu2 %4982 }
 0x891   :  { %5151 = vst.msk [vmem:[#allocation5 + $0xc0] sm:$0xff] %vm5126_vm1, %v4983_v56  ;;  %v4979_v23 = vpop.permute.xlu0 %4978  ;;  %v4869_v56 = vld [vmem:[#allocation4 + $0x321] sm:$0xff] }
 0x892   :  { %5149 = vst.msk [vmem:[#allocation5 + $0xb0] sm:$0xff] %vm5126_vm1, %v4979_v23  ;;  %v5193_v23 = vld [vmem:[#allocation4 + $0x1a] sm:$0xff] }
 0x894   :  { %5058 = vrot.lane.b32.xlu1 %v4868_v54, %s9612_s30 }
 0x896   :  { %5319 = vrot.lane.b32.xlu0 %v5191_v24, %s9614_s0  ;;  %5060 = vrot.lane.b32.xlu2 %v4869_v56, %s9612_s30  ;;  %v4975_v24 = vpop.permute.xlu1 %4974  ;;  %v5197_v56 = vld [vmem:[#allocation4 + $0x4a] sm:$0xff]  ;;  %s9621_s30 = smov 56  }
 0x897   :  { %5147 = vst.msk [vmem:[#allocation5 + $0xa0] sm:$0xff] %vm5126_vm1, %v4975_v24  ;;  %v5196_v24 = vld [vmem:[#allocation4 + $0x3a] sm:$0xff] }
 0x898   :  { %v4989_v33 = vpop.permute.xlu2 %4988 }
 0x899   :  { %5154 = vst.msk [vmem:[#allocation5 + $0xd8] sm:$0xff] %vm5126_vm1, %v4989_v33  ;;  %v4985_v19 = vpop.permute.xlu0 %4984  ;;  %v4710_v33 = vld [vmem:[#allocation4 + $0x1b0] sm:$0xff] }
 0x89a   :  { %5152 = vst.msk [vmem:[#allocation5 + $0xc8] sm:$0xff] %vm5126_vm1, %v4985_v19  ;;  %v5195_v19 = vld [vmem:[#allocation4 + $0x32] sm:$0xff] }
 0x89b   :  { %4774 = vst.msk [vmem:[#allocation5 + $0x100] sm:$0xff] %vm3957_vm12, %v4710_v33  ;;  %v5200_v33 = vld [vmem:[#allocation4 + $0x6a] sm:$0xff] }
 0x89c   :  { %5321 = vrot.lane.b32.xlu1 %v5192_v39, %s9614_s0 }
 0x89e   :  { %5325 = vrot.lane.b32.xlu0 %v5194_v35, %s9614_s0  ;;  %5323 = vrot.lane.b32.xlu2 %v5193_v23, %s9614_s0  ;;  %v4981_v35 = vpop.permute.xlu1 %4980 }
 0x89f   :  { %5150 = vst.msk [vmem:[#allocation5 + $0xb8] sm:$0xff] %vm5126_vm1, %v4981_v35  ;;  %v5198_v35 = vld [vmem:[#allocation4 + $0x52] sm:$0xff] }
 0x8a0   :  { %v4995_v42 = vpop.permute.xlu2 %4994 }
 0x8a1   :  { %5157 = vst.msk [vmem:[#allocation5 + $0xf0] sm:$0xff] %vm5126_vm1, %v4995_v42  ;;  %v4991_v42 = vpop.permute.xlu0 %4990 }
 0x8a2   :  { %5155 = vst.msk [vmem:[#allocation5 + $0xe0] sm:$0xff] %vm5126_vm1, %v4991_v42  ;;  %v5203_v42 = vld [vmem:[#allocation4 + $0x92] sm:$0xff] }
 0x8a4   :  { %5327 = vrot.lane.b32.xlu1 %v5195_v19, %s9614_s0 }
 0x8a6   :  { %5331 = vrot.lane.b32.xlu0 %v5197_v56, %s9614_s0  ;;  %5329 = vrot.lane.b32.xlu2 %v5196_v24, %s9614_s0  ;;  %v4987_v23 = vpop.permute.xlu1 %4986 }
 0x8a7   :  { %5153 = vst.msk [vmem:[#allocation5 + $0xd0] sm:$0xff] %vm5126_vm1, %v4987_v23  ;;  %v5201_v23 = vld [vmem:[#allocation4 + $0x7a] sm:$0xff] }
 0x8a8   :  { %v5001_v54 = vpop.permute.xlu2 %5000 }
 0x8a9   :  { %5160 = vst.msk [vmem:[#allocation5 + $0x108] sm:$0xff] %vm5126_vm1, %v5001_v54  ;;  %v4997_v56 = vpop.permute.xlu0 %4996  ;;  %v5199_v54 = vld [vmem:[#allocation4 + $0x62] sm:$0xff] }
 0x8aa   :  { %5158 = vst.msk [vmem:[#allocation5 + $0xf8] sm:$0xff] %vm5126_vm1, %v4997_v56  ;;  %v5206_v56 = vld [vmem:[#allocation4 + $0xb2] sm:$0xff] }
 0x8ac   :  { %5333 = vrot.lane.b32.xlu1 %v5198_v35, %s9614_s0 }
 0x8ae   :  { %5337 = vrot.lane.b32.xlu0 %v5200_v33, %s9614_s0  ;;  %5335 = vrot.lane.b32.xlu2 %v5199_v54, %s9614_s0  ;;  %v4993_v19 = vpop.permute.xlu1 %4992 }
 0x8af   :  { %5156 = vst.msk [vmem:[#allocation5 + $0xe8] sm:$0xff] %vm5126_vm1, %v4993_v19  ;;  %v5204_v19 = vld [vmem:[#allocation4 + $0x9a] sm:$0xff] }
 0x8b0   :  { %v5007_v39 = vpop.permute.xlu2 %5006 }
 0x8b1   :  { %5163 = vst.msk [vmem:[#allocation5 + $0x120] sm:$0xff] %vm5126_vm1, %v5007_v39  ;;  %v5003_v33 = vpop.permute.xlu0 %5002  ;;  %v5202_v39 = vld [vmem:[#allocation4 + $0x82] sm:$0xff] }
 0x8b2   :  { %5161 = vst.msk [vmem:[#allocation5 + $0x110] sm:$0xff] %vm5126_vm1, %v5003_v33  ;;  %v5209_v33 = vld [vmem:[#allocation4 + $0xda] sm:$0xff] }
 0x8b4   :  { %5339 = vrot.lane.b32.xlu1 %v5201_v23, %s9614_s0 }
 0x8b6   :  { %5343 = vrot.lane.b32.xlu0 %v5203_v42, %s9614_s0  ;;  %5341 = vrot.lane.b32.xlu2 %v5202_v39, %s9614_s0  ;;  %v4999_v35 = vpop.permute.xlu1 %4998 }
 0x8b7   :  { %5159 = vst.msk [vmem:[#allocation5 + $0x100] sm:$0xff] %vm5126_vm1, %v4999_v35  ;;  %v5207_v35 = vld [vmem:[#allocation4 + $0xc2] sm:$0xff] }
 0x8b8   :  { %v5013_v24 = vpop.permute.xlu2 %5012 }
 0x8b9   :  { %5166 = vst.msk [vmem:[#allocation5 + $0x138] sm:$0xff] %vm5126_vm1, %v5013_v24  ;;  %v5009_v42 = vpop.permute.xlu0 %5008  ;;  %v5205_v24 = vld [vmem:[#allocation4 + $0xaa] sm:$0xff] }
 0x8ba   :  { %5164 = vst.msk [vmem:[#allocation5 + $0x128] sm:$0xff] %vm5126_vm1, %v5009_v42  ;;  %v5212_v42 = vld [vmem:[#allocation4 + $0xfa] sm:$0xff] }
 0x8bc   :  { %5345 = vrot.lane.b32.xlu1 %v5204_v19, %s9614_s0 }
 0x8be   :  { %5349 = vrot.lane.b32.xlu0 %v5206_v56, %s9614_s0  ;;  %5347 = vrot.lane.b32.xlu2 %v5205_v24, %s9614_s0  ;;  %v5005_v23 = vpop.permute.xlu1 %5004 }
 0x8bf   :  { %5162 = vst.msk [vmem:[#allocation5 + $0x118] sm:$0xff] %vm5126_vm1, %v5005_v23  ;;  %v5210_v23 = vld [vmem:[#allocation4 + $0xe2] sm:$0xff] }
 0x8c0   :  { %v5019_v54 = vpop.permute.xlu2 %5018 }
 0x8c1   :  { %5169 = vst.msk [vmem:[#allocation5 + $0x150] sm:$0xff] %vm5126_vm1, %v5019_v54  ;;  %v5015_v56 = vpop.permute.xlu0 %5014  ;;  %v5208_v54 = vld [vmem:[#allocation4 + $0xca] sm:$0xff] }
 0x8c2   :  { %5167 = vst.msk [vmem:[#allocation5 + $0x140] sm:$0xff] %vm5126_vm1, %v5015_v56  ;;  %v5215_v56 = vld [vmem:[#allocation4 + $0x122] sm:$0xff] }
 0x8c4   :  { %5351 = vrot.lane.b32.xlu1 %v5207_v35, %s9614_s0 }
 0x8c6   :  { %5355 = vrot.lane.b32.xlu0 %v5209_v33, %s9614_s0  ;;  %5353 = vrot.lane.b32.xlu2 %v5208_v54, %s9614_s0  ;;  %v5011_v19 = vpop.permute.xlu1 %5010 }
 0x8c7   :  { %5165 = vst.msk [vmem:[#allocation5 + $0x130] sm:$0xff] %vm5126_vm1, %v5011_v19  ;;  %v5213_v19 = vld [vmem:[#allocation4 + $0x10a] sm:$0xff] }
 0x8c8   :  { %v5025_v39 = vpop.permute.xlu2 %5024 }
 0x8c9   :  { %5172 = vst.msk [vmem:[#allocation5 + $0x168] sm:$0xff] %vm5126_vm1, %v5025_v39  ;;  %v5211_v39 = vld [vmem:[#allocation4 + $0xf2] sm:$0xff] }
 0x8cc   :  { %5357 = vrot.lane.b32.xlu1 %v5210_v23, %s9614_s0 }
 0x8ce   :  { %5361 = vrot.lane.b32.xlu0 %v5212_v42, %s9614_s0  ;;  %5359 = vrot.lane.b32.xlu2 %v5211_v39, %s9614_s0  ;;  %v5017_v35 = vpop.permute.xlu1 %5016 }
 0x8cf   :  { %5168 = vst.msk [vmem:[#allocation5 + $0x148] sm:$0xff] %vm5126_vm1, %v5017_v35  ;;  %v5216_v35 = vld [vmem:[#allocation4 + $0x12a] sm:$0xff] }
 0x8d0   :  { %v5031_v24 = vpop.permute.xlu2 %5030  ;;  %v5021_v33 = vpop.permute.xlu0 %5020 }
 0x8d1   :  { %5175 = vst.msk [vmem:[#allocation5 + $0x180] sm:$0xff] %vm5126_vm1, %v5031_v24  ;;  %v5214_v24 = vld [vmem:[#allocation4 + $0x112] sm:$0xff] }
 0x8d2   :  { %5170 = vst.msk [vmem:[#allocation5 + $0x158] sm:$0xff] %vm5126_vm1, %v5021_v33  ;;  %v5218_v33 = vld [vmem:[#allocation4 + $0x142] sm:$0xff] }
 0x8d4   :  { %5363 = vrot.lane.b32.xlu1 %v5213_v19, %s9614_s0 }
 0x8d6   :  { %5367 = vrot.lane.b32.xlu0 %v5215_v56, %s9614_s0  ;;  %5365 = vrot.lane.b32.xlu2 %v5214_v24, %s9614_s0  ;;  %v5023_v23 = vpop.permute.xlu1 %5022 }
 0x8d7   :  { %5171 = vst.msk [vmem:[#allocation5 + $0x160] sm:$0xff] %vm5126_vm1, %v5023_v23  ;;  %v5220_v23 = vld [vmem:[#allocation4 + $0x15a] sm:$0xff] }
 0x8d8   :  { %v5037_v54 = vpop.permute.xlu2 %5036  ;;  %v5027_v42 = vpop.permute.xlu0 %5026 }
 0x8d9   :  { %5178 = vst.msk [vmem:[#allocation5 + $0x198] sm:$0xff] %vm5126_vm1, %v5037_v54  ;;  %v5217_v54 = vld [vmem:[#allocation4 + $0x13a] sm:$0xff] }
 0x8da   :  { %5173 = vst.msk [vmem:[#allocation5 + $0x170] sm:$0xff] %vm5126_vm1, %v5027_v42  ;;  %v5221_v42 = vld [vmem:[#allocation4 + $0x16a] sm:$0xff] }
 0x8dc   :  { %5369 = vrot.lane.b32.xlu1 %v5216_v35, %s9614_s0 }
 0x8de   :  { %5373 = vrot.lane.b32.xlu0 %v5218_v33, %s9614_s0  ;;  %5371 = vrot.lane.b32.xlu2 %v5217_v54, %s9614_s0  ;;  %v5029_v19 = vpop.permute.xlu1 %5028 }
 0x8df   :  { %5174 = vst.msk [vmem:[#allocation5 + $0x178] sm:$0xff] %vm5126_vm1, %v5029_v19  ;;  %v5222_v19 = vld [vmem:[#allocation4 + $0x172] sm:$0xff] }
 0x8e0   :  { %v5043_v39 = vpop.permute.xlu2 %5042  ;;  %v5033_v56 = vpop.permute.xlu0 %5032 }
 0x8e1   :  { %5181 = vst.msk [vmem:[#allocation5 + $0x1b0] sm:$0xff] %vm5126_vm1, %v5043_v39  ;;  %v5224_v39 = vld [vmem:[#allocation4 + $0x1ba] sm:$0xff] }
 0x8e2   :  { %5176 = vst.msk [vmem:[#allocation5 + $0x188] sm:$0xff] %vm5126_vm1, %v5033_v56  ;;  %v5219_v56 = vld [vmem:[#allocation4 + $0x152] sm:$0xff] }
 0x8e4   :  { %5375 = vrot.lane.b32.xlu1 %v5219_v56, %s9614_s0 }
 0x8e6   :  { %5379 = vrot.lane.b32.xlu0 %v5221_v42, %s9614_s0  ;;  %5377 = vrot.lane.b32.xlu2 %v5220_v23, %s9614_s0  ;;  %v5035_v35 = vpop.permute.xlu1 %5034 }
 0x8e7   :  { %5177 = vst.msk [vmem:[#allocation5 + $0x190] sm:$0xff] %vm5126_vm1, %v5035_v35  ;;  %v5225_v35 = vld [vmem:[#allocation4 + $0x1ca] sm:$0xff] }
 0x8e8   :  { %v5049_v24 = vpop.permute.xlu2 %5048  ;;  %v5039_v33 = vpop.permute.xlu0 %5038 }
 0x8e9   :  { %5184 = vst.msk [vmem:[#allocation5 + $0x1c8] sm:$0xff] %vm5126_vm1, %v5049_v24  ;;  %v5223_v24 = vld [vmem:[#allocation4 + $0x1b2] sm:$0xff] }
 0x8ea   :  { %5179 = vst.msk [vmem:[#allocation5 + $0x1a0] sm:$0xff] %vm5126_vm1, %v5039_v33  ;;  %v5227_v33 = vld [vmem:[#allocation4 + $0x1e2] sm:$0xff] }
 0x8ec   :  { %5381 = vrot.lane.b32.xlu1 %v5222_v19, %s9614_s0 }
 0x8ee   :  { %5385 = vrot.lane.b32.xlu0 %v5224_v39, %s9614_s0  ;;  %5383 = vrot.lane.b32.xlu2 %v5223_v24, %s9614_s0  ;;  %v5041_v39 = vpop.permute.xlu1 %5040 }
 0x8ef   :  { %5180 = vst.msk [vmem:[#allocation5 + $0x1a8] sm:$0xff] %vm5126_vm1, %v5041_v39  ;;  %v5228_v39 = vld [vmem:[#allocation4 + $0x1ea] sm:$0xff] }
 0x8f0   :  { %v5055_v54 = vpop.permute.xlu2 %5054  ;;  %v5045_v42 = vpop.permute.xlu0 %5044 }
 0x8f1   :  { %5187 = vst.msk [vmem:[#allocation5 + $0x1e0] sm:$0xff] %vm5126_vm1, %v5055_v54  ;;  %v5226_v54 = vld [vmem:[#allocation4 + $0x1d2] sm:$0xff] }
 0x8f2   :  { %5182 = vst.msk [vmem:[#allocation5 + $0x1b8] sm:$0xff] %vm5126_vm1, %v5045_v42  ;;  %v5230_v42 = vld [vmem:[#allocation4 + $0x202] sm:$0xff] }
 0x8f4   :  { %5387 = vrot.lane.b32.xlu1 %v5225_v35, %s9614_s0 }
 0x8f6   :  { %5391 = vrot.lane.b32.xlu0 %v5227_v33, %s9614_s0  ;;  %5389 = vrot.lane.b32.xlu2 %v5226_v54, %s9614_s0  ;;  %v5047_v19 = vpop.permute.xlu1 %5046 }
 0x8f7   :  { %5183 = vst.msk [vmem:[#allocation5 + $0x1c0] sm:$0xff] %vm5126_vm1, %v5047_v19  ;;  %v5231_v19 = vld [vmem:[#allocation4 + $0x212] sm:$0xff] }
 0x8f8   :  { %v5061_v23 = vpop.permute.xlu2 %5060  ;;  %v5051_v56 = vpop.permute.xlu0 %5050 }
 0x8f9   :  { %5190 = vst.msk [vmem:[#allocation5 + $0x1f8] sm:$0xff] %vm5126_vm1, %v5061_v23  ;;  %v5229_v23 = vld [vmem:[#allocation4 + $0x1fa] sm:$0xff] }
 0x8fa   :  { %5185 = vst.msk [vmem:[#allocation5 + $0x1d0] sm:$0xff] %vm5126_vm1, %v5051_v56  ;;  %v5233_v56 = vld [vmem:[#allocation4 + $0x22a] sm:$0xff] }
 0x8fc   :  { %5393 = vrot.lane.b32.xlu1 %v5228_v39, %s9614_s0 }
 0x8fe   :  { %5397 = vrot.lane.b32.xlu0 %v5230_v42, %s9614_s0  ;;  %5395 = vrot.lane.b32.xlu2 %v5229_v23, %s9614_s0  ;;  %v5053_v35 = vpop.permute.xlu1 %5052 }
 0x8ff   :  { %5186 = vst.msk [vmem:[#allocation5 + $0x1d8] sm:$0xff] %vm5126_vm1, %v5053_v35  ;;  %v5234_v35 = vld [vmem:[#allocation4 + $0x232] sm:$0xff] }
 0x900   :  { %v5324_v24 = vpop.permute.xlu2 %5323  ;;  %v5057_v33 = vpop.permute.xlu0 %5056 }
 0x901   :  { %5514 = vst.msk [vmem:[#allocation5 + $0x10] sm:$0xff] %vm5511_vm2, %v5324_v24  ;;  %v5232_v24 = vld [vmem:[#allocation4 + $0x21a] sm:$0xff] }
 0x902   :  { %5188 = vst.msk [vmem:[#allocation5 + $0x1e8] sm:$0xff] %vm5126_vm1, %v5057_v33  ;;  %v5236_v33 = vld [vmem:[#allocation4 + $0x24a] sm:$0xff] }
 0x904   :  { %5399 = vrot.lane.b32.xlu1 %v5231_v19, %s9614_s0 }
 0x906   :  { %5403 = vrot.lane.b32.xlu0 %v5233_v56, %s9614_s0  ;;  %5401 = vrot.lane.b32.xlu2 %v5232_v24, %s9614_s0  ;;  %v5059_v39 = vpop.permute.xlu1 %5058 }
 0x907   :  { %5189 = vst.msk [vmem:[#allocation5 + $0x1f0] sm:$0xff] %vm5126_vm1, %v5059_v39  ;;  %v5237_v39 = vld [vmem:[#allocation4 + $0x25a] sm:$0xff] }
 0x908   :  { %v5330_v54 = vpop.permute.xlu2 %5329  ;;  %v5320_v42 = vpop.permute.xlu0 %5319 }
 0x909   :  { %5517 = vst.msk [vmem:[#allocation5 + $0x28] sm:$0xff] %vm5511_vm2, %v5330_v54  ;;  %v5235_v54 = vld [vmem:[#allocation4 + $0x242] sm:$0xff] }
 0x90a   :  { %5512 = vst.msk [vmem:[#allocation5] sm:$0xff] %vm5511_vm2, %v5320_v42  ;;  %v5239_v42 = vld [vmem:[#allocation4 + $0x272] sm:$0xff] }
 0x90c   :  { %5405 = vrot.lane.b32.xlu1 %v5234_v35, %s9614_s0 }
 0x90e   :  { %5409 = vrot.lane.b32.xlu0 %v5236_v33, %s9614_s0  ;;  %5407 = vrot.lane.b32.xlu2 %v5235_v54, %s9614_s0  ;;  %v5322_v19 = vpop.permute.xlu1 %5321 }
 0x90f   :  { %5513 = vst.msk [vmem:[#allocation5 + $0x8] sm:$0xff] %vm5511_vm2, %v5322_v19  ;;  %v5240_v19 = vld [vmem:[#allocation4 + $0x27a] sm:$0xff] }
 0x910   :  { %v5336_v23 = vpop.permute.xlu2 %5335  ;;  %v5326_v56 = vpop.permute.xlu0 %5325 }
 0x911   :  { %5520 = vst.msk [vmem:[#allocation5 + $0x40] sm:$0xff] %vm5511_vm2, %v5336_v23  ;;  %v5238_v23 = vld [vmem:[#allocation4 + $0x262] sm:$0xff] }
 0x912   :  { %5515 = vst.msk [vmem:[#allocation5 + $0x18] sm:$0xff] %vm5511_vm2, %v5326_v56  ;;  %v5242_v56 = vld [vmem:[#allocation4 + $0x292] sm:$0xff] }
 0x914   :  { %5411 = vrot.lane.b32.xlu1 %v5237_v39, %s9614_s0 }
 0x916   :  { %5415 = vrot.lane.b32.xlu0 %v5239_v42, %s9614_s0  ;;  %5413 = vrot.lane.b32.xlu2 %v5238_v23, %s9614_s0  ;;  %v5328_v35 = vpop.permute.xlu1 %5327 }
 0x917   :  { %5516 = vst.msk [vmem:[#allocation5 + $0x20] sm:$0xff] %vm5511_vm2, %v5328_v35  ;;  %v5243_v35 = vld [vmem:[#allocation4 + $0x2a2] sm:$0xff] }
 0x918   :  { %v5342_v24 = vpop.permute.xlu2 %5341  ;;  %v5332_v33 = vpop.permute.xlu0 %5331 }
 0x919   :  { %5523 = vst.msk [vmem:[#allocation5 + $0x58] sm:$0xff] %vm5511_vm2, %v5342_v24  ;;  %v5241_v24 = vld [vmem:[#allocation4 + $0x28a] sm:$0xff] }
 0x91a   :  { %5518 = vst.msk [vmem:[#allocation5 + $0x30] sm:$0xff] %vm5511_vm2, %v5332_v33  ;;  %v5245_v33 = vld [vmem:[#allocation4 + $0x2ba] sm:$0xff] }
 0x91c   :  { %5417 = vrot.lane.b32.xlu1 %v5240_v19, %s9614_s0 }
 0x91e   :  { %5421 = vrot.lane.b32.xlu0 %v5242_v56, %s9614_s0  ;;  %5419 = vrot.lane.b32.xlu2 %v5241_v24, %s9614_s0  ;;  %v5334_v39 = vpop.permute.xlu1 %5333 }
 0x91f   :  { %5519 = vst.msk [vmem:[#allocation5 + $0x38] sm:$0xff] %vm5511_vm2, %v5334_v39  ;;  %v5246_v39 = vld [vmem:[#allocation4 + $0x2c2] sm:$0xff] }
 0x920   :  { %v5348_v54 = vpop.permute.xlu2 %5347  ;;  %v5338_v42 = vpop.permute.xlu0 %5337 }
 0x921   :  { %5526 = vst.msk [vmem:[#allocation5 + $0x70] sm:$0xff] %vm5511_vm2, %v5348_v54  ;;  %v5244_v54 = vld [vmem:[#allocation4 + $0x2aa] sm:$0xff] }
 0x922   :  { %5521 = vst.msk [vmem:[#allocation5 + $0x48] sm:$0xff] %vm5511_vm2, %v5338_v42  ;;  %v5248_v42 = vld [vmem:[#allocation4 + $0x2da] sm:$0xff] }
 0x924   :  { %5423 = vrot.lane.b32.xlu1 %v5243_v35, %s9614_s0 }
 0x926   :  { %5427 = vrot.lane.b32.xlu0 %v5245_v33, %s9614_s0  ;;  %5425 = vrot.lane.b32.xlu2 %v5244_v54, %s9614_s0  ;;  %v5340_v19 = vpop.permute.xlu1 %5339 }
 0x927   :  { %5522 = vst.msk [vmem:[#allocation5 + $0x50] sm:$0xff] %vm5511_vm2, %v5340_v19  ;;  %v5249_v19 = vld [vmem:[#allocation4 + $0x2ea] sm:$0xff] }
 0x928   :  { %v5354_v23 = vpop.permute.xlu2 %5353  ;;  %v5344_v56 = vpop.permute.xlu0 %5343 }
 0x929   :  { %5529 = vst.msk [vmem:[#allocation5 + $0x88] sm:$0xff] %vm5511_vm2, %v5354_v23  ;;  %v5247_v23 = vld [vmem:[#allocation4 + $0x2d2] sm:$0xff] }
 0x92a   :  { %5524 = vst.msk [vmem:[#allocation5 + $0x60] sm:$0xff] %vm5511_vm2, %v5344_v56  ;;  %v5251_v56 = vld [vmem:[#allocation4 + $0x302] sm:$0xff] }
 0x92c   :  { %5429 = vrot.lane.b32.xlu1 %v5246_v39, %s9614_s0 }
 0x92e   :  { %5433 = vrot.lane.b32.xlu0 %v5248_v42, %s9614_s0  ;;  %5431 = vrot.lane.b32.xlu2 %v5247_v23, %s9614_s0  ;;  %v5346_v35 = vpop.permute.xlu1 %5345 }
 0x92f   :  { %5525 = vst.msk [vmem:[#allocation5 + $0x68] sm:$0xff] %vm5511_vm2, %v5346_v35  ;;  %v5252_v35 = vld [vmem:[#allocation4 + $0x30a] sm:$0xff] }
 0x930   :  { %v5360_v24 = vpop.permute.xlu2 %5359  ;;  %v5350_v33 = vpop.permute.xlu0 %5349 }
 0x931   :  { %5532 = vst.msk [vmem:[#allocation5 + $0xa0] sm:$0xff] %vm5511_vm2, %v5360_v24  ;;  %v5250_v24 = vld [vmem:[#allocation4 + $0x2f2] sm:$0xff] }
 0x932   :  { %5527 = vst.msk [vmem:[#allocation5 + $0x78] sm:$0xff] %vm5511_vm2, %v5350_v33  ;;  %v5254_v33 = vld [vmem:[#allocation4 + $0x322] sm:$0xff] }
 0x934   :  { %5435 = vrot.lane.b32.xlu1 %v5249_v19, %s9614_s0 }
 0x936   :  { %5439 = vrot.lane.b32.xlu0 %v5251_v56, %s9614_s0  ;;  %5437 = vrot.lane.b32.xlu2 %v5250_v24, %s9614_s0  ;;  %v5352_v39 = vpop.permute.xlu1 %5351 }
 0x937   :  { %5528 = vst.msk [vmem:[#allocation5 + $0x80] sm:$0xff] %vm5511_vm2, %v5352_v39  ;;  %v5607_v39 = vld [vmem:[#allocation4 + $0x188] sm:$0xff] }
 0x938   :  { %v5366_v54 = vpop.permute.xlu2 %5365  ;;  %v5356_v42 = vpop.permute.xlu0 %5355 }
 0x939   :  { %5535 = vst.msk [vmem:[#allocation5 + $0xb8] sm:$0xff] %vm5511_vm2, %v5366_v54  ;;  %v5253_v54 = vld [vmem:[#allocation4 + $0x31a] sm:$0xff] }
 0x93a   :  { %5530 = vst.msk [vmem:[#allocation5 + $0x90] sm:$0xff] %vm5511_vm2, %v5356_v42 }
 0x93c   :  { %5441 = vrot.lane.b32.xlu1 %v5252_v35, %s9614_s0 }
 0x93e   :  { %5445 = vrot.lane.b32.xlu0 %v5254_v33, %s9614_s0  ;;  %5443 = vrot.lane.b32.xlu2 %v5253_v54, %s9614_s0  ;;  %v5358_v24 = vpop.permute.xlu1 %5357 }
 0x93f   :  { %5531 = vst.msk [vmem:[#allocation5 + $0x98] sm:$0xff] %vm5511_vm2, %v5358_v24  ;;  %v15412_v24 = vld [vmem:[#allocation8_spill] sm:$0xff] }
 0x940   :  { %v5372_v23 = vpop.permute.xlu2 %5371  ;;  %v5362_v56 = vpop.permute.xlu0 %5361 }
 0x941   :  { %5538 = vst.msk [vmem:[#allocation5 + $0xd0] sm:$0xff] %vm5511_vm2, %v5372_v23 }
 0x942   :  { %5533 = vst.msk [vmem:[#allocation5 + $0xa8] sm:$0xff] %vm5511_vm2, %v5362_v56  ;;  %v5606_v56 = vld [vmem:[#allocation4 + $0x180] sm:$0xff] }
 0x944   :  { %5704 = vrot.lane.b32.xlu1 %v12589_v36, %s9616_s20 }
 0x946   :  { %5708 = vrot.lane.b32.xlu0 %v12580_v45, %s9616_s20  ;;  %5706 = vrot.lane.b32.xlu2 %v12568_v15, %s9616_s20  ;;  %v5364_v45 = vpop.permute.xlu1 %5363 }
 0x947   :  { %5534 = vst.msk [vmem:[#allocation5 + $0xb0] sm:$0xff] %vm5511_vm2, %v5364_v45 }
 0x948   :  { %v5378_v42 = vpop.permute.xlu2 %5377  ;;  %v5368_v19 = vpop.permute.xlu0 %5367 }
 0x949   :  { %5541 = vst.msk [vmem:[#allocation5 + $0xe8] sm:$0xff] %vm5511_vm2, %v5378_v42 }
 0x94a   :  { %5536 = vst.msk [vmem:[#allocation5 + $0xc0] sm:$0xff] %vm5511_vm2, %v5368_v19  ;;  %v5638_v19 = vld [vmem:[#allocation4 + $0x330] sm:$0xff] }
 0x94c   :  { %5710 = vrot.lane.b32.xlu1 %v12601_v59, %s9616_s20 }
 0x94e   :  { %5714 = vrot.lane.b32.xlu0 %v12593_v1, %s9616_s20  ;;  %5712 = vrot.lane.b32.xlu2 %v12571_v28, %s9616_s20  ;;  %v5370_v36 = vpop.permute.xlu1 %5369 }
 0x94f   :  { %5537 = vst.msk [vmem:[#allocation5 + $0xc8] sm:$0xff] %vm5511_vm2, %v5370_v36  ;;  %v5962_v36 = vld [vmem:[#allocation4 + $0x21] sm:$0xff] }
 0x950   :  { %v5384_v33 = vpop.permute.xlu2 %5383  ;;  %v5374_v23 = vpop.permute.xlu0 %5373 }
 0x951   :  { %5544 = vst.msk [vmem:[#allocation5 + $0x100] sm:$0xff] %vm5511_vm2, %v5384_v33 }
 0x952   :  { %5539 = vst.msk [vmem:[#allocation5 + $0xd8] sm:$0xff] %vm5511_vm2, %v5374_v23  ;;  %v15414_v23 = vld [vmem:[#allocation6_spill] sm:$0xff] }
 0x954   :  { %5716 = vrot.lane.b32.xlu1 %v12615_v17, %s9616_s20 }
 0x956   :  { %5720 = vrot.lane.b32.xlu0 %v12605_v62, %s9616_s20  ;;  %5718 = vrot.lane.b32.xlu2 %v12574_v48, %s9616_s20  ;;  %v5376_v59 = vpop.permute.xlu1 %5375 }
 0x957   :  { %5540 = vst.msk [vmem:[#allocation5 + $0xe0] sm:$0xff] %vm5511_vm2, %v5376_v59 }
 0x958   :  { %v5390_v15 = vpop.permute.xlu2 %5389  ;;  %v5380_v1 = vpop.permute.xlu0 %5379 }
 0x959   :  { %5547 = vst.msk [vmem:[#allocation5 + $0x118] sm:$0xff] %vm5511_vm2, %v5390_v15  ;;  %v15415_v15 = vld [vmem:[#allocation10_spill] sm:$0xff] }
 0x95a   :  { %5542 = vst.msk [vmem:[#allocation5 + $0xf0] sm:$0xff] %vm5511_vm2, %v5380_v1 }
 0x95c   :  { %5722 = vrot.lane.b32.xlu1 %v12628_v40, %s9616_s20 }
 0x95e   :  { %5726 = vrot.lane.b32.xlu0 %v12620_v16, %s9616_s20  ;;  %5724 = vrot.lane.b32.xlu2 %v12585_v3, %s9616_s20  ;;  %v5382_v17 = vpop.permute.xlu1 %5381 }
 0x95f   :  { %5543 = vst.msk [vmem:[#allocation5 + $0xf8] sm:$0xff] %vm5511_vm2, %v5382_v17  ;;  %v13206_v17 = vld [vmem:[#allocation4 + $0x49] sm:$0xff] }
 0x960   :  { %v5396_v28 = vpop.permute.xlu2 %5395  ;;  %v5386_v62 = vpop.permute.xlu0 %5385 }
 0x961   :  { %5550 = vst.msk [vmem:[#allocation5 + $0x130] sm:$0xff] %vm5511_vm2, %v5396_v28 }
 0x962   :  { %5545 = vst.msk [vmem:[#allocation5 + $0x108] sm:$0xff] %vm5511_vm2, %v5386_v62  ;;  %v5961_v62 = vld [vmem:[#allocation4 + $0x19] sm:$0xff] }
 0x964   :  { %5728 = vrot.lane.b32.xlu1 %v12646_v51, %s9616_s20 }
 0x966   :  { %5732 = vrot.lane.b32.xlu0 %v12632_v29, %s9616_s20  ;;  %5730 = vrot.lane.b32.xlu2 %v12597_v58, %s9616_s20  ;;  %v5388_v40 = vpop.permute.xlu1 %5387 }
 0x967   :  { %5546 = vst.msk [vmem:[#allocation5 + $0x110] sm:$0xff] %vm5511_vm2, %v5388_v40 }
 0x968   :  { %v5402_v48 = vpop.permute.xlu2 %5401  ;;  %v5392_v16 = vpop.permute.xlu0 %5391 }
 0x969   :  { %5553 = vst.msk [vmem:[#allocation5 + $0x148] sm:$0xff] %vm5511_vm2, %v5402_v48  ;;  %v5639_v48 = vld [vmem:[#allocation4 + $0x338] sm:$0xff] }
 0x96a   :  { %5548 = vst.msk [vmem:[#allocation5 + $0x120] sm:$0xff] %vm5511_vm2, %v5392_v16 }
 0x96c   :  { %5734 = vrot.lane.b32.xlu1 %v12657_v10, %s9616_s20 }
 0x96e   :  { %5738 = vrot.lane.b32.xlu0 %v12650_v31, %s9616_s20  ;;  %5736 = vrot.lane.b32.xlu2 %v12609_v43, %s9616_s20  ;;  %v5394_v51 = vpop.permute.xlu1 %5393 }
 0x96f   :  { %5549 = vst.msk [vmem:[#allocation5 + $0x128] sm:$0xff] %vm5511_vm2, %v5394_v51  ;;  %v13221_v51 = vld [vmem:[#allocation4 + $0x69] sm:$0xff] }
 0x970   :  { %v5408_v3 = vpop.permute.xlu2 %5407  ;;  %v5398_v29 = vpop.permute.xlu0 %5397 }
 0x971   :  { %5556 = vst.msk [vmem:[#allocation5 + $0x160] sm:$0xff] %vm5511_vm2, %v5408_v3 }
 0x972   :  { %5551 = vst.msk [vmem:[#allocation5 + $0x138] sm:$0xff] %vm5511_vm2, %v5398_v29  ;;  %v13213_v29 = vld [vmem:[#allocation4 + $0x39] sm:$0xff] }
 0x974   :  { %5740 = vrot.lane.b32.xlu1 %v12669_v61, %s9616_s20 }
 0x976   :  { %5744 = vrot.lane.b32.xlu0 %v12661_v52, %s9616_s20  ;;  %5742 = vrot.lane.b32.xlu2 %v12624_v63, %s9616_s20  ;;  %v5400_v10 = vpop.permute.xlu1 %5399 }
 0x977   :  { %5552 = vst.msk [vmem:[#allocation5 + $0x140] sm:$0xff] %vm5511_vm2, %v5400_v10 }
 0x978   :  { %v5414_v58 = vpop.permute.xlu2 %5413  ;;  %v5404_v31 = vpop.permute.xlu0 %5403 }
 0x979   :  { %5559 = vst.msk [vmem:[#allocation5 + $0x178] sm:$0xff] %vm5511_vm2, %v5414_v58  ;;  %v13215_v58 = vld [vmem:[#allocation4 + $0x31] sm:$0xff] }
 0x97a   :  { %5554 = vst.msk [vmem:[#allocation5 + $0x150] sm:$0xff] %vm5511_vm2, %v5404_v31 }
 0x97c   :  { %5746 = vrot.lane.b32.xlu1 %v12679_v20, %s9616_s20 }
 0x97e   :  { %5750 = vrot.lane.b32.xlu0 %v12673_v53, %s9616_s20  ;;  %5748 = vrot.lane.b32.xlu2 %v12636_v27, %s9616_s20  ;;  %v5406_v61 = vpop.permute.xlu1 %5405 }
 0x97f   :  { %5555 = vst.msk [vmem:[#allocation5 + $0x158] sm:$0xff] %vm5511_vm2, %v5406_v61  ;;  %v13236_v61 = vld [vmem:[#allocation4 + $0x91] sm:$0xff] }
 0x980   :  { %v5420_v43 = vpop.permute.xlu2 %5419  ;;  %v5410_v52 = vpop.permute.xlu0 %5409 }
 0x981   :  { %5562 = vst.msk [vmem:[#allocation5 + $0x190] sm:$0xff] %vm5511_vm2, %v5420_v43 }
 0x982   :  { %5557 = vst.msk [vmem:[#allocation5 + $0x168] sm:$0xff] %vm5511_vm2, %v5410_v52  ;;  %v13228_v52 = vld [vmem:[#allocation4 + $0x61] sm:$0xff] }
 0x984   :  { %5752 = vrot.lane.b32.xlu1 %v12692_v12, %s9616_s20 }
 0x986   :  { %5756 = vrot.lane.b32.xlu0 %v12684_v57, %s9616_s20  ;;  %5754 = vrot.lane.b32.xlu2 %v12653_v13, %s9616_s20  ;;  %v5412_v20 = vpop.permute.xlu1 %5411 }
 0x987   :  { %5558 = vst.msk [vmem:[#allocation5 + $0x170] sm:$0xff] %vm5511_vm2, %v5412_v20 }
 0x988   :  { %v5426_v63 = vpop.permute.xlu2 %5425  ;;  %v5416_v53 = vpop.permute.xlu0 %5415 }
 0x989   :  { %5565 = vst.msk [vmem:[#allocation5 + $0x1a8] sm:$0xff] %vm5511_vm2, %v5426_v63  ;;  %v13230_v63 = vld [vmem:[#allocation4 + $0x51] sm:$0xff] }
 0x98a   :  { %5560 = vst.msk [vmem:[#allocation5 + $0x180] sm:$0xff] %vm5511_vm2, %v5416_v53 }
 0x98c   :  { %5758 = vrot.lane.b32.xlu1 %v12704_v22, %s9616_s20 }
 0x98e   :  { %5762 = vrot.lane.b32.xlu0 %v12696_v38, %s9616_s20  ;;  %5760 = vrot.lane.b32.xlu2 %v12665_v7, %s9616_s20  ;;  %v5418_v12 = vpop.permute.xlu1 %5417 }
 0x98f   :  { %5561 = vst.msk [vmem:[#allocation5 + $0x188] sm:$0xff] %vm5511_vm2, %v5418_v12  ;;  %v13251_v12 = vld [vmem:[#allocation4 + $0xb1] sm:$0xff] }
 0x990   :  { %v5432_v27 = vpop.permute.xlu2 %5431  ;;  %v5422_v57 = vpop.permute.xlu0 %5421 }
 0x991   :  { %5568 = vst.msk [vmem:[#allocation5 + $0x1c0] sm:$0xff] %vm5511_vm2, %v5432_v27 }
 0x992   :  { %5563 = vst.msk [vmem:[#allocation5 + $0x198] sm:$0xff] %vm5511_vm2, %v5422_v57  ;;  %v13243_v57 = vld [vmem:[#allocation4 + $0x81] sm:$0xff] }
 0x994   :  { %5764 = vrot.lane.b32.xlu1 %v5606_v56, %s9616_s20 }
 0x996   :  { %5768 = vrot.lane.b32.xlu0 %v12708_v14, %s9616_s20  ;;  %5766 = vrot.lane.b32.xlu2 %v5607_v39, %s9616_s20  ;;  %v5424_v22 = vpop.permute.xlu1 %5423 }
 0x997   :  { %5564 = vst.msk [vmem:[#allocation5 + $0x1a0] sm:$0xff] %vm5511_vm2, %v5424_v22  ;;  %v13260_v22 = vld [vmem:[#allocation4 + $0x99] sm:$0xff] }
 0x998   :  { %v5438_v13 = vpop.permute.xlu2 %5437  ;;  %v5428_v38 = vpop.permute.xlu0 %5427 }
 0x999   :  { %5571 = vst.msk [vmem:[#allocation5 + $0x1d8] sm:$0xff] %vm5511_vm2, %v5438_v13  ;;  %v13245_v13 = vld [vmem:[#allocation4 + $0x79] sm:$0xff] }
 0x99a   :  { %5566 = vst.msk [vmem:[#allocation5 + $0x1b0] sm:$0xff] %vm5511_vm2, %v5428_v38 }
 0x99c   :  { %5770 = vrot.lane.b32.xlu1 %v12727_v8, %s9616_s20 }
 0x99e   :  { %5774 = vrot.lane.b32.xlu0 %v12719_v49, %s9616_s20  ;;  %5772 = vrot.lane.b32.xlu2 %v12688_v21, %s9616_s20  ;;  %v5430_v54 = vpop.permute.xlu1 %5429 }
 0x99f   :  { %5567 = vst.msk [vmem:[#allocation5 + $0x1b8] sm:$0xff] %vm5511_vm2, %v5430_v54 }
 0x9a0   :  { %v5444_v7 = vpop.permute.xlu2 %5443  ;;  %v5434_v14 = vpop.permute.xlu0 %5433 }
 0x9a1   :  { %5574 = vst.msk [vmem:[#allocation5 + $0x1f0] sm:$0xff] %vm5511_vm2, %v5444_v7  ;;  %v13258_v7 = vld [vmem:[#allocation4 + $0xa9] sm:$0xff] }
 0x9a2   :  { %5569 = vst.msk [vmem:[#allocation5 + $0x1c8] sm:$0xff] %vm5511_vm2, %v5434_v14  ;;  %v13266_v14 = vld [vmem:[#allocation4 + $0xd9] sm:$0xff] }
 0x9a4   :  { %5776 = vrot.lane.b32.xlu1 %v12745_v6, %s9616_s20 }
 0x9a6   :  { %5780 = vrot.lane.b32.xlu0 %v12731_v34, %s9616_s20  ;;  %5778 = vrot.lane.b32.xlu2 %v12700_v41, %s9616_s20  ;;  %v5436_v8 = vpop.permute.xlu1 %5435 }
 0x9a7   :  { %5570 = vst.msk [vmem:[#allocation5 + $0x1d0] sm:$0xff] %vm5511_vm2, %v5436_v8  ;;  %v13275_v8 = vld [vmem:[#allocation4 + $0xc1] sm:$0xff] }
 0x9a8   :  { %v5707_v49 = vpop.permute.xlu2 %5706  ;;  %v5440_v35 = vpop.permute.xlu0 %5439 }
 0x9a9   :  { %5898 = vst.msk [vmem:[#allocation5 + $0x8] sm:$0xff] %vm5896_vm3, %v5707_v49 }
 0x9aa   :  { %5572 = vst.msk [vmem:[#allocation5 + $0x1e0] sm:$0xff] %vm5511_vm2, %v5440_v35 }
 0x9ac   :  { %5782 = vrot.lane.b32.xlu1 %v12756_v25, %s9616_s20 }
 0x9ae   :  { %5786 = vrot.lane.b32.xlu0 %v12749_v4, %s9616_s20  ;;  %5784 = vrot.lane.b32.xlu2 %v12714_v50, %s9616_s20  ;;  %v5442_v6 = vpop.permute.xlu1 %5441 }
 0x9af   :  { %5573 = vst.msk [vmem:[#allocation5 + $0x1e8] sm:$0xff] %vm5511_vm2, %v5442_v6 }
 0x9b0   :  { %v5713_v21 = vpop.permute.xlu2 %5712  ;;  %v5446_v34 = vpop.permute.xlu0 %5445 }
 0x9b1   :  { %5901 = vst.msk [vmem:[#allocation5 + $0x20] sm:$0xff] %vm5896_vm3, %v5713_v21  ;;  %v13273_v21 = vld [vmem:[#allocation4 + $0xc9] sm:$0xff] }
 0x9b2   :  { %5575 = vst.msk [vmem:[#allocation5 + $0x1f8] sm:$0xff] %vm5511_vm2, %v5446_v34  ;;  %v13281_v34 = vld [vmem:[#allocation4 + $0xf9] sm:$0xff] }
 0x9b4   :  { %5788 = vrot.lane.b32.xlu1 %v12768_v32, %s9616_s20 }
 0x9b6   :  { %5792 = vrot.lane.b32.xlu0 %v12760_v44, %s9616_s20  ;;  %5790 = vrot.lane.b32.xlu2 %v12723_v37, %s9616_s20  ;;  %v5705_v25 = vpop.permute.xlu1 %5704 }
 0x9b7   :  { %5897 = vst.msk [vmem:[#allocation5] sm:$0xff] %vm5896_vm3, %v5705_v25  ;;  %v13290_v25 = vld [vmem:[#allocation4 + $0xe1] sm:$0xff] }
 0x9b8   :  { %v5719_v41 = vpop.permute.xlu2 %5718  ;;  %v5709_v4 = vpop.permute.xlu0 %5708 }
 0x9b9   :  { %5904 = vst.msk [vmem:[#allocation5 + $0x38] sm:$0xff] %vm5896_vm3, %v5719_v41 }
 0x9ba   :  { %5899 = vst.msk [vmem:[#allocation5 + $0x10] sm:$0xff] %vm5896_vm3, %v5709_v4 }
 0x9bc   :  { %5794 = vrot.lane.b32.xlu1 %v12783_v60, %s9616_s20 }
 0x9be   :  { %5798 = vrot.lane.b32.xlu0 %v12772_v46, %s9616_s20  ;;  %5796 = vrot.lane.b32.xlu2 %v12735_v9, %s9616_s20  ;;  %v5711_v32 = vpop.permute.xlu1 %5710 }
 0x9bf   :  { %5900 = vst.msk [vmem:[#allocation5 + $0x18] sm:$0xff] %vm5896_vm3, %v5711_v32 }
 0x9c0   :  { %v5725_v50 = vpop.permute.xlu2 %5724  ;;  %v5715_v44 = vpop.permute.xlu0 %5714 }
 0x9c1   :  { %5907 = vst.msk [vmem:[#allocation5 + $0x50] sm:$0xff] %vm5896_vm3, %v5725_v50  ;;  %v13288_v50 = vld [vmem:[#allocation4 + $0xf1] sm:$0xff] }
 0x9c2   :  { %5902 = vst.msk [vmem:[#allocation5 + $0x28] sm:$0xff] %vm5896_vm3, %v5715_v44  ;;  %v5983_v44 = vld [vmem:[#allocation4 + $0x121] sm:$0xff] }
 0x9c4   :  { %5800 = vrot.lane.b32.xlu1 %v12795_v0, %s9616_s20 }
 0x9c6   :  { %5804 = vrot.lane.b32.xlu0 %v12787_v5, %s9616_s20  ;;  %5802 = vrot.lane.b32.xlu2 %v12752_v47, %s9616_s20  ;;  %v5717_v60 = vpop.permute.xlu1 %5716 }
 0x9c7   :  { %5903 = vst.msk [vmem:[#allocation5 + $0x30] sm:$0xff] %vm5896_vm3, %v5717_v60  ;;  %v13302_v60 = vld [vmem:[#allocation4 + $0x109] sm:$0xff] }
 0x9c8   :  { %v5731_v37 = vpop.permute.xlu2 %5730  ;;  %v5721_v46 = vpop.permute.xlu0 %5720 }
 0x9c9   :  { %5910 = vst.msk [vmem:[#allocation5 + $0x68] sm:$0xff] %vm5896_vm3, %v5731_v37 }
 0x9ca   :  { %5905 = vst.msk [vmem:[#allocation5 + $0x40] sm:$0xff] %vm5896_vm3, %v5721_v46 }
 0x9cc   :  { %5806 = vrot.lane.b32.xlu1 %v12807_v26, %s9616_s20 }
 0x9ce   :  { %5810 = vrot.lane.b32.xlu0 %v12799_v2, %s9616_s20  ;;  %5808 = vrot.lane.b32.xlu2 %v12764_v18, %s9616_s20  ;;  %v5723_v0 = vpop.permute.xlu1 %5722  ;;  %v15411_v18 = vld [vmem:[#allocation7_spill] sm:$0xff] }
 0x9cf   :  { %5906 = vst.msk [vmem:[#allocation5 + $0x48] sm:$0xff] %vm5896_vm3, %v5723_v0 }
 0x9d0   :  { %v5737_v9 = vpop.permute.xlu2 %5736  ;;  %v5727_v5 = vpop.permute.xlu0 %5726 }
 0x9d1   :  { %5913 = vst.msk [vmem:[#allocation5 + $0x80] sm:$0xff] %vm5896_vm3, %v5737_v9  ;;  %v13300_v9 = vld [vmem:[#allocation4 + $0x111] sm:$0xff] }
 0x9d2   :  { %5908 = vst.msk [vmem:[#allocation5 + $0x58] sm:$0xff] %vm5896_vm3, %v5727_v5  ;;  %v5986_v5 = vld [vmem:[#allocation4 + $0x141] sm:$0xff] }
 0x9d4   :  { %5812 = vrot.lane.b32.xlu1 %v12821_v30, %s9616_s20 }
 0x9d6   :  { %5816 = vrot.lane.b32.xlu0 %v12816_v55, %s9616_s20  ;;  %5814 = vrot.lane.b32.xlu2 %v12778_v11, %s9616_s20  ;;  %v5729_v55 = vpop.permute.xlu1 %5728  ;;  %v15413_v11 = vld [vmem:[#allocation9_spill] sm:$0xff] }
 0x9d7   :  { %5909 = vst.msk [vmem:[#allocation5 + $0x60] sm:$0xff] %vm5896_vm3, %v5729_v55  ;;  %v5989_v55 = vld [vmem:[#allocation4 + $0x169] sm:$0xff] }
 0x9d8   :  { %v5743_v47 = vpop.permute.xlu2 %5742  ;;  %v5733_v2 = vpop.permute.xlu0 %5732 }
 0x9d9   :  { %5916 = vst.msk [vmem:[#allocation5 + $0x98] sm:$0xff] %vm5896_vm3, %v5743_v47 }
 0x9da   :  { %5911 = vst.msk [vmem:[#allocation5 + $0x70] sm:$0xff] %vm5896_vm3, %v5733_v2 }
 0x9dc   :  { %5818 = vrot.lane.b32.xlu1 %v15413_v11, %s9616_s20 }
 0x9de   :  { %5822 = vrot.lane.b32.xlu0 %v15411_v18, %s9616_s20  ;;  %5820 = vrot.lane.b32.xlu2 %v15412_v24, %s9616_s20  ;;  %v5735_v33 = vpop.permute.xlu1 %5734  ;;  %v5985_v18 = vld [vmem:[#allocation4 + $0x139] sm:$0xff] }
 0x9df   :  { %5912 = vst.msk [vmem:[#allocation5 + $0x78] sm:$0xff] %vm5896_vm3, %v5735_v33  ;;  %v5992_v33 = vld [vmem:[#allocation4 + $0x189] sm:$0xff] }
 0x9e0   :  { %v5749_v26 = vpop.permute.xlu2 %5748  ;;  %v5739_v42 = vpop.permute.xlu0 %5738 }
 0x9e1   :  { %5919 = vst.msk [vmem:[#allocation5 + $0xb0] sm:$0xff] %vm5896_vm3, %v5749_v26  ;;  %v5984_v26 = vld [vmem:[#allocation4 + $0x129] sm:$0xff] }
 0x9e2   :  { %5914 = vst.msk [vmem:[#allocation5 + $0x88] sm:$0xff] %vm5896_vm3, %v5739_v42 }
 0x9e4   :  { %5824 = vrot.lane.b32.xlu1 %v15415_v15, %s9616_s20 }
 0x9e6   :  { %5828 = vrot.lane.b32.xlu0 %v5638_v19, %s9616_s20  ;;  %5826 = vrot.lane.b32.xlu2 %v15414_v23, %s9616_s20  ;;  %v5741_v28 = vpop.permute.xlu1 %5740  ;;  %v5988_v19 = vld [vmem:[#allocation4 + $0x159] sm:$0xff] }
 0x9e7   :  { %5915 = vst.msk [vmem:[#allocation5 + $0x90] sm:$0xff] %vm5896_vm3, %v5741_v28  ;;  %v5995_v28 = vld [vmem:[#allocation4 + $0x1e1] sm:$0xff] }
 0x9e8   :  { %v5755_v30 = vpop.permute.xlu2 %5754  ;;  %v5745_v45 = vpop.permute.xlu0 %5744 }
 0x9e9   :  { %5922 = vst.msk [vmem:[#allocation5 + $0xc8] sm:$0xff] %vm5896_vm3, %v5755_v30  ;;  %v5987_v30 = vld [vmem:[#allocation4 + $0x151] sm:$0xff] }
 0x9ea   :  { %5917 = vst.msk [vmem:[#allocation5 + $0xa0] sm:$0xff] %vm5896_vm3, %v5745_v45 }
 0x9ec   :  { %5830 = vrot.lane.b32.xlu1 %v5639_v48, %s9616_s20 }
 0x9ee   :  { %6091 = vrot.lane.b32.xlu0 %v5962_v36, %s9618_s22  ;;  %6089 = vrot.lane.b32.xlu2 %v5961_v62, %s9618_s22  ;;  %v5747_v3 = vpop.permute.xlu1 %5746  ;;  %v5991_v36 = vld [vmem:[#allocation4 + $0x181] sm:$0xff] }
 0x9ef   :  { %5918 = vst.msk [vmem:[#allocation5 + $0xa8] sm:$0xff] %vm5896_vm3, %v5747_v3  ;;  %v5993_v3 = vld [vmem:[#allocation4 + $0x1c9] sm:$0xff] }
 0x9f0   :  { %v5761_v1 = vpop.permute.xlu2 %5760  ;;  %v5751_v59 = vpop.permute.xlu0 %5750 }
 0x9f1   :  { %5925 = vst.msk [vmem:[#allocation5 + $0xe0] sm:$0xff] %vm5896_vm3, %v5761_v1  ;;  %v5990_v1 = vld [vmem:[#allocation4 + $0x171] sm:$0xff] }
 0x9f2   :  { %5920 = vst.msk [vmem:[#allocation5 + $0xb8] sm:$0xff] %vm5896_vm3, %v5751_v59 }
 0x9f4   :  { %6093 = vrot.lane.b32.xlu1 %v13215_v58, %s9618_s22 }
 0x9f6   :  { %6097 = vrot.lane.b32.xlu0 %v13206_v17, %s9618_s22  ;;  %6095 = vrot.lane.b32.xlu2 %v13213_v29, %s9618_s22  ;;  %v5753_v43 = vpop.permute.xlu1 %5752 }
 0x9f7   :  { %5921 = vst.msk [vmem:[#allocation5 + $0xc0] sm:$0xff] %vm5896_vm3, %v5753_v43 }
 0x9f8   :  { %v5767_v16 = vpop.permute.xlu2 %5766  ;;  %v5757_v40 = vpop.permute.xlu0 %5756 }
 0x9f9   :  { %5928 = vst.msk [vmem:[#allocation5 + $0xf8] sm:$0xff] %vm5896_vm3, %v5767_v16  ;;  %v5994_v16 = vld [vmem:[#allocation4 + $0x1d1] sm:$0xff] }
 0x9fa   :  { %5923 = vst.msk [vmem:[#allocation5 + $0xd0] sm:$0xff] %vm5896_vm3, %v5757_v40  ;;  %v5998_v40 = vld [vmem:[#allocation4 + $0x201] sm:$0xff] }
 0x9fc   :  { %6099 = vrot.lane.b32.xlu1 %v13230_v63, %s9618_s22 }
 0x9fe   :  { %6103 = vrot.lane.b32.xlu0 %v13221_v51, %s9618_s22  ;;  %6101 = vrot.lane.b32.xlu2 %v13228_v52, %s9618_s22  ;;  %v5759_v27 = vpop.permute.xlu1 %5758 }
 0x9ff   :  { %5924 = vst.msk [vmem:[#allocation5 + $0xd8] sm:$0xff] %vm5896_vm3, %v5759_v27  ;;  %v5996_v27 = vld [vmem:[#allocation4 + $0x1e9] sm:$0xff] }
 0xa00   :  { %v5773_v31 = vpop.permute.xlu2 %5772  ;;  %v5763_v10 = vpop.permute.xlu0 %5762 }
 0xa01   :  { %5931 = vst.msk [vmem:[#allocation5 + $0x110] sm:$0xff] %vm5896_vm3, %v5773_v31 }
 0xa02   :  { %5926 = vst.msk [vmem:[#allocation5 + $0xe8] sm:$0xff] %vm5896_vm3, %v5763_v10 }
 0xa04   :  { %6105 = vrot.lane.b32.xlu1 %v13245_v13, %s9618_s22 }
 0xa06   :  { %6109 = vrot.lane.b32.xlu0 %v13236_v61, %s9618_s22  ;;  %6107 = vrot.lane.b32.xlu2 %v13243_v57, %s9618_s22  ;;  %v5765_v39 = vpop.permute.xlu1 %5764 }
 0xa07   :  { %5927 = vst.msk [vmem:[#allocation5 + $0xf0] sm:$0xff] %vm5896_vm3, %v5765_v39 }
 0xa08   :  { %v5779_v53 = vpop.permute.xlu2 %5778  ;;  %v5769_v20 = vpop.permute.xlu0 %5768 }
 0xa09   :  { %5934 = vst.msk [vmem:[#allocation5 + $0x128] sm:$0xff] %vm5896_vm3, %v5779_v53  ;;  %v5997_v53 = vld [vmem:[#allocation4 + $0x1f9] sm:$0xff] }
 0xa0a   :  { %5929 = vst.msk [vmem:[#allocation5 + $0x100] sm:$0xff] %vm5896_vm3, %v5769_v20  ;;  %v6001_v20 = vld [vmem:[#allocation4 + $0x229] sm:$0xff] }
 0xa0c   :  { %6111 = vrot.lane.b32.xlu1 %v13260_v22, %s9618_s22 }
 0xa0e   :  { %6115 = vrot.lane.b32.xlu0 %v13251_v12, %s9618_s22  ;;  %6113 = vrot.lane.b32.xlu2 %v13258_v7, %s9618_s22  ;;  %v5771_v54 = vpop.permute.xlu1 %5770 }
 0xa0f   :  { %5930 = vst.msk [vmem:[#allocation5 + $0x108] sm:$0xff] %vm5896_vm3, %v5771_v54  ;;  %v5999_v54 = vld [vmem:[#allocation4 + $0x211] sm:$0xff] }
 0xa10   :  { %v5785_v38 = vpop.permute.xlu2 %5784  ;;  %v5775_v56 = vpop.permute.xlu0 %5774 }
 0xa11   :  { %5937 = vst.msk [vmem:[#allocation5 + $0x140] sm:$0xff] %vm5896_vm3, %v5785_v38 }
 0xa12   :  { %5932 = vst.msk [vmem:[#allocation5 + $0x118] sm:$0xff] %vm5896_vm3, %v5775_v56 }
 0xa14   :  { %6117 = vrot.lane.b32.xlu1 %v13275_v8, %s9618_s22 }
 0xa16   :  { %6121 = vrot.lane.b32.xlu0 %v13266_v14, %s9618_s22  ;;  %6119 = vrot.lane.b32.xlu2 %v13273_v21, %s9618_s22  ;;  %v5777_v6 = vpop.permute.xlu1 %5776 }
 0xa17   :  { %5933 = vst.msk [vmem:[#allocation5 + $0x120] sm:$0xff] %vm5896_vm3, %v5777_v6 }
 0xa18   :  { %v5791_v49 = vpop.permute.xlu2 %5790  ;;  %v5781_v35 = vpop.permute.xlu0 %5780 }
 0xa19   :  { %5940 = vst.msk [vmem:[#allocation5 + $0x158] sm:$0xff] %vm5896_vm3, %v5791_v49  ;;  %v6000_v49 = vld [vmem:[#allocation4 + $0x219] sm:$0xff] }
 0xa1a   :  { %5935 = vst.msk [vmem:[#allocation5 + $0x130] sm:$0xff] %vm5896_vm3, %v5781_v35  ;;  %v6004_v35 = vld [vmem:[#allocation4 + $0x249] sm:$0xff] }
 0xa1c   :  { %6123 = vrot.lane.b32.xlu1 %v13290_v25, %s9618_s22 }
 0xa1e   :  { %6127 = vrot.lane.b32.xlu0 %v13281_v34, %s9618_s22  ;;  %6125 = vrot.lane.b32.xlu2 %v13288_v50, %s9618_s22  ;;  %v5783_v32 = vpop.permute.xlu1 %5782 }
 0xa1f   :  { %5936 = vst.msk [vmem:[#allocation5 + $0x138] sm:$0xff] %vm5896_vm3, %v5783_v32  ;;  %v6007_v32 = vld [vmem:[#allocation4 + $0x271] sm:$0xff] }
 0xa20   :  { %v5797_v41 = vpop.permute.xlu2 %5796  ;;  %v5787_v4 = vpop.permute.xlu0 %5786 }
 0xa21   :  { %5943 = vst.msk [vmem:[#allocation5 + $0x170] sm:$0xff] %vm5896_vm3, %v5797_v41 }
 0xa22   :  { %5938 = vst.msk [vmem:[#allocation5 + $0x148] sm:$0xff] %vm5896_vm3, %v5787_v4 }
 0xa24   :  { %6129 = vrot.lane.b32.xlu1 %v13302_v60, %s9618_s22 }
 0xa26   :  { %6133 = vrot.lane.b32.xlu0 %v5983_v44, %s9618_s22  ;;  %6131 = vrot.lane.b32.xlu2 %v13300_v9, %s9618_s22  ;;  %v5789_v0 = vpop.permute.xlu1 %5788  ;;  %v6003_v44 = vld [vmem:[#allocation4 + $0x241] sm:$0xff] }
 0xa27   :  { %5939 = vst.msk [vmem:[#allocation5 + $0x150] sm:$0xff] %vm5896_vm3, %v5789_v0  ;;  %v6006_v0 = vld [vmem:[#allocation4 + $0x261] sm:$0xff] }
 0xa28   :  { %v5803_v37 = vpop.permute.xlu2 %5802  ;;  %v5793_v46 = vpop.permute.xlu0 %5792 }
 0xa29   :  { %5946 = vst.msk [vmem:[#allocation5 + $0x188] sm:$0xff] %vm5896_vm3, %v5803_v37  ;;  %v6002_v37 = vld [vmem:[#allocation4 + $0x231] sm:$0xff] }
 0xa2a   :  { %5941 = vst.msk [vmem:[#allocation5 + $0x160] sm:$0xff] %vm5896_vm3, %v5793_v46 }
 0xa2c   :  { %6135 = vrot.lane.b32.xlu1 %v5984_v26, %s9618_s22 }
 0xa2e   :  { %6139 = vrot.lane.b32.xlu0 %v5986_v5, %s9618_s22  ;;  %6137 = vrot.lane.b32.xlu2 %v5985_v18, %s9618_s22  ;;  %v5795_v24 = vpop.permute.xlu1 %5794  ;;  %v6010_v18 = vld [vmem:[#allocation4 + $0x291] sm:$0xff] }
 0xa2f   :  { %5942 = vst.msk [vmem:[#allocation5 + $0x168] sm:$0xff] %vm5896_vm3, %v5795_v24  ;;  %v6009_v24 = vld [vmem:[#allocation4 + $0x289] sm:$0xff] }
 0xa30   :  { %v5809_v47 = vpop.permute.xlu2 %5808  ;;  %v5799_v2 = vpop.permute.xlu0 %5798 }
 0xa31   :  { %5949 = vst.msk [vmem:[#allocation5 + $0x1a0] sm:$0xff] %vm5896_vm3, %v5809_v47 }
 0xa32   :  { %5944 = vst.msk [vmem:[#allocation5 + $0x178] sm:$0xff] %vm5896_vm3, %v5799_v2  ;;  %v6005_v2 = vld [vmem:[#allocation4 + $0x259] sm:$0xff] }
 0xa34   :  { %6141 = vrot.lane.b32.xlu1 %v5987_v30, %s9618_s22 }
 0xa36   :  { %6145 = vrot.lane.b32.xlu0 %v5989_v55, %s9618_s22  ;;  %6143 = vrot.lane.b32.xlu2 %v5988_v19, %s9618_s22  ;;  %v5801_v23 = vpop.permute.xlu1 %5800  ;;  %v6013_v19 = vld [vmem:[#allocation4 + $0x2b9] sm:$0xff] }
 0xa37   :  { %5945 = vst.msk [vmem:[#allocation5 + $0x180] sm:$0xff] %vm5896_vm3, %v5801_v23  ;;  %v6012_v23 = vld [vmem:[#allocation4 + $0x2a9] sm:$0xff] }
 0xa38   :  { %v5815_v42 = vpop.permute.xlu2 %5814  ;;  %v5805_v11 = vpop.permute.xlu0 %5804 }
 0xa39   :  { %5952 = vst.msk [vmem:[#allocation5 + $0x1b8] sm:$0xff] %vm5896_vm3, %v5815_v42 }
 0xa3a   :  { %5947 = vst.msk [vmem:[#allocation5 + $0x190] sm:$0xff] %vm5896_vm3, %v5805_v11  ;;  %v6008_v11 = vld [vmem:[#allocation4 + $0x279] sm:$0xff] }
 0xa3c   :  { %6147 = vrot.lane.b32.xlu1 %v5990_v1, %s9618_s22 }
 0xa3e   :  { %6151 = vrot.lane.b32.xlu0 %v5992_v33, %s9618_s22  ;;  %6149 = vrot.lane.b32.xlu2 %v5991_v36, %s9618_s22  ;;  %v5807_v62 = vpop.permute.xlu1 %5806  ;;  %v6016_v36 = vld [vmem:[#allocation4 + $0x2d9] sm:$0xff] }
 0xa3f   :  { %5948 = vst.msk [vmem:[#allocation5 + $0x198] sm:$0xff] %vm5896_vm3, %v5807_v62  ;;  %v6015_v62 = vld [vmem:[#allocation4 + $0x2d1] sm:$0xff] }
 0xa40   :  { %v5821_v45 = vpop.permute.xlu2 %5820  ;;  %v5811_v15 = vpop.permute.xlu0 %5810 }
 0xa41   :  { %5955 = vst.msk [vmem:[#allocation5 + $0x1d0] sm:$0xff] %vm5896_vm3, %v5821_v45 }
 0xa42   :  { %5950 = vst.msk [vmem:[#allocation5 + $0x1a8] sm:$0xff] %vm5896_vm3, %v5811_v15  ;;  %v6011_v15 = vld [vmem:[#allocation4 + $0x2a1] sm:$0xff] }
 0xa44   :  { %6153 = vrot.lane.b32.xlu1 %v5993_v3, %s9618_s22 }
 0xa46   :  { %6157 = vrot.lane.b32.xlu0 %v5995_v28, %s9618_s22  ;;  %6155 = vrot.lane.b32.xlu2 %v5994_v16, %s9618_s22  ;;  %v5813_v43 = vpop.permute.xlu1 %5812  ;;  %v6019_v16 = vld [vmem:[#allocation4 + $0x301] sm:$0xff] }
 0xa47   :  { %5951 = vst.msk [vmem:[#allocation5 + $0x1b0] sm:$0xff] %vm5896_vm3, %v5813_v43  ;;  %v6018_v43 = vld [vmem:[#allocation4 + $0x2f1] sm:$0xff] }
 0xa48   :  { %v5827_v59 = vpop.permute.xlu2 %5826  ;;  %v5817_v48 = vpop.permute.xlu0 %5816 }
 0xa49   :  { %5958 = vst.msk [vmem:[#allocation5 + $0x1e8] sm:$0xff] %vm5896_vm3, %v5827_v59 }
 0xa4a   :  { %5953 = vst.msk [vmem:[#allocation5 + $0x1c0] sm:$0xff] %vm5896_vm3, %v5817_v48  ;;  %v6014_v48 = vld [vmem:[#allocation4 + $0x2c1] sm:$0xff] }
 0xa4c   :  { %6159 = vrot.lane.b32.xlu1 %v5996_v27, %s9618_s22 }
 0xa4e   :  { %6163 = vrot.lane.b32.xlu0 %v5998_v40, %s9618_s22  ;;  %6161 = vrot.lane.b32.xlu2 %v5997_v53, %s9618_s22  ;;  %v5819_v39 = vpop.permute.xlu1 %5818  ;;  %v6346_v53 = vld [vmem:[#allocation4 + $0x1a] sm:$0xff] }
 0xa4f   :  { %5954 = vst.msk [vmem:[#allocation5 + $0x1c8] sm:$0xff] %vm5896_vm3, %v5819_v39  ;;  %v6021_v39 = vld [vmem:[#allocation4 + $0x319] sm:$0xff] }
 0xa50   :  { %v6090_v31 = vpop.permute.xlu2 %6089  ;;  %v5823_v10 = vpop.permute.xlu0 %5822 }
 0xa51   :  { %6282 = vst.msk [vmem:[#allocation5] sm:$0xff] %vm6281_vm4, %v6090_v31 }
 0xa52   :  { %5956 = vst.msk [vmem:[#allocation5 + $0x1d8] sm:$0xff] %vm5896_vm3, %v5823_v10  ;;  %v6017_v10 = vld [vmem:[#allocation4 + $0x2e9] sm:$0xff] }
 0xa54   :  { %6165 = vrot.lane.b32.xlu1 %v5999_v54, %s9618_s22 }
 0xa56   :  { %6169 = vrot.lane.b32.xlu0 %v6001_v20, %s9618_s22  ;;  %6167 = vrot.lane.b32.xlu2 %v6000_v49, %s9618_s22  ;;  %v5825_v6 = vpop.permute.xlu1 %5824  ;;  %v7502_v49 = vld [vmem:[#allocation4 + $0x32] sm:$0xff] }
 0xa57   :  { %5957 = vst.msk [vmem:[#allocation5 + $0x1e0] sm:$0xff] %vm5896_vm3, %v5825_v6  ;;  %v6732_v6 = vld [vmem:[#allocation4 + $0x30] sm:$0xff] }
 0xa58   :  { %v6096_v38 = vpop.permute.xlu2 %6095  ;;  %v5829_v56 = vpop.permute.xlu0 %5828 }
 0xa59   :  { %6285 = vst.msk [vmem:[#allocation5 + $0x18] sm:$0xff] %vm6281_vm4, %v6096_v38 }
 0xa5a   :  { %5959 = vst.msk [vmem:[#allocation5 + $0x1f0] sm:$0xff] %vm5896_vm3, %v5829_v56  ;;  %v6020_v56 = vld [vmem:[#allocation4 + $0x309] sm:$0xff] }
 0xa5c   :  { %6171 = vrot.lane.b32.xlu1 %v6002_v37, %s9618_s22 }
 0xa5e   :  { %6175 = vrot.lane.b32.xlu0 %v6004_v35, %s9618_s22  ;;  %6173 = vrot.lane.b32.xlu2 %v6003_v44, %s9618_s22  ;;  %v5831_v5 = vpop.permute.xlu1 %5830 }
 0xa5f   :  { %5960 = vst.msk [vmem:[#allocation5 + $0x1f8] sm:$0xff] %vm5896_vm3, %v5831_v5 }
 0xa60   :  { %v6102_v41 = vpop.permute.xlu2 %6101  ;;  %v6092_v4 = vpop.permute.xlu0 %6091 }
 0xa61   :  { %6288 = vst.msk [vmem:[#allocation5 + $0x30] sm:$0xff] %vm6281_vm4, %v6102_v41 }
 0xa62   :  { %6283 = vst.msk [vmem:[#allocation5 + $0x8] sm:$0xff] %vm6281_vm4, %v6092_v4 }
 0xa64   :  { %6177 = vrot.lane.b32.xlu1 %v6005_v2, %s9618_s22 }
 0xa66   :  { %6181 = vrot.lane.b32.xlu0 %v6007_v32, %s9618_s22  ;;  %6179 = vrot.lane.b32.xlu2 %v6006_v0, %s9618_s22  ;;  %v6094_v55 = vpop.permute.xlu1 %6093  ;;  %v6733_v32 = vld [vmem:[#allocation4 + $0x38] sm:$0xff] }
 0xa67   :  { %6284 = vst.msk [vmem:[#allocation5 + $0x10] sm:$0xff] %vm6281_vm4, %v6094_v55  ;;  %v7503_v0 = vld [vmem:[#allocation4 + $0x3a] sm:$0xff]  ;;  %v7504_v55 = vld [vmem:[#allocation4 + $0x4a] sm:$0xff] }
 0xa68   :  { %v6108_v46 = vpop.permute.xlu2 %6107  ;;  %v6098_v47 = vpop.permute.xlu0 %6097 }
 0xa69   :  { %6291 = vst.msk [vmem:[#allocation5 + $0x48] sm:$0xff] %vm6281_vm4, %v6108_v46  ;;  %v6347_v46 = vld [vmem:[#allocation4 + $0x22] sm:$0xff] }
 0xa6a   :  { %6286 = vst.msk [vmem:[#allocation5 + $0x20] sm:$0xff] %vm6281_vm4, %v6098_v47 }
 0xa6c   :  { %6183 = vrot.lane.b32.xlu1 %v6008_v11, %s9618_s22 }
 0xa6e   :  { %6187 = vrot.lane.b32.xlu0 %v6010_v18, %s9618_s22  ;;  %6185 = vrot.lane.b32.xlu2 %v6009_v24, %s9618_s22  ;;  %v6100_v33 = vpop.permute.xlu1 %6099 }
 0xa6f   :  { %6287 = vst.msk [vmem:[#allocation5 + $0x28] sm:$0xff] %vm6281_vm4, %v6100_v33 }
 0xa70   :  { %v6114_v26 = vpop.permute.xlu2 %6113  ;;  %v6104_v42 = vpop.permute.xlu0 %6103 }
 0xa71   :  { %6294 = vst.msk [vmem:[#allocation5 + $0x60] sm:$0xff] %vm6281_vm4, %v6114_v26 }
 0xa72   :  { %6289 = vst.msk [vmem:[#allocation5 + $0x38] sm:$0xff] %vm6281_vm4, %v6104_v42  ;;  %v7505_v42 = vld [vmem:[#allocation4 + $0x52] sm:$0xff] }
 0xa74   :  { %6189 = vrot.lane.b32.xlu1 %v6011_v15, %s9618_s22 }
 0xa76   :  { %6193 = vrot.lane.b32.xlu0 %v6013_v19, %s9618_s22  ;;  %6191 = vrot.lane.b32.xlu2 %v6012_v23, %s9618_s22  ;;  %v6106_v28 = vpop.permute.xlu1 %6105  ;;  %v6736_v23 = vld [vmem:[#allocation4 + $0x60] sm:$0xff] }
 0xa77   :  { %6290 = vst.msk [vmem:[#allocation5 + $0x40] sm:$0xff] %vm6281_vm4, %v6106_v28 }
 0xa78   :  { %v6120_v30 = vpop.permute.xlu2 %6119  ;;  %v6110_v45 = vpop.permute.xlu0 %6109 }
 0xa79   :  { %6297 = vst.msk [vmem:[#allocation5 + $0x78] sm:$0xff] %vm6281_vm4, %v6120_v30  ;;  %v6735_v30 = vld [vmem:[#allocation4 + $0x50] sm:$0xff] }
 0xa7a   :  { %6292 = vst.msk [vmem:[#allocation5 + $0x50] sm:$0xff] %vm6281_vm4, %v6110_v45 }
 0xa7c   :  { %6195 = vrot.lane.b32.xlu1 %v6014_v48, %s9618_s22  ;;  %v7507_v48 = vld [vmem:[#allocation4 + $0x6a] sm:$0xff] }
 0xa7e   :  { %6199 = vrot.lane.b32.xlu0 %v6016_v36, %s9618_s22  ;;  %6197 = vrot.lane.b32.xlu2 %v6015_v62, %s9618_s22  ;;  %v6112_v40 = vpop.permute.xlu1 %6111 }
 0xa7f   :  { %6293 = vst.msk [vmem:[#allocation5 + $0x58] sm:$0xff] %vm6281_vm4, %v6112_v40 }
 0xa80   :  { %v6126_v1 = vpop.permute.xlu2 %6125  ;;  %v6116_v59 = vpop.permute.xlu0 %6115 }
 0xa81   :  { %6300 = vst.msk [vmem:[#allocation5 + $0x90] sm:$0xff] %vm6281_vm4, %v6126_v1  ;;  %v7506_v1 = vld [vmem:[#allocation4 + $0x62] sm:$0xff] }
 0xa82   :  { %6295 = vst.msk [vmem:[#allocation5 + $0x68] sm:$0xff] %vm6281_vm4, %v6116_v59 }
 0xa84   :  { %6201 = vrot.lane.b32.xlu1 %v6017_v10, %s9618_s22 }
 0xa86   :  { %6205 = vrot.lane.b32.xlu0 %v6019_v16, %s9618_s22  ;;  %6203 = vrot.lane.b32.xlu2 %v6018_v43, %s9618_s22  ;;  %v6118_v20 = vpop.permute.xlu1 %6117  ;;  %v7508_v16 = vld [vmem:[#allocation4 + $0x7a] sm:$0xff] }
 0xa87   :  { %6296 = vst.msk [vmem:[#allocation5 + $0x70] sm:$0xff] %vm6281_vm4, %v6118_v20  ;;  %v6738_v43 = vld [vmem:[#allocation4 + $0x78] sm:$0xff] }
 0xa88   :  { %v6132_v3 = vpop.permute.xlu2 %6131  ;;  %v6122_v31 = vpop.permute.xlu0 %6121 }
 0xa89   :  { %6303 = vst.msk [vmem:[#allocation5 + $0xa8] sm:$0xff] %vm6281_vm4, %v6132_v3 }
 0xa8a   :  { %6298 = vst.msk [vmem:[#allocation5 + $0x80] sm:$0xff] %vm6281_vm4, %v6122_v31 }
 0xa8c   :  { %6207 = vrot.lane.b32.xlu1 %v6020_v56, %s9618_s22  ;;  %v7958_v56 = vld [vmem:[%s15284_s4 + $0x38] sm:$0xff] }
 0xa8e   :  { %6474 = vrot.lane.b32.xlu0 %v6346_v53, %s9619_s2  ;;  %6209 = vrot.lane.b32.xlu2 %v6021_v39, %s9618_s22  ;;  %v6124_v35 = vpop.permute.xlu1 %6123  ;;  %v7959_v39 = vld [vmem:[%s15284_s4 + $0x40] sm:$0xff] }
 0xa8f   :  { %6299 = vst.msk [vmem:[#allocation5 + $0x88] sm:$0xff] %vm6281_vm4, %v6124_v35  ;;  %8160 = vmatpush.msra.mxu1 %v7959_v39  ;;  %9582 = vmatpush.msrb.mxu3 %v7959_v39  ;;  %v7956_v35 = vld [vmem:[%s15284_s4 + $0x28] sm:$0xff]  ;;  %v6747_v39 = vld [vmem:[#allocation4 + $0xe0] sm:$0xff] }
 0xa90   :  { %v6138_v27 = vpop.permute.xlu2 %6137  ;;  %v6128_v38 = vpop.permute.xlu0 %6127 }
 0xa91   :  { %6306 = vst.msk [vmem:[#allocation5 + $0xc0] sm:$0xff] %vm6281_vm4, %v6138_v27  ;;  %v6739_v27 = vld [vmem:[#allocation4 + $0x80] sm:$0xff]  ;;  %8161 = vmatpush.msra.mxu1 %v7958_v56  ;;  %9583 = vmatpush.msrb.mxu3 %v7958_v56 }
 0xa92   :  { %6301 = vst.msk [vmem:[#allocation5 + $0x98] sm:$0xff] %vm6281_vm4, %v6128_v38 }
 0xa94   :  { %6860 = vrot.lane.b32.xlu1 %v6732_v6, %s9622_s16 }
 0xa96   :  { %7630 = vrot.lane.b32.xlu0 %v7502_v49, %s9620_s3  ;;  %7245 = vrot.lane.b32.xlu2 %v13215_v58, %s9621_s30  ;;  %v6130_v44 = vpop.permute.xlu1 %6129  ;;  %v6734_v58 = vld [vmem:[#allocation4 + $0x48] sm:$0xff] }
 0xa97   :  { %6302 = vst.msk [vmem:[#allocation5 + $0xa0] sm:$0xff] %vm6281_vm4, %v6130_v44  ;;  %v7955_v44 = vld [vmem:[%s15284_s4 + $0x20] sm:$0xff] }
 0xa98   :  { %v6144_v54 = vpop.permute.xlu2 %6143  ;;  %v6134_v41 = vpop.permute.xlu0 %6133 }
 0xa99   :  { %6309 = vst.msk [vmem:[#allocation5 + $0xd8] sm:$0xff] %vm6281_vm4, %v6144_v54  ;;  %v7509_v54 = vld [vmem:[#allocation4 + $0x82] sm:$0xff] }
 0xa9a   :  { %6304 = vst.msk [vmem:[#allocation5 + $0xb0] sm:$0xff] %vm6281_vm4, %v6134_v41 }
 0xa9c   :  { %6476 = vrot.lane.b32.xlu1 %v6347_v46, %s9619_s2  ;;  %v7511_v46 = vld [vmem:[#allocation4 + $0x9a] sm:$0xff] }
 0xa9e   :  { %7247 = vrot.lane.b32.xlu0 %v13213_v29, %s9621_s30  ;;  %6862 = vrot.lane.b32.xlu2 %v6733_v32, %s9622_s16  ;;  %v6136_v29 = vpop.permute.xlu1 %6135  ;;  %v7510_v32 = vld [vmem:[#allocation4 + $0x92] sm:$0xff] }
 0xa9f   :  { %6305 = vst.msk [vmem:[#allocation5 + $0xb8] sm:$0xff] %vm6281_vm4, %v6136_v29 }
 0xaa0   :  { %v6150_v4 = vpop.permute.xlu2 %6149  ;;  %v6140_v37 = vpop.permute.xlu0 %6139 }
 0xaa1   :  { %6312 = vst.msk [vmem:[#allocation5 + $0xf0] sm:$0xff] %vm6281_vm4, %v6150_v4 }
 0xaa2   :  { %6307 = vst.msk [vmem:[#allocation5 + $0xc8] sm:$0xff] %vm6281_vm4, %v6140_v37  ;;  %v7954_v37 = vld [vmem:[%s15284_s4 + $0x18] sm:$0xff] }
 0xaa4   :  { %7632 = vrot.lane.b32.xlu1 %v7503_v0, %s9620_s3 }
 0xaa6   :  { %6864 = vrot.lane.b32.xlu0 %v6734_v58, %s9622_s16  ;;  %6478 = vrot.lane.b32.xlu2 %v7502_v49, %s9619_s2  ;;  %v6142_v18 = vpop.permute.xlu1 %6141  ;;  %v7957_v49 = vld [vmem:[%s15284_s4 + $0x30] sm:$0xff] }
 0xaa7   :  { %6308 = vst.msk [vmem:[#allocation5 + $0xd0] sm:$0xff] %vm6281_vm4, %v6142_v18  ;;  %8162 = vmatpush.msra.mxu1 %v7957_v49  ;;  %9584 = vmatpush.msrb.mxu3 %v7957_v49  ;;  %v7953_v58 = vld [vmem:[%s15284_s4 + $0x10] sm:$0xff] }
 0xaa8   :  { %v6156_v5 = vpop.permute.xlu2 %6155  ;;  %v6146_v47 = vpop.permute.xlu0 %6145 }
 0xaa9   :  { %6315 = vst.msk [vmem:[#allocation5 + $0x108] sm:$0xff] %vm6281_vm4, %v6156_v5  ;;  %8163 = vmatpush.msra.mxu1 %v7956_v35  ;;  %9585 = vmatpush.msrb.mxu3 %v7956_v35  ;;  %v6749_v35 = vld [vmem:[#allocation4 + $0xf8] sm:$0xff] }
 0xaaa   :  { %6310 = vst.msk [vmem:[#allocation5 + $0xe0] sm:$0xff] %vm6281_vm4, %v6146_v47  ;;  %v7952_v47 = vld [vmem:[%s15284_s4 + $0x8] sm:$0xff] }
 0xaab   :  { %8164 = vmatpush.msra.mxu1 %v7955_v44  ;;  %9586 = vmatpush.msrb.mxu3 %v7955_v44 }
 0xaac   :  { %7249 = vrot.lane.b32.xlu1 %v13206_v17, %s9621_s30 }
 0xaad   :  { %8165 = vmatpush.msra.mxu1 %v7954_v37  ;;  %9587 = vmatpush.msrb.mxu3 %v7954_v37 }
 0xaae   :  { %6480 = vrot.lane.b32.xlu0 %v7503_v0, %s9619_s2  ;;  %7634 = vrot.lane.b32.xlu2 %v7504_v55, %s9620_s3  ;;  %v6148_v11 = vpop.permute.xlu1 %6147 }
 0xaaf   :  { %6311 = vst.msk [vmem:[#allocation5 + $0xe8] sm:$0xff] %vm6281_vm4, %v6148_v11  ;;  %8166 = vmatpush.msra.mxu1 %v7953_v58  ;;  %9588 = vmatpush.msrb.mxu3 %v7953_v58  ;;  %v7519_v58 = vld [vmem:[#allocation4 + $0xfa] sm:$0xff] }
 0xab0   :  { %v6162_v2 = vpop.permute.xlu2 %6161  ;;  %v6152_v26 = vpop.permute.xlu0 %6151 }
 0xab1   :  { %6318 = vst.msk [vmem:[#allocation5 + $0x120] sm:$0xff] %vm6281_vm4, %v6162_v2  ;;  %8167 = vmatpush.msra.mxu1 %v7952_v47  ;;  %9589 = vmatpush.msrb.mxu3 %v7952_v47  ;;  %v6741_v2 = vld [vmem:[#allocation4 + $0x98] sm:$0xff] }
 0xab2   :  { %6313 = vst.msk [vmem:[#allocation5 + $0xf8] sm:$0xff] %vm6281_vm4, %v6152_v26 }
 0xab4   :  { %6866 = vrot.lane.b32.xlu1 %v6735_v30, %s9622_s16 }
 0xab6   :  { %7636 = vrot.lane.b32.xlu0 %v7505_v42, %s9620_s3  ;;  %7251 = vrot.lane.b32.xlu2 %v13230_v63, %s9621_s30  ;;  %v6154_v33 = vpop.permute.xlu1 %6153  ;;  %v6737_v63 = vld [vmem:[#allocation4 + $0x68] sm:$0xff] }
 0xab7   :  { %6314 = vst.msk [vmem:[#allocation5 + $0x100] sm:$0xff] %vm6281_vm4, %v6154_v33 }
 0xab8   :  { %v6168_v24 = vpop.permute.xlu2 %6167  ;;  %v6158_v19 = vpop.permute.xlu0 %6157 }
 0xab9   :  { %6321 = vst.msk [vmem:[#allocation5 + $0x138] sm:$0xff] %vm6281_vm4, %v6168_v24 }
 0xaba   :  { %6316 = vst.msk [vmem:[#allocation5 + $0x110] sm:$0xff] %vm6281_vm4, %v6158_v19  ;;  %v7512_v19 = vld [vmem:[#allocation4 + $0xaa] sm:$0xff] }
 0xabc   :  { %6482 = vrot.lane.b32.xlu1 %v7504_v55, %s9619_s2 }
 0xabe   :  { %7253 = vrot.lane.b32.xlu0 %v13228_v52, %s9621_s30  ;;  %6868 = vrot.lane.b32.xlu2 %v6736_v23, %s9622_s16  ;;  %v6160_v36 = vpop.permute.xlu1 %6159  ;;  %v7514_v23 = vld [vmem:[#allocation4 + $0xc2] sm:$0xff] }
 0xabf   :  { %6317 = vst.msk [vmem:[#allocation5 + $0x118] sm:$0xff] %vm6281_vm4, %v6160_v36 }
 0xac0   :  { %v6174_v17 = vpop.permute.xlu2 %6173  ;;  %v6164_v45 = vpop.permute.xlu0 %6163 }
 0xac1   :  { %6324 = vst.msk [vmem:[#allocation5 + $0x150] sm:$0xff] %vm6281_vm4, %v6174_v17 }
 0xac2   :  { %6319 = vst.msk [vmem:[#allocation5 + $0x128] sm:$0xff] %vm6281_vm4, %v6164_v45  ;;  %v7513_v45 = vld [vmem:[#allocation4 + $0xb2] sm:$0xff] }
 0xac4   :  { %7638 = vrot.lane.b32.xlu1 %v7506_v1, %s9620_s3 }
 0xac6   :  { %6870 = vrot.lane.b32.xlu0 %v6737_v63, %s9622_s16  ;;  %6484 = vrot.lane.b32.xlu2 %v7505_v42, %s9619_s2  ;;  %v6166_v59 = vpop.permute.xlu1 %6165  ;;  %v6742_v42 = vld [vmem:[#allocation4 + $0xa8] sm:$0xff] }
 0xac7   :  { %6320 = vst.msk [vmem:[#allocation5 + $0x130] sm:$0xff] %vm6281_vm4, %v6166_v59 }
 0xac8   :  { %v6180_v15 = vpop.permute.xlu2 %6179  ;;  %v6170_v52 = vpop.permute.xlu0 %6169 }
 0xac9   :  { %6327 = vst.msk [vmem:[#allocation5 + $0x168] sm:$0xff] %vm6281_vm4, %v6180_v15 }
 0xaca   :  { %6322 = vst.msk [vmem:[#allocation5 + $0x140] sm:$0xff] %vm6281_vm4, %v6170_v52 }
 0xacc   :  { %7255 = vrot.lane.b32.xlu1 %v13221_v51, %s9621_s30 }
 0xace   :  { %6486 = vrot.lane.b32.xlu0 %v7506_v1, %s9619_s2  ;;  %7640 = vrot.lane.b32.xlu2 %v7507_v48, %s9620_s3  ;;  %v6172_v40 = vpop.permute.xlu1 %6171  ;;  %v6744_v1 = vld [vmem:[#allocation4 + $0xc0] sm:$0xff] }
 0xacf   :  { %6323 = vst.msk [vmem:[#allocation5 + $0x148] sm:$0xff] %vm6281_vm4, %v6172_v40  ;;  %v7515_v40 = vld [vmem:[#allocation4 + $0xca] sm:$0xff] }
 0xad0   :  { %v6186_v28 = vpop.permute.xlu2 %6185  ;;  %v6176_v62 = vpop.permute.xlu0 %6175 }
 0xad1   :  { %6330 = vst.msk [vmem:[#allocation5 + $0x180] sm:$0xff] %vm6281_vm4, %v6186_v28 }
 0xad2   :  { %6325 = vst.msk [vmem:[#allocation5 + $0x158] sm:$0xff] %vm6281_vm4, %v6176_v62  ;;  %v6745_v62 = vld [vmem:[#allocation4 + $0xc8] sm:$0xff] }
 0xad4   :  { %6872 = vrot.lane.b32.xlu1 %v6738_v43, %s9622_s16 }
 0xad6   :  { %7642 = vrot.lane.b32.xlu0 %v7508_v16, %s9620_s3  ;;  %7257 = vrot.lane.b32.xlu2 %v13245_v13, %s9621_s30  ;;  %v6178_v10 = vpop.permute.xlu1 %6177  ;;  %v6740_v13 = vld [vmem:[#allocation4 + $0x90] sm:$0xff] }
 0xad7   :  { %6326 = vst.msk [vmem:[#allocation5 + $0x160] sm:$0xff] %vm6281_vm4, %v6178_v10 }
 0xad8   :  { %v6192_v3 = vpop.permute.xlu2 %6191  ;;  %v6182_v31 = vpop.permute.xlu0 %6181 }
 0xad9   :  { %6333 = vst.msk [vmem:[#allocation5 + $0x198] sm:$0xff] %vm6281_vm4, %v6192_v3 }
 0xada   :  { %6328 = vst.msk [vmem:[#allocation5 + $0x170] sm:$0xff] %vm6281_vm4, %v6182_v31 }
 0xadc   :  { %6488 = vrot.lane.b32.xlu1 %v7507_v48, %s9619_s2  ;;  %v6746_v48 = vld [vmem:[#allocation4 + $0xd8] sm:$0xff] }
 0xade   :  { %7259 = vrot.lane.b32.xlu0 %v13243_v57, %s9621_s30  ;;  %6874 = vrot.lane.b32.xlu2 %v6739_v27, %s9622_s16  ;;  %v6184_v38 = vpop.permute.xlu1 %6183  ;;  %v7517_v27 = vld [vmem:[#allocation4 + $0xe2] sm:$0xff] }
 0xadf   :  { %6329 = vst.msk [vmem:[#allocation5 + $0x178] sm:$0xff] %vm6281_vm4, %v6184_v38 }
 0xae0   :  { %v6198_v51 = vpop.permute.xlu2 %6197  ;;  %v6188_v53 = vpop.permute.xlu0 %6187 }
 0xae1   :  { %6336 = vst.msk [vmem:[#allocation5 + $0x1b0] sm:$0xff] %vm6281_vm4, %v6198_v51 }
 0xae2   :  { %6331 = vst.msk [vmem:[#allocation5 + $0x188] sm:$0xff] %vm6281_vm4, %v6188_v53  ;;  %v7516_v53 = vld [vmem:[#allocation4 + $0xda] sm:$0xff] }
 0xae4   :  { %7644 = vrot.lane.b32.xlu1 %v7509_v54, %s9620_s3 }
 0xae6   :  { %6876 = vrot.lane.b32.xlu0 %v6740_v13, %s9622_s16  ;;  %6490 = vrot.lane.b32.xlu2 %v7508_v16, %s9619_s2  ;;  %v6190_v6 = vpop.permute.xlu1 %6189 }
 0xae7   :  { %6332 = vst.msk [vmem:[#allocation5 + $0x190] sm:$0xff] %vm6281_vm4, %v6190_v6 }
 0xae8   :  { %v6204_v20 = vpop.permute.xlu2 %6203  ;;  %v6194_v57 = vpop.permute.xlu0 %6193 }
 0xae9   :  { %6339 = vst.msk [vmem:[#allocation5 + $0x1c8] sm:$0xff] %vm6281_vm4, %v6204_v20 }
 0xaea   :  { %6334 = vst.msk [vmem:[#allocation5 + $0x1a0] sm:$0xff] %vm6281_vm4, %v6194_v57 }
 0xaec   :  { %7261 = vrot.lane.b32.xlu1 %v13236_v61, %s9621_s30  ;;  %v7951_v61 = vld [vmem:[%s15284_s4] sm:$0xff] }
 0xaed   :  { %8168 = vmatpush.msra.mxu1 %v7951_v61  ;;  %9590 = vmatpush.msrb.mxu3 %v7951_v61 }
 0xaee   :  { %6492 = vrot.lane.b32.xlu0 %v7509_v54, %s9619_s2  ;;  %7646 = vrot.lane.b32.xlu2 %v7510_v32, %s9620_s3  ;;  %v6196_v29 = vpop.permute.xlu1 %6195  ;;  %v6748_v54 = vld [vmem:[#allocation4 + $0xf0] sm:$0xff] }
 0xaef   :  { %6335 = vst.msk [vmem:[#allocation5 + $0x1a8] sm:$0xff] %vm6281_vm4, %v6196_v29 }
 0xaf0   :  { %v6210_v41 = vpop.permute.xlu2 %6209  ;;  %v6200_v4 = vpop.permute.xlu0 %6199 }
 0xaf1   :  { %6342 = vst.msk [vmem:[#allocation5 + $0x1e0] sm:$0xff] %vm6281_vm4, %v6210_v41 }
 0xaf2   :  { %6337 = vst.msk [vmem:[#allocation5 + $0x1b8] sm:$0xff] %vm6281_vm4, %v6200_v4  ;;  %v7518_v4 = vld [vmem:[#allocation4 + $0xf2] sm:$0xff] }
 0xaf4   :  { %6878 = vrot.lane.b32.xlu1 %v6741_v2, %s9622_s16  ;;  %v6750_v2 = vld [vmem:[#allocation4 + $0x108] sm:$0xff] }
 0xaf6   :  { %7648 = vrot.lane.b32.xlu0 %v7511_v46, %s9620_s3  ;;  %7263 = vrot.lane.b32.xlu2 %v13260_v22, %s9621_s30  ;;  %v6202_v26 = vpop.permute.xlu1 %6201  ;;  %v6743_v22 = vld [vmem:[#allocation4 + $0xb0] sm:$0xff] }
 0xaf7   :  { %6338 = vst.msk [vmem:[#allocation5 + $0x1c0] sm:$0xff] %vm6281_vm4, %v6202_v26 }
 0xaf8   :  { %v7246_v5 = vpop.permute.xlu2 %7245  ;;  %v6206_v0 = vpop.permute.xlu0 %6205 }
 0xaf9   :  { %6340 = vst.msk [vmem:[#allocation5 + $0x1d0] sm:$0xff] %vm6281_vm4, %v6206_v0 }
 0xafc   :  { %6494 = vrot.lane.b32.xlu1 %v7510_v32, %s9619_s2 }
 0xafe   :  { %7265 = vrot.lane.b32.xlu0 %v13258_v7, %s9621_s30  ;;  %6880 = vrot.lane.b32.xlu2 %v6742_v42, %s9622_s16  ;;  %v6208_v11 = vpop.permute.xlu1 %6207  ;;  %v6752_v42 = vld [vmem:[#allocation4 + $0x120] sm:$0xff] }
 0xaff   :  { %6341 = vst.msk [vmem:[#allocation5 + $0x1d8] sm:$0xff] %vm6281_vm4, %v6208_v11  ;;  %v7521_v11 = vld [vmem:[#allocation4 + $0x112] sm:$0xff] }
 0xb00   :  { %v6863_v18 = vpop.permute.xlu2 %6862  ;;  %v6475_v55 = vpop.permute.xlu0 %6474 }
 0xb01   :  { %6667 = vst.msk [vmem:[#allocation5] sm:$0xff] %vm6666_vm5, %v6475_v55  ;;  %v6751_v55 = vld [vmem:[#allocation4 + $0x110] sm:$0xff] }
 0xb04   :  { %7650 = vrot.lane.b32.xlu1 %v7512_v19, %s9620_s3 }
 0xb06   :  { %6882 = vrot.lane.b32.xlu0 %v6743_v22, %s9622_s16  ;;  %6496 = vrot.lane.b32.xlu2 %v7511_v46, %s9619_s2  ;;  %v6861_v17 = vpop.permute.xlu1 %6860 }
 0xb07   :  { %7053 = vst.msk [vmem:[#allocation5] sm:$0xff] %vm7052_vm6, %v6861_v17 }
 0xb08   :  { %v6479_v24 = vpop.permute.xlu2 %6478  ;;  %v7631_v7 = vpop.permute.xlu0 %7630  ;;  %7438 = vst.msk [vmem:[#allocation5] sm:$0xff] %vm7437_vm7, %v7246_v5  ;;  %v7520_v5 = vld [vmem:[#allocation4 + $0x10a] sm:$0xff] }
 0xb09   :  { %6669 = vst.msk [vmem:[#allocation5 + $0x10] sm:$0xff] %vm6666_vm5, %v6479_v24 }
 0xb0a   :  { %7823 = vst.msk [vmem:[#allocation5] sm:$0xff] %vm7822_vm8, %v7631_v7 }
 0xb0c   :  { %7267 = vrot.lane.b32.xlu1 %v13251_v12, %s9621_s30 }
 0xb0e   :  { %6498 = vrot.lane.b32.xlu0 %v7512_v19, %s9619_s2  ;;  %7652 = vrot.lane.b32.xlu2 %v7513_v45, %s9620_s3  ;;  %v6477_v15 = vpop.permute.xlu1 %6476 }
 0xb0f   :  { %6668 = vst.msk [vmem:[#allocation5 + $0x8] sm:$0xff] %vm6666_vm5, %v6477_v15 }
 0xb10   :  { %v7635_v30 = vpop.permute.xlu2 %7634  ;;  %v7248_v33 = vpop.permute.xlu0 %7247  ;;  %7054 = vst.msk [vmem:[#allocation5 + $0x8] sm:$0xff] %vm7052_vm6, %v6863_v18 }
 0xb11   :  { %v7887_v52 = vld [vmem:[#allocation5] sm:$0xff]  ;;  %7439 = vst.msk [vmem:[#allocation5 + $0x8] sm:$0xff] %vm7437_vm7, %v7248_v33 }
 0xb12   :  { %9449 = vmatmul.msk.f32.vlgmr.msra.gmra.mxu1 %vm7960_vm9, %v7887_v52  ;;  %v7522_v33 = vld [vmem:[#allocation4 + $0x122] sm:$0xff] }
 0xb14   :  { %6884 = vrot.lane.b32.xlu1 %v6744_v1, %s9622_s16 }
 0xb16   :  { %7654 = vrot.lane.b32.xlu0 %v7514_v23, %s9620_s3  ;;  %7269 = vrot.lane.b32.xlu2 %v13275_v8, %s9621_s30  ;;  %v7633_v28 = vpop.permute.xlu1 %7632 }
 0xb17   :  { %7824 = vst.msk [vmem:[#allocation5 + $0x8] sm:$0xff] %vm7822_vm8, %v7633_v28  ;;  %v6753_v28 = vld [vmem:[#allocation4 + $0x128] sm:$0xff] }
 0xb18   :  { %v7252_v63 = vpop.permute.xlu2 %7251  ;;  %v6865_v36 = vpop.permute.xlu0 %6864 }
 0xb19   :  { %7055 = vst.msk [vmem:[#allocation5 + $0x10] sm:$0xff] %vm7052_vm6, %v6865_v36 }
 0xb1c   :  { %6500 = vrot.lane.b32.xlu1 %v7513_v45, %s9619_s2  ;;  %v7137_v45 = vld [vmem:[#allocation4 + $0x121] sm:$0xff] }
 0xb1e   :  { %7271 = vrot.lane.b32.xlu0 %v13273_v21, %s9621_s30  ;;  %6886 = vrot.lane.b32.xlu2 %v6745_v62, %s9622_s16  ;;  %v7250_v16 = vpop.permute.xlu1 %7249  ;;  %v7888_v3 = vld [vmem:[#allocation5 + $0x8] sm:$0xff] }
 0xb1f   :  { %9450 = vmatmul.msk.f32.gmra.mxu1 %vm7960_vm9, %v7888_v3  ;;  %7440 = vst.msk [vmem:[#allocation5 + $0x10] sm:$0xff] %vm7437_vm7, %v7250_v16  ;;  %v6754_v16 = vld [vmem:[#allocation4 + $0x138] sm:$0xff]  ;;  %v6755_v3 = vld [vmem:[#allocation4 + $0x140] sm:$0xff] }
 0xb20   :  { %v6869_v12 = vpop.permute.xlu2 %6868  ;;  %v6481_v59 = vpop.permute.xlu0 %6480  ;;  %7825 = vst.msk [vmem:[#allocation5 + $0x10] sm:$0xff] %vm7822_vm8, %v7635_v30 }
 0xb21   :  { %6670 = vst.msk [vmem:[#allocation5 + $0x18] sm:$0xff] %vm6666_vm5, %v6481_v59  ;;  %v7139_v59 = vld [vmem:[#allocation4 + $0x139] sm:$0xff] }
 0xb24   :  { %7656 = vrot.lane.b32.xlu1 %v7515_v40, %s9620_s3 }
 0xb26   :  { %6888 = vrot.lane.b32.xlu0 %v6746_v48, %s9622_s16  ;;  %6502 = vrot.lane.b32.xlu2 %v7514_v23, %s9619_s2  ;;  %v6867_v43 = vpop.permute.xlu1 %6866  ;;  %v7523_v23 = vld [vmem:[#allocation4 + $0x12a] sm:$0xff] }
 0xb27   :  { %7056 = vst.msk [vmem:[#allocation5 + $0x18] sm:$0xff] %vm7052_vm6, %v6867_v43  ;;  %v7889_v10 = vld [vmem:[#allocation5 + $0x10] sm:$0xff] }
 0xb28   :  { %v6485_v8 = vpop.permute.xlu2 %6484  ;;  %v7637_v21 = vpop.permute.xlu0 %7636  ;;  %7441 = vst.msk [vmem:[#allocation5 + $0x18] sm:$0xff] %vm7437_vm7, %v7252_v63  ;;  %9451 = vmatmul.msk.f32.gmra.mxu1 %vm7960_vm9, %v7889_v10  ;;  %v8362_v63 = vld [vmem:[%s15285_s5] sm:$0xff] }
 0xb29   :  { %6672 = vst.msk [vmem:[#allocation5 + $0x28] sm:$0xff] %vm6666_vm5, %v6485_v8  ;;  %8574 = vmatpush.msra.mxu2 %v8362_v63  ;;  %9591 = vmatpush.msra.mxu3 %v8362_v63 }
 0xb2a   :  { %7826 = vst.msk [vmem:[#allocation5 + $0x18] sm:$0xff] %vm7822_vm8, %v7637_v21 }
 0xb2c   :  { %7273 = vrot.lane.b32.xlu1 %v13266_v14, %s9621_s30 }
 0xb2e   :  { %6504 = vrot.lane.b32.xlu0 %v7515_v40, %s9619_s2  ;;  %7658 = vrot.lane.b32.xlu2 %v7516_v53, %s9620_s3  ;;  %v6483_v20 = vpop.permute.xlu1 %6482 }
 0xb2f   :  { %6671 = vst.msk [vmem:[#allocation5 + $0x20] sm:$0xff] %vm6666_vm5, %v6483_v20  ;;  %v7525_v20 = vld [vmem:[#allocation4 + $0x142] sm:$0xff] }
 0xb30   :  { %v7641_v31 = vpop.permute.xlu2 %7640  ;;  %v7254_v51 = vpop.permute.xlu0 %7253  ;;  %7057 = vst.msk [vmem:[#allocation5 + $0x20] sm:$0xff] %vm7052_vm6, %v6869_v12  ;;  %v7138_v12 = vld [vmem:[#allocation4 + $0x129] sm:$0xff] }
 0xb31   :  { %v7890_v57 = vld [vmem:[#allocation5 + $0x18] sm:$0xff]  ;;  %7442 = vst.msk [vmem:[#allocation5 + $0x20] sm:$0xff] %vm7437_vm7, %v7254_v51 }
 0xb32   :  { %9452 = vmatmul.msk.f32.gmra.mxu1 %vm7960_vm9, %v7890_v57  ;;  %v7524_v51 = vld [vmem:[#allocation4 + $0x13a] sm:$0xff]  ;;  %v7526_v57 = vld [vmem:[#allocation4 + $0x152] sm:$0xff] }
 0xb34   :  { %6890 = vrot.lane.b32.xlu1 %v6747_v39, %s9622_s16 }
 0xb36   :  { %7660 = vrot.lane.b32.xlu0 %v7517_v27, %s9620_s3  ;;  %7275 = vrot.lane.b32.xlu2 %v13290_v25, %s9621_s30  ;;  %v7639_v56 = vpop.permute.xlu1 %7638 }
 0xb37   :  { %7827 = vst.msk [vmem:[#allocation5 + $0x20] sm:$0xff] %vm7822_vm8, %v7639_v56 }
 0xb38   :  { %v7258_v13 = vpop.permute.xlu2 %7257  ;;  %v6871_v38 = vpop.permute.xlu0 %6870 }
 0xb39   :  { %7058 = vst.msk [vmem:[#allocation5 + $0x28] sm:$0xff] %vm7052_vm6, %v6871_v38  ;;  %v7140_v38 = vld [vmem:[#allocation4 + $0x141] sm:$0xff] }
 0xb3c   :  { %6506 = vrot.lane.b32.xlu1 %v7516_v53, %s9619_s2 }
 0xb3e   :  { %7277 = vrot.lane.b32.xlu0 %v13288_v50, %s9621_s30  ;;  %6892 = vrot.lane.b32.xlu2 %v6748_v54, %s9622_s16  ;;  %v7256_v41 = vpop.permute.xlu1 %7255  ;;  %v7891_v6 = vld [vmem:[#allocation5 + $0x20] sm:$0xff] }
 0xb3f   :  { %9453 = vmatmul.msk.f32.gmra.mxu1 %vm7960_vm9, %v7891_v6  ;;  %7443 = vst.msk [vmem:[#allocation5 + $0x28] sm:$0xff] %vm7437_vm7, %v7256_v41  ;;  %v7142_v41 = vld [vmem:[#allocation4 + $0x159] sm:$0xff] }
 0xb40   :  { %v6875_v14 = vpop.permute.xlu2 %6874  ;;  %v6487_v49 = vpop.permute.xlu0 %6486  ;;  %7828 = vst.msk [vmem:[#allocation5 + $0x28] sm:$0xff] %vm7822_vm8, %v7641_v31 }
 0xb41   :  { %6673 = vst.msk [vmem:[#allocation5 + $0x30] sm:$0xff] %vm6666_vm5, %v6487_v49 }
 0xb44   :  { %7662 = vrot.lane.b32.xlu1 %v7518_v4, %s9620_s3 }
 0xb46   :  { %6894 = vrot.lane.b32.xlu0 %v6749_v35, %s9622_s16  ;;  %6508 = vrot.lane.b32.xlu2 %v7517_v27, %s9619_s2  ;;  %v6873_v37 = vpop.permute.xlu1 %6872  ;;  %v7141_v35 = vld [vmem:[#allocation4 + $0x151] sm:$0xff] }
 0xb47   :  { %7059 = vst.msk [vmem:[#allocation5 + $0x30] sm:$0xff] %vm7052_vm6, %v6873_v37  ;;  %v7892_v46 = vld [vmem:[#allocation5 + $0x28] sm:$0xff] }
 0xb48   :  { %v6491_v25 = vpop.permute.xlu2 %6490  ;;  %v7643_v50 = vpop.permute.xlu0 %7642  ;;  %7444 = vst.msk [vmem:[#allocation5 + $0x30] sm:$0xff] %vm7437_vm7, %v7258_v13  ;;  %9454 = vmatmul.msk.f32.gmra.mxu1 %vm7960_vm9, %v7892_v46 }
 0xb49   :  { %6675 = vst.msk [vmem:[#allocation5 + $0x40] sm:$0xff] %vm6666_vm5, %v6491_v25  ;;  %v6756_v25 = vld [vmem:[#allocation4 + $0x150] sm:$0xff] }
 0xb4a   :  { %7829 = vst.msk [vmem:[#allocation5 + $0x30] sm:$0xff] %vm7822_vm8, %v7643_v50 }
 0xb4c   :  { %7279 = vrot.lane.b32.xlu1 %v13281_v34, %s9621_s30 }
 0xb4e   :  { %6510 = vrot.lane.b32.xlu0 %v7518_v4, %s9619_s2  ;;  %7664 = vrot.lane.b32.xlu2 %v7519_v58, %s9620_s3  ;;  %v6489_v47 = vpop.permute.xlu1 %6488 }
 0xb4f   :  { %6674 = vst.msk [vmem:[#allocation5 + $0x38] sm:$0xff] %vm6666_vm5, %v6489_v47  ;;  %v7527_v47 = vld [vmem:[#allocation4 + $0x15a] sm:$0xff] }
 0xb50   :  { %v7647_v44 = vpop.permute.xlu2 %7646  ;;  %v7260_v32 = vpop.permute.xlu0 %7259  ;;  %7060 = vst.msk [vmem:[#allocation5 + $0x38] sm:$0xff] %vm7052_vm6, %v6875_v14 }
 0xb51   :  { %v7893_v61 = vld [vmem:[#allocation5 + $0x30] sm:$0xff]  ;;  %7445 = vst.msk [vmem:[#allocation5 + $0x38] sm:$0xff] %vm7437_vm7, %v7260_v32  ;;  %v6758_v32 = vld [vmem:[#allocation4 + $0x168] sm:$0xff] }
 0xb52   :  { %9455 = vmatmul.msk.f32.gmra.mxu1 %vm7960_vm9, %v7893_v61 }
 0xb54   :  { %6896 = vrot.lane.b32.xlu1 %v6750_v2, %s9622_s16 }
 0xb56   :  { %7666 = vrot.lane.b32.xlu0 %v7520_v5, %s9620_s3  ;;  %7281 = vrot.lane.b32.xlu2 %v13302_v60, %s9621_s30  ;;  %v7645_v18 = vpop.permute.xlu1 %7644 }
 0xb57   :  { %7830 = vst.msk [vmem:[#allocation5 + $0x38] sm:$0xff] %vm7822_vm8, %v7645_v18 }
 0xb58   :  { %v7264_v29 = vpop.permute.xlu2 %7263  ;;  %v6877_v0 = vpop.permute.xlu0 %6876 }
 0xb59   :  { %7061 = vst.msk [vmem:[#allocation5 + $0x40] sm:$0xff] %vm7052_vm6, %v6877_v0 }
 0xb5c   :  { %6512 = vrot.lane.b32.xlu1 %v7519_v58, %s9619_s2 }
 0xb5e   :  { %7283 = vrot.lane.b32.xlu0 %v13300_v9, %s9621_s30  ;;  %6898 = vrot.lane.b32.xlu2 %v6751_v55, %s9622_s16  ;;  %v7262_v22 = vpop.permute.xlu1 %7261  ;;  %v7894_v24 = vld [vmem:[#allocation5 + $0x38] sm:$0xff]  ;;  %v7143_v55 = vld [vmem:[#allocation4 + $0x169] sm:$0xff] }
 0xb5f   :  { %9456 = vmatmul.msk.f32.gmra.mxu1 %vm7960_vm9, %v7894_v24  ;;  %7446 = vst.msk [vmem:[#allocation5 + $0x40] sm:$0xff] %vm7437_vm7, %v7262_v22 }
 0xb60   :  { %v6881_v34 = vpop.permute.xlu2 %6880  ;;  %v6493_v26 = vpop.permute.xlu0 %6492  ;;  %7831 = vst.msk [vmem:[#allocation5 + $0x40] sm:$0xff] %vm7822_vm8, %v7647_v44  ;;  %v6757_v44 = vld [vmem:[#allocation4 + $0x158] sm:$0xff] }
 0xb61   :  { %6676 = vst.msk [vmem:[#allocation5 + $0x48] sm:$0xff] %vm6666_vm5, %v6493_v26  ;;  %v7528_v26 = vld [vmem:[#allocation4 + $0x16a] sm:$0xff] }
 0xb64   :  { %7668 = vrot.lane.b32.xlu1 %v7521_v11, %s9620_s3 }
 0xb66   :  { %6900 = vrot.lane.b32.xlu0 %v6752_v42, %s9622_s16  ;;  %6514 = vrot.lane.b32.xlu2 %v7520_v5, %s9619_s2  ;;  %v6879_v19 = vpop.permute.xlu1 %6878  ;;  %v7529_v42 = vld [vmem:[#allocation4 + $0x172] sm:$0xff] }
 0xb67   :  { %7062 = vst.msk [vmem:[#allocation5 + $0x48] sm:$0xff] %vm7052_vm6, %v6879_v19  ;;  %v7895_v17 = vld [vmem:[#allocation5 + $0x40] sm:$0xff]  ;;  %v6759_v19 = vld [vmem:[#allocation4 + $0x170] sm:$0xff] }
 0xb68   :  { %v6497_v60 = vpop.permute.xlu2 %6496  ;;  %v7649_v9 = vpop.permute.xlu0 %7648  ;;  %7447 = vst.msk [vmem:[#allocation5 + $0x48] sm:$0xff] %vm7437_vm7, %v7264_v29  ;;  %9457 = vmatmul.msk.f32.gmra.mxu1 %vm7960_vm9, %v7895_v17 }
 0xb69   :  { %6678 = vst.msk [vmem:[#allocation5 + $0x58] sm:$0xff] %vm6666_vm5, %v6497_v60 }
 0xb6a   :  { %7832 = vst.msk [vmem:[#allocation5 + $0x48] sm:$0xff] %vm7822_vm8, %v7649_v9 }
 0xb6c   :  { %7285 = vrot.lane.b32.xlu1 %v7137_v45, %s9621_s30 }
 0xb6e   :  { %6516 = vrot.lane.b32.xlu0 %v7521_v11, %s9619_s2  ;;  %7670 = vrot.lane.b32.xlu2 %v7522_v33, %s9620_s3  ;;  %v6495_v36 = vpop.permute.xlu1 %6494 }
 0xb6f   :  { %6677 = vst.msk [vmem:[#allocation5 + $0x50] sm:$0xff] %vm6666_vm5, %v6495_v36 }
 0xb70   :  { %v7653_v7 = vpop.permute.xlu2 %7652  ;;  %v7266_v30 = vpop.permute.xlu0 %7265  ;;  %7063 = vst.msk [vmem:[#allocation5 + $0x50] sm:$0xff] %vm7052_vm6, %v6881_v34 }
 0xb71   :  { %v7896_v1 = vld [vmem:[#allocation5 + $0x48] sm:$0xff]  ;;  %7448 = vst.msk [vmem:[#allocation5 + $0x50] sm:$0xff] %vm7437_vm7, %v7266_v30 }
 0xb72   :  { %9458 = vmatmul.msk.f32.gmra.mxu1 %vm7960_vm9, %v7896_v1  ;;  %v7145_v30 = vld [vmem:[#allocation4 + $0x181] sm:$0xff] }
 0xb74   :  { %6902 = vrot.lane.b32.xlu1 %v6753_v28, %s9622_s16  ;;  %v7530_v28 = vld [vmem:[#allocation4 + $0x182] sm:$0xff] }
 0xb76   :  { %7672 = vrot.lane.b32.xlu0 %v7523_v23, %s9620_s3  ;;  %7287 = vrot.lane.b32.xlu2 %v7138_v12, %s9621_s30  ;;  %v7651_v48 = vpop.permute.xlu1 %7650 }
 0xb77   :  { %7833 = vst.msk [vmem:[#allocation5 + $0x50] sm:$0xff] %vm7822_vm8, %v7651_v48 }
 0xb78   :  { %v7270_v15 = vpop.permute.xlu2 %7269  ;;  %v6883_v52 = vpop.permute.xlu0 %6882 }
 0xb79   :  { %7064 = vst.msk [vmem:[#allocation5 + $0x58] sm:$0xff] %vm7052_vm6, %v6883_v52 }
 0xb7c   :  { %6518 = vrot.lane.b32.xlu1 %v7522_v33, %s9619_s2 }
 0xb7e   :  { %7289 = vrot.lane.b32.xlu0 %v7139_v59, %s9621_s30  ;;  %6904 = vrot.lane.b32.xlu2 %v6754_v16, %s9622_s16  ;;  %v7268_v40 = vpop.permute.xlu1 %7267  ;;  %v7897_v31 = vld [vmem:[#allocation5 + $0x50] sm:$0xff] }
 0xb7f   :  { %9459 = vmatmul.msk.f32.gmra.mxu1 %vm7960_vm9, %v7897_v31  ;;  %7449 = vst.msk [vmem:[#allocation5 + $0x58] sm:$0xff] %vm7437_vm7, %v7268_v40  ;;  %v7146_v40 = vld [vmem:[#allocation4 + $0x189] sm:$0xff] }
 0xb80   :  { %v6887_v62 = vpop.permute.xlu2 %6886  ;;  %v6499_v8 = vpop.permute.xlu0 %6498  ;;  %7834 = vst.msk [vmem:[#allocation5 + $0x58] sm:$0xff] %vm7822_vm8, %v7653_v7  ;;  %v7144_v7 = vld [vmem:[#allocation4 + $0x171] sm:$0xff] }
 0xb81   :  { %6679 = vst.msk [vmem:[#allocation5 + $0x60] sm:$0xff] %vm6666_vm5, %v6499_v8 }
 0xb84   :  { %7674 = vrot.lane.b32.xlu1 %v7524_v51, %s9620_s3 }
 0xb86   :  { %6906 = vrot.lane.b32.xlu0 %v6755_v3, %s9622_s16  ;;  %6520 = vrot.lane.b32.xlu2 %v7523_v23, %s9619_s2  ;;  %v6885_v53 = vpop.permute.xlu1 %6884  ;;  %v6760_v23 = vld [vmem:[#allocation4 + $0x180] sm:$0xff] }
 0xb87   :  { %7065 = vst.msk [vmem:[#allocation5 + $0x60] sm:$0xff] %vm7052_vm6, %v6885_v53  ;;  %v7898_v13 = vld [vmem:[#allocation5 + $0x58] sm:$0xff] }
 0xb88   :  { %v6503_v21 = vpop.permute.xlu2 %6502  ;;  %v7655_v43 = vpop.permute.xlu0 %7654  ;;  %7450 = vst.msk [vmem:[#allocation5 + $0x60] sm:$0xff] %vm7437_vm7, %v7270_v15  ;;  %9460 = vmatmul.msk.f32.gmra.mxu1 %vm7960_vm9, %v7898_v13  ;;  %v6761_v15 = vld [vmem:[#allocation4 + $0x188] sm:$0xff]  ;;  %v7532_v3 = vld [vmem:[#allocation4 + $0x19a] sm:$0xff] }
 0xb89   :  { %6681 = vst.msk [vmem:[#allocation5 + $0x70] sm:$0xff] %vm6666_vm5, %v6503_v21  ;;  %v7531_v21 = vld [vmem:[#allocation4 + $0x18a] sm:$0xff]  ;;  %v6762_v13 = vld [vmem:[#allocation4 + $0x198] sm:$0xff] }
 0xb8a   :  { %7835 = vst.msk [vmem:[#allocation5 + $0x60] sm:$0xff] %vm7822_vm8, %v7655_v43 }
 0xb8c   :  { %7291 = vrot.lane.b32.xlu1 %v7140_v38, %s9621_s30 }
 0xb8e   :  { %6522 = vrot.lane.b32.xlu0 %v7524_v51, %s9619_s2  ;;  %7676 = vrot.lane.b32.xlu2 %v7525_v20, %s9620_s3  ;;  %v6501_v56 = vpop.permute.xlu1 %6500 }
 0xb8f   :  { %v8170_v14 = vpop.f32.mrf.mxu1  ;;  %6680 = vst.msk [vmem:[#allocation5 + $0x68] sm:$0xff] %vm6666_vm5, %v6501_v56 }
 0xb90   :  { %v7659_v10 = vpop.permute.xlu2 %7658  ;;  %v7272_v27 = vpop.permute.xlu0 %7271  ;;  %9513 = vmatmul.msk.f32.vlgmr.msra.gmra.mxu2 %vm3957_vm12, %v8170_v14  ;;  %7066 = vst.msk [vmem:[#allocation5 + $0x68] sm:$0xff] %vm7052_vm6, %v6887_v62  ;;  %v6763_v14 = vld [vmem:[#allocation4 + $0x1a0] sm:$0xff] }
 0xb91   :  { %v7899_v54 = vld [vmem:[#allocation5 + $0x60] sm:$0xff]  ;;  %7451 = vst.msk [vmem:[#allocation5 + $0x68] sm:$0xff] %vm7437_vm7, %v7272_v27 }
 0xb92   :  { %9461 = vmatmul.msk.f32.gmra.mxu1 %vm7960_vm9, %v7899_v54  ;;  %v7147_v27 = vld [vmem:[#allocation4 + $0x199] sm:$0xff] }
 0xb94   :  { %6908 = vrot.lane.b32.xlu1 %v6756_v25, %s9622_s16 }
 0xb96   :  { %7678 = vrot.lane.b32.xlu0 %v7526_v57, %s9620_s3  ;;  %7293 = vrot.lane.b32.xlu2 %v7141_v35, %s9621_s30  ;;  %v7657_v50 = vpop.permute.xlu1 %7656 }
 0xb97   :  { %7836 = vst.msk [vmem:[#allocation5 + $0x68] sm:$0xff] %vm7822_vm8, %v7657_v50  ;;  %v6378_v50 = vld [vmem:[#allocation4 + $0x1ca] sm:$0xff] }
 0xb98   :  { %v7276_v39 = vpop.permute.xlu2 %7275  ;;  %v6889_v49 = vpop.permute.xlu0 %6888 }
 0xb99   :  { %7067 = vst.msk [vmem:[#allocation5 + $0x70] sm:$0xff] %vm7052_vm6, %v6889_v49  ;;  %v6764_v49 = vld [vmem:[#allocation4 + $0x1e0] sm:$0xff] }
 0xb9c   :  { %6524 = vrot.lane.b32.xlu1 %v7525_v20, %s9619_s2  ;;  %v8173_v37 = vpop.f32.mrf.mxu1  ;;  %v7148_v20 = vld [vmem:[#allocation4 + $0x1a1] sm:$0xff] }
 0xb9d   :  { %9514 = vmatmul.msk.f32.gmra.mxu2 %vm3957_vm12, %v8173_v37 }
 0xb9e   :  { %7295 = vrot.lane.b32.xlu0 %v7142_v41, %s9621_s30  ;;  %6910 = vrot.lane.b32.xlu2 %v6757_v44, %s9622_s16  ;;  %v7274_v58 = vpop.permute.xlu1 %7273  ;;  %v7900_v5 = vld [vmem:[#allocation5 + $0x68] sm:$0xff] }
 0xb9f   :  { %7452 = vst.msk [vmem:[#allocation5 + $0x70] sm:$0xff] %vm7437_vm7, %v7274_v58  ;;  %9462 = vmatmul.msk.f32.gmra.mxu1 %vm7960_vm9, %v7900_v5  ;;  %v7534_v5 = vld [vmem:[#allocation4 + $0x1e2] sm:$0xff] }
 0xba0   :  { %v6893_v6 = vpop.permute.xlu2 %6892  ;;  %v6505_v4 = vpop.permute.xlu0 %6504  ;;  %7837 = vst.msk [vmem:[#allocation5 + $0x70] sm:$0xff] %vm7822_vm8, %v7659_v10 }
 0xba1   :  { %6682 = vst.msk [vmem:[#allocation5 + $0x78] sm:$0xff] %vm6666_vm5, %v6505_v4  ;;  %v6379_v4 = vld [vmem:[#allocation4 + $0x1d2] sm:$0xff] }
 0xba4   :  { %7680 = vrot.lane.b32.xlu1 %v7527_v47, %s9620_s3 }
 0xba5   :  { %v8176_v0 = vpop.f32.mrf.mxu1 }
 0xba6   :  { %6912 = vrot.lane.b32.xlu0 %v6758_v32, %s9622_s16  ;;  %6526 = vrot.lane.b32.xlu2 %v7526_v57, %s9619_s2  ;;  %v6891_v2 = vpop.permute.xlu1 %6890 }
 0xba7   :  { %9515 = vmatmul.msk.f32.gmra.mxu2 %vm3957_vm12, %v8176_v0  ;;  %7068 = vst.msk [vmem:[#allocation5 + $0x78] sm:$0xff] %vm7052_vm6, %v6891_v2  ;;  %v7901_v18 = vld [vmem:[#allocation5 + $0x70] sm:$0xff] }
 0xba8   :  { %v6509_v46 = vpop.permute.xlu2 %6508  ;;  %v7661_v29 = vpop.permute.xlu0 %7660  ;;  %7453 = vst.msk [vmem:[#allocation5 + $0x78] sm:$0xff] %vm7437_vm7, %v7276_v39  ;;  %9463 = vmatmul.msk.f32.gmra.mxu1 %vm7960_vm9, %v7901_v18 }
 0xba9   :  { %6684 = vst.msk [vmem:[#allocation5 + $0x88] sm:$0xff] %vm6666_vm5, %v6509_v46 }
 0xbaa   :  { %7838 = vst.msk [vmem:[#allocation5 + $0x78] sm:$0xff] %vm7822_vm8, %v7661_v29  ;;  %v7149_v29 = vld [vmem:[#allocation4 + $0x1e1] sm:$0xff] }
 0xbac   :  { %7297 = vrot.lane.b32.xlu1 %v7143_v55, %s9621_s30  ;;  %v6765_v55 = vld [vmem:[#allocation4 + $0x1e8] sm:$0xff] }
 0xbae   :  { %6528 = vrot.lane.b32.xlu0 %v7527_v47, %s9619_s2  ;;  %7682 = vrot.lane.b32.xlu2 %v7528_v26, %s9620_s3  ;;  %v6507_v24 = vpop.permute.xlu1 %6506  ;;  %v7535_v47 = vld [vmem:[#allocation4 + $0x1ea] sm:$0xff] }
 0xbaf   :  { %v8179_v22 = vpop.f32.mrf.mxu1  ;;  %6683 = vst.msk [vmem:[#allocation5 + $0x80] sm:$0xff] %vm6666_vm5, %v6507_v24 }
 0xbb0   :  { %v7665_v61 = vpop.permute.xlu2 %7664  ;;  %v7278_v34 = vpop.permute.xlu0 %7277  ;;  %9516 = vmatmul.msk.f32.gmra.mxu2 %vm3957_vm12, %v8179_v22  ;;  %7069 = vst.msk [vmem:[#allocation5 + $0x80] sm:$0xff] %vm7052_vm6, %v6893_v6  ;;  %v7533_v6 = vld [vmem:[#allocation4 + $0x1a2] sm:$0xff] }
 0xbb1   :  { %v7902_v11 = vld [vmem:[#allocation5 + $0x78] sm:$0xff]  ;;  %7454 = vst.msk [vmem:[#allocation5 + $0x80] sm:$0xff] %vm7437_vm7, %v7278_v34 }
 0xbb2   :  { %9464 = vmatmul.msk.f32.gmra.mxu1 %vm7960_vm9, %v7902_v11 }
 0xbb4   :  { %6914 = vrot.lane.b32.xlu1 %v6759_v19, %s9622_s16 }
 0xbb6   :  { %7684 = vrot.lane.b32.xlu0 %v7529_v42, %s9620_s3  ;;  %7299 = vrot.lane.b32.xlu2 %v7144_v7, %s9621_s30  ;;  %v7663_v33 = vpop.permute.xlu1 %7662  ;;  %v6393_v7 = vld [vmem:[#allocation4 + $0x27a] sm:$0xff] }
 0xbb7   :  { %7839 = vst.msk [vmem:[#allocation5 + $0x80] sm:$0xff] %vm7822_vm8, %v7663_v33 }
 0xbb8   :  { %v7282_v60 = vpop.permute.xlu2 %7281  ;;  %v6895_v9 = vpop.permute.xlu0 %6894 }
 0xbb9   :  { %7070 = vst.msk [vmem:[#allocation5 + $0x88] sm:$0xff] %vm7052_vm6, %v6895_v9  ;;  %v6766_v9 = vld [vmem:[#allocation4 + $0x1f8] sm:$0xff] }
 0xbbc   :  { %6530 = vrot.lane.b32.xlu1 %v7528_v26, %s9619_s2  ;;  %v8182_v63 = vpop.f32.mrf.mxu1  ;;  %v7150_v26 = vld [vmem:[#allocation4 + $0x1e9] sm:$0xff] }
 0xbbd   :  { %9517 = vmatmul.msk.f32.gmra.mxu2 %vm3957_vm12, %v8182_v63 }
 0xbbe   :  { %7301 = vrot.lane.b32.xlu0 %v7145_v30, %s9621_s30  ;;  %6916 = vrot.lane.b32.xlu2 %v6760_v23, %s9622_s16  ;;  %v7280_v52 = vpop.permute.xlu1 %7279  ;;  %v7903_v1 = vld [vmem:[#allocation5 + $0x80] sm:$0xff] }
 0xbbf   :  { %7455 = vst.msk [vmem:[#allocation5 + $0x88] sm:$0xff] %vm7437_vm7, %v7280_v52  ;;  %9465 = vmatmul.msk.f32.gmra.mxu1 %vm7960_vm9, %v7903_v1  ;;  %v7152_v23 = vld [vmem:[#allocation4 + $0x201] sm:$0xff] }
 0xbc0   :  { %v6899_v17 = vpop.permute.xlu2 %6898  ;;  %v6511_v45 = vpop.permute.xlu0 %6510  ;;  %7840 = vst.msk [vmem:[#allocation5 + $0x88] sm:$0xff] %vm7822_vm8, %v7665_v61 }
 0xbc1   :  { %6685 = vst.msk [vmem:[#allocation5 + $0x90] sm:$0xff] %vm6666_vm5, %v6511_v45  ;;  %v7536_v45 = vld [vmem:[#allocation4 + $0x1fa] sm:$0xff] }
 0xbc4   :  { %7686 = vrot.lane.b32.xlu1 %v7530_v28, %s9620_s3 }
 0xbc5   :  { %v8185_v59 = vpop.f32.mrf.mxu1 }
 0xbc6   :  { %6918 = vrot.lane.b32.xlu0 %v6761_v15, %s9622_s16  ;;  %6532 = vrot.lane.b32.xlu2 %v7529_v42, %s9619_s2  ;;  %v6897_v48 = vpop.permute.xlu1 %6896  ;;  %v7151_v42 = vld [vmem:[#allocation4 + $0x1f9] sm:$0xff] }
 0xbc7   :  { %9518 = vmatmul.msk.f32.gmra.mxu2 %vm3957_vm12, %v8185_v59  ;;  %7071 = vst.msk [vmem:[#allocation5 + $0x90] sm:$0xff] %vm7052_vm6, %v6897_v48  ;;  %v7904_v16 = vld [vmem:[#allocation5 + $0x88] sm:$0xff]  ;;  %v13757_v59 = vld [vmem:[#allocation4 + $0x292] sm:$0xff] }
 0xbc8   :  { %v6515_v36 = vpop.permute.xlu2 %6514  ;;  %v7667_v12 = vpop.permute.xlu0 %7666  ;;  %7456 = vst.msk [vmem:[#allocation5 + $0x90] sm:$0xff] %vm7437_vm7, %v7282_v60  ;;  %9466 = vmatmul.msk.f32.gmra.mxu1 %vm7960_vm9, %v7904_v16 }
 0xbc9   :  { %6687 = vst.msk [vmem:[#allocation5 + $0xa0] sm:$0xff] %vm6666_vm5, %v6515_v36 }
 0xbca   :  { %7841 = vst.msk [vmem:[#allocation5 + $0x90] sm:$0xff] %vm7822_vm8, %v7667_v12  ;;  %v6779_v12 = vld [vmem:[#allocation4 + $0x290] sm:$0xff] }
 0xbcc   :  { %7303 = vrot.lane.b32.xlu1 %v7146_v40, %s9621_s30  ;;  %v7164_v40 = vld [vmem:[#allocation4 + $0x291] sm:$0xff] }
 0xbce   :  { %6534 = vrot.lane.b32.xlu0 %v7530_v28, %s9619_s2  ;;  %7688 = vrot.lane.b32.xlu2 %v7531_v21, %s9620_s3  ;;  %v6513_v51 = vpop.permute.xlu1 %6512  ;;  %v6767_v28 = vld [vmem:[#allocation4 + $0x200] sm:$0xff] }
 0xbcf   :  { %v8188_v43 = vpop.f32.mrf.mxu1  ;;  %6686 = vst.msk [vmem:[#allocation5 + $0x98] sm:$0xff] %vm6666_vm5, %v6513_v51 }
 0xbd0   :  { %v7671_v62 = vpop.permute.xlu2 %7670  ;;  %v7284_v8 = vpop.permute.xlu0 %7283  ;;  %9519 = vmatmul.msk.f32.gmra.mxu2 %vm3957_vm12, %v8188_v43  ;;  %7072 = vst.msk [vmem:[#allocation5 + $0x98] sm:$0xff] %vm7052_vm6, %v6899_v17 }
 0xbd1   :  { %v7905_v53 = vld [vmem:[#allocation5 + $0x90] sm:$0xff]  ;;  %7457 = vst.msk [vmem:[#allocation5 + $0x98] sm:$0xff] %vm7437_vm7, %v7284_v8 }
 0xbd2   :  { %9467 = vmatmul.msk.f32.gmra.mxu1 %vm7960_vm9, %v7905_v53  ;;  %v6394_v53 = vld [vmem:[#allocation4 + $0x28a] sm:$0xff] }
 0xbd4   :  { %6920 = vrot.lane.b32.xlu1 %v6762_v13, %s9622_s16 }
 0xbd6   :  { %7690 = vrot.lane.b32.xlu0 %v7532_v3, %s9620_s3  ;;  %7305 = vrot.lane.b32.xlu2 %v7147_v27, %s9621_s30  ;;  %v7669_v57 = vpop.permute.xlu1 %7668  ;;  %v7165_v27 = vld [vmem:[#allocation4 + $0x2a1] sm:$0xff] }
 0xbd7   :  { %7842 = vst.msk [vmem:[#allocation5 + $0x98] sm:$0xff] %vm7822_vm8, %v7669_v57 }
 0xbd8   :  { %v7288_v31 = vpop.permute.xlu2 %7287  ;;  %v6901_v10 = vpop.permute.xlu0 %6900 }
 0xbd9   :  { %7073 = vst.msk [vmem:[#allocation5 + $0xa0] sm:$0xff] %vm7052_vm6, %v6901_v10 }
 0xbdc   :  { %6536 = vrot.lane.b32.xlu1 %v7531_v21, %s9619_s2  ;;  %v8191_v56 = vpop.f32.mrf.mxu1  ;;  %v7537_v21 = vld [vmem:[#allocation4 + $0x202] sm:$0xff] }
 0xbdd   :  { %9520 = vmatmul.msk.f32.gmra.mxu2 %vm3957_vm12, %v8191_v56  ;;  %v6780_v56 = vld [vmem:[#allocation4 + $0x2a0] sm:$0xff] }
 0xbde   :  { %7307 = vrot.lane.b32.xlu0 %v7148_v20, %s9621_s30  ;;  %6922 = vrot.lane.b32.xlu2 %v6763_v14, %s9622_s16  ;;  %v7286_v35 = vpop.permute.xlu1 %7285  ;;  %v7906_v25 = vld [vmem:[#allocation5 + $0x98] sm:$0xff] }
 0xbdf   :  { %7458 = vst.msk [vmem:[#allocation5 + $0xa0] sm:$0xff] %vm7437_vm7, %v7286_v35  ;;  %9468 = vmatmul.msk.f32.gmra.mxu1 %vm7960_vm9, %v7906_v25  ;;  %v7153_v14 = vld [vmem:[#allocation4 + $0x211] sm:$0xff] }
 0xbe0   :  { %v6905_v38 = vpop.permute.xlu2 %6904  ;;  %v6517_v39 = vpop.permute.xlu0 %6516  ;;  %7843 = vst.msk [vmem:[#allocation5 + $0xa0] sm:$0xff] %vm7822_vm8, %v7671_v62 }
 0xbe1   :  { %6688 = vst.msk [vmem:[#allocation5 + $0xa8] sm:$0xff] %vm6666_vm5, %v6517_v39 }
 0xbe4   :  { %7692 = vrot.lane.b32.xlu1 %v7533_v6, %s9620_s3  ;;  %v7550_v6 = vld [vmem:[#allocation4 + $0x2a2] sm:$0xff] }
 0xbe5   :  { %v8194_v44 = vpop.f32.mrf.mxu1 }
 0xbe6   :  { %6924 = vrot.lane.b32.xlu0 %v6764_v49, %s9622_s16  ;;  %6538 = vrot.lane.b32.xlu2 %v6378_v50, %s9619_s2  ;;  %v6903_v32 = vpop.permute.xlu1 %6902  ;;  %v7538_v50 = vld [vmem:[#allocation4 + $0x212] sm:$0xff] }
 0xbe7   :  { %9521 = vmatmul.msk.f32.gmra.mxu2 %vm3957_vm12, %v8194_v44  ;;  %7074 = vst.msk [vmem:[#allocation5 + $0xa8] sm:$0xff] %vm7052_vm6, %v6903_v32  ;;  %v7907_v58 = vld [vmem:[#allocation5 + $0xa0] sm:$0xff] }
 0xbe8   :  { %v6521_v54 = vpop.permute.xlu2 %6520  ;;  %v7673_v41 = vpop.permute.xlu0 %7672  ;;  %7459 = vst.msk [vmem:[#allocation5 + $0xa8] sm:$0xff] %vm7437_vm7, %v7288_v31  ;;  %9469 = vmatmul.msk.f32.gmra.mxu1 %vm7960_vm9, %v7907_v58  ;;  %v6768_v31 = vld [vmem:[#allocation4 + $0x210] sm:$0xff] }
 0xbe9   :  { %6690 = vst.msk [vmem:[#allocation5 + $0xb8] sm:$0xff] %vm6666_vm5, %v6521_v54 }
 0xbea   :  { %7844 = vst.msk [vmem:[#allocation5 + $0xa8] sm:$0xff] %vm7822_vm8, %v7673_v41 }
 0xbec   :  { %7309 = vrot.lane.b32.xlu1 %v7149_v29, %s9621_s30  ;;  %v13800_v29 = vld [vmem:[#allocation4 + $0x21a] sm:$0xff] }
 0xbee   :  { %6540 = vrot.lane.b32.xlu0 %v6379_v4, %s9619_s2  ;;  %7694 = vrot.lane.b32.xlu2 %v7534_v5, %s9620_s3  ;;  %v6519_v2 = vpop.permute.xlu1 %6518  ;;  %v6781_v4 = vld [vmem:[#allocation4 + $0x2a8] sm:$0xff] }
 0xbef   :  { %v8197_v61 = vpop.f32.mrf.mxu1  ;;  %6689 = vst.msk [vmem:[#allocation5 + $0xb0] sm:$0xff] %vm6666_vm5, %v6519_v2  ;;  %v7166_v2 = vld [vmem:[#allocation4 + $0x2a9] sm:$0xff] }
 0xbf0   :  { %v7677_v37 = vpop.permute.xlu2 %7676  ;;  %v7290_v46 = vpop.permute.xlu0 %7289  ;;  %9522 = vmatmul.msk.f32.gmra.mxu2 %vm3957_vm12, %v8197_v61  ;;  %7075 = vst.msk [vmem:[#allocation5 + $0xb0] sm:$0xff] %vm7052_vm6, %v6905_v38 }
 0xbf1   :  { %v7908_v18 = vld [vmem:[#allocation5 + $0xa8] sm:$0xff]  ;;  %7460 = vst.msk [vmem:[#allocation5 + $0xb0] sm:$0xff] %vm7437_vm7, %v7290_v46 }
 0xbf2   :  { %9470 = vmatmul.msk.f32.gmra.mxu1 %vm7960_vm9, %v7908_v18 }
 0xbf4   :  { %6926 = vrot.lane.b32.xlu1 %v6765_v55, %s9622_s16 }
 0xbf6   :  { %7696 = vrot.lane.b32.xlu0 %v7535_v47, %s9620_s3  ;;  %7311 = vrot.lane.b32.xlu2 %v7150_v26, %s9621_s30  ;;  %v7675_v22 = vpop.permute.xlu1 %7674 }
 0xbf7   :  { %7845 = vst.msk [vmem:[#allocation5 + $0xb0] sm:$0xff] %vm7822_vm8, %v7675_v22  ;;  %v7551_v22 = vld [vmem:[#allocation4 + $0x2aa] sm:$0xff] }
 0xbf8   :  { %v7294_v0 = vpop.permute.xlu2 %7293  ;;  %v6907_v34 = vpop.permute.xlu0 %6906 }
 0xbf9   :  { %7076 = vst.msk [vmem:[#allocation5 + $0xb8] sm:$0xff] %vm7052_vm6, %v6907_v34  ;;  %v7154_v34 = vld [vmem:[#allocation4 + $0x219] sm:$0xff] }
 0xbfc   :  { %6542 = vrot.lane.b32.xlu1 %v7534_v5, %s9619_s2  ;;  %v8200_v11 = vpop.f32.mrf.mxu1  ;;  %v6769_v5 = vld [vmem:[#allocation4 + $0x218] sm:$0xff] }
 0xbfd   :  { %9523 = vmatmul.msk.f32.gmra.mxu2 %vm3957_vm12, %v8200_v11 }
 0xbfe   :  { %7313 = vrot.lane.b32.xlu0 %v7151_v42, %s9621_s30  ;;  %6928 = vrot.lane.b32.xlu2 %v6766_v9, %s9622_s16  ;;  %v7292_v30 = vpop.permute.xlu1 %7291  ;;  %v7909_v17 = vld [vmem:[#allocation5 + $0xb0] sm:$0xff] }
 0xbff   :  { %7461 = vst.msk [vmem:[#allocation5 + $0xb8] sm:$0xff] %vm7437_vm7, %v7292_v30  ;;  %9471 = vmatmul.msk.f32.gmra.mxu1 %vm7960_vm9, %v7909_v17  ;;  %v6782_v17 = vld [vmem:[#allocation4 + $0x2b8] sm:$0xff] }
 0xc00   :  { %v6911_v60 = vpop.permute.xlu2 %6910  ;;  %v6523_v24 = vpop.permute.xlu0 %6522  ;;  %7846 = vst.msk [vmem:[#allocation5 + $0xb8] sm:$0xff] %vm7822_vm8, %v7677_v37 }
 0xc01   :  { %6691 = vst.msk [vmem:[#allocation5 + $0xc0] sm:$0xff] %vm6666_vm5, %v6523_v24  ;;  %v7155_v24 = vld [vmem:[#allocation4 + $0x229] sm:$0xff] }
 0xc04   :  { %7698 = vrot.lane.b32.xlu1 %v7536_v45, %s9620_s3 }
 0xc05   :  { %v8203_v63 = vpop.f32.mrf.mxu1 }
 0xc06   :  { %6568 = vrot.lane.b32.xlu0 %v6393_v7, %s9619_s2  ;;  %6544 = vrot.lane.b32.xlu2 %v7535_v47, %s9619_s2  ;;  %v6909_v36 = vpop.permute.xlu1 %6908 }
 0xc07   :  { %9524 = vmatmul.msk.f32.gmra.mxu2 %vm3957_vm12, %v8203_v63  ;;  %7077 = vst.msk [vmem:[#allocation5 + $0xc0] sm:$0xff] %vm7052_vm6, %v6909_v36  ;;  %v7910_v1 = vld [vmem:[#allocation5 + $0xb8] sm:$0xff] }
 0xc08   :  { %v6527_v19 = vpop.permute.xlu2 %6526  ;;  %v7679_v33 = vpop.permute.xlu0 %7678  ;;  %7462 = vst.msk [vmem:[#allocation5 + $0xc0] sm:$0xff] %vm7437_vm7, %v7294_v0  ;;  %9472 = vmatmul.msk.f32.gmra.mxu1 %vm7960_vm9, %v7910_v1  ;;  %v7540_v1 = vld [vmem:[#allocation4 + $0x22a] sm:$0xff] }
 0xc09   :  { %6693 = vst.msk [vmem:[#allocation5 + $0xd0] sm:$0xff] %vm6666_vm5, %v6527_v19 }
 0xc0a   :  { %7847 = vst.msk [vmem:[#allocation5 + $0xc0] sm:$0xff] %vm7822_vm8, %v7679_v33  ;;  %v6770_v33 = vld [vmem:[#allocation4 + $0x228] sm:$0xff] }
 0xc0c   :  { %6930 = vrot.lane.b32.xlu1 %v6767_v28, %s9622_s16  ;;  %v6771_v28 = vld [vmem:[#allocation4 + $0x230] sm:$0xff] }
 0xc0e   :  { %7315 = vrot.lane.b32.xlu0 %v7152_v23, %s9621_s30  ;;  %6954 = vrot.lane.b32.xlu2 %v6779_v12, %s9622_s16  ;;  %v6525_v8 = vpop.permute.xlu1 %6524  ;;  %v7167_v12 = vld [vmem:[#allocation4 + $0x2b9] sm:$0xff] }
 0xc0f   :  { %v8206_v48 = vpop.f32.mrf.mxu1  ;;  %6692 = vst.msk [vmem:[#allocation5 + $0xc8] sm:$0xff] %vm6666_vm5, %v6525_v8  ;;  %v7168_v8 = vld [vmem:[#allocation4 + $0x2c1] sm:$0xff] }
 0xc10   :  { %v7683_v15 = vpop.permute.xlu2 %7682  ;;  %v7296_v52 = vpop.permute.xlu0 %7295  ;;  %9525 = vmatmul.msk.f32.gmra.mxu2 %vm3957_vm12, %v8206_v48  ;;  %7078 = vst.msk [vmem:[#allocation5 + $0xc8] sm:$0xff] %vm7052_vm6, %v6911_v60 }
 0xc11   :  { %v7911_v3 = vld [vmem:[#allocation5 + $0xc0] sm:$0xff]  ;;  %7463 = vst.msk [vmem:[#allocation5 + $0xc8] sm:$0xff] %vm7437_vm7, %v7296_v52 }
 0xc12   :  { %9473 = vmatmul.msk.f32.gmra.mxu1 %vm7960_vm9, %v7911_v3 }
 0xc14   :  { %7339 = vrot.lane.b32.xlu1 %v7164_v40, %s9621_s30 }
 0xc16   :  { %7724 = vrot.lane.b32.xlu0 %v13757_v59, %s9620_s3  ;;  %7700 = vrot.lane.b32.xlu2 %v7537_v21, %s9620_s3  ;;  %v7681_v51 = vpop.permute.xlu1 %7680 }
 0xc17   :  { %7848 = vst.msk [vmem:[#allocation5 + $0xc8] sm:$0xff] %vm7822_vm8, %v7681_v51  ;;  %v6783_v51 = vld [vmem:[#allocation4 + $0x2c0] sm:$0xff] }
 0xc18   :  { %v7300_v62 = vpop.permute.xlu2 %7299  ;;  %v6913_v16 = vpop.permute.xlu0 %6912 }
 0xc19   :  { %7079 = vst.msk [vmem:[#allocation5 + $0xd0] sm:$0xff] %vm7052_vm6, %v6913_v16 }
 0xc1c   :  { %6546 = vrot.lane.b32.xlu1 %v7536_v45, %s9619_s2  ;;  %v8209_v13 = vpop.f32.mrf.mxu1  ;;  %v13824_v45 = vld [vmem:[#allocation4 + $0x2ba] sm:$0xff] }
 0xc1d   :  { %9526 = vmatmul.msk.f32.gmra.mxu2 %vm3957_vm12, %v8209_v13 }
 0xc1e   :  { %6932 = vrot.lane.b32.xlu0 %v6768_v31, %s9622_s16  ;;  %6570 = vrot.lane.b32.xlu2 %v6394_v53, %s9619_s2  ;;  %v7298_v38 = vpop.permute.xlu1 %7297  ;;  %v7912_v57 = vld [vmem:[#allocation5 + $0xc8] sm:$0xff] }
 0xc1f   :  { %7464 = vst.msk [vmem:[#allocation5 + $0xd0] sm:$0xff] %vm7437_vm7, %v7298_v38  ;;  %9474 = vmatmul.msk.f32.gmra.mxu1 %vm7960_vm9, %v7912_v57  ;;  %v7553_v38 = vld [vmem:[#allocation4 + $0x2c2] sm:$0xff]  ;;  %v7541_v57 = vld [vmem:[#allocation4 + $0x232] sm:$0xff] }
 0xc20   :  { %v6917_v43 = vpop.permute.xlu2 %6916  ;;  %v6529_v10 = vpop.permute.xlu0 %6528  ;;  %7849 = vst.msk [vmem:[#allocation5 + $0xd0] sm:$0xff] %vm7822_vm8, %v7683_v15 }
 0xc21   :  { %6694 = vst.msk [vmem:[#allocation5 + $0xd8] sm:$0xff] %vm6666_vm5, %v6529_v10 }
 0xc24   :  { %6956 = vrot.lane.b32.xlu1 %v6780_v56, %s9622_s16 }
 0xc25   :  { %v8212_v49 = vpop.f32.mrf.mxu1 }
 0xc26   :  { %7341 = vrot.lane.b32.xlu0 %v7165_v27, %s9621_s30  ;;  %7317 = vrot.lane.b32.xlu2 %v7153_v14, %s9621_s30  ;;  %v6915_v35 = vpop.permute.xlu1 %6914 }
 0xc27   :  { %9527 = vmatmul.msk.f32.gmra.mxu2 %vm3957_vm12, %v8212_v49  ;;  %7080 = vst.msk [vmem:[#allocation5 + $0xd8] sm:$0xff] %vm7052_vm6, %v6915_v35  ;;  %v7913_v41 = vld [vmem:[#allocation5 + $0xd0] sm:$0xff] }
 0xc28   :  { %v6533_v20 = vpop.permute.xlu2 %6532  ;;  %v7685_v39 = vpop.permute.xlu0 %7684  ;;  %7465 = vst.msk [vmem:[#allocation5 + $0xd8] sm:$0xff] %vm7437_vm7, %v7300_v62  ;;  %9475 = vmatmul.msk.f32.gmra.mxu1 %vm7960_vm9, %v7913_v41  ;;  %v13869_v41 = vld [vmem:[#allocation4 + $0x242] sm:$0xff] }
 0xc29   :  { %6696 = vst.msk [vmem:[#allocation5 + $0xe8] sm:$0xff] %vm6666_vm5, %v6533_v20 }
 0xc2a   :  { %7850 = vst.msk [vmem:[#allocation5 + $0xd8] sm:$0xff] %vm7822_vm8, %v7685_v39  ;;  %v6784_v39 = vld [vmem:[#allocation4 + $0x2d0] sm:$0xff] }
 0xc2c   :  { %7702 = vrot.lane.b32.xlu1 %v7538_v50, %s9620_s3 }
 0xc2e   :  { %6548 = vrot.lane.b32.xlu0 %v7537_v21, %s9619_s2  ;;  %7726 = vrot.lane.b32.xlu2 %v7550_v6, %s9620_s3  ;;  %v6531_v37 = vpop.permute.xlu1 %6530 }
 0xc2f   :  { %v8215_v32 = vpop.f32.mrf.mxu1  ;;  %6695 = vst.msk [vmem:[#allocation5 + $0xe0] sm:$0xff] %vm6666_vm5, %v6531_v37  ;;  %v7157_v37 = vld [vmem:[#allocation4 + $0x241] sm:$0xff] }
 0xc30   :  { %v7689_v54 = vpop.permute.xlu2 %7688  ;;  %v7302_v25 = vpop.permute.xlu0 %7301  ;;  %9528 = vmatmul.msk.f32.gmra.mxu2 %vm3957_vm12, %v8215_v32  ;;  %7081 = vst.msk [vmem:[#allocation5 + $0xe0] sm:$0xff] %vm7052_vm6, %v6917_v43  ;;  %v7156_v43 = vld [vmem:[#allocation4 + $0x231] sm:$0xff] }
 0xc31   :  { %v7914_v58 = vld [vmem:[#allocation5 + $0xd8] sm:$0xff]  ;;  %7466 = vst.msk [vmem:[#allocation5 + $0xe0] sm:$0xff] %vm7437_vm7, %v7302_v25  ;;  %v6772_v25 = vld [vmem:[#allocation4 + $0x240] sm:$0xff] }
 0xc32   :  { %9476 = vmatmul.msk.f32.gmra.mxu1 %vm7960_vm9, %v7914_v58 }
 0xc34   :  { %6572 = vrot.lane.b32.xlu1 %v13757_v59, %s9619_s2 }
 0xc36   :  { %6958 = vrot.lane.b32.xlu0 %v6781_v4, %s9622_s16  ;;  %6934 = vrot.lane.b32.xlu2 %v6769_v5, %s9622_s16  ;;  %v7687_v0 = vpop.permute.xlu1 %7686 }
 0xc37   :  { %7851 = vst.msk [vmem:[#allocation5 + $0xe0] sm:$0xff] %vm7822_vm8, %v7687_v0  ;;  %v7158_v0 = vld [vmem:[#allocation4 + $0x249] sm:$0xff] }
 0xc38   :  { %v7306_v44 = vpop.permute.xlu2 %7305  ;;  %v6919_v46 = vpop.permute.xlu0 %6918 }
 0xc39   :  { %7082 = vst.msk [vmem:[#allocation5 + $0xe8] sm:$0xff] %vm7052_vm6, %v6919_v46 }
 0xc3c   :  { %7319 = vrot.lane.b32.xlu1 %v7154_v34, %s9621_s30  ;;  %v8218_v18 = vpop.f32.mrf.mxu1 }
 0xc3d   :  { %9529 = vmatmul.msk.f32.gmra.mxu2 %vm3957_vm12, %v8218_v18 }
 0xc3e   :  { %7704 = vrot.lane.b32.xlu0 %v13800_v29, %s9620_s3  ;;  %7343 = vrot.lane.b32.xlu2 %v7166_v2, %s9621_s30  ;;  %v7304_v55 = vpop.permute.xlu1 %7303  ;;  %v7915_v42 = vld [vmem:[#allocation5 + $0xe0] sm:$0xff] }
 0xc3f   :  { %7467 = vst.msk [vmem:[#allocation5 + $0xe8] sm:$0xff] %vm7437_vm7, %v7304_v55  ;;  %9477 = vmatmul.msk.f32.gmra.mxu1 %vm7960_vm9, %v7915_v42  ;;  %v6785_v55 = vld [vmem:[#allocation4 + $0x2d8] sm:$0xff]  ;;  %v6773_v42 = vld [vmem:[#allocation4 + $0x248] sm:$0xff] }
 0xc40   :  { %v6923_v47 = vpop.permute.xlu2 %6922  ;;  %v6535_v61 = vpop.permute.xlu0 %6534  ;;  %7852 = vst.msk [vmem:[#allocation5 + $0xe8] sm:$0xff] %vm7822_vm8, %v7689_v54 }
 0xc41   :  { %6697 = vst.msk [vmem:[#allocation5 + $0xf0] sm:$0xff] %vm6666_vm5, %v6535_v61 }
 0xc44   :  { %7728 = vrot.lane.b32.xlu1 %v7551_v22, %s9620_s3 }
 0xc45   :  { %v8221_v9 = vpop.f32.mrf.mxu1 }
 0xc46   :  { %6574 = vrot.lane.b32.xlu0 %v7550_v6, %s9619_s2  ;;  %6550 = vrot.lane.b32.xlu2 %v7538_v50, %s9619_s2  ;;  %v6921_v7 = vpop.permute.xlu1 %6920 }
 0xc47   :  { %9530 = vmatmul.msk.f32.gmra.mxu2 %vm3957_vm12, %v8221_v9  ;;  %7083 = vst.msk [vmem:[#allocation5 + $0xf0] sm:$0xff] %vm7052_vm6, %v6921_v7  ;;  %v7916_v19 = vld [vmem:[#allocation5 + $0xe8] sm:$0xff] }
 0xc48   :  { %v6539_v26 = vpop.permute.xlu2 %6538  ;;  %v7691_v60 = vpop.permute.xlu0 %7690  ;;  %7468 = vst.msk [vmem:[#allocation5 + $0xf0] sm:$0xff] %vm7437_vm7, %v7306_v44  ;;  %9478 = vmatmul.msk.f32.gmra.mxu1 %vm7960_vm9, %v7916_v19  ;;  %v7169_v44 = vld [vmem:[#allocation4 + $0x2d1] sm:$0xff] }
 0xc49   :  { %6699 = vst.msk [vmem:[#allocation5 + $0x100] sm:$0xff] %vm6666_vm5, %v6539_v26 }
 0xc4a   :  { %7853 = vst.msk [vmem:[#allocation5 + $0xf0] sm:$0xff] %vm7822_vm8, %v7691_v60  ;;  %v13892_v60 = vld [vmem:[#allocation4 + $0x2da] sm:$0xff] }
 0xc4c   :  { %6936 = vrot.lane.b32.xlu1 %v6770_v33, %s9622_s16  ;;  %v6774_v33 = vld [vmem:[#allocation4 + $0x258] sm:$0xff] }
 0xc4e   :  { %7321 = vrot.lane.b32.xlu0 %v7155_v24, %s9621_s30  ;;  %6960 = vrot.lane.b32.xlu2 %v6782_v17, %s9622_s16  ;;  %v6537_v63 = vpop.permute.xlu1 %6536  ;;  %v7170_v17 = vld [vmem:[#allocation4 + $0x2d9] sm:$0xff] }
 0xc4f   :  { %v8224_v15 = vpop.f32.mrf.mxu1  ;;  %6698 = vst.msk [vmem:[#allocation5 + $0xf8] sm:$0xff] %vm6666_vm5, %v6537_v63 }
 0xc50   :  { %v7695_v11 = vpop.permute.xlu2 %7694  ;;  %v7308_v30 = vpop.permute.xlu0 %7307  ;;  %9531 = vmatmul.msk.f32.gmra.mxu2 %vm3957_vm12, %v8224_v15  ;;  %7084 = vst.msk [vmem:[#allocation5 + $0xf8] sm:$0xff] %vm7052_vm6, %v6923_v47  ;;  %v7554_v47 = vld [vmem:[#allocation4 + $0x2d2] sm:$0xff] }
 0xc51   :  { %v7917_v52 = vld [vmem:[#allocation5 + $0xf0] sm:$0xff]  ;;  %7469 = vst.msk [vmem:[#allocation5 + $0xf8] sm:$0xff] %vm7437_vm7, %v7308_v30 }
 0xc52   :  { %9479 = vmatmul.msk.f32.gmra.mxu1 %vm7960_vm9, %v7917_v52  ;;  %v7543_v30 = vld [vmem:[#allocation4 + $0x24a] sm:$0xff] }
 0xc54   :  { %7345 = vrot.lane.b32.xlu1 %v7167_v12, %s9621_s30 }
 0xc56   :  { %7730 = vrot.lane.b32.xlu0 %v13824_v45, %s9620_s3  ;;  %7706 = vrot.lane.b32.xlu2 %v7540_v1, %s9620_s3  ;;  %v7693_v62 = vpop.permute.xlu1 %7692 }
 0xc57   :  { %7854 = vst.msk [vmem:[#allocation5 + $0xf8] sm:$0xff] %vm7822_vm8, %v7693_v62  ;;  %v7159_v62 = vld [vmem:[#allocation4 + $0x259] sm:$0xff] }
 0xc58   :  { %v7312_v23 = vpop.permute.xlu2 %7311  ;;  %v6925_v36 = vpop.permute.xlu0 %6924 }
 0xc59   :  { %7085 = vst.msk [vmem:[#allocation5 + $0x100] sm:$0xff] %vm7052_vm6, %v6925_v36  ;;  %v7171_v36 = vld [vmem:[#allocation4 + $0x2e9] sm:$0xff] }
 0xc5c   :  { %6552 = vrot.lane.b32.xlu1 %v13800_v29, %s9619_s2  ;;  %v8227_v16 = vpop.f32.mrf.mxu1 }
 0xc5d   :  { %9532 = vmatmul.msk.f32.gmra.mxu2 %vm3957_vm12, %v8227_v16 }
 0xc5e   :  { %6938 = vrot.lane.b32.xlu0 %v6771_v28, %s9622_s16  ;;  %6576 = vrot.lane.b32.xlu2 %v7551_v22, %s9619_s2  ;;  %v7310_v21 = vpop.permute.xlu1 %7309  ;;  %v7918_v40 = vld [vmem:[#allocation5 + $0xf8] sm:$0xff] }
 0xc5f   :  { %7470 = vst.msk [vmem:[#allocation5 + $0x100] sm:$0xff] %vm7437_vm7, %v7310_v21  ;;  %9480 = vmatmul.msk.f32.gmra.mxu1 %vm7960_vm9, %v7918_v40 }
 0xc60   :  { %v6929_v59 = vpop.permute.xlu2 %6928  ;;  %v6541_v48 = vpop.permute.xlu0 %6540  ;;  %7855 = vst.msk [vmem:[#allocation5 + $0x100] sm:$0xff] %vm7822_vm8, %v7695_v11 }
 0xc61   :  { %6700 = vst.msk [vmem:[#allocation5 + $0x108] sm:$0xff] %vm6666_vm5, %v6541_v48  ;;  %v13896_v11 = vpop.f32.mrf.mxu2  ;;  %v6786_v48 = vld [vmem:[#allocation4 + $0x2e8] sm:$0xff] }
 0xc64   :  { %6962 = vrot.lane.b32.xlu1 %v6783_v51, %s9622_s16  ;;  %v7544_v51 = vld [vmem:[#allocation4 + $0x25a] sm:$0xff] }
 0xc65   :  { %v8230_v10 = vpop.f32.mrf.mxu1 }
 0xc66   :  { %7347 = vrot.lane.b32.xlu0 %v7168_v8, %s9621_s30  ;;  %7323 = vrot.lane.b32.xlu2 %v7156_v43, %s9621_s30  ;;  %v6927_v27 = vpop.permute.xlu1 %6926  ;;  %v7556_v43 = vld [vmem:[#allocation4 + $0x2ea] sm:$0xff] }
 0xc67   :  { %9533 = vmatmul.msk.f32.gmra.mxu2 %vm3957_vm12, %v8230_v10  ;;  %7086 = vst.msk [vmem:[#allocation5 + $0x108] sm:$0xff] %vm7052_vm6, %v6927_v27  ;;  %v7919_v13 = vld [vmem:[#allocation5 + $0x100] sm:$0xff]  ;;  %v6787_v10 = vld [vmem:[#allocation4 + $0x2f0] sm:$0xff] }
 0xc68   :  { %v6545_v3 = vpop.permute.xlu2 %6544  ;;  %v7697_v31 = vpop.permute.xlu0 %7696  ;;  %7471 = vst.msk [vmem:[#allocation5 + $0x108] sm:$0xff] %vm7437_vm7, %v7312_v23  ;;  %9481 = vmatmul.msk.f32.gmra.mxu1 %vm7960_vm9, %v7919_v13 }
 0xc69   :  { %6702 = vst.msk [vmem:[#allocation5 + $0x118] sm:$0xff] %vm6666_vm5, %v6545_v3  ;;  %v13909_v15 = vpop.f32.mrf.mxu2 }
 0xc6a   :  { %7856 = vst.msk [vmem:[#allocation5 + $0x108] sm:$0xff] %vm7822_vm8, %v7697_v31 }
 0xc6c   :  { %7708 = vrot.lane.b32.xlu1 %v7541_v57, %s9620_s3 }
 0xc6e   :  { %6554 = vrot.lane.b32.xlu0 %v7540_v1, %s9619_s2  ;;  %7732 = vrot.lane.b32.xlu2 %v7553_v38, %s9620_s3  ;;  %v6543_v56 = vpop.permute.xlu1 %6542 }
 0xc6f   :  { %v8233_v49 = vpop.f32.mrf.mxu1  ;;  %6701 = vst.msk [vmem:[#allocation5 + $0x110] sm:$0xff] %vm6666_vm5, %v6543_v56 }
 0xc70   :  { %v6955_v53 = vpop.permute.xlu2 %6954  ;;  %v7314_v20 = vpop.permute.xlu0 %7313  ;;  %9534 = vmatmul.msk.f32.gmra.mxu2 %vm3957_vm12, %v8233_v49  ;;  %7087 = vst.msk [vmem:[#allocation5 + $0x110] sm:$0xff] %vm7052_vm6, %v6929_v59 }
 0xc71   :  { %v7920_v35 = vld [vmem:[#allocation5 + $0x108] sm:$0xff]  ;;  %7472 = vst.msk [vmem:[#allocation5 + $0x110] sm:$0xff] %vm7437_vm7, %v7314_v20  ;;  %v13923_v8 = vpop.f32.mrf.mxu2 }
 0xc72   :  { %9482 = vmatmul.msk.f32.gmra.mxu1 %vm7960_vm9, %v7920_v35 }
 0xc74   :  { %6578 = vrot.lane.b32.xlu1 %v13824_v45, %s9619_s2 }
 0xc76   :  { %6964 = vrot.lane.b32.xlu0 %v6784_v39, %s9622_s16  ;;  %6940 = vrot.lane.b32.xlu2 %v6772_v25, %s9622_s16  ;;  %v7699_v50 = vpop.permute.xlu1 %7698  ;;  %v13944_v39 = vld [vmem:[#allocation4 + $0x262] sm:$0xff]  ;;  %v7172_v25 = vld [vmem:[#allocation4 + $0x2f1] sm:$0xff] }
 0xc77   :  { %7857 = vst.msk [vmem:[#allocation5 + $0x110] sm:$0xff] %vm7822_vm8, %v7699_v50 }
 0xc78   :  { %v7701_v14 = vpop.permute.xlu2 %7700  ;;  %v6569_v54 = vpop.permute.xlu0 %6568 }
 0xc79   :  { %6714 = vst.msk [vmem:[#allocation5 + $0x178] sm:$0xff] %vm6666_vm5, %v6569_v54  ;;  %v13934_v20 = vpop.f32.mrf.mxu2 }
 0xc7a   :  { %7100 = vst.msk [vmem:[#allocation5 + $0x178] sm:$0xff] %vm7052_vm6, %v6955_v53 }
 0xc7c   :  { %7325 = vrot.lane.b32.xlu1 %v7157_v37, %s9621_s30  ;;  %v8236_v32 = vpop.f32.mrf.mxu1 }
 0xc7d   :  { %9535 = vmatmul.msk.f32.gmra.mxu2 %vm3957_vm12, %v8236_v32  ;;  %v7557_v32 = vld [vmem:[#allocation4 + $0x2f2] sm:$0xff] }
 0xc7e   :  { %7710 = vrot.lane.b32.xlu0 %v13869_v41, %s9620_s3  ;;  %7349 = vrot.lane.b32.xlu2 %v7169_v44, %s9621_s30  ;;  %v6931_v58 = vpop.permute.xlu1 %6930  ;;  %v7921_v5 = vld [vmem:[#allocation5 + $0x110] sm:$0xff] }
 0xc7f   :  { %7088 = vst.msk [vmem:[#allocation5 + $0x118] sm:$0xff] %vm7052_vm6, %v6931_v58  ;;  %9483 = vmatmul.msk.f32.gmra.mxu1 %vm7960_vm9, %v7921_v5 }
 0xc80   :  { %v6571_v6 = vpop.permute.xlu2 %6570  ;;  %v7316_v4 = vpop.permute.xlu0 %7315 }
 0xc81   :  { %6715 = vst.msk [vmem:[#allocation5 + $0x180] sm:$0xff] %vm6666_vm5, %v6571_v6  ;;  %v13951_v35 = vpop.f32.mrf.mxu2 }
 0xc82   :  { %7473 = vst.msk [vmem:[#allocation5 + $0x118] sm:$0xff] %vm7437_vm7, %v7316_v4 }
 0xc83   :  { %7858 = vst.msk [vmem:[#allocation5 + $0x118] sm:$0xff] %vm7822_vm8, %v7701_v14 }
 0xc84   :  { %7734 = vrot.lane.b32.xlu1 %v7554_v47, %s9620_s3 }
 0xc85   :  { %v8239_v61 = vpop.f32.mrf.mxu1 }
 0xc86   :  { %6580 = vrot.lane.b32.xlu0 %v7553_v38, %s9619_s2  ;;  %6556 = vrot.lane.b32.xlu2 %v7541_v57, %s9619_s2  ;;  %v7340_v34 = vpop.permute.xlu1 %7339  ;;  %v6775_v57 = vld [vmem:[#allocation4 + $0x260] sm:$0xff] }
 0xc87   :  { %9536 = vmatmul.msk.f32.gmra.mxu2 %vm3957_vm12, %v8239_v61  ;;  %7485 = vst.msk [vmem:[#allocation5 + $0x178] sm:$0xff] %vm7437_vm7, %v7340_v34  ;;  %v6776_v34 = vld [vmem:[#allocation4 + $0x270] sm:$0xff] }
 0xc88   :  { %v7318_v46 = vpop.permute.xlu2 %7317  ;;  %v7725_v29 = vpop.permute.xlu0 %7724 }
 0xc89   :  { %7870 = vst.msk [vmem:[#allocation5 + $0x178] sm:$0xff] %vm7822_vm8, %v7725_v29  ;;  %v13963_v58 = vpop.f32.mrf.mxu2 }
 0xc8a   :  { %v7922_v26 = vld [vmem:[#allocation5 + $0x118] sm:$0xff] }
 0xc8b   :  { %9484 = vmatmul.msk.f32.gmra.mxu1 %vm7960_vm9, %v7922_v26 }
 0xc8c   :  { %6942 = vrot.lane.b32.xlu1 %v6773_v42, %s9622_s16 }
 0xc8e   :  { %7327 = vrot.lane.b32.xlu0 %v7158_v0, %s9621_s30  ;;  %6966 = vrot.lane.b32.xlu2 %v6785_v55, %s9622_s16  ;;  %v6547_v24 = vpop.permute.xlu1 %6546 }
 0xc8f   :  { %v8242_v9 = vpop.f32.mrf.mxu1  ;;  %6703 = vst.msk [vmem:[#allocation5 + $0x120] sm:$0xff] %vm6666_vm5, %v6547_v24 }
 0xc90   :  { %v7727_v2 = vpop.permute.xlu2 %7726  ;;  %v6933_v18 = vpop.permute.xlu0 %6932  ;;  %9537 = vmatmul.msk.f32.gmra.mxu2 %vm3957_vm12, %v8242_v9  ;;  %v7934_v7 = vld [vmem:[#allocation5 + $0x178] sm:$0xff] }
 0xc91   :  { %7089 = vst.msk [vmem:[#allocation5 + $0x120] sm:$0xff] %vm7052_vm6, %v6933_v18  ;;  %9496 = vmatmul.msk.f32.vlgmr.msrb.gmra.mxu3 %vm7960_vm9, %v7934_v7  ;;  %v13972_v18 = vld [vmem:[#allocation4 + $0x302] sm:$0xff]  ;;  %v7546_v9 = vld [vmem:[#allocation4 + $0x272] sm:$0xff] }
 0xc92   :  { %7474 = vst.msk [vmem:[#allocation5 + $0x120] sm:$0xff] %vm7437_vm7, %v7318_v46  ;;  %v7161_v46 = vld [vmem:[#allocation4 + $0x271] sm:$0xff]  ;;  %v7173_v7 = vld [vmem:[#allocation4 + $0x301] sm:$0xff] }
 0xc94   :  { %7351 = vrot.lane.b32.xlu1 %v7170_v17, %s9621_s30 }
 0xc96   :  { %7736 = vrot.lane.b32.xlu0 %v13892_v60, %s9620_s3  ;;  %7712 = vrot.lane.b32.xlu2 %v7543_v30, %s9620_s3  ;;  %v6957_v23 = vpop.permute.xlu1 %6956 }
 0xc97   :  { %7101 = vst.msk [vmem:[#allocation5 + $0x180] sm:$0xff] %vm7052_vm6, %v6957_v23  ;;  %v7174_v23 = vld [vmem:[#allocation4 + $0x309] sm:$0xff] }
 0xc98   :  { %v6935_v22 = vpop.permute.xlu2 %6934  ;;  %v7342_v19 = vpop.permute.xlu0 %7341 }
 0xc99   :  { %7486 = vst.msk [vmem:[#allocation5 + $0x180] sm:$0xff] %vm7437_vm7, %v7342_v19  ;;  %v6777_v19 = vld [vmem:[#allocation4 + $0x278] sm:$0xff] }
 0xc9a   :  { %7871 = vst.msk [vmem:[#allocation5 + $0x180] sm:$0xff] %vm7822_vm8, %v7727_v2  ;;  %v6788_v2 = vld [vmem:[#allocation4 + $0x300] sm:$0xff] }
 0xc9c   :  { %6558 = vrot.lane.b32.xlu1 %v13869_v41, %s9619_s2  ;;  %v8245_v52 = vpop.f32.mrf.mxu1  ;;  %v7160_v41 = vld [vmem:[#allocation4 + $0x261] sm:$0xff] }
 0xc9d   :  { %9538 = vmatmul.msk.f32.gmra.mxu2 %vm3957_vm12, %v8245_v52 }
 0xc9e   :  { %6944 = vrot.lane.b32.xlu0 %v6774_v33, %s9622_s16  ;;  %6582 = vrot.lane.b32.xlu2 %v7554_v47, %s9619_s2  ;;  %v7703_v12 = vpop.permute.xlu1 %7702 }
 0xc9f   :  { %7859 = vst.msk [vmem:[#allocation5 + $0x120] sm:$0xff] %vm7822_vm8, %v7703_v12 }
 0xca0   :  { %v7344_v45 = vpop.permute.xlu2 %7343  ;;  %v6549_v63 = vpop.permute.xlu0 %6548 }
 0xca1   :  { %6704 = vst.msk [vmem:[#allocation5 + $0x128] sm:$0xff] %vm6666_vm5, %v6549_v63  ;;  %v7935_v59 = vld [vmem:[#allocation5 + $0x180] sm:$0xff] }
 0xca2   :  { %7090 = vst.msk [vmem:[#allocation5 + $0x128] sm:$0xff] %vm7052_vm6, %v6935_v22  ;;  %9497 = vmatmul.msk.f32.gmra.mxu3 %vm7960_vm9, %v7935_v59  ;;  %v6789_v59 = vld [vmem:[#allocation4 + $0x308] sm:$0xff] }
 0xca4   :  { %6968 = vrot.lane.b32.xlu1 %v6786_v48, %s9622_s16 }
 0xca5   :  { %v8248_v16 = vpop.f32.mrf.mxu1 }
 0xca6   :  { %7353 = vrot.lane.b32.xlu0 %v7171_v36, %s9621_s30  ;;  %7329 = vrot.lane.b32.xlu2 %v7159_v62, %s9621_s30  ;;  %v6573_v21 = vpop.permute.xlu1 %6572  ;;  %v7923_v40 = vld [vmem:[#allocation5 + $0x120] sm:$0xff] }
 0xca7   :  { %9539 = vmatmul.msk.f32.gmra.mxu2 %vm3957_vm12, %v8248_v16  ;;  %6716 = vst.msk [vmem:[#allocation5 + $0x188] sm:$0xff] %vm6666_vm5, %v6573_v21  ;;  %9485 = vmatmul.msk.f32.gmra.mxu1 %vm7960_vm9, %v7923_v40 }
 0xca8   :  { %v6551_v1 = vpop.permute.xlu2 %6550  ;;  %v6959_v28 = vpop.permute.xlu0 %6958 }
 0xca9   :  { %6705 = vst.msk [vmem:[#allocation5 + $0x130] sm:$0xff] %vm6666_vm5, %v6551_v1 }
 0xcaa   :  { %7102 = vst.msk [vmem:[#allocation5 + $0x188] sm:$0xff] %vm7052_vm6, %v6959_v28  ;;  %v7162_v28 = vld [vmem:[#allocation4 + $0x279] sm:$0xff] }
 0xcab   :  { %7487 = vst.msk [vmem:[#allocation5 + $0x188] sm:$0xff] %vm7437_vm7, %v7344_v45 }
 0xcac   :  { %7714 = vrot.lane.b32.xlu1 %v7544_v51, %s9620_s3 }
 0xcae   :  { %6560 = vrot.lane.b32.xlu0 %v7543_v30, %s9619_s2  ;;  %7738 = vrot.lane.b32.xlu2 %v7556_v43, %s9620_s3  ;;  %v7320_v27 = vpop.permute.xlu1 %7319 }
 0xcaf   :  { %v8251_v13 = vpop.f32.mrf.mxu1  ;;  %7475 = vst.msk [vmem:[#allocation5 + $0x128] sm:$0xff] %vm7437_vm7, %v7320_v27 }
 0xcb0   :  { %v6961_v3 = vpop.permute.xlu2 %6960  ;;  %v7705_v31 = vpop.permute.xlu0 %7704  ;;  %9540 = vmatmul.msk.f32.gmra.mxu2 %vm3957_vm12, %v8251_v13 }
 0xcb1   :  { %7860 = vst.msk [vmem:[#allocation5 + $0x128] sm:$0xff] %vm7822_vm8, %v7705_v31  ;;  %v7559_v31 = vld [vmem:[#allocation4 + $0x30a] sm:$0xff] }
 0xcb4   :  { %6584 = vrot.lane.b32.xlu1 %v13892_v60, %s9619_s2  ;;  %v13976_v60 = vpop.f32.mrf.mxu2 }
 0xcb6   :  { %6970 = vrot.lane.b32.xlu0 %v6787_v10, %s9622_s16  ;;  %6946 = vrot.lane.b32.xlu2 %v6775_v57, %s9622_s16  ;;  %v7729_v56 = vpop.permute.xlu1 %7728  ;;  %v6778_v57 = vld [vmem:[#allocation4 + $0x288] sm:$0xff] }
 0xcb7   :  { %7872 = vst.msk [vmem:[#allocation5 + $0x188] sm:$0xff] %vm7822_vm8, %v7729_v56 }
 0xcb8   :  { %v7707_v53 = vpop.permute.xlu2 %7706  ;;  %v6575_v38 = vpop.permute.xlu0 %6574  ;;  %v7924_v49 = vld [vmem:[#allocation5 + $0x128] sm:$0xff] }
 0xcb9   :  { %6717 = vst.msk [vmem:[#allocation5 + $0x190] sm:$0xff] %vm6666_vm5, %v6575_v38  ;;  %9486 = vmatmul.msk.f32.gmra.mxu1 %vm7960_vm9, %v7924_v49 }
 0xcba   :  { %7103 = vst.msk [vmem:[#allocation5 + $0x190] sm:$0xff] %vm7052_vm6, %v6961_v3 }
 0xcbc   :  { %7331 = vrot.lane.b32.xlu1 %v7160_v41, %s9621_s30  ;;  %v8254_v6 = vpop.f32.mrf.mxu1  ;;  %v13989_v45 = vpop.f32.mrf.mxu2  ;;  %v7163_v41 = vld [vmem:[#allocation4 + $0x289] sm:$0xff] }
 0xcbd   :  { %9541 = vmatmul.msk.f32.gmra.mxu2 %vm3957_vm12, %v8254_v6  ;;  %v6791_v6 = vld [vmem:[#allocation4 + $0x320] sm:$0xff] }
 0xcbe   :  { %7716 = vrot.lane.b32.xlu0 %v13944_v39, %s9620_s3  ;;  %7355 = vrot.lane.b32.xlu2 %v7172_v25, %s9621_s30  ;;  %v6937_v4 = vpop.permute.xlu1 %6936  ;;  %v7936_v44 = vld [vmem:[#allocation5 + $0x188] sm:$0xff]  ;;  %v7175_v25 = vld [vmem:[#allocation4 + $0x319] sm:$0xff] }
 0xcbf   :  { %7091 = vst.msk [vmem:[#allocation5 + $0x130] sm:$0xff] %vm7052_vm6, %v6937_v4  ;;  %9498 = vmatmul.msk.f32.gmra.mxu3 %vm7960_vm9, %v7936_v44 }
 0xcc0   :  { %v6577_v14 = vpop.permute.xlu2 %6576  ;;  %v7322_v54 = vpop.permute.xlu0 %7321 }
 0xcc1   :  { %6718 = vst.msk [vmem:[#allocation5 + $0x198] sm:$0xff] %vm6666_vm5, %v6577_v14 }
 0xcc2   :  { %7476 = vst.msk [vmem:[#allocation5 + $0x130] sm:$0xff] %vm7437_vm7, %v7322_v54 }
 0xcc3   :  { %7861 = vst.msk [vmem:[#allocation5 + $0x130] sm:$0xff] %vm7822_vm8, %v7707_v53 }
 0xcc4   :  { %7740 = vrot.lane.b32.xlu1 %v7557_v32, %s9620_s3  ;;  %v14003_v62 = vpop.f32.mrf.mxu2 }
 0xcc5   :  { %v8257_v5 = vpop.f32.mrf.mxu1 }
 0xcc6   :  { %6586 = vrot.lane.b32.xlu0 %v7556_v43, %s9619_s2  ;;  %6562 = vrot.lane.b32.xlu2 %v7544_v51, %s9619_s2  ;;  %v7346_v47 = vpop.permute.xlu1 %7345  ;;  %v7547_v43 = vld [vmem:[#allocation4 + $0x27a] sm:$0xff] }
 0xcc7   :  { %9542 = vmatmul.msk.f32.gmra.mxu2 %vm3957_vm12, %v8257_v5  ;;  %7488 = vst.msk [vmem:[#allocation5 + $0x190] sm:$0xff] %vm7437_vm7, %v7346_v47  ;;  %v6790_v51 = vld [vmem:[#allocation4 + $0x318] sm:$0xff] }
 0xcc8   :  { %v7324_v50 = vpop.permute.xlu2 %7323  ;;  %v7731_v37 = vpop.permute.xlu0 %7730  ;;  %v7560_v5 = vld [vmem:[#allocation4 + $0x31a] sm:$0xff] }
 0xcc9   :  { %7873 = vst.msk [vmem:[#allocation5 + $0x190] sm:$0xff] %vm7822_vm8, %v7731_v37 }
 0xcca   :  { %v7925_v61 = vld [vmem:[#allocation5 + $0x130] sm:$0xff] }
 0xccb   :  { %9487 = vmatmul.msk.f32.gmra.mxu1 %vm7960_vm9, %v7925_v61 }
 0xccc   :  { %6948 = vrot.lane.b32.xlu1 %v6776_v34, %s9622_s16  ;;  %v14014_v13 = vpop.f32.mrf.mxu2 }
 0xcce   :  { %7333 = vrot.lane.b32.xlu0 %v7161_v46, %s9621_s30  ;;  %6972 = vrot.lane.b32.xlu2 %v6788_v2, %s9622_s16  ;;  %v6553_v55 = vpop.permute.xlu1 %6552 }
 0xccf   :  { %v8260_v42 = vpop.f32.mrf.mxu1  ;;  %6706 = vst.msk [vmem:[#allocation5 + $0x138] sm:$0xff] %vm6666_vm5, %v6553_v55  ;;  %v7562_v55 = vld [vmem:[#allocation4 + $0x332] sm:$0xff] }
 0xcd0   :  { %v7733_v29 = vpop.permute.xlu2 %7732  ;;  %v6939_v0 = vpop.permute.xlu0 %6938  ;;  %9543 = vmatmul.msk.f32.gmra.mxu2 %vm3957_vm12, %v8260_v42  ;;  %v7937_v22 = vld [vmem:[#allocation5 + $0x190] sm:$0xff] }
 0xcd1   :  { %7092 = vst.msk [vmem:[#allocation5 + $0x138] sm:$0xff] %vm7052_vm6, %v6939_v0  ;;  %9499 = vmatmul.msk.f32.gmra.mxu3 %vm7960_vm9, %v7937_v22 }
 0xcd2   :  { %7477 = vst.msk [vmem:[#allocation5 + $0x138] sm:$0xff] %vm7437_vm7, %v7324_v50 }
 0xcd4   :  { %7357 = vrot.lane.b32.xlu1 %v7173_v7, %s9621_s30  ;;  %v14031_v4 = vpop.f32.mrf.mxu2  ;;  %v7177_v7 = vld [vmem:[#allocation4 + $0x331] sm:$0xff] }
 0xcd6   :  { %7742 = vrot.lane.b32.xlu0 %v13972_v18, %s9620_s3  ;;  %7718 = vrot.lane.b32.xlu2 %v7546_v9, %s9620_s3  ;;  %v6963_v17 = vpop.permute.xlu1 %6962 }
 0xcd7   :  { %7104 = vst.msk [vmem:[#allocation5 + $0x198] sm:$0xff] %vm7052_vm6, %v6963_v17 }
 0xcd8   :  { %v6941_v26 = vpop.permute.xlu2 %6940  ;;  %v7348_v24 = vpop.permute.xlu0 %7347 }
 0xcd9   :  { %7489 = vst.msk [vmem:[#allocation5 + $0x198] sm:$0xff] %vm7437_vm7, %v7348_v24 }
 0xcda   :  { %7874 = vst.msk [vmem:[#allocation5 + $0x198] sm:$0xff] %vm7822_vm8, %v7733_v29 }
 0xcdc   :  { %6564 = vrot.lane.b32.xlu1 %v13944_v39, %s9619_s2  ;;  %v8263_v63 = vpop.f32.mrf.mxu1  ;;  %v7548_v39 = vld [vmem:[#allocation4 + $0x28a] sm:$0xff]  ;;  %v14041_v61 = vpop.f32.mrf.mxu2 }
 0xcdd   :  { %9544 = vmatmul.msk.f32.gmra.mxu2 %vm3957_vm12, %v8263_v63 }
 0xcde   :  { %6950 = vrot.lane.b32.xlu0 %v6777_v19, %s9622_s16  ;;  %6588 = vrot.lane.b32.xlu2 %v7557_v32, %s9619_s2  ;;  %v7709_v52 = vpop.permute.xlu1 %7708  ;;  %v6792_v19 = vld [vmem:[#allocation4 + $0x330] sm:$0xff] }
 0xcdf   :  { %7862 = vst.msk [vmem:[#allocation5 + $0x138] sm:$0xff] %vm7822_vm8, %v7709_v52 }
 0xce0   :  { %v7350_v30 = vpop.permute.xlu2 %7349  ;;  %v6555_v33 = vpop.permute.xlu0 %6554 }
 0xce1   :  { %6707 = vst.msk [vmem:[#allocation5 + $0x140] sm:$0xff] %vm6666_vm5, %v6555_v33  ;;  %v7938_v12 = vld [vmem:[#allocation5 + $0x198] sm:$0xff] }
 0xce2   :  { %7093 = vst.msk [vmem:[#allocation5 + $0x140] sm:$0xff] %vm7052_vm6, %v6941_v26  ;;  %9500 = vmatmul.msk.f32.gmra.mxu3 %vm7960_vm9, %v7938_v12  ;;  %v7176_v26 = vld [vmem:[#allocation4 + $0x321] sm:$0xff]  ;;  %v7179_v12 = vld [vmem:[#allocation4 + $0x349] sm:$0xff] }
 0xce4   :  { %6974 = vrot.lane.b32.xlu1 %v6789_v59, %s9622_s16  ;;  %v7178_v59 = vld [vmem:[#allocation4 + $0x339] sm:$0xff] }
 0xce5   :  { %v8266_v48 = vpop.f32.mrf.mxu1 }
 0xce6   :  { %7359 = vrot.lane.b32.xlu0 %v7174_v23, %s9621_s30  ;;  %7335 = vrot.lane.b32.xlu2 %v7162_v28, %s9621_s30  ;;  %v6579_v3 = vpop.permute.xlu1 %6578  ;;  %v7926_v21 = vld [vmem:[#allocation5 + $0x138] sm:$0xff] }
 0xce7   :  { %9545 = vmatmul.msk.f32.gmra.mxu2 %vm3957_vm12, %v8266_v48  ;;  %6719 = vst.msk [vmem:[#allocation5 + $0x1a0] sm:$0xff] %vm6666_vm5, %v6579_v3  ;;  %9488 = vmatmul.msk.f32.gmra.mxu1 %vm7960_vm9, %v7926_v21  ;;  %v7563_v28 = vld [vmem:[#allocation4 + $0x33a] sm:$0xff] }
 0xce8   :  { %v6557_v36 = vpop.permute.xlu2 %6556  ;;  %v6965_v1 = vpop.permute.xlu0 %6964 }
 0xce9   :  { %6708 = vst.msk [vmem:[#allocation5 + $0x148] sm:$0xff] %vm6666_vm5, %v6557_v36 }
 0xcea   :  { %7105 = vst.msk [vmem:[#allocation5 + $0x1a0] sm:$0xff] %vm7052_vm6, %v6965_v1 }
 0xceb   :  { %7490 = vst.msk [vmem:[#allocation5 + $0x1a0] sm:$0xff] %vm7437_vm7, %v7350_v30  ;;  %v6793_v30 = vld [vmem:[#allocation4 + $0x338] sm:$0xff] }
 0xcec   :  { %7720 = vrot.lane.b32.xlu1 %v7547_v43, %s9620_s3  ;;  %v6794_v43 = vld [vmem:[#allocation4 + $0x348] sm:$0xff] }
 0xcee   :  { %6566 = vrot.lane.b32.xlu0 %v7546_v9, %s9619_s2  ;;  %7744 = vrot.lane.b32.xlu2 %v7559_v31, %s9620_s3  ;;  %v7326_v53 = vpop.permute.xlu1 %7325 }
 0xcef   :  { %v8269_v27 = vpop.f32.mrf.mxu1  ;;  %7478 = vst.msk [vmem:[#allocation5 + $0x140] sm:$0xff] %vm7437_vm7, %v7326_v53 }
 0xcf0   :  { %v6967_v16 = vpop.permute.xlu2 %6966  ;;  %v7711_v40 = vpop.permute.xlu0 %7710  ;;  %9546 = vmatmul.msk.f32.gmra.mxu2 %vm3957_vm12, %v8269_v27  ;;  %v7564_v27 = vld [vmem:[#allocation4 + $0x34a] sm:$0xff] }
 0xcf1   :  { %7863 = vst.msk [vmem:[#allocation5 + $0x140] sm:$0xff] %vm7822_vm8, %v7711_v40 }
 0xcf4   :  { %6590 = vrot.lane.b32.xlu1 %v13972_v18, %s9619_s2  ;;  %v7561_v18 = vld [vmem:[#allocation4 + $0x322] sm:$0xff] }
 0xcf6   :  { %6976 = vrot.lane.b32.xlu0 %v6790_v51, %s9622_s16  ;;  %6952 = vrot.lane.b32.xlu2 %v6778_v57, %s9622_s16  ;;  %v7735_v56 = vpop.permute.xlu1 %7734 }
 0xcf7   :  { %7875 = vst.msk [vmem:[#allocation5 + $0x1a0] sm:$0xff] %vm7822_vm8, %v7735_v56 }
 0xcf8   :  { %v7713_v10 = vpop.permute.xlu2 %7712  ;;  %v6581_v38 = vpop.permute.xlu0 %6580  ;;  %v7927_v49 = vld [vmem:[#allocation5 + $0x140] sm:$0xff] }
 0xcf9   :  { %6720 = vst.msk [vmem:[#allocation5 + $0x1a8] sm:$0xff] %vm6666_vm5, %v6581_v38  ;;  %9489 = vmatmul.msk.f32.gmra.mxu1 %vm7960_vm9, %v7927_v49  ;;  %v7565_v38 = vld [vmem:[#allocation4 + $0x352] sm:$0xff] }
 0xcfa   :  { %7106 = vst.msk [vmem:[#allocation5 + $0x1a8] sm:$0xff] %vm7052_vm6, %v6967_v16  ;;  %v14071_v16 = vpop.f32.mrf.mxu2 }
 0xcfc   :  { %7337 = vrot.lane.b32.xlu1 %v7163_v41, %s9621_s30  ;;  %v8272_v50 = vpop.f32.mrf.mxu1  ;;  %v7180_v41 = vld [vmem:[#allocation4 + $0x351] sm:$0xff] }
 0xcfd   :  { %9547 = vmatmul.msk.f32.gmra.mxu2 %vm3957_vm12, %v8272_v50 }
 0xcfe   :  { %7722 = vrot.lane.b32.xlu0 %v7548_v39, %s9620_s3  ;;  %7361 = vrot.lane.b32.xlu2 %v7175_v25, %s9621_s30  ;;  %v6943_v37 = vpop.permute.xlu1 %6942  ;;  %v7939_v32 = vld [vmem:[#allocation5 + $0x1a0] sm:$0xff]  ;;  %v6795_v25 = vld [vmem:[#allocation4 + $0x350] sm:$0xff] }
 0xcff   :  { %7094 = vst.msk [vmem:[#allocation5 + $0x148] sm:$0xff] %vm7052_vm6, %v6943_v37  ;;  %9501 = vmatmul.msk.f32.gmra.mxu3 %vm7960_vm9, %v7939_v32 }
 0xd00   :  { %v6583_v14 = vpop.permute.xlu2 %6582  ;;  %v7328_v54 = vpop.permute.xlu0 %7327 }
 0xd01   :  { %6721 = vst.msk [vmem:[#allocation5 + $0x1b0] sm:$0xff] %vm6666_vm5, %v6583_v14 }
 0xd02   :  { %7479 = vst.msk [vmem:[#allocation5 + $0x148] sm:$0xff] %vm7437_vm7, %v7328_v54  ;;  %v14088_v14 = vpop.f32.mrf.mxu2 }
 0xd03   :  { %7864 = vst.msk [vmem:[#allocation5 + $0x148] sm:$0xff] %vm7822_vm8, %v7713_v10 }
 0xd04   :  { %7746 = vrot.lane.b32.xlu1 %v7560_v5, %s9620_s3 }
 0xd06   :  { %6978 = vrot.lane.b32.xlu0 %v6791_v6, %s9622_s16  ;;  %6592 = vrot.lane.b32.xlu2 %v7559_v31, %s9619_s2  ;;  %v7352_v47 = vpop.permute.xlu1 %7351 }
 0xd07   :  { %7491 = vst.msk [vmem:[#allocation5 + $0x1a8] sm:$0xff] %vm7437_vm7, %v7352_v47 }
 0xd08   :  { %v7330_v44 = vpop.permute.xlu2 %7329  ;;  %v7737_v46 = vpop.permute.xlu0 %7736 }
 0xd09   :  { %v8275_v0 = vpop.f32.mrf.mxu1  ;;  %7876 = vst.msk [vmem:[#allocation5 + $0x1a8] sm:$0xff] %vm7822_vm8, %v7737_v46 }
 0xd0a   :  { %9548 = vmatmul.msk.f32.gmra.mxu2 %vm3957_vm12, %v8275_v0  ;;  %v7928_v34 = vld [vmem:[#allocation5 + $0x148] sm:$0xff] }
 0xd0b   :  { %9490 = vmatmul.msk.f32.gmra.mxu1 %vm7960_vm9, %v7928_v34 }
 0xd0c   :  { %7363 = vrot.lane.b32.xlu1 %v7176_v26, %s9621_s30 }
 0xd0e   :  { %6594 = vrot.lane.b32.xlu0 %v7560_v5, %s9619_s2  ;;  %7748 = vrot.lane.b32.xlu2 %v7561_v18, %s9620_s3  ;;  %v6559_v22 = vpop.permute.xlu1 %6558 }
 0xd0f   :  { %6709 = vst.msk [vmem:[#allocation5 + $0x150] sm:$0xff] %vm6666_vm5, %v6559_v22 }
 0xd10   :  { %v7739_v29 = vpop.permute.xlu2 %7738  ;;  %v6945_v2 = vpop.permute.xlu0 %6944  ;;  %v7940_v24 = vld [vmem:[#allocation5 + $0x1a8] sm:$0xff] }
 0xd11   :  { %7095 = vst.msk [vmem:[#allocation5 + $0x150] sm:$0xff] %vm7052_vm6, %v6945_v2  ;;  %9502 = vmatmul.msk.f32.gmra.mxu3 %vm7960_vm9, %v7940_v24 }
 0xd12   :  { %7480 = vst.msk [vmem:[#allocation5 + $0x150] sm:$0xff] %vm7437_vm7, %v7330_v44 }
 0xd14   :  { %6980 = vrot.lane.b32.xlu1 %v6792_v19, %s9622_s16 }
 0xd16   :  { %7750 = vrot.lane.b32.xlu0 %v7562_v55, %s9620_s3  ;;  %7365 = vrot.lane.b32.xlu2 %v7177_v7, %s9621_s30  ;;  %v6969_v33 = vpop.permute.xlu1 %6968 }
 0xd17   :  { %7107 = vst.msk [vmem:[#allocation5 + $0x1b0] sm:$0xff] %vm7052_vm6, %v6969_v33 }
 0xd18   :  { %v6947_v42 = vpop.permute.xlu2 %6946  ;;  %v7354_v9 = vpop.permute.xlu0 %7353 }
 0xd19   :  { %7492 = vst.msk [vmem:[#allocation5 + $0x1b0] sm:$0xff] %vm7437_vm7, %v7354_v9 }
 0xd1a   :  { %7877 = vst.msk [vmem:[#allocation5 + $0x1b0] sm:$0xff] %vm7822_vm8, %v7739_v29  ;;  %v14100_v29 = vpop.f32.mrf.mxu2 }
 0xd1c   :  { %6211 = vrot.lane.b32.xlu1 %v7176_v26, %s9618_s22 }
 0xd1e   :  { %6982 = vrot.lane.b32.xlu0 %v6793_v30, %s9622_s16  ;;  %6596 = vrot.lane.b32.xlu2 %v7561_v18, %s9619_s2  ;;  %v7715_v36 = vpop.permute.xlu1 %7714 }
 0xd1f   :  { %7865 = vst.msk [vmem:[#allocation5 + $0x150] sm:$0xff] %vm7822_vm8, %v7715_v36 }
 0xd20   :  { %v7356_v17 = vpop.permute.xlu2 %7355  ;;  %v6561_v23 = vpop.permute.xlu0 %6560 }
 0xd21   :  { %6710 = vst.msk [vmem:[#allocation5 + $0x158] sm:$0xff] %vm6666_vm5, %v6561_v23  ;;  %v7941_v1 = vld [vmem:[#allocation5 + $0x1b0] sm:$0xff] }
 0xd22   :  { %7096 = vst.msk [vmem:[#allocation5 + $0x158] sm:$0xff] %vm7052_vm6, %v6947_v42  ;;  %9503 = vmatmul.msk.f32.gmra.mxu3 %vm7960_vm9, %v7941_v1 }
 0xd24   :  { %7367 = vrot.lane.b32.xlu1 %v7178_v59, %s9621_s30  ;;  %v8278_v48 = vpop.f32.mrf.mxu1 }
 0xd25   :  { %9549 = vmatmul.msk.f32.gmra.mxu2 %vm3957_vm12, %v8278_v48 }
 0xd26   :  { %6213 = vrot.lane.b32.xlu0 %v7177_v7, %s9618_s22  ;;  %7752 = vrot.lane.b32.xlu2 %v7563_v28, %s9620_s3  ;;  %v6585_v21 = vpop.permute.xlu1 %6584  ;;  %v7929_v40 = vld [vmem:[#allocation5 + $0x150] sm:$0xff] }
 0xd27   :  { %6722 = vst.msk [vmem:[#allocation5 + $0x1b8] sm:$0xff] %vm6666_vm5, %v6585_v21  ;;  %9491 = vmatmul.msk.f32.gmra.mxu1 %vm7960_vm9, %v7929_v40 }
 0xd28   :  { %v6563_v63 = vpop.permute.xlu2 %6562  ;;  %v6971_v52 = vpop.permute.xlu0 %6970 }
 0xd29   :  { %6711 = vst.msk [vmem:[#allocation5 + $0x160] sm:$0xff] %vm6666_vm5, %v6563_v63 }
 0xd2a   :  { %7108 = vst.msk [vmem:[#allocation5 + $0x1b8] sm:$0xff] %vm7052_vm6, %v6971_v52 }
 0xd2b   :  { %7493 = vst.msk [vmem:[#allocation5 + $0x1b8] sm:$0xff] %vm7437_vm7, %v7356_v17  ;;  %v14118_v17 = vpop.f32.mrf.mxu2 }
 0xd2c   :  { %6598 = vrot.lane.b32.xlu1 %v7562_v55, %s9619_s2 }
 0xd2e   :  { %7369 = vrot.lane.b32.xlu0 %v7179_v12, %s9621_s30  ;;  %6984 = vrot.lane.b32.xlu2 %v6794_v43, %s9622_s16  ;;  %v7332_v10 = vpop.permute.xlu1 %7331 }
 0xd2f   :  { %7481 = vst.msk [vmem:[#allocation5 + $0x158] sm:$0xff] %vm7437_vm7, %v7332_v10 }
 0xd30   :  { %v6973_v3 = vpop.permute.xlu2 %6972  ;;  %v7717_v31 = vpop.permute.xlu0 %7716 }
 0xd31   :  { %7866 = vst.msk [vmem:[#allocation5 + $0x158] sm:$0xff] %vm7822_vm8, %v7717_v31 }
 0xd34   :  { %7754 = vrot.lane.b32.xlu1 %v7564_v27, %s9620_s3 }
 0xd36   :  { %6600 = vrot.lane.b32.xlu0 %v7563_v28, %s9619_s2  ;;  %6215 = vrot.lane.b32.xlu2 %v7178_v59, %s9618_s22  ;;  %v8281_v57 = vpop.f32.mrf.mxu1  ;;  %v7741_v56 = vpop.permute.xlu1 %7740 }
 0xd37   :  { %9550 = vmatmul.msk.f32.gmra.mxu2 %vm3957_vm12, %v8281_v57  ;;  %7878 = vst.msk [vmem:[#allocation5 + $0x1b8] sm:$0xff] %vm7822_vm8, %v7741_v56  ;;  %v14127_v28 = vpop.f32.mrf.mxu2 }
 0xd38   :  { %v7719_v51 = vpop.permute.xlu2 %7718  ;;  %v6587_v53 = vpop.permute.xlu0 %6586  ;;  %v7930_v49 = vld [vmem:[#allocation5 + $0x158] sm:$0xff] }
 0xd39   :  { %6723 = vst.msk [vmem:[#allocation5 + $0x1c0] sm:$0xff] %vm6666_vm5, %v6587_v53  ;;  %9492 = vmatmul.msk.f32.gmra.mxu1 %vm7960_vm9, %v7930_v49 }
 0xd3a   :  { %7109 = vst.msk [vmem:[#allocation5 + $0x1c0] sm:$0xff] %vm7052_vm6, %v6973_v3 }
 0xd3c   :  { %6986 = vrot.lane.b32.xlu1 %v6795_v25, %s9622_s16 }
 0xd3e   :  { %7756 = vrot.lane.b32.xlu0 %v7565_v38, %s9620_s3  ;;  %7371 = vrot.lane.b32.xlu2 %v7180_v41, %s9621_s30  ;;  %v6949_v50 = vpop.permute.xlu1 %6948  ;;  %v7942_v44 = vld [vmem:[#allocation5 + $0x1b8] sm:$0xff] }
 0xd3f   :  { %7097 = vst.msk [vmem:[#allocation5 + $0x160] sm:$0xff] %vm7052_vm6, %v6949_v50  ;;  %9504 = vmatmul.msk.f32.gmra.mxu3 %vm7960_vm9, %v7942_v44  ;;  %v14134_v31 = vpop.f32.mrf.mxu2 }
 0xd40   :  { %v6589_v39 = vpop.permute.xlu2 %6588  ;;  %v7334_v54 = vpop.permute.xlu0 %7333 }
 0xd41   :  { %6724 = vst.msk [vmem:[#allocation5 + $0x1c8] sm:$0xff] %vm6666_vm5, %v6589_v39 }
 0xd42   :  { %7482 = vst.msk [vmem:[#allocation5 + $0x160] sm:$0xff] %vm7437_vm7, %v7334_v54 }
 0xd43   :  { %7867 = vst.msk [vmem:[#allocation5 + $0x160] sm:$0xff] %vm7822_vm8, %v7719_v51 }
 0xd46   :  { %v7358_v46 = vpop.permute.xlu1 %7357 }
 0xd47   :  { %7494 = vst.msk [vmem:[#allocation5 + $0x1c0] sm:$0xff] %vm7437_vm7, %v7358_v46  ;;  %v14139_v27 = vpop.f32.mrf.mxu2 }
 0xd48   :  { %v7336_v6 = vpop.permute.xlu2 %7335  ;;  %v7743_v37 = vpop.permute.xlu0 %7742 }
 0xd49   :  { %v8284_v5 = vpop.f32.mrf.mxu1  ;;  %7879 = vst.msk [vmem:[#allocation5 + $0x1c0] sm:$0xff] %vm7822_vm8, %v7743_v37 }
 0xd4a   :  { %9551 = vmatmul.msk.f32.gmra.mxu2 %vm3957_vm12, %v8284_v5  ;;  %v7931_v0 = vld [vmem:[#allocation5 + $0x160] sm:$0xff] }
 0xd4b   :  { %9493 = vmatmul.msk.f32.gmra.mxu1 %vm7960_vm9, %v7931_v0 }
 0xd4e   :  { %v6565_v34 = vpop.permute.xlu1 %6564 }
 0xd4f   :  { %6712 = vst.msk [vmem:[#allocation5 + $0x168] sm:$0xff] %vm6666_vm5, %v6565_v34  ;;  %v14146_v54 = vpop.f32.mrf.mxu2 }
 0xd50   :  { %v7745_v32 = vpop.permute.xlu2 %7744  ;;  %v6951_v47 = vpop.permute.xlu0 %6950  ;;  %v7943_v18 = vld [vmem:[#allocation5 + $0x1c0] sm:$0xff] }
 0xd51   :  { %7098 = vst.msk [vmem:[#allocation5 + $0x168] sm:$0xff] %vm7052_vm6, %v6951_v47  ;;  %9505 = vmatmul.msk.f32.gmra.mxu3 %vm7960_vm9, %v7943_v18 }
 0xd52   :  { %7483 = vst.msk [vmem:[#allocation5 + $0x168] sm:$0xff] %vm7437_vm7, %v7336_v6 }
 0xd56   :  { %v6975_v42 = vpop.permute.xlu1 %6974 }
 0xd57   :  { %7110 = vst.msk [vmem:[#allocation5 + $0x1c8] sm:$0xff] %vm7052_vm6, %v6975_v42  ;;  %v14154_v37 = vpop.f32.mrf.mxu2 }
 0xd58   :  { %v6953_v2 = vpop.permute.xlu2 %6952  ;;  %v7360_v26 = vpop.permute.xlu0 %7359 }
 0xd59   :  { %7495 = vst.msk [vmem:[#allocation5 + $0x1c8] sm:$0xff] %vm7437_vm7, %v7360_v26  ;;  %v8311_v26 = vpop.f32.mrf.mxu3 }
 0xd5a   :  { %7880 = vst.msk [vmem:[#allocation5 + $0x1c8] sm:$0xff] %vm7822_vm8, %v7745_v32 }
 0xd5e   :  { %v7721_v9 = vpop.permute.xlu1 %7720 }
 0xd5f   :  { %7868 = vst.msk [vmem:[#allocation5 + $0x168] sm:$0xff] %vm7822_vm8, %v7721_v9  ;;  %v14161_v0 = vpop.f32.mrf.mxu2 }
 0xd60   :  { %v7362_v55 = vpop.permute.xlu2 %7361  ;;  %v6567_v22 = vpop.permute.xlu0 %6566 }
 0xd61   :  { %6713 = vst.msk [vmem:[#allocation5 + $0x170] sm:$0xff] %vm6666_vm5, %v6567_v22  ;;  %v7944_v19 = vld [vmem:[#allocation5 + $0x1c8] sm:$0xff] }
 0xd62   :  { %7099 = vst.msk [vmem:[#allocation5 + $0x170] sm:$0xff] %vm7052_vm6, %v6953_v2  ;;  %9506 = vmatmul.msk.f32.gmra.mxu3 %vm7960_vm9, %v7944_v19 }
 0xd64   :  { %v8287_v30 = vpop.f32.mrf.mxu1 }
 0xd65   :  { %9552 = vmatmul.msk.f32.gmra.mxu2 %vm3957_vm12, %v8287_v30 }
 0xd66   :  { %v6591_v23 = vpop.permute.xlu1 %6590  ;;  %v7932_v63 = vld [vmem:[#allocation5 + $0x168] sm:$0xff] }
 0xd67   :  { %6725 = vst.msk [vmem:[#allocation5 + $0x1d0] sm:$0xff] %vm6666_vm5, %v6591_v23  ;;  %9494 = vmatmul.msk.f32.gmra.mxu1 %vm7960_vm9, %v7932_v63  ;;  %v14167_v18 = vpop.f32.mrf.mxu2 }
 0xd68   :  { %v6593_v24 = vpop.permute.xlu2 %6592  ;;  %v6977_v7 = vpop.permute.xlu0 %6976 }
 0xd69   :  { %6726 = vst.msk [vmem:[#allocation5 + $0x1d8] sm:$0xff] %vm6666_vm5, %v6593_v24 }
 0xd6a   :  { %7111 = vst.msk [vmem:[#allocation5 + $0x1d0] sm:$0xff] %vm7052_vm6, %v6977_v7  ;;  %v8314_v7 = vpop.f32.mrf.mxu3 }
 0xd6b   :  { %7496 = vst.msk [vmem:[#allocation5 + $0x1d0] sm:$0xff] %vm7437_vm7, %v7362_v55 }
 0xd6e   :  { %v7338_v1 = vpop.permute.xlu1 %7337 }
 0xd6f   :  { %7484 = vst.msk [vmem:[#allocation5 + $0x170] sm:$0xff] %vm7437_vm7, %v7338_v1  ;;  %v14173_v9 = vpop.f32.mrf.mxu2 }
 0xd70   :  { %v7749_v33 = vpop.permute.xlu2 %7748  ;;  %v7723_v36 = vpop.permute.xlu0 %7722 }
 0xd71   :  { %7869 = vst.msk [vmem:[#allocation5 + $0x170] sm:$0xff] %vm7822_vm8, %v7723_v36 }
 0xd76   :  { %v8290_v59 = vpop.f32.mrf.mxu1  ;;  %v7747_v3 = vpop.permute.xlu1 %7746 }
 0xd77   :  { %9553 = vmatmul.msk.f32.gmra.mxu2 %vm3957_vm12, %v8290_v59  ;;  %7881 = vst.msk [vmem:[#allocation5 + $0x1d0] sm:$0xff] %vm7822_vm8, %v7747_v3  ;;  %v14177_v23 = vpop.f32.mrf.mxu2 }
 0xd78   :  { %v7366_v52 = vpop.permute.xlu2 %7365  ;;  %v6979_v12 = vpop.permute.xlu0 %6978  ;;  %v7933_v21 = vld [vmem:[#allocation5 + $0x170] sm:$0xff] }
 0xd79   :  { %7112 = vst.msk [vmem:[#allocation5 + $0x1d8] sm:$0xff] %vm7052_vm6, %v6979_v12  ;;  %9495 = vmatmul.msk.f32.gmra.mxu1 %vm7960_vm9, %v7933_v21 }
 0xd7e   :  { %v7364_v51 = vpop.permute.xlu1 %7363  ;;  %v7945_v10 = vld [vmem:[#allocation5 + $0x1d0] sm:$0xff] }
 0xd7f   :  { %7497 = vst.msk [vmem:[#allocation5 + $0x1d8] sm:$0xff] %vm7437_vm7, %v7364_v51  ;;  %9507 = vmatmul.msk.f32.gmra.mxu3 %vm7960_vm9, %v7945_v10  ;;  %v14180_v36 = vpop.f32.mrf.mxu2 }
 0xd80   :  { %v6597_v48 = vpop.permute.xlu2 %6596  ;;  %v6595_v40 = vpop.permute.xlu0 %6594  ;;  %7882 = vst.msk [vmem:[#allocation5 + $0x1d8] sm:$0xff] %vm7822_vm8, %v7749_v33 }
 0xd81   :  { %6727 = vst.msk [vmem:[#allocation5 + $0x1e0] sm:$0xff] %vm6666_vm5, %v6595_v40  ;;  %v8317_v33 = vpop.f32.mrf.mxu3 }
 0xd86   :  { %v6981_v57 = vpop.permute.xlu1 %6980 }
 0xd87   :  { %7113 = vst.msk [vmem:[#allocation5 + $0x1e0] sm:$0xff] %vm7052_vm6, %v6981_v57  ;;  %v7946_v56 = vld [vmem:[#allocation5 + $0x1d8] sm:$0xff]  ;;  %v14184_v12 = vpop.f32.mrf.mxu2 }
 0xd88   :  { %v7753_v43 = vpop.permute.xlu2 %7752  ;;  %v7751_v53 = vpop.permute.xlu0 %7750  ;;  %7498 = vst.msk [vmem:[#allocation5 + $0x1e0] sm:$0xff] %vm7437_vm7, %v7366_v52  ;;  %9508 = vmatmul.msk.f32.gmra.mxu3 %vm7960_vm9, %v7946_v56 }
 0xd89   :  { %v8293_v39 = vpop.f32.mrf.mxu1  ;;  %7883 = vst.msk [vmem:[#allocation5 + $0x1e0] sm:$0xff] %vm7822_vm8, %v7751_v53  ;;  %v8320_v63 = vpop.f32.mrf.mxu3 }
 0xd8a   :  { %9554 = vmatmul.msk.f32.gmra.mxu2 %vm3957_vm12, %v8293_v39 }
 0xd8e   :  { %v6212_v41 = vpop.permute.xlu1 %6211 }
 0xd8f   :  { %6343 = vst.msk [vmem:[#allocation5 + $0x1e8] sm:$0xff] %vm6281_vm4, %v6212_v41 }
 0xd90   :  { %v6985_v38 = vpop.permute.xlu2 %6984  ;;  %v6983_v49 = vpop.permute.xlu0 %6982  ;;  %6728 = vst.msk [vmem:[#allocation5 + $0x1e8] sm:$0xff] %vm6666_vm5, %v6597_v48  ;;  %v7947_v50 = vld [vmem:[#allocation5 + $0x1e0] sm:$0xff] }
 0xd91   :  { %7114 = vst.msk [vmem:[#allocation5 + $0x1e8] sm:$0xff] %vm7052_vm6, %v6983_v49  ;;  %9509 = vmatmul.msk.f32.gmra.mxu3 %vm7960_vm9, %v7947_v50  ;;  %v8323_v1 = vpop.f32.mrf.mxu3  ;;  %v14187_v48 = vpop.f32.mrf.mxu2 }
 0xd96   :  { %v7368_v44 = vpop.permute.xlu1 %7367 }
 0xd97   :  { %7499 = vst.msk [vmem:[#allocation5 + $0x1e8] sm:$0xff] %vm7437_vm7, %v7368_v44 }
 0xd98   :  { %v6216_v25 = vpop.permute.xlu2 %6215  ;;  %v6214_v6 = vpop.permute.xlu0 %6213  ;;  %7884 = vst.msk [vmem:[#allocation5 + $0x1e8] sm:$0xff] %vm7822_vm8, %v7753_v43 }
 0xd99   :  { %6345 = vst.msk [vmem:[#allocation5 + $0x1f8] sm:$0xff] %vm6281_vm4, %v6216_v25  ;;  %v8326_v59 = vpop.f32.mrf.mxu3  ;;  %v14190_v21 = vpop.f32.mrf.mxu2 }
 0xd9a   :  { %6344 = vst.msk [vmem:[#allocation5 + $0x1f0] sm:$0xff] %vm6281_vm4, %v6214_v6 }
 0xd9e   :  { %v6599_v46 = vpop.permute.xlu1 %6598 }
 0xd9f   :  { %6729 = vst.msk [vmem:[#allocation5 + $0x1f0] sm:$0xff] %vm6666_vm5, %v6599_v46  ;;  %v7948_v5 = vld [vmem:[#allocation5 + $0x1e8] sm:$0xff] }
 0xda0   :  { %v7370_v32 = vpop.permute.xlu0 %7369  ;;  %7115 = vst.msk [vmem:[#allocation5 + $0x1f0] sm:$0xff] %vm7052_vm6, %v6985_v38  ;;  %9510 = vmatmul.msk.f32.gmra.mxu3 %vm7960_vm9, %v7948_v5  ;;  %v7372_v55 = vpop.permute.xlu2 %7371  ;;  %v14221_v5 = vld [vmem:[%s15286_s6] ss:$0 sm:$0xff] }
 0xda1   :  { %7500 = vst.msk [vmem:[#allocation5 + $0x1f0] sm:$0xff] %vm7437_vm7, %v7370_v32  ;;  %v8329_v3 = vpop.f32.mrf.mxu3  ;;  %v14195_v51 = vpop.f32.mrf.mxu2 }
 0xda4   :  { %v8296_v2 = vpop.f32.mrf.mxu1 }
 0xda5   :  { %9555 = vmatmul.msk.f32.gmra.mxu2 %vm3957_vm12, %v8296_v2  ;;  %v14230_v2 = vadd.f32 %v14221_v5, %v13896_v11 }
 0xda6   :  { %v7755_v34 = vpop.permute.xlu1 %7754 }
 0xda7   :  { %7885 = vst.msk [vmem:[#allocation5 + $0x1f0] sm:$0xff] %vm7822_vm8, %v7755_v34  ;;  %v14234_v34 = vadd.f32 %v14221_v5, %v13923_v8  ;;  %v14252_v8 = vadd.f32 %v14221_v5, %v13951_v35 }
 0xda8   :  { %v6601_v47 = vpop.permute.xlu0 %6600 }
 0xda9   :  { %6730 = vst.msk [vmem:[#allocation5 + $0x1f8] sm:$0xff] %vm6666_vm5, %v6601_v47  ;;  %v8332_v40 = vpop.f32.mrf.mxu3  ;;  %v14198_v38 = vpop.f32.mrf.mxu2  ;;  %v14226_v47 = vadd.f32 %v14221_v5, %v13909_v15  ;;  %v8904_v15 = vmul.f32 %v14230_v2, %v14230_v2 }
 0xdab   :  { %v8771_v11 = vsel %vm3957_vm12, %v14226_v47, 0.0 }
 0xdae   :  { %v6987_v42 = vpop.permute.xlu1 %6986  ;;  %v7949_v22 = vld [vmem:[#allocation5 + $0x1f0] sm:$0xff] }
 0xdaf   :  { %7116 = vst.msk [vmem:[#allocation5 + $0x1f8] sm:$0xff] %vm7052_vm6, %v6987_v42  ;;  %9511 = vmatmul.msk.f32.gmra.mxu3 %vm7960_vm9, %v7949_v22  ;;  %v14242_v42 = vadd.f32 %v14221_v5, %v13934_v20  ;;  %v8906_v22 = vmul.f32 %v14234_v34, %v14234_v34  ;;  %v8773_v20 = vsel %vm3957_vm12, %v14234_v34, 0.0 }
 0xdb0   :  { %v7757_v24 = vpop.permute.xlu0 %7756  ;;  %7501 = vst.msk [vmem:[#allocation5 + $0x1f8] sm:$0xff] %vm7437_vm7, %v7372_v55  ;;  %v8905_v55 = vmul.f32 %v14226_v47, %v14226_v47 }
 0xdb1   :  { %7886 = vst.msk [vmem:[#allocation5 + $0x1f8] sm:$0xff] %vm7822_vm8, %v7757_v24  ;;  %v14202_v56 = vpop.f32.mrf.mxu2  ;;  %v8770_v24 = vsel %vm3957_vm12, %v14230_v2, 0.0  ;;  %v8971_v35 = vsel %vm3957_vm12, %v8906_v22, 0.0 }
 0xdb6   :  { %v8299_v19 = vpop.f32.mrf.mxu1 }
 0xdb7   :  { %9556 = vmatmul.msk.f32.gmra.mxu2 %vm3957_vm12, %v8299_v19  ;;  %v8907_v19 = vmul.f32 %v14242_v42, %v14242_v42 }
 0xdb8   :  { %v7950_v30 = vld [vmem:[#allocation5 + $0x1f8] sm:$0xff] }
 0xdb9   :  { %9512 = vmatmul.msk.f32.gmra.mxu3 %vm7960_vm9, %v7950_v30  ;;  %v14207_v25 = vpop.f32.mrf.mxu2  ;;  %v14263_v30 = vadd.f32 %v14221_v5, %v13963_v58 }
 0xdc1   :  { %9562 = vmatmul.msk.f32.vlgmr.msra.gmra.mxu3 %vm3957_vm12, %v8317_v33  ;;  %v14210_v6 = vpop.f32.mrf.mxu2  ;;  %v8968_v33 = vsel %vm3957_vm12, %v8904_v15, 0.0 }
 0xdc2   :  { %v8335_v10 = vpop.f32.mrf.mxu3 }
 0xdc8   :  { %v8302_v52 = vpop.f32.mrf.mxu1 }
 0xdc9   :  { %9557 = vmatmul.msk.f32.gmra.mxu2 %vm3957_vm12, %v8302_v52  ;;  %9563 = vmatmul.msk.f32.gmra.mxu3 %vm3957_vm12, %v8320_v63  ;;  %v14213_v44 = vpop.f32.mrf.mxu2  ;;  %v8772_v63 = vadd.f32 %v8771_v11, %v8770_v24  ;;  %v8775_v52 = vsel %vm3957_vm12, %v14242_v42, 0.0 }
 0xdcb   :  { %v8774_v58 = vadd.f32 %v8773_v20, %v8772_v63 }
 0xdd1   :  { %9564 = vmatmul.msk.f32.gmra.mxu3 %vm3957_vm12, %v8323_v1  ;;  %v14216_v32 = vpop.f32.mrf.mxu2  ;;  %v8908_v1 = vmul.f32 %v14252_v8, %v14252_v8 }
 0xdd4   :  { %v8338_v53 = vpop.f32.mrf.mxu3 }
 0xdd9   :  { %9565 = vmatmul.msk.f32.gmra.mxu3 %vm3957_vm12, %v8326_v59  ;;  %v14273_v59 = vadd.f32 %v14221_v5, %v13976_v60 }
 0xddb   :  { %v8781_v22 = vsel %vm3957_vm12, %v14273_v59, 0.0 }
 0xde1   :  { %9566 = vmatmul.msk.f32.gmra.mxu3 %vm3957_vm12, %v8329_v3 }
 0xde4   :  { %v8305_v43 = vpop.f32.mrf.mxu1 }
 0xde5   :  { %9558 = vmatmul.msk.f32.gmra.mxu2 %vm3957_vm12, %v8305_v43  ;;  %v8341_v39 = vpop.f32.mrf.mxu3 }
 0xde9   :  { %9567 = vmatmul.msk.f32.gmra.mxu3 %vm3957_vm12, %v8332_v40 }
 0xdf1   :  { %9568 = vmatmul.msk.f32.gmra.mxu3 %vm3957_vm12, %v8335_v10  ;;  %v8973_v10 = vsel %vm3957_vm12, %v8907_v19, 0.0 }
 0xdf6   :  { %v8308_v57 = vpop.f32.mrf.mxu1 }
 0xdf7   :  { %9559 = vmatmul.msk.f32.gmra.mxu2 %vm3957_vm12, %v8308_v57  ;;  %v8909_v57 = vmul.f32 %v14263_v30, %v14263_v30 }
 0xdf9   :  { %9569 = vmatmul.msk.f32.gmra.mxu3 %vm3957_vm12, %v8338_v53  ;;  %v8777_v53 = vsel %vm3957_vm12, %v14252_v8, 0.0 }
 0xdff   :  { %9560 = vmatmul.msk.f32.gmra.mxu2 %vm3957_vm12, %v8311_v26  ;;  %v14236_v26 = vpop.f32.mrf.mxu2 }
 0xe01   :  { %9570 = vmatmul.msk.f32.gmra.mxu3 %vm3957_vm12, %v8341_v39  ;;  %v14284_v39 = vadd.f32 %v14221_v5, %v13989_v45  ;;  %v8977_v45 = vsel %vm3957_vm12, %v8909_v57, 0.0 }
 0xe02   :  { %v8344_v49 = vpop.f32.mrf.mxu3 }
 0xe03   :  { %v8911_v24 = vmul.f32 %v14284_v39, %v14284_v39 }
 0xe07   :  { %9561 = vmatmul.msk.f32.gmra.mxu2 %vm3957_vm12, %v8314_v7  ;;  %v8969_v7 = vsel %vm3957_vm12, %v8905_v55, 0.0  ;;  %v14275_v3 = vpop.f32.mrf.mxu2  ;;  %v14294_v55 = vadd.f32 %v14221_v5, %v14003_v62  ;;  %v8783_v62 = vsel %vm3957_vm12, %v14284_v39, 0.0 }
 0xe08   :  { %v8970_v40 = vadd.f32 %v8969_v7, %v8968_v33  ;;  %v14303_v7 = vadd.f32 %v14221_v5, %v14014_v13  ;;  %v8981_v13 = vsel %vm3957_vm12, %v8911_v24, 0.0 }
 0xe09   :  { %9571 = vmatmul.msk.f32.gmra.mxu3 %vm3957_vm12, %v8344_v49  ;;  %v8776_v49 = vadd.f32 %v8775_v52, %v8774_v58  ;;  %v8912_v63 = vmul.f32 %v14294_v55, %v14294_v55  ;;  %v8785_v58 = vsel %vm3957_vm12, %v14294_v55, 0.0 }
 0xe0a   :  { %v8972_v60 = vadd.f32 %v8971_v35, %v8970_v40  ;;  %v14312_v35 = vadd.f32 %v14221_v5, %v14031_v4 }
 0xe0b   :  { %v8347_v41 = vpop.f32.mrf.mxu3  ;;  %v8778_v11 = vadd.f32 %v8777_v53, %v8776_v49  ;;  %v8787_v49 = vsel %vm3957_vm12, %v14303_v7, 0.0 }
 0xe0c   :  { %v8974_v15 = vadd.f32 %v8973_v10, %v8972_v60  ;;  %v14323_v10 = vadd.f32 %v14221_v5, %v14041_v61  ;;  %v8983_v60 = vsel %vm3957_vm12, %v8912_v63, 0.0 }
 0xe0f   :  { %v14314_v52 = vpop.f32.mrf.mxu2 }
 0xe11   :  { %9572 = vmatmul.msk.f32.gmra.mxu3 %vm3957_vm12, %v8347_v41  ;;  %v8975_v41 = vsel %vm3957_vm12, %v8908_v1, 0.0 }
 0xe12   :  { %v8976_v20 = vadd.f32 %v8975_v41, %v8974_v15  ;;  %v8914_v41 = vmul.f32 %v14312_v35, %v14312_v35 }
 0xe14   :  { %v8350_v50 = vpop.f32.mrf.mxu3  ;;  %v8978_v1 = vadd.f32 %v8977_v45, %v8976_v20  ;;  %v8915_v45 = vmul.f32 %v14323_v10, %v14323_v10 }
 0xe17   :  { %v14353_v63 = vpop.f32.mrf.mxu2 }
 0xe19   :  { %9573 = vmatmul.msk.f32.gmra.mxu3 %vm3957_vm12, %v8350_v50  ;;  %v8779_v50 = vsel %vm3957_vm12, %v14263_v30, 0.0 }
 0xe1a   :  { %v8780_v19 = vadd.f32 %v8779_v50, %v8778_v11  ;;  %v14332_v50 = vadd.f32 %v14221_v5, %v14071_v16  ;;  %v8789_v11 = vsel %vm3957_vm12, %v14312_v35, 0.0  ;;  %v8987_v16 = vsel %vm3957_vm12, %v8914_v41, 0.0 }
 0xe1b   :  { %v14373_v41 = vadd.f32 %v14221_v5, %v14127_v28 }
 0xe1c   :  { %v8782_v40 = vadd.f32 %v8781_v22, %v8780_v19  ;;  %v14342_v22 = vadd.f32 %v14221_v5, %v14088_v14  ;;  %v8791_v19 = vsel %vm3957_vm12, %v14323_v10, 0.0  ;;  %v8989_v14 = vsel %vm3957_vm12, %v8915_v45, 0.0 }
 0xe1d   :  { %v14382_v45 = vadd.f32 %v14221_v5, %v14134_v31 }
 0xe1e   :  { %v8784_v57 = vadd.f32 %v8783_v62, %v8782_v40  ;;  %v14351_v62 = vadd.f32 %v14221_v5, %v14100_v29 }
 0xe20   :  { %v8786_v61 = vadd.f32 %v8785_v58, %v8784_v57  ;;  %v8917_v58 = vmul.f32 %v14342_v22, %v14342_v22 }
 0xe22   :  { %v8788_v20 = vadd.f32 %v8787_v49, %v8786_v61  ;;  %v8918_v49 = vmul.f32 %v14351_v62, %v14351_v62 }
 0xe23   :  { %v8353_v46 = vpop.f32.mrf.mxu3 }
 0xe24   :  { %9574 = vmatmul.msk.f32.gmra.mxu3 %vm3957_vm12, %v8353_v46  ;;  %v8910_v46 = vmul.f32 %v14273_v59, %v14273_v59  ;;  %v8790_v40 = vadd.f32 %v8789_v11, %v8788_v20 }
 0xe26   :  { %v8979_v33 = vsel %vm3957_vm12, %v8910_v46, 0.0  ;;  %v8792_v57 = vadd.f32 %v8791_v19, %v8790_v40  ;;  %v8920_v19 = vmul.f32 %v14373_v41, %v14373_v41 }
 0xe27   :  { %v8980_v53 = vadd.f32 %v8979_v33, %v8978_v1  ;;  %v8916_v33 = vmul.f32 %v14332_v50, %v14332_v50 }
 0xe29   :  { %v8982_v46 = vadd.f32 %v8981_v13, %v8980_v53  ;;  %v8793_v13 = vsel %vm3957_vm12, %v14332_v50, 0.0 }
 0xe2a   :  { %v8794_v61 = vadd.f32 %v8793_v13, %v8792_v57  ;;  %v8801_v13 = vsel %vm3957_vm12, %v14373_v41, 0.0 }
 0xe2b   :  { %v8984_v24 = vadd.f32 %v8983_v60, %v8982_v46  ;;  %v8795_v60 = vsel %vm3957_vm12, %v14342_v22, 0.0 }
 0xe2c   :  { %v8796_v20 = vadd.f32 %v8795_v60, %v8794_v61  ;;  %v8999_v60 = vsel %vm3957_vm12, %v8920_v19, 0.0  ;;  %v14413_v61 = vadd.f32 %v14221_v5, %v14154_v37 }
 0xe32   :  { %v8356_v43 = vpop.f32.mrf.mxu3 }
 0xe33   :  { %9575 = vmatmul.msk.f32.gmra.mxu3 %vm3957_vm12, %v8356_v43  ;;  %v8913_v43 = vmul.f32 %v14303_v7, %v14303_v7 }
 0xe35   :  { %v8985_v15 = vsel %vm3957_vm12, %v8913_v43, 0.0  ;;  %v14362_v43 = vadd.f32 %v14221_v5, %v14118_v17  ;;  %v8993_v17 = vsel %vm3957_vm12, %v8917_v58, 0.0  ;;  %v8921_v58 = vmul.f32 %v14382_v45, %v14382_v45 }
 0xe36   :  { %v8986_v1 = vadd.f32 %v8985_v15, %v8984_v24  ;;  %v8797_v15 = vsel %vm3957_vm12, %v14351_v62, 0.0 }
 0xe37   :  { %v8919_v11 = vmul.f32 %v14362_v43, %v14362_v43  ;;  %v8799_v28 = vsel %vm3957_vm12, %v14362_v43, 0.0 }
 0xe38   :  { %v8988_v53 = vadd.f32 %v8987_v16, %v8986_v1  ;;  %v8995_v16 = vsel %vm3957_vm12, %v8918_v49, 0.0  ;;  %v14393_v1 = vpop.f32.mrf.mxu2  ;;  %v8803_v49 = vsel %vm3957_vm12, %v14382_v45, 0.0 }
 0xe39   :  { %v8997_v31 = vsel %vm3957_vm12, %v8919_v11, 0.0 }
 0xe3a   :  { %v8990_v46 = vadd.f32 %v8989_v14, %v8988_v53  ;;  %v8798_v14 = vadd.f32 %v8797_v15, %v8796_v20  ;;  %v14402_v53 = vadd.f32 %v14221_v5, %v14146_v54  ;;  %v9001_v54 = vsel %vm3957_vm12, %v8921_v58, 0.0 }
 0xe3b   :  { %v14422_v20 = vadd.f32 %v14221_v5, %v14161_v0 }
 0xe3c   :  { %v8359_v4 = vpop.f32.mrf.mxu3  ;;  %v8807_v37 = vsel %vm3957_vm12, %v14402_v53, 0.0 }
 0xe3d   :  { %9576 = vmatmul.msk.f32.gmra.mxu3 %vm3957_vm12, %v8359_v4  ;;  %v8991_v4 = vsel %vm3957_vm12, %v8916_v33, 0.0  ;;  %v14391_v33 = vadd.f32 %v14221_v5, %v14139_v27 }
 0xe3e   :  { %v8992_v24 = vadd.f32 %v8991_v4, %v8990_v46  ;;  %v8800_v4 = vadd.f32 %v8799_v28, %v8798_v14  ;;  %v14431_v14 = vadd.f32 %v14221_v5, %v14167_v18 }
 0xe3f   :  { %v8922_v46 = vmul.f32 %v14391_v33, %v14391_v33  ;;  %v8805_v11 = vsel %vm3957_vm12, %v14391_v33, 0.0 }
 0xe40   :  { %v8994_v40 = vadd.f32 %v8993_v17, %v8992_v24  ;;  %v8802_v15 = vadd.f32 %v8801_v13, %v8800_v4  ;;  %v8923_v24 = vmul.f32 %v14402_v53, %v14402_v53  ;;  %v8925_v4 = vmul.f32 %v14422_v20, %v14422_v20 }
 0xe41   :  { %v9003_v19 = vsel %vm3957_vm12, %v8922_v46, 0.0 }
 0xe42   :  { %v8996_v57 = vadd.f32 %v8995_v16, %v8994_v40  ;;  %v8804_v28 = vadd.f32 %v8803_v49, %v8802_v15  ;;  %v8924_v40 = vmul.f32 %v14413_v61, %v14413_v61  ;;  %v9005_v0 = vsel %vm3957_vm12, %v8923_v24, 0.0 }
 0xe43   :  { %v8811_v15 = vsel %vm3957_vm12, %v14422_v20, 0.0 }
 0xe44   :  { %v14364_v29 = vpop.f32.mrf.mxu3  ;;  %v8998_v17 = vadd.f32 %v8997_v31, %v8996_v57  ;;  %v14433_v31 = vpop.f32.mrf.mxu2  ;;  %v8806_v58 = vadd.f32 %v8805_v11, %v8804_v28  ;;  %v8809_v57 = vsel %vm3957_vm12, %v14413_v61, 0.0  ;;  %v14453_v11 = vadd.f32 %v14221_v5, %v14177_v23 }
 0xe45   :  { %v8813_v28 = vsel %vm3957_vm12, %v14431_v14, 0.0 }
 0xe46   :  { %v9000_v16 = vadd.f32 %v8999_v60, %v8998_v17  ;;  %v14442_v60 = vadd.f32 %v14221_v5, %v14173_v9  ;;  %v8808_v46 = vadd.f32 %v8807_v37, %v8806_v58  ;;  %v9007_v17 = vsel %vm3957_vm12, %v8924_v40, 0.0 }
 0xe47   :  { %v9009_v9 = vsel %vm3957_vm12, %v8925_v4, 0.0  ;;  %v14462_v37 = vadd.f32 %v14221_v5, %v14180_v36 }
 0xe48   :  { %v9002_v13 = vadd.f32 %v9001_v54, %v9000_v16  ;;  %15416 = vst [vmem:[#allocation11_spill] sm:$0xff] %v14442_v60  ;;  %v8926_v54 = vmul.f32 %v14431_v14, %v14431_v14  ;;  %v8810_v16 = vadd.f32 %v8809_v57, %v8808_v46  ;;  %v8815_v23 = vsel %vm3957_vm12, %v14442_v60, 0.0 }
 0xe49   :  { %15417 = vst [vmem:[#allocation12_spill] sm:$0xff] %v14462_v37  ;;  %v14471_v57 = vadd.f32 %v14221_v5, %v14184_v12 }
 0xe4a   :  { %v9004_v49 = vadd.f32 %v9003_v19, %v9002_v13  ;;  %v8927_v19 = vmul.f32 %v14442_v60, %v14442_v60  ;;  %v8812_v13 = vadd.f32 %v8811_v15, %v8810_v16  ;;  %v9011_v58 = vsel %vm3957_vm12, %v8926_v54, 0.0 }
 0xe4b   :  { %v8929_v15 = vmul.f32 %v14462_v37, %v14462_v37  ;;  %v14482_v54 = vadd.f32 %v14221_v5, %v14187_v48 }
 0xe4c   :  { %v14404_v27 = vpop.f32.mrf.mxu3  ;;  %v9006_v24 = vadd.f32 %v9005_v0, %v9004_v49  ;;  %v8928_v0 = vmul.f32 %v14453_v11, %v14453_v11  ;;  %v14473_v4 = vpop.f32.mrf.mxu2  ;;  %v8814_v46 = vadd.f32 %v8813_v28, %v8812_v13  ;;  %v9013_v36 = vsel %vm3957_vm12, %v8927_v19, 0.0 }
 0xe4d   :  { %15418 = vst [vmem:[#allocation13_spill] sm:$0xff] %v14482_v54  ;;  %v8930_v28 = vmul.f32 %v14471_v57, %v14471_v57  ;;  %v14493_v19 = vadd.f32 %v14221_v5, %v14190_v21  ;;  %v9017_v48 = vsel %vm3957_vm12, %v8929_v15, 0.0  ;;  %v8823_v21 = vsel %vm3957_vm12, %v14482_v54, 0.0 }
 0xe4e   :  { %v9008_v40 = vadd.f32 %v9007_v17, %v9006_v24  ;;  %v8817_v17 = vsel %vm3957_vm12, %v14453_v11, 0.0  ;;  %v8816_v16 = vadd.f32 %v8815_v23, %v8814_v46  ;;  %v9015_v60 = vsel %vm3957_vm12, %v8928_v0, 0.0 }
 0xe4f   :  { %v8931_v23 = vmul.f32 %v14482_v54, %v14482_v54  ;;  %v14502_v0 = vadd.f32 %v14221_v5, %v14195_v51 }
 0xe50   :  { %v9010_v49 = vadd.f32 %v9009_v9, %v9008_v40  ;;  %v8819_v9 = vsel %vm3957_vm12, %v14462_v37, 0.0  ;;  %v8818_v13 = vadd.f32 %v8817_v17, %v8816_v16  ;;  %v9019_v37 = vsel %vm3957_vm12, %v8930_v28, 0.0 }
 0xe51   :  { %15419 = vst [vmem:[#allocation14_spill] sm:$0xff] %v14502_v0  ;;  %v14511_v17 = vadd.f32 %v14221_v5, %v14198_v38  ;;  %v9021_v51 = vsel %vm3957_vm12, %v8931_v23, 0.0  ;;  %v14522_v28 = vadd.f32 %v14221_v5, %v14202_v56  ;;  %v14533_v23 = vadd.f32 %v14221_v5, %v14207_v25 }
 0xe52   :  { %v9012_v24 = vadd.f32 %v9011_v58, %v9010_v49  ;;  %v8821_v58 = vsel %vm3957_vm12, %v14471_v57, 0.0  ;;  %v8820_v46 = vadd.f32 %v8819_v9, %v8818_v13  ;;  %v8933_v9 = vmul.f32 %v14502_v0, %v14502_v0 }
 0xe53   :  { %15420 = vst [vmem:[#allocation15_spill] sm:$0xff] %v14522_v28  ;;  %v8831_v25 = vsel %vm3957_vm12, %v14522_v28, 0.0 }
 0xe54   :  { %v14444_v18 = vpop.f32.mrf.mxu3  ;;  %v9014_v40 = vadd.f32 %v9013_v36, %v9012_v24  ;;  %v8932_v36 = vmul.f32 %v14493_v19, %v14493_v19  ;;  %v14513_v15 = vpop.f32.mrf.mxu2  ;;  %v8822_v16 = vadd.f32 %v8821_v58, %v8820_v46  ;;  %v8934_v58 = vmul.f32 %v14511_v17, %v14511_v17 }
 0xe55   :  { %v9025_v56 = vsel %vm3957_vm12, %v8933_v9, 0.0 }
 0xe56   :  { %v9016_v49 = vadd.f32 %v9015_v60, %v9014_v40  ;;  %v8825_v60 = vsel %vm3957_vm12, %v14493_v19, 0.0  ;;  %v8824_v13 = vadd.f32 %v8823_v21, %v8822_v16  ;;  %v9023_v54 = vsel %vm3957_vm12, %v8932_v36, 0.0 }
 0xe57   :  { %v8935_v21 = vmul.f32 %v14522_v28, %v14522_v28  ;;  %v14542_v36 = vadd.f32 %v14221_v5, %v14210_v6 }
 0xe58   :  { %v9018_v24 = vadd.f32 %v9017_v48, %v9016_v49  ;;  %v8827_v48 = vsel %vm3957_vm12, %v14502_v0, 0.0  ;;  %v8826_v46 = vadd.f32 %v8825_v60, %v8824_v13  ;;  %v9027_v0 = vsel %vm3957_vm12, %v8934_v58, 0.0 }
 0xe59   :  { %15421 = vst [vmem:[#allocation16_spill] sm:$0xff] %v14542_v36  ;;  %v14551_v60 = vadd.f32 %v14221_v5, %v14213_v44  ;;  %v9029_v6 = vsel %vm3957_vm12, %v8935_v21, 0.0  ;;  %v14562_v58 = vadd.f32 %v14221_v5, %v14216_v32  ;;  %v14573_v21 = vadd.f32 %v14221_v5, %v14236_v26 }
 0xe5a   :  { %v9020_v40 = vadd.f32 %v9019_v37, %v9018_v24  ;;  %v8829_v37 = vsel %vm3957_vm12, %v14511_v17, 0.0  ;;  %v8828_v16 = vadd.f32 %v8827_v48, %v8826_v46  ;;  %v8937_v48 = vmul.f32 %v14542_v36, %v14542_v36 }
 0xe5b   :  { %15422 = vst [vmem:[#allocation17_spill] sm:$0xff] %v14562_v58  ;;  %v8839_v26 = vsel %vm3957_vm12, %v14562_v58, 0.0 }
 0xe5c   :  { %v14484_v12 = vpop.f32.mrf.mxu3  ;;  %v9022_v49 = vadd.f32 %v9021_v51, %v9020_v40  ;;  %v8936_v51 = vmul.f32 %v14533_v23, %v14533_v23  ;;  %v14553_v9 = vpop.f32.mrf.mxu2  ;;  %v8830_v13 = vadd.f32 %v8829_v37, %v8828_v16  ;;  %v8938_v37 = vmul.f32 %v14551_v60, %v14551_v60 }
 0xe5d   :  { %v9033_v32 = vsel %vm3957_vm12, %v8937_v48, 0.0 }
 0xe5e   :  { %v9024_v24 = vadd.f32 %v9023_v54, %v9022_v49  ;;  %v8833_v54 = vsel %vm3957_vm12, %v14533_v23, 0.0  ;;  %v8832_v46 = vadd.f32 %v8831_v25, %v8830_v13  ;;  %v9031_v28 = vsel %vm3957_vm12, %v8936_v51, 0.0 }
 0xe5f   :  { %v8939_v25 = vmul.f32 %v14562_v58, %v14562_v58  ;;  %v14582_v51 = vadd.f32 %v14221_v5, %v14275_v3 }
 0xe60   :  { %v9026_v40 = vadd.f32 %v9025_v56, %v9024_v24  ;;  %v8835_v56 = vsel %vm3957_vm12, %v14542_v36, 0.0  ;;  %v8834_v16 = vadd.f32 %v8833_v54, %v8832_v46  ;;  %v9035_v36 = vsel %vm3957_vm12, %v8938_v37, 0.0 }
 0xe61   :  { %15423 = vst [vmem:[#allocation18_spill] sm:$0xff] %v14582_v51  ;;  %v14591_v54 = vadd.f32 %v14221_v5, %v14314_v52  ;;  %v9037_v3 = vsel %vm3957_vm12, %v8939_v25, 0.0  ;;  %v14600_v37 = vadd.f32 %v14221_v5, %v14353_v63  ;;  %v14611_v25 = vadd.f32 %v14221_v5, %v14393_v1 }
 0xe62   :  { %v9028_v49 = vadd.f32 %v9027_v0, %v9026_v40  ;;  %v8837_v0 = vsel %vm3957_vm12, %v14551_v60, 0.0  ;;  %v8836_v13 = vadd.f32 %v8835_v56, %v8834_v16  ;;  %v8941_v56 = vmul.f32 %v14582_v51, %v14582_v51 }
 0xe63   :  { %15424 = vst [vmem:[#allocation19_spill] sm:$0xff] %v14611_v25  ;;  %v8847_v1 = vsel %vm3957_vm12, %v14600_v37, 0.0 }
 0xe64   :  { %v14524_v38 = vpop.f32.mrf.mxu3  ;;  %v9030_v24 = vadd.f32 %v9029_v6, %v9028_v49  ;;  %v8940_v6 = vmul.f32 %v14573_v21, %v14573_v21  ;;  %v8838_v46 = vadd.f32 %v8837_v0, %v8836_v13  ;;  %v8942_v0 = vmul.f32 %v14591_v54, %v14591_v54 }
 0xe65   :  { %v9041_v63 = vsel %vm3957_vm12, %v8941_v56, 0.0 }
 0xe66   :  { %v9032_v40 = vadd.f32 %v9031_v28, %v9030_v24  ;;  %v8841_v28 = vsel %vm3957_vm12, %v14573_v21, 0.0  ;;  %v8840_v16 = vadd.f32 %v8839_v26, %v8838_v46  ;;  %v9039_v52 = vsel %vm3957_vm12, %v8940_v6, 0.0 }
 0xe67   :  { %v8943_v26 = vmul.f32 %v14600_v37, %v14600_v37  ;;  %v14620_v6 = vadd.f32 %v14221_v5, %v14433_v31 }
 0xe68   :  { %v8711_v48 = vpop.f32.mrf.mxu2  ;;  %v9034_v49 = vadd.f32 %v9033_v32, %v9032_v40  ;;  %v8843_v32 = vsel %vm3957_vm12, %v14582_v51, 0.0  ;;  %v8842_v13 = vadd.f32 %v8841_v28, %v8840_v16  ;;  %v9043_v51 = vsel %vm3957_vm12, %v8942_v0, 0.0 }
 0xe69   :  { %15425 = vst [vmem:[#allocation20_spill] sm:$0xff] %v14620_v6  ;;  %v14629_v28 = vadd.f32 %v14221_v5, %v14473_v4  ;;  %v9045_v31 = vsel %vm3957_vm12, %v8943_v26, 0.0  ;;  %v14638_v0 = vadd.f32 %v14221_v5, %v14513_v15  ;;  %v14647_v26 = vadd.f32 %v14221_v5, %v14553_v9 }
 0xe6a   :  { %v9036_v24 = vadd.f32 %v9035_v36, %v9034_v49  ;;  %v8845_v36 = vsel %vm3957_vm12, %v14591_v54, 0.0  ;;  %v8844_v46 = vadd.f32 %v8843_v32, %v8842_v13  ;;  %v8945_v32 = vmul.f32 %v14620_v6, %v14620_v6 }
 0xe6b   :  { %15426 = vst [vmem:[#allocation21_spill] sm:$0xff] %v14629_v28 }
 0xe6c   :  { %v14564_v44 = vpop.f32.mrf.mxu3  ;;  %v9038_v40 = vadd.f32 %v9037_v3, %v9036_v24  ;;  %v8944_v3 = vmul.f32 %v14611_v25, %v14611_v25  ;;  %v8846_v16 = vadd.f32 %v8845_v36, %v8844_v46  ;;  %v8946_v36 = vmul.f32 %v14629_v28, %v14629_v28  ;;  %15427 = vst [vmem:[#allocation22_spill] sm:$0xff] %v14647_v26 }
 0xe6d   :  { %v9049_v15 = vsel %vm3957_vm12, %v8945_v32, 0.0 }
 0xe6e   :  { %v9040_v49 = vadd.f32 %v9039_v52, %v9038_v40  ;;  %v8849_v52 = vsel %vm3957_vm12, %v14611_v25, 0.0  ;;  %v8848_v13 = vadd.f32 %v8847_v1, %v8846_v16  ;;  %v9047_v4 = vsel %vm3957_vm12, %v8944_v3, 0.0 }
 0xe6f   :  { %v8947_v1 = vmul.f32 %v14638_v0, %v14638_v0  ;;  %v14657_v3 = vadd.f32 %v14221_v5, %v8711_v48  ;;  %v9051_v9 = vsel %vm3957_vm12, %v8946_v36, 0.0  ;;  %v8857_v48 = vsel %vm3957_vm12, %v14647_v26, 0.0 }
 0xe70   :  { %v9042_v24 = vadd.f32 %v9041_v63, %v9040_v49  ;;  %v8851_v63 = vsel %vm3957_vm12, %v14620_v6, 0.0  ;;  %v8850_v46 = vadd.f32 %v8849_v52, %v8848_v13  ;;  %v8948_v52 = vmul.f32 %v14647_v26, %v14647_v26 }
 0xe71   :  { %15428 = vst [vmem:[#allocation23_spill] sm:$0xff] %v14657_v3  ;;  %v9053_v6 = vsel %vm3957_vm12, %v8947_v1, 0.0 }
 0xe72   :  { %v9044_v40 = vadd.f32 %v9043_v51, %v9042_v24  ;;  %v8853_v51 = vsel %vm3957_vm12, %v14629_v28, 0.0  ;;  %v8852_v16 = vadd.f32 %v8851_v63, %v8850_v46  ;;  %v9055_v46 = vsel %vm3957_vm12, %v8948_v52, 0.0 }
 0xe74   :  { %v14602_v58 = vpop.f32.mrf.mxu3  ;;  %v9046_v49 = vadd.f32 %v9045_v31, %v9044_v40  ;;  %v8855_v31 = vsel %vm3957_vm12, %v14638_v0, 0.0  ;;  %v8854_v28 = vadd.f32 %v8853_v51, %v8852_v16 }
 0xe76   :  { %v9048_v24 = vadd.f32 %v9047_v4, %v9046_v49  ;;  %v8949_v4 = vmul.f32 %v14657_v3, %v14657_v3  ;;  %v8856_v49 = vadd.f32 %v8855_v31, %v8854_v28 }
 0xe78   :  { %v9050_v13 = vadd.f32 %v9049_v15, %v9048_v24  ;;  %v8858_v1 = vadd.f32 %v8857_v48, %v8856_v49  ;;  %v9057_v24 = vsel %vm3957_vm12, %v8949_v4, 0.0  ;;  %v14693_v4 = vadd.f32 %v14221_v5, %v14364_v29 }
 0xe79   :  { %v14705_v29 = vadd.f32 %v14221_v5, %v14404_v27 }
 0xe7a   :  { %v8714_v56 = vpop.f32.mrf.mxu2  ;;  %v9052_v36 = vadd.f32 %v9051_v9, %v9050_v13 }
 0xe7b   :  { %v14665_v32 = vadd.f32 %v14221_v5, %v8714_v56  ;;  %v8859_v56 = vsel %vm3957_vm12, %v14657_v3, 0.0  ;;  %v8869_v27 = vsel %vm3957_vm12, %v14705_v29, 0.0 }
 0xe7c   :  { %v14649_v25 = vpop.f32.mrf.mxu3  ;;  %v9054_v51 = vadd.f32 %v9053_v6, %v9052_v36  ;;  %v8860_v28 = vadd.f32 %v8859_v56, %v8858_v1 }
 0xe7d   :  { %v8950_v15 = vmul.f32 %v14665_v32, %v14665_v32  ;;  %v8861_v16 = vsel %vm3957_vm12, %v14665_v32, 0.0 }
 0xe7e   :  { %v9056_v9 = vadd.f32 %v9055_v46, %v9054_v51  ;;  %v8862_v6 = vadd.f32 %v8861_v16, %v8860_v28 }
 0xe7f   :  { %v9059_v52 = vsel %vm3957_vm12, %v8950_v15, 0.0 }
 0xe80   :  { %v9058_v26 = vadd.f32 %v9057_v24, %v9056_v9 }
 0xe82   :  { %v8717_v40 = vpop.f32.mrf.mxu2  ;;  %v9060_v49 = vadd.f32 %v9059_v52, %v9058_v26  ;;  %v8867_v26 = vsel %vm3957_vm12, %v14693_v4, 0.0  ;;  %v8954_v52 = vmul.f32 %v14705_v29, %v14705_v29 }
 0xe83   :  { %v14673_v63 = vadd.f32 %v14221_v5, %v8717_v40 }
 0xe84   :  { %v8747_v31 = vpop.f32.mrf.mxu3 }
 0xe85   :  { %v8951_v40 = vmul.f32 %v14673_v63, %v14673_v63  ;;  %v8863_v13 = vsel %vm3957_vm12, %v14673_v63, 0.0 }
 0xe86   :  { %v8864_v46 = vadd.f32 %v8863_v13, %v8862_v6  ;;  %v14714_v13 = vadd.f32 %v14221_v5, %v14444_v18 }
 0xe87   :  { %v9061_v36 = vsel %vm3957_vm12, %v8951_v40, 0.0 }
 0xe88   :  { %v9062_v51 = vadd.f32 %v9061_v36, %v9060_v49  ;;  %v9067_v49 = vsel %vm3957_vm12, %v8954_v52, 0.0 }
 0xe8a   :  { %v8720_v3 = vpop.f32.mrf.mxu2 }
 0xe8b   :  { %v14689_v48 = vadd.f32 %v14221_v5, %v8720_v3  ;;  %v8953_v3 = vmul.f32 %v14693_v4, %v14693_v4 }
 0xe8c   :  { %v8750_v9 = vpop.f32.mrf.mxu3 }
 0xe8d   :  { %v8865_v56 = vsel %vm3957_vm12, %v14689_v48, 0.0  ;;  %v8952_v15 = vmul.f32 %v14689_v48, %v14689_v48  ;;  %v9065_v28 = vsel %vm3957_vm12, %v8953_v3, 0.0  ;;  %v14732_v3 = vadd.f32 %v14221_v5, %v14524_v38 }
 0xe8e   :  { %v8866_v1 = vadd.f32 %v8865_v56, %v8864_v46  ;;  %v8955_v46 = vmul.f32 %v14714_v13, %v14714_v13  ;;  %v14723_v56 = vadd.f32 %v14221_v5, %v14484_v12 }
 0xe8f   :  { %v9063_v24 = vsel %vm3957_vm12, %v8952_v15, 0.0  ;;  %15430 = vst [vmem:[#allocation25_spill] sm:$0xff] %v14732_v3  ;;  %v8957_v52 = vmul.f32 %v14732_v3, %v14732_v3  ;;  %v8875_v38 = vsel %vm3957_vm12, %v14732_v3, 0.0 }
 0xe90   :  { %v9064_v16 = vadd.f32 %v9063_v24, %v9062_v51  ;;  %v8868_v40 = vadd.f32 %v8867_v26, %v8866_v1  ;;  %15429 = vst [vmem:[#allocation24_spill] sm:$0xff] %v14723_v56  ;;  %v8871_v51 = vsel %vm3957_vm12, %v14714_v13, 0.0  ;;  %v9069_v1 = vsel %vm3957_vm12, %v8955_v46, 0.0 }
 0xe91   :  { %v8956_v24 = vmul.f32 %v14723_v56, %v14723_v56  ;;  %v8873_v12 = vsel %vm3957_vm12, %v14723_v56, 0.0 }
 0xe92   :  { %v9066_v6 = vadd.f32 %v9065_v28, %v9064_v16  ;;  %v8870_v36 = vadd.f32 %v8869_v27, %v8868_v40 }
 0xe93   :  { %v9071_v28 = vsel %vm3957_vm12, %v8956_v24, 0.0 }
 0xe94   :  { %v9068_v15 = vadd.f32 %v9067_v49, %v9066_v6  ;;  %v8872_v18 = vadd.f32 %v8871_v51, %v8870_v36  ;;  %v8753_v26 = vpop.f32.mrf.mxu3  ;;  %v14741_v6 = vadd.f32 %v14221_v5, %v14564_v44  ;;  %v9073_v49 = vsel %vm3957_vm12, %v8957_v52, 0.0 }
 0xe96   :  { %v9070_v16 = vadd.f32 %v9069_v1, %v9068_v15  ;;  %v8874_v40 = vadd.f32 %v8873_v12, %v8872_v18  ;;  %15431 = vst [vmem:[#allocation26_spill] sm:$0xff] %v14741_v6  ;;  %v8958_v46 = vmul.f32 %v14741_v6, %v14741_v6  ;;  %v14750_v15 = vadd.f32 %v14221_v5, %v14602_v58 }
 0xe97   :  { %v8877_v18 = vsel %vm3957_vm12, %v14741_v6, 0.0  ;;  %v14759_v12 = vadd.f32 %v14221_v5, %v14649_v25 }
 0xe98   :  { %v9072_v27 = vadd.f32 %v9071_v28, %v9070_v16  ;;  %v8876_v36 = vadd.f32 %v8875_v38, %v8874_v40  ;;  %15432 = vst [vmem:[#allocation27_spill] sm:$0xff] %v14750_v15  ;;  %v9075_v24 = vsel %vm3957_vm12, %v8958_v46, 0.0  ;;  %v8959_v16 = vmul.f32 %v14750_v15, %v14750_v15 }
 0xe99   :  { %15433 = vst [vmem:[#allocation28_spill] sm:$0xff] %v14759_v12  ;;  %v8879_v58 = vsel %vm3957_vm12, %v14750_v15, 0.0  ;;  %v14767_v38 = vadd.f32 %v14221_v5, %v8747_v31 }
 0xe9a   :  { %v9074_v51 = vadd.f32 %v9073_v49, %v9072_v27  ;;  %v8878_v44 = vadd.f32 %v8877_v18, %v8876_v36  ;;  %v9077_v52 = vsel %vm3957_vm12, %v8959_v16, 0.0  ;;  %v8960_v27 = vmul.f32 %v14759_v12, %v14759_v12 }
 0xe9b   :  { %15434 = vst [vmem:[#allocation29_spill] sm:$0xff] %v14767_v38  ;;  %v8881_v49 = vsel %vm3957_vm12, %v14759_v12, 0.0  ;;  %v8961_v18 = vmul.f32 %v14767_v38, %v14767_v38  ;;  %v8883_v16 = vsel %vm3957_vm12, %v14767_v38, 0.0 }
 0xe9c   :  { %v8756_v1 = vpop.f32.mrf.mxu3  ;;  %v9076_v40 = vadd.f32 %v9075_v24, %v9074_v51  ;;  %v8880_v28 = vadd.f32 %v8879_v58, %v8878_v44  ;;  %v9079_v51 = vsel %vm3957_vm12, %v8960_v27, 0.0  ;;  %v14775_v44 = vadd.f32 %v14221_v5, %v8750_v9 }
 0xe9e   :  { %v9078_v36 = vadd.f32 %v9077_v52, %v9076_v40  ;;  %v8882_v46 = vadd.f32 %v8881_v49, %v8880_v28  ;;  %15435 = vst [vmem:[#allocation30_spill] sm:$0xff] %v14775_v44  ;;  %v9081_v40 = vsel %vm3957_vm12, %v8961_v18, 0.0  ;;  %v8962_v58 = vmul.f32 %v14775_v44, %v14775_v44 }
 0xe9f   :  { %v14783_v28 = vadd.f32 %v14221_v5, %v8753_v26  ;;  %v8885_v27 = vsel %vm3957_vm12, %v14775_v44, 0.0 }
 0xea0   :  { %v9080_v24 = vadd.f32 %v9079_v51, %v9078_v36  ;;  %v8884_v31 = vadd.f32 %v8883_v16, %v8882_v46  ;;  %v9083_v36 = vsel %vm3957_vm12, %v8962_v58, 0.0  ;;  %v14791_v46 = vadd.f32 %v14221_v5, %v8756_v1 }
 0xea1   :  { %15436 = vst [vmem:[#allocation7_spill] sm:$0xff] %v14783_v28  ;;  %v8963_v51 = vmul.f32 %v14783_v28, %v14783_v28  ;;  %v8887_v26 = vsel %vm3957_vm12, %v14783_v28, 0.0 }
 0xea2   :  { %v9082_v52 = vadd.f32 %v9081_v40, %v9080_v24  ;;  %v8886_v49 = vadd.f32 %v8885_v27, %v8884_v31  ;;  %15437 = vst [vmem:[#allocation8_spill] sm:$0xff] %v14791_v46  ;;  %v8964_v58 = vmul.f32 %v14791_v46, %v14791_v46 }
 0xea3   :  { %v9085_v40 = vsel %vm3957_vm12, %v8963_v51, 0.0 }
 0xea4   :  { %v9084_v16 = vadd.f32 %v9083_v36, %v9082_v52  ;;  %v8888_v31 = vadd.f32 %v8887_v26, %v8886_v49  ;;  %v9087_v49 = vsel %vm3957_vm12, %v8964_v58, 0.0 }
 0xea6   :  { %v9086_v27 = vadd.f32 %v9085_v40, %v9084_v16 }
 0xea7   :  { %v8759_v25 = vpop.f32.mrf.mxu3 }
 0xea8   :  { %v14794_v18 = vadd.f32 %v14221_v5, %v8759_v25  ;;  %v8889_v25 = vsel %vm3957_vm12, %v14791_v46, 0.0  ;;  %v9088_v28 = vadd.f32 %v9087_v49, %v9086_v27 }
 0xea9   :  { %v8890_v36 = vadd.f32 %v8889_v25, %v8888_v31 }
 0xeaa   :  { %15438 = vst [vmem:[#allocation9_spill] sm:$0xff] %v14794_v18  ;;  %v8965_v1 = vmul.f32 %v14794_v18, %v14794_v18  ;;  %v8891_v52 = vsel %vm3957_vm12, %v14794_v18, 0.0 }
 0xeab   :  { %v8892_v44 = vadd.f32 %v8891_v52, %v8890_v36 }
 0xeac   :  { %v9089_v51 = vsel %vm3957_vm12, %v8965_v1, 0.0 }
 0xead   :  { %v9090_v38 = vadd.f32 %v9089_v51, %v9088_v28 }
 0xeb6   :  { %v8762_v9 = vpop.f32.mrf.mxu3 }
 0xeb7   :  { %v14799_v24 = vadd.f32 %v14221_v5, %v8762_v9 }
 0xeb9   :  { %15439 = vst [vmem:[#allocation6_spill] sm:$0xff] %v14799_v24  ;;  %v8966_v9 = vmul.f32 %v14799_v24, %v14799_v24  ;;  %v8893_v26 = vsel %vm3957_vm12, %v14799_v24, 0.0 }
 0xeba   :  { %v8894_v18 = vadd.f32 %v8893_v26, %v8892_v44 }
 0xebb   :  { %v9091_v40 = vsel %vm3957_vm12, %v8966_v9, 0.0 }
 0xebc   :  { %v9092_v31 = vadd.f32 %v9091_v40, %v9090_v38 }
 0xec0   :  { %v8765_v16 = vpop.f32.mrf.mxu3 }
 0xec1   :  { %v8766_v46 = vadd.f32 %v14221_v5, %v8765_v16 }
 0xec3   :  { %v8895_v12 = vsel %vm3957_vm12, %v8766_v46, 0.0  ;;  %v8967_v15 = vmul.f32 %v8766_v46, %v8766_v46 }
 0xec4   :  { %v8896_v25 = vadd.f32 %v8895_v12, %v8894_v18 }
 0xec5   :  { %v9093_v58 = vsel %vm3957_vm12, %v8967_v15, 0.0 }
 0xec6   :  { %v8897_v1 = vrot.slane %v8896_v25, 4  ;;  %v9094_v6 = vadd.f32 %v9093_v58, %v9092_v31 }
 0xec8   :  { %v8898_v3 = vadd.f32 %v8897_v1, %v8896_v25  ;;  %v9095_v24 = vrot.slane %v9094_v6, 4 }
 0xeca   :  { %v8899_v27 = vrot.slane %v8898_v3, 2  ;;  %v9096_v52 = vadd.f32 %v9095_v24, %v9094_v6 }
 0xecc   :  { %v8900_v36 = vadd.f32 %v8899_v27, %v8898_v3  ;;  %v9097_v49 = vrot.slane %v9096_v52, 2  ;;  %v8768_v3 = vld [vmem:[%s15287_s7] sm:$0x1] }
 0xece   :  { %v8901_v9 = vrot.slane %v8900_v36, 1  ;;  %v9098_v56 = vadd.f32 %v9097_v49, %v9096_v52  ;;  %v8769_v52 = vld [vmem:[%s15288_s8] sm:$0x1] }
 0xed0   :  { %v8902_v5 = vadd.f32 %v8901_v9, %v8900_v36  ;;  %v9099_v28 = vrot.slane %v9098_v56, 1 }
 0xed2   :  { %v8903_v44 = vmul.f32 0.001953125, %v8902_v5  ;;  %v9100_v51 = vadd.f32 %v9099_v28, %v9098_v56 }
 0xed4   :  { %v9101_v26 = vmul.f32 0.001953125, %v9100_v51  ;;  %v9102_v16 = vmul.f32 %v8903_v44, %v8903_v44 }
 0xed6   :  { %v9103_v38 = vsub.f32 %v9101_v26, %v9102_v16 }
 0xed8   :  { %v9104_v12 = vadd.f32 1e-05, %v9103_v38 }
 0xeda   :  { %9608 = vrsqrt.f32 %v9104_v12  ;;  %vm9111_vm11 = vweird.f32 %v9104_v12 }
 0xee0   :  { %v9609_v15 = vpop.eup %9608 }
 0xee1   :  { %v9106_v18 = vmul.f32 %v9609_v15, %v9104_v12  ;;  %vm9112_vm10 = vweird.f32 %v9609_v15 }
 0xee2   :  { %vm9113_vm13 = vmor %vm9111_vm11, %vm9112_vm10 }
 0xee3   :  { %v9107_v40 = vmul.f32 %v9609_v15, %v9106_v18 }
 0xee5   :  { %v9108_v31 = vmul.f32 0.5, %v9107_v40 }
 0xee7   :  { %v9109_v25 = vsub.f32 1.5, %v9108_v31 }
 0xee9   :  { %v9110_v58 = vmul.f32 %v9609_v15, %v9109_v25 }
 0xeeb   :  { %v9114_v6 = vsel %vm9113_vm13, %v9609_v15, %v9110_v58 }
 0xeec   :  { %v9115_v56 = vmul.f32 %v9114_v6, %v8768_v3 }
 0xeee   :  { %v14823_v24 = vperm.slane %v9115_v56, 0  ;;  %v9116_v27 = vmul.f32 %v9115_v56, %v8903_v44 }
 0xef0   :  { %v9184_v1 = vmul.f32 %v14823_v24, %v8766_v46  ;;  %v9117_v36 = vsub.f32 %v8769_v52, %v9116_v27  ;;  %v9121_v9 = vmul.f32 %v14823_v24, %v14230_v2  ;;  %v9122_v5 = vmul.f32 %v14823_v24, %v14226_v47 }
 0xef1   :  { %v9123_v28 = vmul.f32 %v14823_v24, %v14234_v34  ;;  %v9124_v46 = vmul.f32 %v14823_v24, %v14242_v42  ;;  %v9125_v44 = vmul.f32 %v14823_v24, %v14252_v8  ;;  %v9126_v2 = vmul.f32 %v14823_v24, %v14263_v30 }
 0xef2   :  { %v14829_v49 = vperm.slane %v9117_v36, 0  ;;  %v9127_v34 = vmul.f32 %v14823_v24, %v14273_v59  ;;  %v9128_v42 = vmul.f32 %v14823_v24, %v14284_v39  ;;  %v9129_v8 = vmul.f32 %v14823_v24, %v14294_v55 }
 0xef3   :  { %v9130_v59 = vmul.f32 %v14823_v24, %v14303_v7  ;;  %v9131_v39 = vmul.f32 %v14823_v24, %v14312_v35  ;;  %v9132_v6 = vmul.f32 %v14823_v24, %v14323_v10  ;;  %v9133_v35 = vmul.f32 %v14823_v24, %v14332_v50 }
 0xef4   :  { %v9188_v51 = vadd.f32 %v14829_v49, %v9121_v9  ;;  %v9189_v26 = vadd.f32 %v14829_v49, %v9122_v5  ;;  %v9190_v16 = vadd.f32 %v14829_v49, %v9123_v28  ;;  %v9191_v47 = vadd.f32 %v14829_v49, %v9124_v46 }
 0xef5   :  { %v9192_v38 = vadd.f32 %v14829_v49, %v9125_v44  ;;  %v9193_v12 = vadd.f32 %v14829_v49, %v9126_v2  ;;  %v14856_v15 = vadd.f32 %v14829_v49, %v9184_v1  ;;  %v9194_v30 = vadd.f32 %v14829_v49, %v9127_v34 }
 0xef6   :  { %v9252_v18 = vmax.f32 %v9188_v51, 0.0  ;;  %v9253_v40 = vmax.f32 %v9189_v26, 0.0  ;;  %v9254_v31 = vmax.f32 %v9190_v16, 0.0  ;;  %v9195_v25 = vadd.f32 %v14829_v49, %v9128_v42 }
 0xef7   :  { %v9255_v58 = vmax.f32 %v9191_v47, 0.0  ;;  %v9196_v55 = vadd.f32 %v14829_v49, %v9129_v8  ;;  %v9256_v3 = vmax.f32 %v9192_v38, 0.0  ;;  %v9197_v56 = vadd.f32 %v14829_v49, %v9130_v59 }
 0xef8   :  { %9316 = vst.msk [vmem:[%s15289_s9] sm:$0xff] %vm3957_vm12, %v9252_v18  ;;  %v9257_v7 = vmax.f32 %v9193_v12, 0.0  ;;  %v9198_v1 = vadd.f32 %v14829_v49, %v9131_v39  ;;  %v9258_v27 = vmax.f32 %v9194_v30, 0.0  ;;  %v9134_v10 = vmul.f32 %v14823_v24, %v14342_v22 }
 0xef9   :  { %9317 = vst.msk [vmem:[%s15289_s9 + $0x8] sm:$0xff] %vm3957_vm12, %v9253_v40  ;;  %v9199_v52 = vadd.f32 %v14829_v49, %v9132_v6  ;;  %v9259_v36 = vmax.f32 %v9195_v25, 0.0  ;;  %v9135_v50 = vmul.f32 %v14823_v24, %v14351_v62  ;;  %v9200_v9 = vadd.f32 %v14829_v49, %v9133_v35 }
 0xefa   :  { %9318 = vst.msk [vmem:[%s15289_s9 + $0x10] sm:$0xff] %vm3957_vm12, %v9254_v31  ;;  %v9260_v5 = vmax.f32 %v9196_v55, 0.0  ;;  %v9136_v22 = vmul.f32 %v14823_v24, %v14362_v43  ;;  %v9201_v28 = vadd.f32 %v14829_v49, %v9134_v10  ;;  %v9261_v46 = vmax.f32 %v9197_v56, 0.0  ;;  %v15441_v55 = vld [vmem:[#allocation12_spill] sm:$0xff] }
 0xefb   :  { %9319 = vst.msk [vmem:[%s15289_s9 + $0x18] sm:$0xff] %vm3957_vm12, %v9255_v58  ;;  %v9137_v62 = vmul.f32 %v14823_v24, %v14373_v41  ;;  %v9202_v44 = vadd.f32 %v14829_v49, %v9135_v50  ;;  %v9262_v51 = vmax.f32 %v9198_v1, 0.0  ;;  %v9138_v43 = vmul.f32 %v14823_v24, %v14382_v45  ;;  %v15442_v1 = vld [vmem:[#allocation13_spill] sm:$0xff] }
 0xefc   :  { %9320 = vst.msk [vmem:[%s15289_s9 + $0x20] sm:$0xff] %vm3957_vm12, %v9256_v3  ;;  %v9203_v26 = vadd.f32 %v14829_v49, %v9136_v22  ;;  %v9263_v16 = vmax.f32 %v9199_v52, 0.0  ;;  %v9139_v41 = vmul.f32 %v14823_v24, %v14391_v33  ;;  %v9264_v47 = vmax.f32 %v9200_v9, 0.0  ;;  %v15443_v9 = vld [vmem:[#allocation14_spill] sm:$0xff] }
 0xefd   :  { %9321 = vst.msk [vmem:[%s15289_s9 + $0x28] sm:$0xff] %vm3957_vm12, %v9257_v7  ;;  %v9204_v2 = vadd.f32 %v14829_v49, %v9137_v62  ;;  %v9140_v45 = vmul.f32 %v14823_v24, %v14402_v53  ;;  %v9205_v34 = vadd.f32 %v14829_v49, %v9138_v43  ;;  %v9265_v38 = vmax.f32 %v9201_v28, 0.0 }
 0xefe   :  { %9322 = vst.msk [vmem:[%s15289_s9 + $0x30] sm:$0xff] %vm3957_vm12, %v9258_v27  ;;  %v9141_v33 = vmul.f32 %v14823_v24, %v14413_v61  ;;  %v9206_v42 = vadd.f32 %v14829_v49, %v9139_v41  ;;  %v9266_v8 = vmax.f32 %v9202_v44, 0.0  ;;  %v9142_v53 = vmul.f32 %v14823_v24, %v14422_v20  ;;  %v15440_v20 = vld [vmem:[#allocation11_spill] sm:$0xff] }
 0xeff   :  { %9323 = vst.msk [vmem:[%s15289_s9 + $0x38] sm:$0xff] %vm3957_vm12, %v9259_v36  ;;  %v9207_v12 = vadd.f32 %v14829_v49, %v9140_v45  ;;  %v9267_v30 = vmax.f32 %v9203_v26, 0.0  ;;  %v9143_v61 = vmul.f32 %v14823_v24, %v14431_v14  ;;  %v9268_v40 = vmax.f32 %v9204_v2, 0.0  ;;  %v15444_v44 = vld [vmem:[#allocation15_spill] sm:$0xff]  ;;  %v15445_v2 = vld [vmem:[#allocation16_spill] sm:$0xff] }
 0xf00   :  { %9324 = vst.msk [vmem:[%s15289_s9 + $0x40] sm:$0xff] %vm3957_vm12, %v9260_v5  ;;  %v9208_v18 = vadd.f32 %v14829_v49, %v9141_v33  ;;  %v9144_v31 = vmul.f32 %v14823_v24, %v15440_v20  ;;  %v9209_v59 = vadd.f32 %v14829_v49, %v9142_v53  ;;  %v9269_v25 = vmax.f32 %v9205_v34, 0.0 }
 0xf01   :  { %9325 = vst.msk [vmem:[%s15289_s9 + $0x48] sm:$0xff] %vm3957_vm12, %v9261_v46  ;;  %v9145_v14 = vmul.f32 %v14823_v24, %v14453_v11  ;;  %v9210_v58 = vadd.f32 %v14829_v49, %v9143_v61  ;;  %v9270_v39 = vmax.f32 %v9206_v42, 0.0  ;;  %v9146_v3 = vmul.f32 %v14823_v24, %v15441_v55  ;;  %v15446_v42 = vld [vmem:[#allocation17_spill] sm:$0xff] }
 0xf02   :  { %9326 = vst.msk [vmem:[%s15289_s9 + $0x50] sm:$0xff] %vm3957_vm12, %v9262_v51  ;;  %v9211_v6 = vadd.f32 %v14829_v49, %v9144_v31  ;;  %v9271_v56 = vmax.f32 %v9207_v12, 0.0  ;;  %v9147_v11 = vmul.f32 %v14823_v24, %v14471_v57  ;;  %v9272_v35 = vmax.f32 %v9208_v18, 0.0  ;;  %v15447_v18 = vld [vmem:[#allocation18_spill] sm:$0xff] }
 0xf03   :  { %9327 = vst.msk [vmem:[%s15289_s9 + $0x58] sm:$0xff] %vm3957_vm12, %v9263_v16  ;;  %v9212_v7 = vadd.f32 %v14829_v49, %v9145_v14  ;;  %v9148_v27 = vmul.f32 %v14823_v24, %v15442_v1  ;;  %v9213_v10 = vadd.f32 %v14829_v49, %v9146_v3  ;;  %v9273_v52 = vmax.f32 %v9209_v59, 0.0 }
 0xf04   :  { %9328 = vst.msk [vmem:[%s15289_s9 + $0x60] sm:$0xff] %vm3957_vm12, %v9264_v47  ;;  %v9149_v57 = vmul.f32 %v14823_v24, %v14493_v19  ;;  %v9214_v36 = vadd.f32 %v14829_v49, %v9147_v11  ;;  %v9274_v50 = vmax.f32 %v9210_v58, 0.0  ;;  %v9150_v5 = vmul.f32 %v14823_v24, %v15443_v9 }
 0xf05   :  { %9329 = vst.msk [vmem:[%s15289_s9 + $0x68] sm:$0xff] %vm3957_vm12, %v9265_v38  ;;  %v9215_v22 = vadd.f32 %v14829_v49, %v9148_v27  ;;  %v9275_v28 = vmax.f32 %v9211_v6, 0.0  ;;  %v9151_v19 = vmul.f32 %v14823_v24, %v14511_v17  ;;  %v9276_v62 = vmax.f32 %v9212_v7, 0.0 }
 0xf06   :  { %9330 = vst.msk [vmem:[%s15289_s9 + $0x70] sm:$0xff] %vm3957_vm12, %v9266_v8  ;;  %v9216_v46 = vadd.f32 %v14829_v49, %v9149_v57  ;;  %v9152_v51 = vmul.f32 %v14823_v24, %v15444_v44  ;;  %v9217_v43 = vadd.f32 %v14829_v49, %v9150_v5  ;;  %v9277_v26 = vmax.f32 %v9213_v10, 0.0 }
 0xf07   :  { %9331 = vst.msk [vmem:[%s15289_s9 + $0x78] sm:$0xff] %vm3957_vm12, %v9267_v30  ;;  %v9153_v17 = vmul.f32 %v14823_v24, %v14533_v23  ;;  %v9218_v16 = vadd.f32 %v14829_v49, %v9151_v19  ;;  %v9278_v41 = vmax.f32 %v9214_v36, 0.0  ;;  %v9154_v47 = vmul.f32 %v14823_v24, %v15445_v2 }
 0xf08   :  { %9332 = vst.msk [vmem:[%s15289_s9 + $0x80] sm:$0xff] %vm3957_vm12, %v9268_v40  ;;  %v9219_v45 = vadd.f32 %v14829_v49, %v9152_v51  ;;  %v9279_v34 = vmax.f32 %v9215_v22, 0.0  ;;  %v9155_v23 = vmul.f32 %v14823_v24, %v14551_v60  ;;  %v9280_v33 = vmax.f32 %v9216_v46, 0.0 }
 0xf09   :  { %9333 = vst.msk [vmem:[%s15289_s9 + $0x88] sm:$0xff] %vm3957_vm12, %v9269_v25  ;;  %v9220_v38 = vadd.f32 %v14829_v49, %v9153_v17  ;;  %v9156_v8 = vmul.f32 %v14823_v24, %v15446_v42  ;;  %v9221_v53 = vadd.f32 %v14829_v49, %v9154_v47  ;;  %v9281_v12 = vmax.f32 %v9217_v43, 0.0 }
 0xf0a   :  { %9334 = vst.msk [vmem:[%s15289_s9 + $0x90] sm:$0xff] %vm3957_vm12, %v9270_v39  ;;  %v9157_v60 = vmul.f32 %v14823_v24, %v14573_v21  ;;  %v9222_v30 = vadd.f32 %v14829_v49, %v9155_v23  ;;  %v9282_v61 = vmax.f32 %v9218_v16, 0.0  ;;  %v9158_v40 = vmul.f32 %v14823_v24, %v15447_v18 }
 0xf0b   :  { %9335 = vst.msk [vmem:[%s15289_s9 + $0x98] sm:$0xff] %vm3957_vm12, %v9271_v56  ;;  %v9223_v20 = vadd.f32 %v14829_v49, %v9156_v8  ;;  %v9283_v31 = vmax.f32 %v9219_v45, 0.0  ;;  %v9159_v21 = vmul.f32 %v14823_v24, %v14591_v54  ;;  %v9284_v25 = vmax.f32 %v9220_v38, 0.0  ;;  %v15448_v54 = vld [vmem:[#allocation19_spill] sm:$0xff] }
 0xf0c   :  { %9336 = vst.msk [vmem:[%s15289_s9 + $0xa0] sm:$0xff] %vm3957_vm12, %v9272_v35  ;;  %v9224_v59 = vadd.f32 %v14829_v49, %v9157_v60  ;;  %v9160_v14 = vmul.f32 %v14823_v24, %v14600_v37  ;;  %v9225_v58 = vadd.f32 %v14829_v49, %v9158_v40  ;;  %v9285_v39 = vmax.f32 %v9221_v53, 0.0  ;;  %v15449_v37 = vld [vmem:[#allocation20_spill] sm:$0xff]  ;;  %v15450_v35 = vld [vmem:[#allocation21_spill] sm:$0xff] }
 0xf0d   :  { %9337 = vst.msk [vmem:[%s15289_s9 + $0xa8] sm:$0xff] %vm3957_vm12, %v9273_v52  ;;  %v9161_v55 = vmul.f32 %v14823_v24, %v15448_v54  ;;  %v9226_v3 = vadd.f32 %v14829_v49, %v9159_v21  ;;  %v9286_v6 = vmax.f32 %v9222_v30, 0.0  ;;  %v9162_v56 = vmul.f32 %v14823_v24, %v15449_v37  ;;  %v15455_v30 = vld [vmem:[#allocation26_spill] sm:$0xff]  ;;  %v15458_v54 = vld [vmem:[#allocation29_spill] sm:$0xff] }
 0xf0e   :  { %9338 = vst.msk [vmem:[%s15289_s9 + $0xb0] sm:$0xff] %vm3957_vm12, %v9274_v50  ;;  %v9227_v11 = vadd.f32 %v14829_v49, %v9160_v14  ;;  %v9287_v7 = vmax.f32 %v9223_v20, 0.0  ;;  %v9163_v1 = vmul.f32 %v14823_v24, %v15450_v35  ;;  %v9288_v10 = vmax.f32 %v9224_v59, 0.0  ;;  %v15451_v50 = vld [vmem:[#allocation22_spill] sm:$0xff]  ;;  %v15456_v20 = vld [vmem:[#allocation27_spill] sm:$0xff] }
 0xf0f   :  { %9339 = vst.msk [vmem:[%s15289_s9 + $0xb8] sm:$0xff] %vm3957_vm12, %v9275_v28  ;;  %v9228_v27 = vadd.f32 %v14829_v49, %v9161_v55  ;;  %v9164_v52 = vmul.f32 %v14823_v24, %v14638_v0  ;;  %v9229_v57 = vadd.f32 %v14829_v49, %v9162_v56  ;;  %v9289_v36 = vmax.f32 %v9225_v58, 0.0  ;;  %v15452_v0 = vld [vmem:[#allocation23_spill] sm:$0xff]  ;;  %v15459_v37 = vld [vmem:[#allocation30_spill] sm:$0xff] }
 0xf10   :  { %9340 = vst.msk [vmem:[%s15289_s9 + $0xc0] sm:$0xff] %vm3957_vm12, %v9276_v62  ;;  %v9165_v9 = vmul.f32 %v14823_v24, %v15451_v50  ;;  %v9230_v5 = vadd.f32 %v14829_v49, %v9163_v1  ;;  %v9290_v22 = vmax.f32 %v9226_v3, 0.0  ;;  %v9166_v28 = vmul.f32 %v14823_v24, %v15452_v0  ;;  %v15460_v35 = vld [vmem:[#allocation7_spill] sm:$0xff] }
 0xf11   :  { %9341 = vst.msk [vmem:[%s15289_s9 + $0xc8] sm:$0xff] %vm3957_vm12, %v9277_v26  ;;  %v9231_v19 = vadd.f32 %v14829_v49, %v9164_v52  ;;  %v9291_v46 = vmax.f32 %v9227_v11, 0.0  ;;  %v9167_v62 = vmul.f32 %v14823_v24, %v14665_v32  ;;  %v9292_v51 = vmax.f32 %v9228_v27, 0.0  ;;  %v15461_v52 = vld [vmem:[#allocation8_spill] sm:$0xff] }
 0xf12   :  { %9342 = vst.msk [vmem:[%s15289_s9 + $0xd0] sm:$0xff] %vm3957_vm12, %v9278_v41  ;;  %v9232_v44 = vadd.f32 %v14829_v49, %v9165_v9  ;;  %v9168_v43 = vmul.f32 %v14823_v24, %v14673_v63  ;;  %v9233_v26 = vadd.f32 %v14829_v49, %v9166_v28  ;;  %v9293_v17 = vmax.f32 %v9229_v57, 0.0  ;;  %v15462_v9 = vld [vmem:[#allocation9_spill] sm:$0xff]  ;;  %v15463_v28 = vld [vmem:[#allocation6_spill] sm:$0xff] }
 0xf13   :  { %9343 = vst.msk [vmem:[%s15289_s9 + $0xd8] sm:$0xff] %vm3957_vm12, %v9279_v34  ;;  %v9169_v32 = vmul.f32 %v14823_v24, %v14689_v48  ;;  %v9234_v16 = vadd.f32 %v14829_v49, %v9167_v62  ;;  %v9294_v41 = vmax.f32 %v9230_v5, 0.0  ;;  %v9170_v63 = vmul.f32 %v14823_v24, %v14693_v4 }
 0xf14   :  { %9344 = vst.msk [vmem:[%s15289_s9 + $0xe0] sm:$0xff] %vm3957_vm12, %v9280_v33  ;;  %v9235_v2 = vadd.f32 %v14829_v49, %v9168_v43  ;;  %v9295_v47 = vmax.f32 %v9231_v19, 0.0  ;;  %v9171_v48 = vmul.f32 %v14823_v24, %v14705_v29  ;;  %v9296_v34 = vmax.f32 %v9232_v44, 0.0  ;;  %v15453_v29 = vld [vmem:[#allocation24_spill] sm:$0xff] }
 0xf15   :  { %9345 = vst.msk [vmem:[%s15289_s9 + $0xe8] sm:$0xff] %vm3957_vm12, %v9281_v12  ;;  %v9236_v45 = vadd.f32 %v14829_v49, %v9169_v32  ;;  %v9172_v4 = vmul.f32 %v14823_v24, %v14714_v13  ;;  %v9237_v23 = vadd.f32 %v14829_v49, %v9170_v63  ;;  %v9297_v38 = vmax.f32 %v9233_v26, 0.0  ;;  %v15454_v13 = vld [vmem:[#allocation25_spill] sm:$0xff] }
 0xf16   :  { %9346 = vst.msk [vmem:[%s15289_s9 + $0xf0] sm:$0xff] %vm3957_vm12, %v9282_v61  ;;  %v9173_v33 = vmul.f32 %v14823_v24, %v15453_v29  ;;  %v9238_v42 = vadd.f32 %v14829_v49, %v9171_v48  ;;  %v9298_v8 = vmax.f32 %v9234_v16, 0.0  ;;  %v9174_v53 = vmul.f32 %v14823_v24, %v15454_v13 }
 0xf17   :  { %9347 = vst.msk [vmem:[%s15289_s9 + $0xf8] sm:$0xff] %vm3957_vm12, %v9283_v31  ;;  %v9239_v12 = vadd.f32 %v14829_v49, %v9172_v4  ;;  %v9299_v60 = vmax.f32 %v9235_v2, 0.0  ;;  %v9175_v61 = vmul.f32 %v14823_v24, %v15455_v30  ;;  %v9300_v40 = vmax.f32 %v9236_v45, 0.0 }
 0xf18   :  { %9348 = vst.msk [vmem:[%s15289_s9 + $0x100] sm:$0xff] %vm3957_vm12, %v9284_v25  ;;  %v9240_v18 = vadd.f32 %v14829_v49, %v9173_v33  ;;  %v9176_v31 = vmul.f32 %v14823_v24, %v15456_v20  ;;  %v9241_v21 = vadd.f32 %v14829_v49, %v9174_v53  ;;  %v9301_v59 = vmax.f32 %v9237_v23, 0.0  ;;  %v15457_v25 = vld [vmem:[#allocation28_spill] sm:$0xff] }
 0xf19   :  { %9349 = vst.msk [vmem:[%s15289_s9 + $0x108] sm:$0xff] %vm3957_vm12, %v9285_v39  ;;  %v9177_v14 = vmul.f32 %v14823_v24, %v15457_v25  ;;  %v9242_v58 = vadd.f32 %v14829_v49, %v9175_v61  ;;  %v9302_v39 = vmax.f32 %v9238_v42, 0.0  ;;  %v9178_v55 = vmul.f32 %v14823_v24, %v15458_v54 }
 0xf1a   :  { %9350 = vst.msk [vmem:[%s15289_s9 + $0x110] sm:$0xff] %vm3957_vm12, %v9286_v6  ;;  %v9243_v3 = vadd.f32 %v14829_v49, %v9176_v31  ;;  %v9303_v6 = vmax.f32 %v9239_v12, 0.0  ;;  %v9179_v56 = vmul.f32 %v14823_v24, %v15459_v37  ;;  %v9180_v1 = vmul.f32 %v14823_v24, %v15460_v35 }
 0xf1b   :  { %9351 = vst.msk [vmem:[%s15289_s9 + $0x118] sm:$0xff] %vm3957_vm12, %v9287_v7  ;;  %v9244_v11 = vadd.f32 %v14829_v49, %v9177_v14  ;;  %v9304_v7 = vmax.f32 %v9240_v18, 0.0  ;;  %v9245_v27 = vadd.f32 %v14829_v49, %v9178_v55  ;;  %v9181_v57 = vmul.f32 %v14823_v24, %v15461_v52 }
 0xf1c   :  { %9352 = vst.msk [vmem:[%s15289_s9 + $0x120] sm:$0xff] %vm3957_vm12, %v9288_v10  ;;  %v9305_v10 = vmax.f32 %v9241_v21, 0.0  ;;  %v9306_v50 = vmax.f32 %v9242_v58, 0.0  ;;  %v9182_v5 = vmul.f32 %v14823_v24, %v15462_v9  ;;  %v9307_v0 = vmax.f32 %v9243_v3, 0.0 }
 0xf1d   :  { %9353 = vst.msk [vmem:[%s15289_s9 + $0x128] sm:$0xff] %vm3957_vm12, %v9289_v36  ;;  %v9246_v36 = vadd.f32 %v14829_v49, %v9179_v56  ;;  %v9183_v19 = vmul.f32 %v14823_v24, %v15463_v28  ;;  %v9308_v62 = vmax.f32 %v9244_v11, 0.0  ;;  %v9315_v16 = vmax.f32 %v14856_v15, 0.0 }
 0xf1e   :  { %9354 = vst.msk [vmem:[%s15289_s9 + $0x130] sm:$0xff] %vm3957_vm12, %v9290_v22  ;;  %v9247_v22 = vadd.f32 %v14829_v49, %v9180_v1  ;;  %v9249_v44 = vadd.f32 %v14829_v49, %v9182_v5 }
 0xf1f   :  { %9355 = vst.msk [vmem:[%s15289_s9 + $0x138] sm:$0xff] %vm3957_vm12, %v9291_v46  ;;  %v9248_v46 = vadd.f32 %v14829_v49, %v9181_v57  ;;  %v9250_v43 = vadd.f32 %v14829_v49, %v9183_v19  ;;  %v9310_v26 = vmax.f32 %v9246_v36, 0.0 }
 0xf20   :  { %9356 = vst.msk [vmem:[%s15289_s9 + $0x140] sm:$0xff] %vm3957_vm12, %v9292_v51  ;;  %v9309_v51 = vmax.f32 %v9245_v27, 0.0  ;;  %v9311_v24 = vmax.f32 %v9247_v22, 0.0  ;;  %v9313_v32 = vmax.f32 %v9249_v44, 0.0 }
 0xf21   :  { %9357 = vst.msk [vmem:[%s15289_s9 + $0x148] sm:$0xff] %vm3957_vm12, %v9293_v17  ;;  %v9312_v17 = vmax.f32 %v9248_v46, 0.0  ;;  %v9314_v49 = vmax.f32 %v9250_v43, 0.0 }
 0xf22   :  { %9358 = vst.msk [vmem:[%s15289_s9 + $0x150] sm:$0xff] %vm3957_vm12, %v9294_v41 }
 0xf23   :  { %9359 = vst.msk [vmem:[%s15289_s9 + $0x158] sm:$0xff] %vm3957_vm12, %v9295_v47 }
 0xf24   :  { %9360 = vst.msk [vmem:[%s15289_s9 + $0x160] sm:$0xff] %vm3957_vm12, %v9296_v34 }
 0xf25   :  { %9361 = vst.msk [vmem:[%s15289_s9 + $0x168] sm:$0xff] %vm3957_vm12, %v9297_v38 }
 0xf26   :  { %9362 = vst.msk [vmem:[%s15289_s9 + $0x170] sm:$0xff] %vm3957_vm12, %v9298_v8 }
 0xf27   :  { %9363 = vst.msk [vmem:[%s15289_s9 + $0x178] sm:$0xff] %vm3957_vm12, %v9299_v60 }
 0xf28   :  { %9364 = vst.msk [vmem:[%s15289_s9 + $0x180] sm:$0xff] %vm3957_vm12, %v9300_v40 }
 0xf29   :  { %9365 = vst.msk [vmem:[%s15289_s9 + $0x188] sm:$0xff] %vm3957_vm12, %v9301_v59 }
 0xf2a   :  { %9366 = vst.msk [vmem:[%s15289_s9 + $0x190] sm:$0xff] %vm3957_vm12, %v9302_v39 }
 0xf2b   :  { %9367 = vst.msk [vmem:[%s15289_s9 + $0x198] sm:$0xff] %vm3957_vm12, %v9303_v6 }
 0xf2c   :  { %9368 = vst.msk [vmem:[%s15289_s9 + $0x1a0] sm:$0xff] %vm3957_vm12, %v9304_v7 }
 0xf2d   :  { %9369 = vst.msk [vmem:[%s15289_s9 + $0x1a8] sm:$0xff] %vm3957_vm12, %v9305_v10 }
 0xf2e   :  { %9370 = vst.msk [vmem:[%s15289_s9 + $0x1b0] sm:$0xff] %vm3957_vm12, %v9306_v50 }
 0xf2f   :  { %9371 = vst.msk [vmem:[%s15289_s9 + $0x1b8] sm:$0xff] %vm3957_vm12, %v9307_v0 }
 0xf30   :  { %9372 = vst.msk [vmem:[%s15289_s9 + $0x1c0] sm:$0xff] %vm3957_vm12, %v9308_v62 }
 0xf31   :  { %9373 = vst.msk [vmem:[%s15289_s9 + $0x1c8] sm:$0xff] %vm3957_vm12, %v9309_v51 }
 0xf32   :  { %9374 = vst.msk [vmem:[%s15289_s9 + $0x1d0] sm:$0xff] %vm3957_vm12, %v9310_v26 }
 0xf33   :  { %9375 = vst.msk [vmem:[%s15289_s9 + $0x1d8] sm:$0xff] %vm3957_vm12, %v9311_v24 }
 0xf34   :  { %9376 = vst.msk [vmem:[%s15289_s9 + $0x1e0] sm:$0xff] %vm3957_vm12, %v9312_v17 }
 0xf35   :  { %9377 = vst.msk [vmem:[%s15289_s9 + $0x1e8] sm:$0xff] %vm3957_vm12, %v9313_v32 }
 0xf36   :  { %9378 = vst.msk [vmem:[%s15289_s9 + $0x1f0] sm:$0xff] %vm3957_vm12, %v9314_v49 }
 0xf37   :  { %9379 = vst.msk [vmem:[%s15289_s9 + $0x1f8] sm:$0xff] %vm3957_vm12, %v9315_v16 }

</bundles_post_ra>
